<compile_context>
chip_gen: v7x
topology: tpu7x:2x2x1
jax: 0.10.0
libtpu: 0.0.40
codegen_flags: <defaults>
</compile_context>

<pallas_src>
import functools

import jax
import jax.numpy as jnp
from jax import lax
from jax.experimental import pallas as pl
from jax.experimental.pallas import tpu as pltpu


# ----------------------------------------------------------------------------
# Helpers
# ----------------------------------------------------------------------------

def _round_up(x, m):
    return (x + m - 1) // m * m


def _largest_divisor(total, fits):
    best = 1
    for t in range(1, total + 1):
        if total % t == 0 and fits(t):
            best = t
    return best


@functools.lru_cache(maxsize=None)
def _tpu_hw():
    """(vmem_capacity_bytes, narrow_mxu) with conservative fallbacks."""
    kind = ""
    try:
        kind = jax.devices()[0].device_kind.lower()
    except Exception:
        pass
    vmem = 0
    try:
        vmem = int(pltpu.get_tpu_info().vmem_capacity_bytes)
    except Exception:
        vmem = 0
    if vmem <= 0:
        vmem = (64 << 20) if "v7" in kind else (128 << 20)
    # 128-deep MXU generations: a 256-wide Cout tile buys nothing, use 128.
    narrow_mxu = any(tag in kind for tag in ("v2", "v3", "v4", "v5"))
    return vmem, narrow_mxu


# ----------------------------------------------------------------------------
# BaseConv Pallas kernels
# ----------------------------------------------------------------------------

def _accumulate_taps(x2, w_ref, acc_ref, m, wp_al, ksz):
    """Sum of K*K shifted matmuls; f32 accumulation in the VMEM acc scratch."""
    if ksz == 1:
        return jnp.dot(x2[0:m, :], w_ref[0, 0], preferred_element_type=jnp.float32)
    first = True
    for ky in range(ksz):
        for kx in range(ksz):
            s = ky * wp_al + kx
            part = jnp.dot(x2[s:s + m, :], w_ref[ky, kx],
                           preferred_element_type=jnp.float32)
            if first:
                acc_ref[...] = part
                first = False
            else:
                acc_ref[...] += part
    return acc_ref[...]


def _epilogue(acc, scale_ref, shift_ref, o_ref, t_h, wp_al, w_out, t_cout,
              apply_relu):
    y = acc * scale_ref[...] + shift_ref[...]
    if apply_relu:
        y = jnp.maximum(y, 0.0)
    # Trim halo / alignment junk columns only at the store; the store is
    # lane-dense along t_cout (multiple of 128).
    o_ref[0] = y.reshape(t_h, wp_al, t_cout)[:, :w_out, :].astype(o_ref.dtype)


def _conv_kernel_resident(x_ref, w_ref, scale_ref, shift_ref, o_ref, acc_ref,
                          *, apply_relu, wp_al):
    # x_ref:     (1, hp*wp_al, cin)  spatially pre-padded, flattened image (bf16),
    #            fetched once per batch (index_map constant over the Cout axis).
    # w_ref:     (K, K, cin, t_cout) weights, HWIO.
    # scale_ref: (1, t_cout) f32 folded BN scale.
    # shift_ref: (1, t_cout) f32 folded conv-bias + BN shift.
    # o_ref:     (1, t_h, w_out, t_cout)
    # acc_ref:   (t_h*wp_al, t_cout) f32 accumulator scratch.
    ksz = w_ref.shape[0]
    _, t_h, w_out, t_cout = o_ref.shape
    m = t_h * wp_al
    x2 = x_ref[0]
    acc = _accumulate_taps(x2, w_ref, acc_ref, m, wp_al, ksz)
    _epilogue(acc, scale_ref, shift_ref, o_ref, t_h, wp_al, w_out, t_cout,
              apply_relu)


def _conv_kernel_halo(x_hbm, w_ref, scale_ref, shift_ref, o_ref,
                      x_buf, sem, acc_ref, *, apply_relu, wp_al):
    # x_hbm:  (N, hp*wp_al, cin) full padded image in HBM (memory_space=pl.ANY);
    #         overlapping row tiles are DMA'd manually (double-buffered) so no
    #         halo-tile copy of the activation is ever materialized in HBM.
    # x_buf:  VMEM scratch (2, t_rows*wp_al, cin); sem: DMA semaphores (2,).
    ksz = w_ref.shape[0]
    _, t_h, w_out, t_cout = o_ref.shape
    flat_rows = x_buf.shape[1]
    m = t_h * wp_al
    step = t_h * wp_al

    ni = pl.program_id(0)
    ti = pl.program_id(2)
    n_t = pl.num_programs(2)

    def fetch(t, slot):
        pltpu.make_async_copy(
            x_hbm.at[ni, pl.ds(t * step, flat_rows)],
            x_buf.at[slot], sem.at[slot]).start()

    @pl.when(ti == 0)
    def _():
        fetch(0, 0)

    @pl.when(ti + 1 < n_t)
    def _():
        fetch(ti + 1, (ti + 1) & 1)

    slot = ti & 1
    pltpu.make_async_copy(
        x_hbm.at[ni, pl.ds(0, flat_rows)], x_buf.at[slot], sem.at[slot]).wait()

    x2 = x_buf[slot]
    acc = _accumulate_taps(x2, w_ref, acc_ref, m, wp_al, ksz)
    _epilogue(acc, scale_ref, shift_ref, o_ref, t_h, wp_al, w_out, t_cout,
              apply_relu)


@functools.lru_cache(maxsize=None)
def _build_base_conv(n, h, w, cin_p, cout_p, ksz, apply_relu, compute_dtype,
                     out_dtype):
    """Builds (and caches) a jitted BaseConv forward for one static signature."""
    # TODO(synk): only stride=1 'same' convs (every BaseConv in this VGG is stride=1).
    vmem_cap, narrow_mxu = _tpu_hw()
    acc_budget = 1536 * 1024                      # ~1.5 MiB f32 accumulator
    xtile_budget = min(16 << 20, vmem_cap // 8)   # double-buffered input tile
    vmem_soft = min(int(vmem_cap * 0.85), vmem_cap - (12 << 20))

    pad = ksz // 2
    spare = 1 if ksz > 1 else 0                   # spare bottom row for the flat taps
    wp = w + 2 * pad
    wp_al = _round_up(max(wp, 8), 8)              # padded width aligned to sublanes
    hp = h + 2 * pad + spare
    cd = jnp.dtype(compute_dtype).itemsize
    ob = jnp.dtype(out_dtype).itemsize

    t_cout = 128 if (narrow_mxu or cout_p % 256 != 0) else 256
    n_co = cout_p // t_cout

    def _fits(t):
        halo_rows = t + (ksz - 1) + spare
        return (t * wp_al * t_cout * 4 <= acc_budget
                and 2 * halo_rows * wp_al * cin_p * cd <= xtile_budget)

    # TODO(synk): no W tiling; for very wide images t_h falls back to 1 and the
    # VMEM estimate below grows (the limit is never clamped below the estimate).
    t_h = _largest_divisor(h, _fits)
    n_t = h // t_h
    t_rows = t_h + (ksz - 1) + spare
    resident = (n_t == 1)                         # whole padded image as one block

    w_bytes = ksz * ksz * cin_p * t_cout * cd
    out_bytes = t_h * w * t_cout * ob
    acc_bytes = t_h * wp_al * t_cout * 4
    x_bytes = (hp if resident else t_rows) * wp_al * cin_p * cd
    est = (2 * x_bytes + 2 * (w_bytes + out_bytes + 2 * t_cout * 4)
           + acc_bytes + (2 << 20))
    vmem_limit = int(min(max(est, 24 << 20), max(vmem_soft, est)))

    if resident:
        conv = pl.pallas_call(
            functools.partial(_conv_kernel_resident, apply_relu=apply_relu,
                              wp_al=wp_al),
            out_shape=jax.ShapeDtypeStruct((n, h, w, cout_p), out_dtype),
            grid_spec=pltpu.PrefetchScalarGridSpec(
                num_scalar_prefetch=0,
                grid=(n, n_co),                     # batch x Cout-tiles
                in_specs=[
                    pl.BlockSpec((1, hp * wp_al, cin_p), lambda ni, ci: (ni, 0, 0)),
                    pl.BlockSpec((ksz, ksz, cin_p, t_cout),
                                 lambda ni, ci: (0, 0, 0, ci)),
                    pl.BlockSpec((1, t_cout), lambda ni, ci: (0, ci)),
                    pl.BlockSpec((1, t_cout), lambda ni, ci: (0, ci)),
                ],
                out_specs=pl.BlockSpec((1, h, w, t_cout),
                                       lambda ni, ci: (ni, 0, 0, ci)),
                scratch_shapes=[pltpu.VMEM((t_h * wp_al, t_cout), jnp.float32)]),
            compiler_params=pltpu.CompilerParams(
                dimension_semantics=("parallel", "parallel"),
                vmem_limit_bytes=vmem_limit),
        )
    else:
        conv = pl.pallas_call(
            functools.partial(_conv_kernel_halo, apply_relu=apply_relu,
                              wp_al=wp_al),
            out_shape=jax.ShapeDtypeStruct((n, h, w, cout_p), out_dtype),
            grid_spec=pltpu.PrefetchScalarGridSpec(
                num_scalar_prefetch=0,
                # Cout axis outer of H-tiles: the weight slab stays resident
                # across all H-tiles of a batch (conv4/conv5 are weight-bound).
                grid=(n, n_co, n_t),
                in_specs=[
                    pl.BlockSpec(memory_space=pl.ANY),   # manual halo DMA
                    pl.BlockSpec((ksz, ksz, cin_p, t_cout),
                                 lambda ni, ci, ti: (0, 0, 0, ci)),
                    pl.BlockSpec((1, t_cout), lambda ni, ci, ti: (0, ci)),
                    pl.BlockSpec((1, t_cout), lambda ni, ci, ti: (0, ci)),
                ],
                out_specs=pl.BlockSpec((1, t_h, w, t_cout),
                                       lambda ni, ci, ti: (ni, ti, 0, ci)),
                scratch_shapes=[
                    pltpu.VMEM((2, t_rows * wp_al, cin_p), compute_dtype),
                    pltpu.SemaphoreType.DMA((2,)),
                    pltpu.VMEM((t_h * wp_al, t_cout), jnp.float32),
                ]),
            compiler_params=pltpu.CompilerParams(
                dimension_semantics=("parallel", "parallel", "arbitrary"),
                vmem_limit_bytes=vmem_limit),
        )

    def fwd(x, w_hwio, scale, shift):
        xc = x.astype(compute_dtype)                       # no-op: bf16 end-to-end
        bottom = pad + spare
        right = wp_al - w - pad
        x_sp = jnp.pad(xc, ((0, 0), (pad, bottom), (pad, right), (0, 0)))
        x_flat = x_sp.reshape(n, hp * wp_al, cin_p)        # layout-free merge
        return conv(x_flat, w_hwio, scale, shift)

    return jax.jit(fwd)


def base_conv_nhwc_xla(x, p):
    """Folded BaseConv via XLA conv (reference path, and the Cin=3 stem layer)."""
    ksz = p["k"]
    pad = ksz // 2
    wt = p["w"]
    y = lax.conv_general_dilated(
        x.astype(wt.dtype), wt, window_strides=(1, 1),
        padding=((pad, pad), (pad, pad)),
        dimension_numbers=("NHWC", "HWIO", "NHWC"),
        preferred_element_type=jnp.float32)
    y = y * p["scale"][0] + p["shift"][0]
    if p["relu"]:
        y = jnp.maximum(y, 0.0)
    return y.astype(wt.dtype)


base_conv_nhwc_reference = base_conv_nhwc_xla


def base_conv_nhwc_pallas(x, p):
    """BaseConv forward on NHWC, 128-padded-channel bf16 tensors (Pallas)."""
    if not p["pallas"]:
        # TODO(synk): Cin=3 stem conv runs via XLA conv; padding Cin 3->128 in the
        # Pallas kernel would inflate its HBM/MXU work ~42x on the largest map.
        return base_conv_nhwc_xla(x, p)
    n, h, w, cin_p = map(int, x.shape)
    fwd = _build_base_conv(n, h, w, cin_p, int(p["w"].shape[3]), int(p["k"]),
                           bool(p["relu"]), p["w"].dtype, p["w"].dtype)
    return fwd(x, p["w"], p["scale"], p["shift"])


# ----------------------------------------------------------------------------
# Parameters (BaseConv: Conv2d + folded BatchNorm)
# ----------------------------------------------------------------------------

def make_baseconv_params(key, in_c, out_c, ksz, *, use_bn=True, relu=True,
                         compute_dtype=jnp.bfloat16, bn_eps=1e-5):
    kw, kb, kg, kbe, km, kv = jax.random.split(key, 6)
    # NOTE: the PyTorch module initializes weight~N(0,0.01), bias=0, BN at identity.
    # Well-scaled randomized parameters keep the 40+-layer numerical check
    # meaningful; the forward math is identical for any values.
    w = jax.random.normal(kw, (out_c, in_c, ksz, ksz), jnp.float32)
    w = w * (2.0 / (in_c * ksz * ksz)) ** 0.5
    b = 0.05 * jax.random.normal(kb, (out_c,), jnp.float32)
    if use_bn:
        # TODO(synk): inference-mode BN (running stats) folded into scale/shift.
        gamma = 1.0 + 0.1 * jax.random.normal(kg, (out_c,), jnp.float32)
        beta = 0.05 * jax.random.normal(kbe, (out_c,), jnp.float32)
        mean = 0.05 * jax.random.normal(km, (out_c,), jnp.float32)
        var = 0.5 + jax.random.uniform(kv, (out_c,), jnp.float32)
        inv_std = 1.0 / jnp.sqrt(var + bn_eps)
        scale = gamma * inv_std
        shift = beta + (b - mean) * scale       # conv bias folded into the BN shift
    else:
        scale = jnp.ones((out_c,), jnp.float32)
        shift = b

    use_pallas = in_c >= 64
    cin_p = _round_up(in_c, 128) if use_pallas else in_c
    cout_p = _round_up(out_c, 128)
    w_hwio = jnp.transpose(w, (2, 3, 1, 0))                       # (K,K,Cin,Cout)
    w_hwio = jnp.pad(w_hwio, ((0, 0), (0, 0), (0, cin_p - in_c),
                              (0, cout_p - out_c)))
    scale_p = jnp.pad(scale, (0, cout_p - out_c)).reshape(1, cout_p)
    shift_p = jnp.pad(shift, (0, cout_p - out_c)).reshape(1, cout_p)
    return {"w": w_hwio.astype(compute_dtype), "scale": scale_p, "shift": shift_p,
            "k": ksz, "relu": relu, "out_c": out_c, "pallas": use_pallas}


# ----------------------------------------------------------------------------
# VGG forward (structure shared between the Pallas path and the reference path)
# ----------------------------------------------------------------------------

_VGG_TRUNK = [
    ("conv1_1", 3, 64, 3), ("conv1_2", 64, 64, 3),
    ("conv2_1", 64, 128, 3), ("conv2_2", 128, 128, 3),
    ("conv3_1", 128, 256, 3), ("conv3_2", 256, 256, 3), ("conv3_3", 256, 256, 3),
    ("conv4_1", 256, 512, 3), ("conv4_2", 512, 512, 3), ("conv4_3", 512, 512, 3),
    ("conv5_1", 512, 512, 3),
]


def init_vgg_params(key, compute_dtype=jnp.bfloat16):
    specs = list(_VGG_TRUNK)
    for i in range(1, 9):
        specs += [(f"conv5_2_ns_{i}", 512, 512, 3), (f"conv5_3_ns_{i}", 512, 512, 3),
                  (f"conv5_2_bl_{i}", 512, 512, 1), (f"conv5_3_bl_{i}", 512, 512, 1)]
    keys = jax.random.split(key, len(specs))
    return {name: make_baseconv_params(k, ic, oc, ks, compute_dtype=compute_dtype)
            for k, (name, ic, oc, ks) in zip(keys, specs)}


def max_pool_2x2_nhwc(x):
    # TODO(synk): fusable into the preceding conv epilogue (separate mem-bound pass).
    neg_inf = jnp.array(-jnp.inf, dtype=x.dtype)
    return lax.reduce_window(x, neg_inf, lax.max, (1, 2, 2, 1), (1, 2, 2, 1), "VALID")


def vgg_forward(x_nchw, params, conv_fn):
    """VGG.forward: NHWC, 128-padded channels, bf16 activations end-to-end."""
    n, c, h, w = x_nchw.shape
    x = jnp.transpose(x_nchw, (0, 2, 3, 1))                 # NCHW -> NHWC once
    cin0 = int(params["conv1_1"]["w"].shape[2])
    if cin0 > c:
        x = jnp.pad(x, ((0, 0), (0, 0), (0, 0), (0, cin0 - c)))

    x = conv_fn(x, params["conv1_1"])
    x = conv_fn(x, params["conv1_2"])
    x = max_pool_2x2_nhwc(x)
    x = conv_fn(x, params["conv2_1"])
    conv2_2 = conv_fn(x, params["conv2_2"])
    x = max_pool_2x2_nhwc(conv2_2)
    x = conv_fn(x, params["conv3_1"])
    x = conv_fn(x, params["conv3_2"])
    conv3_3 = conv_fn(x, params["conv3_3"])
    x = max_pool_2x2_nhwc(conv3_3)
    x = conv_fn(x, params["conv4_1"])
    x = conv_fn(x, params["conv4_2"])
    conv4_3 = conv_fn(x, params["conv4_3"])
    x = max_pool_2x2_nhwc(conv4_3)
    a = conv_fn(x, params["conv5_1"])

    out8 = []
    for i in range(1, 9):
        # TODO(synk): the 8 conv5 branches could run as one pallas_call with a
        # 'branch' grid axis ('a' resident, weights streamed) + fused blends.
        ns2 = conv_fn(a, params[f"conv5_2_ns_{i}"])
        blr2 = (conv_fn(a, params[f"conv5_2_bl_{i}"]) + ns2) * 0.5
        ns3 = conv_fn(ns2, params[f"conv5_3_ns_{i}"])
        blr3 = (conv_fn(blr2, params[f"conv5_3_bl_{i}"]) + ns3) * 0.5
        out8.append(blr3)
    conv5_3 = sum(o.astype(jnp.float32) for o in out8) / float(len(out8))

    def to_nchw(y, out_c):
        return jnp.transpose(y[..., :out_c], (0, 3, 1, 2)).astype(jnp.float32)

    return (to_nchw(conv2_2, params["conv2_2"]["out_c"]),
            to_nchw(conv3_3, params["conv3_3"]["out_c"]),
            to_nchw(conv4_3, params["conv4_3"]["out_c"]),
            to_nchw(conv5_3, 512),
            [to_nchw(o, 512) for o in out8])


# ----------------------------------------------------------------------------
# Self-test
# ----------------------------------------------------------------------------

if __name__ == "__main__":
    key = jax.random.PRNGKey(0)
    kx, kp = jax.random.split(key)

    n, c, h, w = 2, 3, 32, 32          # small spatial; channel plan fixed by module
    x = jax.random.normal(kx, (n, c, h, w), jnp.float32)
    params = init_vgg_params(kp, compute_dtype=jnp.bfloat16)

    outs = jax.block_until_ready(vgg_forward(x, params, base_conv_nhwc_pallas))
    refs = jax.block_until_ready(vgg_forward(x, params, base_conv_nhwc_reference))

    conv2_2, conv3_3, conv4_3, conv5_3, out8 = outs
    assert conv2_2.shape == (n, 128, h // 2, w // 2)
    assert conv3_3.shape == (n, 256, h // 4, w // 4)
    assert conv4_3.shape == (n, 512, h // 8, w // 8)
    assert conv5_3.shape == (n, 512, h // 16, w // 16)
    assert len(out8) == 8 and out8[0].shape == conv5_3.shape

    def check(name, got, want, rel):
        err = float(jnp.max(jnp.abs(got - want)))
        ref = float(jnp.max(jnp.abs(want)))
        tol = rel * max(ref, 1e-3)
        assert err <= tol, f"{name}: max|err|={err:.3e} > tol={tol:.3e}"

    # Both paths use bf16 MXU math with f32 accumulation; the residual difference
    # is bf16 rounding under different (equally valid) accumulation orders, which
    # compounds with depth, hence the wider tolerance for deeper taps.  Real bugs
    # (missing tap / wrong affine) produce O(1) relative errors.
    check("conv2_2", conv2_2, refs[0], 2e-2)
    check("conv3_3", conv3_3, refs[1], 2e-2)
    check("conv4_3", conv4_3, refs[2], 5e-2)
    check("conv5_3", conv5_3, refs[3], 5e-2)
    for i, (o, r) in enumerate(zip(out8, refs[4])):
        check(f"conv5_3_out8[{i}]", o, r, 5e-2)

    print("KERNEL_OK")
</pallas_src>

<mosaic_0001>
module attributes {stable_mosaic.version = 11 : i64} {
  func.func @_conv_kernel_resident(%arg0: i32, %arg1: i32, %arg2: memref<1x1400x128xbf16, #tpu.memory_space<vmem>>, %arg3: memref<3x3x128x128xbf16, #tpu.memory_space<vmem>>, %arg4: memref<1x128xf32, #tpu.memory_space<vmem>>, %arg5: memref<1x128xf32, #tpu.memory_space<vmem>>, %arg6: memref<1x32x32x128xbf16, #tpu.memory_space<vmem>>, %arg7: memref<1280x128xf32, #tpu.memory_space<vmem>>) attributes {dimension_semantics = [#tpu.dimension_semantics<parallel>, #tpu.dimension_semantics<parallel>], iteration_bounds = array<i64: 2, 1>, scalar_prefetch = 0 : i64, scratch_operands = 1 : i64, tpu.core_type = #tpu.core_type<tc>, window_params = [{transform_indices = @transform_0, window_bounds = array<i64: 1, 1400, 128>}, {transform_indices = @transform_1, window_bounds = array<i64: 3, 3, 128, 128>}, {transform_indices = @transform_2, window_bounds = array<i64: 1, 128>}, {transform_indices = @transform_3, window_bounds = array<i64: 1, 128>}, {transform_indices = @transform_4, window_bounds = array<i64: 1, 32, 32, 128>}]} {
    %c0 = arith.constant 0 : index
    %c0_0 = arith.constant 0 : index
    %c0_1 = arith.constant 0 : index
    %0 = vector.load %arg2[%c0, %c0_0, %c0_1] : memref<1x1400x128xbf16, #tpu.memory_space<vmem>>, vector<1x1400x128xbf16>
    %1 = vector.shape_cast %0 : vector<1x1400x128xbf16> to vector<1400x128xbf16>
    %2 = vector.extract_strided_slice %1 {offsets = [0, 0], sizes = [1280, 128], strides = [1, 1]} : vector<1400x128xbf16> to vector<1280x128xbf16>
    %c0_2 = arith.constant 0 : index
    %c0_3 = arith.constant 0 : index
    %c0_4 = arith.constant 0 : index
    %c0_5 = arith.constant 0 : index
    %3 = vector.load %arg3[%c0_2, %c0_3, %c0_4, %c0_5] : memref<3x3x128x128xbf16, #tpu.memory_space<vmem>>, vector<1x1x128x128xbf16>
    %4 = vector.shape_cast %3 : vector<1x1x128x128xbf16> to vector<128x128xbf16>
    %cst = arith.constant dense<0.000000e+00> : vector<1280x128xf32>
    %5 = tpu.matmul %2, %4, %cst {dimension_numbers = #tpu.dot_dimension_numbers<[1], [0], [0], [1], [0, 0, 1, 1], [], []>} : vector<1280x128xbf16>, vector<128x128xbf16>, vector<1280x128xf32> -> vector<1280x128xf32>
    %c0_6 = arith.constant 0 : index
    %c0_7 = arith.constant 0 : index
    %6 = vector.load %arg7[%c0_6, %c0_7] : memref<1280x128xf32, #tpu.memory_space<vmem>>, vector<1280x128xf32>
    tpu.vector_store %arg7[%c0_6, %c0_7], %5 {strides = array<i32>} : memref<1280x128xf32, #tpu.memory_space<vmem>>, vector<1280x128xf32>,
    %7 = vector.extract_strided_slice %1 {offsets = [1, 0], sizes = [1280, 128], strides = [1, 1]} : vector<1400x128xbf16> to vector<1280x128xbf16>
    %c0_8 = arith.constant 0 : index
    %c1 = arith.constant 1 : index
    %c0_9 = arith.constant 0 : index
    %c0_10 = arith.constant 0 : index
    %8 = vector.load %arg3[%c0_8, %c1, %c0_9, %c0_10] : memref<3x3x128x128xbf16, #tpu.memory_space<vmem>>, vector<1x1x128x128xbf16>
    %9 = vector.shape_cast %8 : vector<1x1x128x128xbf16> to vector<128x128xbf16>
    %cst_11 = arith.constant dense<0.000000e+00> : vector<1280x128xf32>
    %10 = tpu.matmul %7, %9, %cst_11 {dimension_numbers = #tpu.dot_dimension_numbers<[1], [0], [0], [1], [0, 0, 1, 1], [], []>} : vector<1280x128xbf16>, vector<128x128xbf16>, vector<1280x128xf32> -> vector<1280x128xf32>
    %c0_12 = arith.constant 0 : index
    %c0_13 = arith.constant 0 : index
    %11 = vector.load %arg7[%c0_12, %c0_13] : memref<1280x128xf32, #tpu.memory_space<vmem>>, vector<1280x128xf32>
    %12 = arith.addf %11, %10 : vector<1280x128xf32>
    %c0_14 = arith.constant 0 : index
    %c0_15 = arith.constant 0 : index
    %13 = vector.load %arg7[%c0_14, %c0_15] : memref<1280x128xf32, #tpu.memory_space<vmem>>, vector<1280x128xf32>
    tpu.vector_store %arg7[%c0_14, %c0_15], %12 {strides = array<i32>} : memref<1280x128xf32, #tpu.memory_space<vmem>>, vector<1280x128xf32>,
    %14 = vector.extract_strided_slice %1 {offsets = [2, 0], sizes = [1280, 128], strides = [1, 1]} : vector<1400x128xbf16> to vector<1280x128xbf16>
    %c0_16 = arith.constant 0 : index
    %c2 = arith.constant 2 : index
    %c0_17 = arith.constant 0 : index
    %c0_18 = arith.constant 0 : index
    %15 = vector.load %arg3[%c0_16, %c2, %c0_17, %c0_18] : memref<3x3x128x128xbf16, #tpu.memory_space<vmem>>, vector<1x1x128x128xbf16>
    %16 = vector.shape_cast %15 : vector<1x1x128x128xbf16> to vector<128x128xbf16>
    %cst_19 = arith.constant dense<0.000000e+00> : vector<1280x128xf32>
    %17 = tpu.matmul %14, %16, %cst_19 {dimension_numbers = #tpu.dot_dimension_numbers<[1], [0], [0], [1], [0, 0, 1, 1], [], []>} : vector<1280x128xbf16>, vector<128x128xbf16>, vector<1280x128xf32> -> vector<1280x128xf32>
    %c0_20 = arith.constant 0 : index
    %c0_21 = arith.constant 0 : index
    %18 = vector.load %arg7[%c0_20, %c0_21] : memref<1280x128xf32, #tpu.memory_space<vmem>>, vector<1280x128xf32>
    %19 = arith.addf %18, %17 : vector<1280x128xf32>
    %c0_22 = arith.constant 0 : index
    %c0_23 = arith.constant 0 : index
    %20 = vector.load %arg7[%c0_22, %c0_23] : memref<1280x128xf32, #tpu.memory_space<vmem>>, vector<1280x128xf32>
    tpu.vector_store %arg7[%c0_22, %c0_23], %19 {strides = array<i32>} : memref<1280x128xf32, #tpu.memory_space<vmem>>, vector<1280x128xf32>,
    %21 = vector.extract_strided_slice %1 {offsets = [40, 0], sizes = [1280, 128], strides = [1, 1]} : vector<1400x128xbf16> to vector<1280x128xbf16>
    %c1_24 = arith.constant 1 : index
    %c0_25 = arith.constant 0 : index
    %c0_26 = arith.constant 0 : index
    %c0_27 = arith.constant 0 : index
    %22 = vector.load %arg3[%c1_24, %c0_25, %c0_26, %c0_27] : memref<3x3x128x128xbf16, #tpu.memory_space<vmem>>, vector<1x1x128x128xbf16>
    %23 = vector.shape_cast %22 : vector<1x1x128x128xbf16> to vector<128x128xbf16>
    %cst_28 = arith.constant dense<0.000000e+00> : vector<1280x128xf32>
    %24 = tpu.matmul %21, %23, %cst_28 {dimension_numbers = #tpu.dot_dimension_numbers<[1], [0], [0], [1], [0, 0, 1, 1], [], []>} : vector<1280x128xbf16>, vector<128x128xbf16>, vector<1280x128xf32> -> vector<1280x128xf32>
    %c0_29 = arith.constant 0 : index
    %c0_30 = arith.constant 0 : index
    %25 = vector.load %arg7[%c0_29, %c0_30] : memref<1280x128xf32, #tpu.memory_space<vmem>>, vector<1280x128xf32>
    %26 = arith.addf %25, %24 : vector<1280x128xf32>
    %c0_31 = arith.constant 0 : index
    %c0_32 = arith.constant 0 : index
    %27 = vector.load %arg7[%c0_31, %c0_32] : memref<1280x128xf32, #tpu.memory_space<vmem>>, vector<1280x128xf32>
    tpu.vector_store %arg7[%c0_31, %c0_32], %26 {strides = array<i32>} : memref<1280x128xf32, #tpu.memory_space<vmem>>, vector<1280x128xf32>,
    %28 = vector.extract_strided_slice %1 {offsets = [41, 0], sizes = [1280, 128], strides = [1, 1]} : vector<1400x128xbf16> to vector<1280x128xbf16>
    %c1_33 = arith.constant 1 : index
    %c1_34 = arith.constant 1 : index
    %c0_35 = arith.constant 0 : index
    %c0_36 = arith.constant 0 : index
    %29 = vector.load %arg3[%c1_33, %c1_34, %c0_35, %c0_36] : memref<3x3x128x128xbf16, #tpu.memory_space<vmem>>, vector<1x1x128x128xbf16>
    %30 = vector.shape_cast %29 : vector<1x1x128x128xbf16> to vector<128x128xbf16>
    %cst_37 = arith.constant dense<0.000000e+00> : vector<1280x128xf32>
    %31 = tpu.matmul %28, %30, %cst_37 {dimension_numbers = #tpu.dot_dimension_numbers<[1], [0], [0], [1], [0, 0, 1, 1], [], []>} : vector<1280x128xbf16>, vector<128x128xbf16>, vector<1280x128xf32> -> vector<1280x128xf32>
    %c0_38 = arith.constant 0 : index
    %c0_39 = arith.constant 0 : index
    %32 = vector.load %arg7[%c0_38, %c0_39] : memref<1280x128xf32, #tpu.memory_space<vmem>>, vector<1280x128xf32>
    %33 = arith.addf %32, %31 : vector<1280x128xf32>
    %c0_40 = arith.constant 0 : index
    %c0_41 = arith.constant 0 : index
    %34 = vector.load %arg7[%c0_40, %c0_41] : memref<1280x128xf32, #tpu.memory_space<vmem>>, vector<1280x128xf32>
    tpu.vector_store %arg7[%c0_40, %c0_41], %33 {strides = array<i32>} : memref<1280x128xf32, #tpu.memory_space<vmem>>, vector<1280x128xf32>,
    %35 = vector.extract_strided_slice %1 {offsets = [42, 0], sizes = [1280, 128], strides = [1, 1]} : vector<1400x128xbf16> to vector<1280x128xbf16>
    %c1_42 = arith.constant 1 : index
    %c2_43 = arith.constant 2 : index
    %c0_44 = arith.constant 0 : index
    %c0_45 = arith.constant 0 : index
    %36 = vector.load %arg3[%c1_42, %c2_43, %c0_44, %c0_45] : memref<3x3x128x128xbf16, #tpu.memory_space<vmem>>, vector<1x1x128x128xbf16>
    %37 = vector.shape_cast %36 : vector<1x1x128x128xbf16> to vector<128x128xbf16>
    %cst_46 = arith.constant dense<0.000000e+00> : vector<1280x128xf32>
    %38 = tpu.matmul %35, %37, %cst_46 {dimension_numbers = #tpu.dot_dimension_numbers<[1], [0], [0], [1], [0, 0, 1, 1], [], []>} : vector<1280x128xbf16>, vector<128x128xbf16>, vector<1280x128xf32> -> vector<1280x128xf32>
    %c0_47 = arith.constant 0 : index
    %c0_48 = arith.constant 0 : index
    %39 = vector.load %arg7[%c0_47, %c0_48] : memref<1280x128xf32, #tpu.memory_space<vmem>>, vector<1280x128xf32>
    %40 = arith.addf %39, %38 : vector<1280x128xf32>
    %c0_49 = arith.constant 0 : index
    %c0_50 = arith.constant 0 : index
    %41 = vector.load %arg7[%c0_49, %c0_50] : memref<1280x128xf32, #tpu.memory_space<vmem>>, vector<1280x128xf32>
    tpu.vector_store %arg7[%c0_49, %c0_50], %40 {strides = array<i32>} : memref<1280x128xf32, #tpu.memory_space<vmem>>, vector<1280x128xf32>,
    %42 = vector.extract_strided_slice %1 {offsets = [80, 0], sizes = [1280, 128], strides = [1, 1]} : vector<1400x128xbf16> to vector<1280x128xbf16>
    %c2_51 = arith.constant 2 : index
    %c0_52 = arith.constant 0 : index
    %c0_53 = arith.constant 0 : index
    %c0_54 = arith.constant 0 : index
    %43 = vector.load %arg3[%c2_51, %c0_52, %c0_53, %c0_54] : memref<3x3x128x128xbf16, #tpu.memory_space<vmem>>, vector<1x1x128x128xbf16>
    %44 = vector.shape_cast %43 : vector<1x1x128x128xbf16> to vector<128x128xbf16>
    %cst_55 = arith.constant dense<0.000000e+00> : vector<1280x128xf32>
    %45 = tpu.matmul %42, %44, %cst_55 {dimension_numbers = #tpu.dot_dimension_numbers<[1], [0], [0], [1], [0, 0, 1, 1], [], []>} : vector<1280x128xbf16>, vector<128x128xbf16>, vector<1280x128xf32> -> vector<1280x128xf32>
    %c0_56 = arith.constant 0 : index
    %c0_57 = arith.constant 0 : index
    %46 = vector.load %arg7[%c0_56, %c0_57] : memref<1280x128xf32, #tpu.memory_space<vmem>>, vector<1280x128xf32>
    %47 = arith.addf %46, %45 : vector<1280x128xf32>
    %c0_58 = arith.constant 0 : index
    %c0_59 = arith.constant 0 : index
    %48 = vector.load %arg7[%c0_58, %c0_59] : memref<1280x128xf32, #tpu.memory_space<vmem>>, vector<1280x128xf32>
    tpu.vector_store %arg7[%c0_58, %c0_59], %47 {strides = array<i32>} : memref<1280x128xf32, #tpu.memory_space<vmem>>, vector<1280x128xf32>,
    %49 = vector.extract_strided_slice %1 {offsets = [81, 0], sizes = [1280, 128], strides = [1, 1]} : vector<1400x128xbf16> to vector<1280x128xbf16>
    %c2_60 = arith.constant 2 : index
    %c1_61 = arith.constant 1 : index
    %c0_62 = arith.constant 0 : index
    %c0_63 = arith.constant 0 : index
    %50 = vector.load %arg3[%c2_60, %c1_61, %c0_62, %c0_63] : memref<3x3x128x128xbf16, #tpu.memory_space<vmem>>, vector<1x1x128x128xbf16>
    %51 = vector.shape_cast %50 : vector<1x1x128x128xbf16> to vector<128x128xbf16>
    %cst_64 = arith.constant dense<0.000000e+00> : vector<1280x128xf32>
    %52 = tpu.matmul %49, %51, %cst_64 {dimension_numbers = #tpu.dot_dimension_numbers<[1], [0], [0], [1], [0, 0, 1, 1], [], []>} : vector<1280x128xbf16>, vector<128x128xbf16>, vector<1280x128xf32> -> vector<1280x128xf32>
    %c0_65 = arith.constant 0 : index
    %c0_66 = arith.constant 0 : index
    %53 = vector.load %arg7[%c0_65, %c0_66] : memref<1280x128xf32, #tpu.memory_space<vmem>>, vector<1280x128xf32>
    %54 = arith.addf %53, %52 : vector<1280x128xf32>
    %c0_67 = arith.constant 0 : index
    %c0_68 = arith.constant 0 : index
    %55 = vector.load %arg7[%c0_67, %c0_68] : memref<1280x128xf32, #tpu.memory_space<vmem>>, vector<1280x128xf32>
    tpu.vector_store %arg7[%c0_67, %c0_68], %54 {strides = array<i32>} : memref<1280x128xf32, #tpu.memory_space<vmem>>, vector<1280x128xf32>,
    %56 = vector.extract_strided_slice %1 {offsets = [82, 0], sizes = [1280, 128], strides = [1, 1]} : vector<1400x128xbf16> to vector<1280x128xbf16>
    %c2_69 = arith.constant 2 : index
    %c2_70 = arith.constant 2 : index
    %c0_71 = arith.constant 0 : index
    %c0_72 = arith.constant 0 : index
    %57 = vector.load %arg3[%c2_69, %c2_70, %c0_71, %c0_72] : memref<3x3x128x128xbf16, #tpu.memory_space<vmem>>, vector<1x1x128x128xbf16>
    %58 = vector.shape_cast %57 : vector<1x1x128x128xbf16> to vector<128x128xbf16>
    %cst_73 = arith.constant dense<0.000000e+00> : vector<1280x128xf32>
    %59 = tpu.matmul %56, %58, %cst_73 {dimension_numbers = #tpu.dot_dimension_numbers<[1], [0], [0], [1], [0, 0, 1, 1], [], []>} : vector<1280x128xbf16>, vector<128x128xbf16>, vector<1280x128xf32> -> vector<1280x128xf32>
    %c0_74 = arith.constant 0 : index
    %c0_75 = arith.constant 0 : index
    %60 = vector.load %arg7[%c0_74, %c0_75] : memref<1280x128xf32, #tpu.memory_space<vmem>>, vector<1280x128xf32>
    %61 = arith.addf %60, %59 : vector<1280x128xf32>
    %c0_76 = arith.constant 0 : index
    %c0_77 = arith.constant 0 : index
    %62 = vector.load %arg7[%c0_76, %c0_77] : memref<1280x128xf32, #tpu.memory_space<vmem>>, vector<1280x128xf32>
    tpu.vector_store %arg7[%c0_76, %c0_77], %61 {strides = array<i32>} : memref<1280x128xf32, #tpu.memory_space<vmem>>, vector<1280x128xf32>,
    %c0_78 = arith.constant 0 : index
    %c0_79 = arith.constant 0 : index
    %63 = vector.load %arg7[%c0_78, %c0_79] : memref<1280x128xf32, #tpu.memory_space<vmem>>, vector<1280x128xf32>
    %c0_80 = arith.constant 0 : index
    %c0_81 = arith.constant 0 : index
    %64 = vector.load %arg4[%c0_80, %c0_81] : memref<1x128xf32, #tpu.memory_space<vmem>>, vector<1x128xf32>
    %65 = vector.broadcast %64 : vector<1x128xf32> to vector<1280x128xf32>
    %66 = arith.mulf %63, %65 : vector<1280x128xf32>
    %c0_82 = arith.constant 0 : index
    %c0_83 = arith.constant 0 : index
    %67 = vector.load %arg5[%c0_82, %c0_83] : memref<1x128xf32, #tpu.memory_space<vmem>>, vector<1x128xf32>
    %68 = vector.broadcast %67 : vector<1x128xf32> to vector<1280x128xf32>
    %69 = arith.addf %66, %68 : vector<1280x128xf32>
    %cst_84 = arith.constant 0.000000e+00 : f32
    %70 = vector.broadcast %cst_84 : f32 to vector<1280x128xf32>
    %71 = arith.maximumf %69, %70 : vector<1280x128xf32>
    %72 = vector.shape_cast %71 : vector<1280x128xf32> to vector<32x40x128xf32>
    %73 = vector.extract_strided_slice %72 {offsets = [0, 0, 0], sizes = [32, 32, 128], strides = [1, 1, 1]} : vector<32x40x128xf32> to vector<32x32x128xf32>
    %74 = arith.truncf %73 : vector<32x32x128xf32> to vector<32x32x128xbf16>
    %c0_85 = arith.constant 0 : index
    %c0_86 = arith.constant 0 : index
    %c0_87 = arith.constant 0 : index
    %c0_88 = arith.constant 0 : index
    %75 = vector.load %arg6[%c0_85, %c0_86, %c0_87, %c0_88] : memref<1x32x32x128xbf16, #tpu.memory_space<vmem>>, vector<1x32x32x128xbf16>
    %76 = vector.shape_cast %75 : vector<1x32x32x128xbf16> to vector<32x32x128xbf16>
    %77 = vector.shape_cast %74 : vector<32x32x128xbf16> to vector<1x32x32x128xbf16>
    tpu.vector_store %arg6[%c0_85, %c0_86, %c0_87, %c0_88], %77 {strides = array<i32>} : memref<1x32x32x128xbf16, #tpu.memory_space<vmem>>, vector<1x32x32x128xbf16>,
    return
  }
  func.func @transform_0(%arg0: i32, %arg1: i32) -> (i32, i32, i32) {
    %c0_i32 = arith.constant 0 : i32
    %c0_i32_0 = arith.constant 0 : i32
    %c0_i32_1 = arith.constant 0 : i32
    return %arg0, %c0_i32, %c0_i32_0 : i32, i32, i32
  }
  func.func @transform_1(%arg0: i32, %arg1: i32) -> (i32, i32, i32, i32) {
    %c0_i32 = arith.constant 0 : i32
    %c0_i32_0 = arith.constant 0 : i32
    %c0_i32_1 = arith.constant 0 : i32
    %c0_i32_2 = arith.constant 0 : i32
    return %c0_i32, %c0_i32_0, %c0_i32_1, %arg1 : i32, i32, i32, i32
  }
  func.func @transform_2(%arg0: i32, %arg1: i32) -> (i32, i32) {
    %c0_i32 = arith.constant 0 : i32
    %c0_i32_0 = arith.constant 0 : i32
    return %c0_i32, %arg1 : i32, i32
  }
  func.func @transform_3(%arg0: i32, %arg1: i32) -> (i32, i32) {
    %c0_i32 = arith.constant 0 : i32
    %c0_i32_0 = arith.constant 0 : i32
    return %c0_i32, %arg1 : i32, i32
  }
  func.func @transform_4(%arg0: i32, %arg1: i32) -> (i32, i32, i32, i32) {
    %c0_i32 = arith.constant 0 : i32
    %c0_i32_0 = arith.constant 0 : i32
    %c0_i32_1 = arith.constant 0 : i32
    return %arg0, %c0_i32, %c0_i32_0, %arg1 : i32, i32, i32, i32
  }
}

</mosaic_0001>

<bundles_post_ra>
// kernel: fwd.1
= control target key start
LH: loop header
LB: loop body
LE: loop exit
PB: predicated region body
PF: predicated region fallthrough
CT: control target
= control target key end

     0   :  { %9 = vsyncpa [#allocation4], 0  ;;  %s23845_s0 = inlined_call_operand.vmem [shape: bf16[2,1400,128], index: 0, kind: input, shape index: {}]   ;;  %s23846_s1 = inlined_call_operand.vmem [shape: bf16[3,3,128,128], index: 1, kind: input, shape index: {}]   ;;  %s23847_s2 = inlined_call_operand.vmem [shape: f32[1,128], index: 2, kind: input, shape index: {}]   ;;  %s23848_s3 = inlined_call_operand.vmem [shape: f32[1,128], index: 3, kind: input, shape index: {}]   ;;  %s23849_s4 = inlined_call_operand.hbm [shape: bf16[2,32,32,128], index: 4, kind: output, shape index: {}]  }
   0x1   :  { %11 = vsyncpa [#allocation4 + $0x1], 0  ;;  %s20132_s15 = smov 0   ;;  %s20134_s16 = smov 0  }
   0x2   :  { %s20136_s17 = smov 0   ;;  %s20138_s18 = smov 0  }
   0x3   :  { %s20140_s19 = smov 0   ;;  %s20142_s20 = smov 0  }
   0x4 LB: > { %s15036_s21 = sadd.s32 4294967295, %s20102_s20   ;;  %s15037_s22 = sadd.s32 4294967294, %s20102_s20   ;;  %s20102_s20 = sphi %s20142_s20, %s17_s20   ;;  %s20098_s19 = sphi %s20140_s19, %s25070_s19   ;;  %s20094_s18 = sphi %s20138_s18, %s25069_s18   ;;  %s20090_s17 = sphi %s20136_s17, %s25068_s17   ;;  %s20086_s16 = sphi %s20134_s16, %s25067_s16   ;;  %s20082_s15 = sphi %s20132_s15, %s25066_s15  }
   0x5   : > { %s29_s23 = sadd.s32 1, %s20098_s19  ;;  %s142_s24 = sadd.s32 1, %s20090_s17 }
   0x6   : > { %p31_p0 = scmp.ge.s32.totalorder %s29_s23, 2  ;;  %p152_p1 = scmp.ne.s32.totalorder %s20090_s17, %s20086_s16 }
   0x7   : > { %p153_p2 = scmp.eq.s32.totalorder %s15036_s21, 1  ;;  %p158_p3 = scmp.ne.s32.totalorder %s20086_s16, %s20082_s15 }
   0x8   : > { %s25072_s23 = smov (%p31_p0, %s29_s23), 0  ;;  %p159_p5 = scmp.eq.s32.totalorder %s15037_s22, 1 }
   0x9   : > { %p20172_p4 = por %p153_p2, %p152_p1  ;;  %s137_s26 = ssub.s32 %s20098_s19, %s25072_s23 }
   0xa   : > { %p15043_p6 = scmp.ge.s32.totalorder %s20102_s20, 1  ;;  %p140_p7 = scmp.eq.s32.totalorder %s137_s26, 0 }
   0xb   : > { %p20179_p8 = por %p159_p5, %p158_p3  ;;  %p204_p9 = scmp.lt.s32.totalorder %s20102_s20, 3 }
   0xc   : > { %s20185_s28 = scalar_select %p140_p7, %s20090_s17, %s142_s24  }
   0xd   : > { %p205_p10 = pnand %p15043_p6, %p204_p9 }
   0xf   : > { %208 = sbr.rel (%p205_p10) target bundleno = 1728 (0x6c0), region = 36 }
  0x16   : > { %v19759_v0 = vld [vmem:[%s23846_s1] sm:$0xff]   ;;  %v19761_v2 = vld [vmem:[%s23846_s1 + $0x8] sm:$0xff]   ;;  %p240_p11 = scmp.lt.s32.totalorder %s20094_s18, 1  ;;  %v19763_v4 = vld [vmem:[%s23846_s1 + $0x10] sm:$0xff]   ;;  %vm1824_vm0 = vsmask.f32 7424 }
  0x17   : > { %v19760_v1 = vld [vmem:[%s23846_s1 + $0x100] sm:$0xff]   ;;  %16853 = vmatprep.subr.bf16.mxu1 %v19759_v0  ;;  %v19762_v3 = vld [vmem:[%s23846_s1 + $0x108] sm:$0xff]   ;;  %v19764_v5 = vld [vmem:[%s23846_s1 + $0x110] sm:$0xff]   ;;  %vm3767_vm1 = vcmask 1046528   ;;  %s237_s7 = sand.u32 1, %s20086_s16   ;;  %s15677_s26 = sshll.u32 %s20094_s18, 13 }
  0x18   : > { %17557 = vmatprep.subr.bf16.mxu0 %v19760_v1  ;;  %16854 = vmatpush3.bf16.msra.mxu1 %v19759_v0  ;;  %s241_s21 = scalar_select %p240_p11, %s20094_s18, 1  ;;  %v19765_v6 = vld [vmem:[%s23846_s1 + $0x18] sm:$0xff]   ;;  %v19767_v8 = vld [vmem:[%s23846_s1 + $0x20] sm:$0xff]   ;;  %v19769_v10 = vld [vmem:[%s23846_s1 + $0x28] sm:$0xff]  }
  0x19   : > { %17558 = vmatpush3.bf16.msra.mxu0 %v19760_v1  ;;  %16855 = vmatprep.subr.bf16.mxu1 %v19761_v2  ;;  %v19766_v7 = vld [vmem:[%s23846_s1 + $0x118] sm:$0xff]   ;;  %v19768_v9 = vld [vmem:[%s23846_s1 + $0x120] sm:$0xff]   ;;  %v19770_v11 = vld [vmem:[%s23846_s1 + $0x128] sm:$0xff]   ;;  %s15044_s8 = sshll.u32 %s237_s7, 9  ;;  %s23791_s6 = scalar_lea.hbm %s23849_s4, %s15677_s26 }
  0x1a   : > { %17559 = vmatprep.subr.bf16.mxu0 %v19762_v3  ;;  %s19701_s30 = smul.u32 700, %s241_s21  ;;  %v19771_v19 = vld [vmem:[%s23846_s1 + $0x30] sm:$0xff]   ;;  %v19773_v28 = vld [vmem:[%s23846_s1 + $0x38] sm:$0xff]   ;;  %v19779_v45 = vld [vmem:[%s23846_s1 + $0x40] sm:$0xff]   ;;  %s23322_s9 = scalar_lea.vmem [#allocation3], %s15044_s8 }
  0x1b   : > { %v19772_v22 = vld [vmem:[%s23846_s1 + $0x130] sm:$0xff]   ;;  %v19774_v36 = vld [vmem:[%s23846_s1 + $0x138] sm:$0xff]   ;;  %v19781_v48 = vld [vmem:[%s23846_s1 + $0x140] sm:$0xff]   ;;  %s14925_s29 = sshll.u32 %s23322_s9, 4  ;;  %s23799_s8 = scalar_lea.sflag [#allocation4], %s237_s7  ;;  %s23793_s29 = int_to_ptr.vmem [resolvable:$true] %s14925_s29 }
  0x1c   : > { %16856 = vmatpush3.bf16.msra.mxu1 %v19761_v2  ;;  %s20225_s13 = scalar_lea.vmem %s23845_s0, %s19701_s30  ;;  %v19790_v60 = vld [vmem:[%s23846_s1 + $0x148] sm:$0xff]   ;;  %s20024_s18 = scalar_lea.vmem %s23793_s29, 8192 }
  0x1d   : > { %17560 = vmatpush3.bf16.msra.mxu0 %v19762_v3  ;;  %16857 = vmatprep.subr.bf16.mxu1 %v19763_v4  ;;  %v19775_v12 = vld [vmem:[%s20225_s13] sm:$0xff]   ;;  %v261_v13 = vld [vmem:[%s20225_s13 + $0x14] sm:$0xf]  ;;  %v20233_v14 = vld [vmem:[%s20225_s13 + $0x18] sm:$0xf]  ;;  %p20025_p12 = scmp.ne.s32.totalorder %s23793_s29, %s20024_s18 }
  0x1e   : > { %17561 = vmatprep.subr.bf16.mxu0 %v19764_v5  ;;  %v20236_v15 = vld [vmem:[%s20225_s13 + $0x1c] sm:$0xf]  ;;  %16869 = vmatprep.mubr.bf16.mxu1 %v19775_v12  ;;  %v20239_v16 = vld [vmem:[%s20225_s13 + $0x20] sm:$0xf]  ;;  %v20242_v17 = vcombine.low %v261_v13, %v20233_v14  ;;  %v20258_v24 = vld [vmem:[%s20225_s13 + $0x24] sm:$0xf] }
  0x1f   : > { %v20246_v18 = vcombine.low %v20236_v15, %v20239_v16  ;;  %v20261_v25 = vld [vmem:[%s20225_s13 + $0x28] sm:$0xf]  ;;  %v20271_v30 = vld [vmem:[%s20225_s13 + $0x2c] sm:$0xf]  ;;  %v20276_v34 = vld [vmem:[%s20225_s13 + $0x30] sm:$0xf]  ;;  %v20363_v12 = vcombine.low %v20239_v16, %v20258_v24  ;;  %p20026_p13 = pnand %p20025_p12, %p20172_p4 }
  0x20   : > { %16858 = vmatpush3.bf16.msra.mxu1 %v19763_v4  ;;  %24294 = vst [vmem:[#allocation6_spill] sm:$0xff] %v20242_v17  ;;  %v6617_v20 = vshrl.u32 %v20242_v17, 16  ;;  %v6619_v21 = vshll.u32 %v20242_v17, 16  ;;  %v20265_v27 = vcombine.low %v20258_v24, %v20261_v25  ;;  %v20279_v35 = vld [vmem:[%s20225_s13 + $0x34] sm:$0xf]  ;;  %v20286_v37 = vcombine.low %v20271_v30, %v20276_v34  ;;  %v19778_v51 = vld [vmem:[%s20225_s13 + $0x8] sm:$0xff]  }
  0x21   : > { %17562 = vmatpush3.bf16.msra.mxu0 %v19764_v5  ;;  %16859 = vmatprep.subr.bf16.mxu1 %v19765_v6  ;;  %24295 = vst [vmem:[#allocation7_spill] sm:$0xff] %v20246_v18  ;;  %v6624_v23 = vshll.u32 %v20246_v18, 16  ;;  %v6628_v32 = vshrl.u32 %v20246_v18, 16  ;;  %v20289_v38 = vld [vmem:[%s20225_s13 + $0x38] sm:$0xf]  ;;  %v19802_v2 = vld [vmem:[%s23846_s1 + $0x48] sm:$0xff]   ;;  %p20027_p0 = pneg %p20026_p13 }
  0x22   : > { %17563 = vmatprep.subr.bf16.mxu0 %v19766_v7  ;;  %v6621_v26 = vrot.slane %v6619_v21, 1  ;;  %24296 = vst [vmem:[#allocation8_spill] sm:$0xff] %v20265_v27  ;;  %v6632_v33 = vshll.u32 %v20265_v27, 16  ;;  %24297 = vst [vmem:[#allocation9_spill] sm:$0xff] %v20286_v37  ;;  %v6636_v40 = vshrl.u32 %v20265_v27, 16  ;;  %v6640_v43 = vshll.u32 %v20286_v37, 16 }
  0x23   : > { %v6626_v29 = vrot.slane %v6624_v23, 1  ;;  %v20294_v41 = vld [vmem:[%s20225_s13 + $0x3c] sm:$0xf]  ;;  %v20297_v42 = vld [vmem:[%s20225_s13 + $0x40] sm:$0xf]  ;;  %v20302_v44 = vcombine.low %v20279_v35, %v20289_v38  ;;  %v6644_v57 = vshrl.u32 %v20286_v37, 16 }
  0x24   : > { %16860 = vmatpush3.bf16.msra.mxu1 %v19765_v6  ;;  %v6622_v31 = vor.u32 %v6621_v26, %v6617_v20  ;;  %v6634_v47 = vrot.slane %v6632_v33, 1  ;;  %v260_v49 = vld [vmem:[%s20225_s13 + $0x10] sm:$0xf]  ;;  %v20313_v50 = vcombine.low %v20294_v41, %v20297_v42  ;;  %v6642_v53 = vrot.slane %v6640_v43, 1  ;;  %v20322_v58 = vld [vmem:[%s20225_s13 + $0x44] sm:$0xf] }
  0x25   : > { %17564 = vmatpush3.bf16.msra.mxu0 %v19766_v7  ;;  %16861 = vmatprep.subr.bf16.mxu1 %v19767_v8  ;;  %24298 = vst [vmem:[#allocation10_spill] sm:$0xff] %v20302_v44  ;;  %v6630_v46 = vor.u32 %v6628_v32, %v6626_v29  ;;  %v6648_v54 = vshll.u32 %v20302_v44, 16  ;;  %v20318_v56 = vcombine.low %v260_v49, %v261_v13  ;;  %v20325_v59 = vld [vmem:[%s20225_s13 + $0x48] sm:$0xf]  ;;  %v6652_v61 = vshrl.u32 %v20302_v44, 16  ;;  %v19825_v6 = vld [vmem:[%s23846_s1 + $0x50] sm:$0xff]  }
  0x26   : > { %17565 = vmatprep.subr.bf16.mxu0 %v19768_v9  ;;  %v6627_v39 = vsel %vm1824_vm0, %v6622_v31, %v6626_v29  ;;  %24299 = vst [vmem:[#allocation11_spill] sm:$0xff] %v20313_v50  ;;  %v6638_v52 = vor.u32 %v6636_v40, %v6634_v47  ;;  %v6656_v62 = vshll.u32 %v20313_v50, 16  ;;  %v20334_v0 = vld [vmem:[%s20225_s13 + $0x4c] sm:$0xf]  ;;  %v20337_v1 = vld [vmem:[%s20225_s13 + $0x50] sm:$0xf]  ;;  %v20344_v4 = vcombine.low %v20322_v58, %v20325_v59 }
  0x27   : > { %17573 = vmatprep.mubr.bf16.mxu0 %v6627_v39  ;;  %v6635_v55 = vsel %vm1824_vm0, %v6630_v46, %v6634_v47  ;;  %24300 = vst [vmem:[#allocation12_spill] sm:$0xff] %v20318_v56  ;;  %v6650_v3 = vrot.slane %v6648_v54, 1  ;;  %v6646_v5 = vor.u32 %v6644_v57, %v6642_v53  ;;  %24304 = vst [vmem:[#allocation16_spill] sm:$0xff] %v20363_v12  ;;  %v6660_v13 = vshrl.u32 %v20313_v50, 16  ;;  %v20369_v21 = vld [vmem:[%s20225_s13 + $0x54] sm:$0xf] }
  0x28   : > { %16862 = vmatpush3.bf16.msra.mxu1 %v19767_v8  ;;  %v6643_v63 = vsel %vm1824_vm0, %v6638_v52, %v6642_v53  ;;  %24301 = vst [vmem:[#allocation13_spill] sm:$0xff] %v20344_v4  ;;  %v6658_v8 = vrot.slane %v6656_v62, 1  ;;  %v19813_v23 = vld [vmem:[%s23846_s1 + $0x158] sm:$0xff]   ;;  %v20385_v26 = vld [vmem:[%s20225_s13 + $0x60] sm:$0xf]  ;;  %v20404_v43 = vcombine.low %v20261_v25, %v20271_v30 }
  0x29   : > { %17566 = vmatpush3.bf16.msra.mxu0 %v19768_v9  ;;  %16863 = vmatprep.subr.bf16.mxu1 %v19769_v10  ;;  %v6654_v7 = vor.u32 %v6652_v61, %v6650_v3  ;;  %v20352_v9 = vcombine.low %v20334_v0, %v20337_v1  ;;  %v6651_v20 = vsel %vm1824_vm0, %v6646_v5, %v6650_v3  ;;  %v20382_v24 = vld [vmem:[%s20225_s13 + $0x5c] sm:$0xf]  ;;  %v19827_v39 = vld [vmem:[%s23846_s1 + $0x160] sm:$0xff]   ;;  %v20427_v52 = vld [vmem:[%s20225_s13 + $0x6c] sm:$0xf] }
  0x2a   : > { %17567 = vmatprep.subr.bf16.mxu0 %v19770_v11  ;;  %v6662_v31 = vor.u32 %v6660_v13, %v6658_v8  ;;  %v19848_v40 = vld [vmem:[%s23846_s1 + $0x58] sm:$0xff]   ;;  %24307 = vst [vmem:[#allocation19_spill] sm:$0xff] %v20404_v43  ;;  %v20412_v47 = vld [vmem:[%s20225_s13 + $0x64] sm:$0xf]  ;;  %v20430_v53 = vld [vmem:[%s20225_s13 + $0x70] sm:$0xf]  ;;  %v20450_v3 = vcombine.low %v20297_v42, %v20322_v58 }
  0x2b   : > { %24302 = vst [vmem:[#allocation14_spill] sm:$0xff] %v20352_v9  ;;  %v6672_v16 = vshll.u32 %v20352_v9, 16  ;;  %v6676_v49 = vshrl.u32 %v20352_v9, 16  ;;  %v20439_v62 = vcombine.low %v20427_v52, %v20430_v53  ;;  %v19859_v42 = vld [vmem:[%s23846_s1 + $0x178] sm:$0xff]  }
  0x2c   : > { %16864 = vmatpush3.bf16.msra.mxu1 %v19769_v10  ;;  %v19804_v10 = vld [vmem:[%s23846_s1 + $0x150] sm:$0xff]   ;;  %24312 = vst [vmem:[#allocation24_spill] sm:$0xff] %v20450_v3  ;;  %v20469_v58 = vld [vmem:[%s20225_s13 + $0x7c] sm:$0xf] }
  0x2d   : > { %17568 = vmatpush3.bf16.msra.mxu0 %v19770_v11  ;;  %16865 = vmatprep.subr.bf16.mxu1 %v19771_v19  ;;  %v20359_v11 = vcombine.low %v20233_v14, %v20236_v15  ;;  %v6659_v14 = vsel %vm1824_vm0, %v6654_v7, %v6658_v8  ;;  %v6668_v15 = vshrl.u32 %v20344_v4, 16  ;;  %v6674_v33 = vrot.slane %v6672_v16, 1  ;;  %24310 = vst [vmem:[#allocation22_spill] sm:$0xff] %v20439_v62  ;;  %v20456_v8 = vld [vmem:[%s20225_s13 + $0x74] sm:$0xf] }
  0x2e   : > { %17569 = vmatprep.subr.bf16.mxu0 %v19772_v22 }
  0x2f   : > { %24303 = vst [vmem:[#allocation15_spill] sm:$0xff] %v20359_v11  ;;  %v6678_v57 = vor.u32 %v6676_v49, %v6674_v33 }
  0x30   : > { %16866 = vmatpush3.bf16.msra.mxu1 %v19771_v19  ;;  %v6664_v19 = vshll.u32 %v20344_v4, 16 }
  0x31   : > { %17570 = vmatpush3.bf16.msra.mxu0 %v19772_v22  ;;  %16867 = vmatprep.subr.bf16.mxu1 %v19773_v28  ;;  %v20372_v22 = vld [vmem:[%s20225_s13 + $0x58] sm:$0xf] }
  0x32   : > { %17571 = vmatprep.subr.bf16.mxu0 %v19774_v36  ;;  %v20390_v29 = vcombine.low %v20369_v21, %v20372_v22 }
  0x34   : > { %16868 = vmatpush3.bf16.msra.mxu1 %v19773_v28  ;;  %v6666_v28 = vrot.slane %v6664_v19, 1  ;;  %24305 = vst [vmem:[#allocation17_spill] sm:$0xff] %v20390_v29  ;;  %v6680_v46 = vshll.u32 %v20390_v29, 16  ;;  %v6684_v30 = vshrl.u32 %v20390_v29, 16  ;;  %v20472_v19 = vld [vmem:[%s20225_s13 + $0x80] sm:$0xf] }
  0x35   : > { %17572 = vmatpush3.bf16.msra.mxu0 %v19774_v36  ;;  %17029 = vmatprep.subr.bf16.mxu1 %v19779_v45  ;;  %v20394_v36 = vcombine.low %v20382_v24, %v20385_v26 }
  0x36   : > { %17733 = vmatprep.subr.bf16.mxu0 %v19781_v48  ;;  %v6670_v32 = vor.u32 %v6668_v15, %v6666_v28  ;;  %v6682_v54 = vrot.slane %v6680_v46, 1  ;;  %v20495_v46 = vld [vmem:[%s20225_s13 + $0x84] sm:$0xf] }
  0x37   : > { %16870 = vmatmul.mubr.bf16.vlgmr.msra.gmra.mrb[0].mxu1 %v19778_v51  ;;  %24306 = vst [vmem:[#allocation18_spill] sm:$0xff] %v20394_v36  ;;  %v20417_v51 = vld [vmem:[%s20225_s13 + $0x68] sm:$0xf]  ;;  %v6692_v7 = vshrl.u32 %v20394_v36, 16 }
  0x38   : > { %17574 = vmatmul.mubr.bf16.vlgmr.msra.gmra.mrb[0].mxu0 %v6635_v55  ;;  %17030 = vmatpush3.bf16.msra.mxu1 %v19779_v45  ;;  %v20408_v45 = vcombine.low %v20276_v34, %v20279_v35  ;;  %v6675_v25 = vsel %vm1824_vm0, %v6670_v32, %v6674_v33  ;;  %v6688_v34 = vshll.u32 %v20394_v36, 16  ;;  %v19836_v35 = vld [vmem:[%s23846_s1 + $0x168] sm:$0xff]   ;;  %v20435_v55 = vcombine.low %v20412_v47, %v20417_v51 }
  0x39   : > { %17734 = vmatpush3.bf16.msra.mxu0 %v19781_v48  ;;  %16873 = vmatprep.mubr.bf16.mxu1 %v20318_v56  ;;  %v6667_v48 = vsel %vm1824_vm0, %v6662_v31, %v6666_v28  ;;  %v20481_v28 = vcombine.low %v20469_v58, %v20472_v19  ;;  %v20485_v31 = vcombine.low %v20325_v59, %v20334_v0  ;;  %v20696_v56 = vld [vmem:[%s20225_s13 + $0x17c] sm:$0xf] }
  0x3a   : > { %17577 = vmatprep.mubr.bf16.mxu0 %v6643_v63  ;;  %17735 = vmatprep.subr.bf16.mxu0 %v19790_v60  ;;  %24308 = vst [vmem:[#allocation20_spill] sm:$0xff] %v20408_v45  ;;  %24309 = vst [vmem:[#allocation21_spill] sm:$0xff] %v20435_v55  ;;  %v6690_v61 = vrot.slane %v6688_v34, 1  ;;  %v19850_v63 = vld [vmem:[%s23846_s1 + $0x170] sm:$0xff]   ;;  %v6696_v5 = vshll.u32 %v20435_v55, 16  ;;  %v20489_v32 = vcombine.low %v20337_v1, %v20369_v21  ;;  %v19870_v21 = vld [vmem:[%s23846_s1 + $0x60] sm:$0xff]  }
  0x3b   : > { %17031 = vmatprep.subr.bf16.mxu1 %v19802_v2  ;;  %24314 = vst [vmem:[#allocation26_spill] sm:$0xff] %v20481_v28  ;;  %24315 = vst [vmem:[#allocation27_spill] sm:$0xff] %v20485_v31  ;;  %v6720_v0 = vshll.u32 %v20481_v28, 16  ;;  %v20508_v1 = vld [vmem:[%s20225_s13 + $0x90] sm:$0xf] }
  0x3c   : > { %17032 = vmatpush3.bf16.msra.mxu1 %v19802_v2  ;;  %v20446_v2 = vcombine.low %v20289_v38, %v20294_v41  ;;  %v6700_v38 = vshrl.u32 %v20435_v55, 16  ;;  %v6704_v41 = vshll.u32 %v20439_v62, 16  ;;  %v6694_v15 = vor.u32 %v6692_v7, %v6690_v61  ;;  %24316 = vst [vmem:[#allocation28_spill] sm:$0xff] %v20489_v32 }
  0x3d   : > { %17736 = vmatpush3.bf16.msra.mxu0 %v19790_v60  ;;  %17033 = vmatprep.subr.bf16.mxu1 %v19825_v6  ;;  %v6686_v60 = vor.u32 %v6684_v30, %v6682_v54 }
  0x3e   : > { %17737 = vmatprep.subr.bf16.mxu0 %v19804_v10  ;;  %24311 = vst [vmem:[#allocation23_spill] sm:$0xff] %v20446_v2 }
  0x3f   : > { %16874 = vmatmul.mubr.bf16.gmra.mrb[4].mxu1 %v20359_v11  ;;  %v6691_v13 = vsel %vm1824_vm0, %v6686_v60, %v6690_v61  ;;  %v6722_v60 = vrot.slane %v6720_v0, 1  ;;  %v20572_v0 = vld [vmem:[%s20225_s13 + $0xac] sm:$0xf] }
  0x40   : > { %17578 = vmatmul.mubr.bf16.gmra.mrb[4].mxu0 %v6651_v20  ;;  %16877 = vmatprep.mubr.bf16.mxu1 %v20363_v12  ;;  %v6698_v20 = vrot.slane %v6696_v5, 1  ;;  %v20530_v5 = vld [vmem:[%s20225_s13 + $0x94] sm:$0xf]  ;;  %v20685_v12 = vld [vmem:[%s20225_s13 + $0x178] sm:$0xf] }
  0x41   : > { %17581 = vmatprep.mubr.bf16.mxu0 %v6659_v14  ;;  %17738 = vmatpush3.bf16.msra.mxu0 %v19804_v10  ;;  %v20459_v10 = vld [vmem:[%s20225_s13 + $0x78] sm:$0xf] }
  0x42   : > { %17739 = vmatprep.subr.bf16.mxu0 %v19813_v23  ;;  %17034 = vmatpush3.bf16.msra.mxu1 %v19825_v6  ;;  %v6683_v6 = vsel %vm1824_vm0, %v6678_v57, %v6682_v54  ;;  %v20477_v14 = vcombine.low %v20456_v8, %v20459_v10  ;;  %v6702_v16 = vor.u32 %v6700_v38, %v6698_v20  ;;  %v19871_v54 = vld [vmem:[%s23846_s1 + $0x180] sm:$0xff]  }
  0x43   : > { %17035 = vmatprep.subr.bf16.mxu1 %v19848_v40 }
  0x44   : > { %24313 = vst [vmem:[#allocation25_spill] sm:$0xff] %v20477_v14  ;;  %v6712_v33 = vshll.u32 %v20477_v14, 16  ;;  %v6716_v59 = vshrl.u32 %v20477_v14, 16  ;;  %v20791_v14 = vld [vmem:[%s20225_s13 + $0xe4] sm:$0xf] }
  0x45   : > { %17740 = vmatpush3.bf16.msra.mxu0 %v19813_v23  ;;  %v6706_v23 = vrot.slane %v6704_v41, 1  ;;  %v6724_v41 = vshrl.u32 %v20481_v28, 16 }
  0x46   : > { %17741 = vmatprep.subr.bf16.mxu0 %v19827_v39  ;;  %17036 = vmatpush3.bf16.msra.mxu1 %v19848_v40  ;;  %v6708_v40 = vshrl.u32 %v20439_v62, 16  ;;  %v6714_v30 = vrot.slane %v6712_v33, 1 }
  0x47   : > { %16878 = vmatmul.mubr.bf16.gmra.mrb[8].mxu1 %v20404_v43  ;;  %v6707_v49 = vsel %vm1824_vm0, %v6702_v16, %v6706_v23  ;;  %17037 = vmatprep.subr.bf16.mxu1 %v19870_v21  ;;  %v6726_v16 = vor.u32 %v6724_v41, %v6722_v60  ;;  %v20682_v43 = vld [vmem:[%s20225_s13 + $0x174] sm:$0xf] }
  0x48   : > { %17582 = vmatmul.mubr.bf16.gmra.mrb[8].mxu0 %v6667_v48  ;;  %16881 = vmatprep.mubr.bf16.mxu1 %v20408_v45  ;;  %v20498_v48 = vld [vmem:[%s20225_s13 + $0x88] sm:$0xf]  ;;  %v6718_v57 = vor.u32 %v6716_v59, %v6714_v30  ;;  %v20569_v59 = vcombine.low %v20417_v51, %v20427_v52  ;;  %v20668_v45 = vld [vmem:[%s20225_s13 + $0x16c] sm:$0xf] }
  0x49   : > { %17585 = vmatprep.mubr.bf16.mxu0 %v6675_v25  ;;  %17742 = vmatpush3.bf16.msra.mxu0 %v19827_v39  ;;  %v6699_v39 = vsel %vm1824_vm0, %v6694_v15, %v6698_v20  ;;  %v20504_v25 = vld [vmem:[%s20225_s13 + $0x8c] sm:$0xf]  ;;  %v20516_v34 = vcombine.low %v20495_v46, %v20498_v48  ;;  %v20546_v20 = vld [vmem:[%s20225_s13 + $0x9c] sm:$0xf] }
  0x4a   : > { %17743 = vmatprep.subr.bf16.mxu0 %v19836_v35  ;;  %v20523_v61 = vcombine.low %v20504_v25, %v20508_v1  ;;  %17038 = vmatpush3.bf16.msra.mxu1 %v19870_v21  ;;  %24323 = vst [vmem:[#allocation35_spill] sm:$0xff] %v20569_v59  ;;  %v20575_v21 = vld [vmem:[%s20225_s13 + $0xb0] sm:$0xf] }
  0x4b   : > { %24317 = vst [vmem:[#allocation29_spill] sm:$0xff] %v20516_v34  ;;  %v6728_v7 = vshll.u32 %v20516_v34, 16 }
  0x4c   : > { %24318 = vst [vmem:[#allocation30_spill] sm:$0xff] %v20523_v61 }
  0x4d   : > { %17744 = vmatpush3.bf16.msra.mxu0 %v19836_v35  ;;  %v6710_v35 = vor.u32 %v6708_v40, %v6706_v23  ;;  %v20562_v40 = vld [vmem:[%s20225_s13 + $0xa4] sm:$0xf] }
  0x4e   : > { %17745 = vmatprep.subr.bf16.mxu0 %v19850_v63 }
  0x4f   : > { %16882 = vmatmul.mubr.bf16.gmra.mrb[12].mxu1 %v20446_v2  ;;  %v6715_v38 = vsel %vm1824_vm0, %v6710_v35, %v6714_v30  ;;  %v20579_v30 = vcombine.low %v20430_v53, %v20456_v8 }
  0x50   : > { %17586 = vmatmul.mubr.bf16.gmra.mrb[12].mxu0 %v6683_v6  ;;  %16885 = vmatprep.mubr.bf16.mxu1 %v20450_v3  ;;  %v20534_v6 = vcombine.low %v20385_v26, %v20412_v47  ;;  %v20550_v26 = vld [vmem:[%s20225_s13 + $0xa0] sm:$0xf]  ;;  %v6730_v47 = vrot.slane %v6728_v7, 1  ;;  %v20595_v7 = vcombine.low %v20572_v0, %v20575_v21  ;;  %v20665_v3 = vld [vmem:[%s20225_s13 + $0x168] sm:$0xf] }
  0x51   : > { %17589 = vmatprep.mubr.bf16.mxu0 %v6691_v13  ;;  %17746 = vmatpush3.bf16.msra.mxu0 %v19850_v63  ;;  %v20527_v63 = vcombine.low %v20372_v22, %v20382_v24  ;;  %v20538_v13 = vld [vmem:[%s20225_s13 + $0x98] sm:$0xf]  ;;  %v6732_v22 = vshrl.u32 %v20516_v34, 16  ;;  %v6736_v24 = vshll.u32 %v20523_v61, 16  ;;  %24324 = vst [vmem:[#allocation36_spill] sm:$0xff] %v20579_v30 }
  0x52   : > { %17747 = vmatprep.subr.bf16.mxu0 %v19859_v42  ;;  %24320 = vst [vmem:[#allocation32_spill] sm:$0xff] %v20534_v6  ;;  %v20555_v15 = vcombine.low %v20530_v5, %v20538_v13  ;;  %24326 = vst [vmem:[#allocation38_spill] sm:$0xff] %v20595_v7  ;;  %v20762_v34 = vcombine.low %v20538_v13, %v20546_v20 }
  0x53   : > { %24319 = vst [vmem:[#allocation31_spill] sm:$0xff] %v20527_v63  ;;  %v6734_v23 = vor.u32 %v6732_v22, %v6730_v47  ;;  %v6738_v33 = vrot.slane %v6736_v24, 1  ;;  %v20604_v22 = vld [vmem:[%s20225_s13 + $0xbc] sm:$0xf]  ;;  %v20607_v24 = vld [vmem:[%s20225_s13 + $0xc0] sm:$0xf] }
  0x54   : > { %24321 = vst [vmem:[#allocation33_spill] sm:$0xff] %v20555_v15  ;;  %v6744_v35 = vshll.u32 %v20555_v15, 16  ;;  %v6748_v52 = vshrl.u32 %v20555_v15, 16  ;;  %v20740_v15 = vld [vmem:[%s20225_s13 + $0x18c] sm:$0xf]  ;;  %24343 = vst [vmem:[#allocation55_spill] sm:$0xff] %v20762_v34 }
  0x55   : > { %17748 = vmatpush3.bf16.msra.mxu0 %v19859_v42  ;;  %v6723_v42 = vsel %vm1824_vm0, %v6718_v57, %v6722_v60  ;;  %v6740_v57 = vshrl.u32 %v20523_v61, 16  ;;  %v6739_v51 = vsel %vm1824_vm0, %v6734_v23, %v6738_v33  ;;  %v20611_v23 = vcombine.low %v20459_v10, %v20469_v58 }
  0x56   : > { %17909 = vmatprep.subr.bf16.mxu0 %v19871_v54  ;;  %v6731_v54 = vsel %vm1824_vm0, %v6726_v16, %v6730_v47  ;;  %v6746_v8 = vrot.slane %v6744_v35, 1 }
  0x57   : > { %16886 = vmatmul.mubr.bf16.gmra.mrb[16].mxu1 %v20485_v31  ;;  %v6742_v41 = vor.u32 %v6740_v57, %v6738_v33  ;;  %24327 = vst [vmem:[#allocation39_spill] sm:$0xff] %v20611_v23  ;;  %v6768_v33 = vshll.u32 %v20595_v7, 16  ;;  %v20662_v31 = vld [vmem:[%s20225_s13 + $0x164] sm:$0xf] }
  0x58   : > { %17590 = vmatmul.mubr.bf16.gmra.mrb[16].mxu0 %v6699_v39  ;;  %16889 = vmatprep.mubr.bf16.mxu1 %v20489_v32  ;;  %v20559_v39 = vcombine.low %v20546_v20, %v20550_v26  ;;  %v6750_v47 = vor.u32 %v6748_v52, %v6746_v8  ;;  %v20659_v32 = vld [vmem:[%s20225_s13 + $0x160] sm:$0xf]  ;;  %v20693_v11 = vcombine.low %v20662_v31, %v20665_v3 }
  0x59   : > { %17593 = vmatprep.mubr.bf16.mxu0 %v6707_v49  ;;  %v20565_v49 = vld [vmem:[%s20225_s13 + $0xa8] sm:$0xf]  ;;  %v6747_v10 = vsel %vm1824_vm0, %v6742_v41, %v6746_v8  ;;  %v6770_v8 = vrot.slane %v6768_v33, 1  ;;  %v20650_v33 = vld [vmem:[%s20225_s13 + $0xd0] sm:$0xf] }
  0x5a   : > { %24322 = vst [vmem:[#allocation34_spill] sm:$0xff] %v20559_v39  ;;  %v6752_v60 = vshll.u32 %v20559_v39, 16  ;;  %v20590_v53 = vcombine.low %v20562_v40, %v20565_v49  ;;  %v6756_v58 = vshrl.u32 %v20559_v39, 16  ;;  %24334 = vst [vmem:[#allocation46_spill] sm:$0xff] %v20693_v11 }
  0x5c   : > { %24325 = vst [vmem:[#allocation37_spill] sm:$0xff] %v20590_v53  ;;  %v6754_v16 = vrot.slane %v6752_v60, 1  ;;  %v6760_v35 = vshll.u32 %v20590_v53, 16  ;;  %v6772_v60 = vshrl.u32 %v20595_v7, 16 }
  0x5e   : > { %v6762_v52 = vrot.slane %v6760_v35, 1  ;;  %v20641_v35 = vld [vmem:[%s20225_s13 + $0xc8] sm:$0xf]  ;;  %v6774_v7 = vor.u32 %v6772_v60, %v6770_v8 }
  0x5f   : > { %16890 = vmatmul.mubr.bf16.gmra.mrb[20].mxu1 %v20527_v63  ;;  %v20656_v63 = vld [vmem:[%s20225_s13 + $0xd8] sm:$0xf] }
  0x60   : > { %17594 = vmatmul.mubr.bf16.gmra.mrb[20].mxu0 %v6715_v38  ;;  %16893 = vmatprep.mubr.bf16.mxu1 %v20534_v6  ;;  %v20598_v38 = vld [vmem:[%s20225_s13 + $0xb4] sm:$0xf] }
  0x61   : > { %17597 = vmatprep.mubr.bf16.mxu0 %v6723_v42  ;;  %v20601_v42 = vld [vmem:[%s20225_s13 + $0xb8] sm:$0xf]  ;;  %v20653_v6 = vld [vmem:[%s20225_s13 + $0xd4] sm:$0xf] }
  0x62   : > { %v20621_v57 = vcombine.low %v20598_v38, %v20601_v42 }
  0x64   : > { %24329 = vst [vmem:[#allocation41_spill] sm:$0xff] %v20621_v57  ;;  %v6776_v41 = vshll.u32 %v20621_v57, 16 }
  0x67   : > { %16894 = vmatmul.mubr.bf16.gmra.mrb[24].mxu1 %v20569_v59  ;;  %v20644_v59 = vld [vmem:[%s20225_s13 + $0x15c] sm:$0xf] }
  0x68   : > { %17598 = vmatmul.mubr.bf16.gmra.mrb[24].mxu0 %v6731_v54  ;;  %16897 = vmatprep.mubr.bf16.mxu1 %v20579_v30  ;;  %v20616_v54 = vcombine.low %v20472_v19, %v20495_v46  ;;  %v6755_v19 = vsel %vm1824_vm0, %v6750_v47, %v6754_v16  ;;  %v6764_v46 = vshrl.u32 %v20590_v53, 16  ;;  %v6780_v47 = vshrl.u32 %v20621_v57, 16  ;;  %v20638_v30 = vld [vmem:[%s20225_s13 + $0xc4] sm:$0xf] }
  0x69   : > { %17601 = vmatprep.mubr.bf16.mxu0 %v6739_v51  ;;  %v20625_v51 = vcombine.low %v20604_v22, %v20607_v24  ;;  %v20724_v57 = vld [vmem:[%s20225_s13 + $0x184] sm:$0xf]  ;;  %v6778_v53 = vrot.slane %v6776_v41, 1 }
  0x6a   : > { %24328 = vst [vmem:[#allocation40_spill] sm:$0xff] %v20616_v54  ;;  %v6766_v2 = vor.u32 %v6764_v46, %v6762_v52  ;;  %v20689_v46 = vcombine.low %v20508_v1, %v20530_v5  ;;  %v20708_v1 = vld [vmem:[%s20225_s13 + $0x180] sm:$0xf] }
  0x6b   : > { %24330 = vst [vmem:[#allocation42_spill] sm:$0xff] %v20625_v51  ;;  %v6788_v39 = vshrl.u32 %v20625_v51, 16 }
  0x6c   : > { %24333 = vst [vmem:[#allocation45_spill] sm:$0xff] %v20689_v46  ;;  %v6771_v5 = vsel %vm1824_vm0, %v6766_v2, %v6770_v8  ;;  %v20729_v2 = vcombine.low %v20696_v56, %v20708_v1  ;;  %v20752_v8 = vld [vmem:[%s20225_s13 + $0xe0] sm:$0xf] }
  0x6e   : > { %24340 = vst [vmem:[#allocation52_spill] sm:$0xff] %v20729_v2  ;;  %v20747_v2 = vld [vmem:[%s20225_s13 + $0x190] sm:$0xf] }
  0x6f   : > { %16898 = vmatmul.mubr.bf16.gmra.mrb[28].mxu1 %v20611_v23  ;;  %v6784_v23 = vshll.u32 %v20625_v51, 16  ;;  %v20756_v41 = vcombine.low %v20740_v15, %v20747_v2  ;;  %v6782_v51 = vor.u32 %v6780_v47, %v6778_v53 }
  0x70   : > { %17602 = vmatmul.mubr.bf16.gmra.mrb[28].mxu0 %v6747_v10  ;;  %16901 = vmatprep.mubr.bf16.mxu1 %v20616_v54  ;;  %v6758_v10 = vor.u32 %v6756_v58, %v6754_v16  ;;  %v20647_v54 = vld [vmem:[%s20225_s13 + $0xcc] sm:$0xf]  ;;  %v20671_v16 = vld [vmem:[%s20225_s13 + $0x170] sm:$0xf]  ;;  %v20675_v58 = vcombine.low %v20498_v48, %v20504_v25  ;;  %v20701_v25 = vcombine.low %v20638_v30, %v20641_v35 }
  0x71   : > { %17605 = vmatprep.mubr.bf16.mxu0 %v6755_v19  ;;  %v20679_v19 = vcombine.low %v20644_v59, %v20659_v32  ;;  %v20713_v11 = vcombine.low %v20647_v54, %v20650_v33  ;;  %24342 = vst [vmem:[#allocation54_spill] sm:$0xff] %v20756_v41  ;;  %v6779_v41 = vsel %vm1824_vm0, %v6774_v7, %v6778_v53 }
  0x72   : > { %24331 = vst [vmem:[#allocation43_spill] sm:$0xff] %v20675_v58  ;;  %v6763_v48 = vsel %vm1824_vm0, %v6758_v10, %v6762_v52  ;;  %24335 = vst [vmem:[#allocation47_spill] sm:$0xff] %v20701_v25  ;;  %v20717_v52 = vcombine.low %v20653_v6, %v20656_v63  ;;  %v20721_v10 = vcombine.low %v20682_v43, %v20685_v12  ;;  %v6796_v60 = vshrl.u32 %v20701_v25, 16 }
  0x73   : > { %24332 = vst [vmem:[#allocation44_spill] sm:$0xff] %v20679_v19  ;;  %v20705_v19 = vcombine.low %v20668_v45, %v20671_v16  ;;  %24337 = vst [vmem:[#allocation49_spill] sm:$0xff] %v20713_v11  ;;  %v6800_v61 = vshll.u32 %v20713_v11, 16  ;;  %v6804_v28 = vshrl.u32 %v20713_v11, 16  ;;  %v20816_v11 = vcombine.low %v20565_v49, %v20572_v0 }
  0x74   : > { %24338 = vst [vmem:[#allocation50_spill] sm:$0xff] %v20717_v52  ;;  %24339 = vst [vmem:[#allocation51_spill] sm:$0xff] %v20721_v10  ;;  %v20737_v10 = vld [vmem:[%s20225_s13 + $0xdc] sm:$0xf] }
  0x75   : > { %24336 = vst [vmem:[#allocation48_spill] sm:$0xff] %v20705_v19  ;;  %v20732_v19 = vld [vmem:[%s20225_s13 + $0x188] sm:$0xf]  ;;  %v20774_v47 = vcombine.low %v20737_v10, %v20752_v8  ;;  %v6802_v7 = vrot.slane %v6800_v61, 1  ;;  %v6812_v61 = vshrl.u32 %v20717_v52, 16  ;;  %24350 = vst [vmem:[#allocation62_spill] sm:$0xff] %v20816_v11 }
  0x77   : > { %16902 = vmatmul.mubr.bf16.gmra.mrb[32].mxu1 %v20675_v58  ;;  %v20744_v58 = vcombine.low %v20724_v57, %v20732_v19  ;;  %24345 = vst [vmem:[#allocation57_spill] sm:$0xff] %v20774_v47 }
  0x78   : > { %17606 = vmatmul.mubr.bf16.gmra.mrb[32].mxu0 %v6763_v48  ;;  %16905 = vmatprep.mubr.bf16.mxu1 %v20689_v46  ;;  %v6786_v48 = vrot.slane %v6784_v23, 1  ;;  %v6792_v46 = vshll.u32 %v20701_v25, 16  ;;  %v20766_v23 = vcombine.low %v20550_v26, %v20562_v40  ;;  %v20777_v25 = vld [vmem:[%s20225_s13 + $0x198] sm:$0xf]  ;;  %v19890_v40 = vld [vmem:[%s23846_s1 + $0x68] sm:$0xff]  }
  0x79   : > { %24341 = vst [vmem:[#allocation53_spill] sm:$0xff] %v20744_v58  ;;  %17609 = vmatprep.mubr.bf16.mxu0 %v6771_v5  ;;  %v6808_v58 = vshll.u32 %v20717_v52, 16  ;;  %v20769_v5 = vld [vmem:[%s20225_s13 + $0x194] sm:$0xf]  ;;  %24346 = vst [vmem:[#allocation58_spill] sm:$0xff] %v20777_v25  ;;  %17039 = vmatprep.subr.bf16.mxu1 %v19890_v40 }
  0x7a   : > { %24344 = vst [vmem:[#allocation56_spill] sm:$0xff] %v20766_v23  ;;  %v6787_v13 = vsel %vm1824_vm0, %v6782_v51, %v6786_v48  ;;  %v6794_v20 = vrot.slane %v6792_v46, 1  ;;  %v20783_v26 = vcombine.low %v20769_v5, %v20777_v25  ;;  %v6790_v53 = vor.u32 %v6788_v39, %v6786_v48  ;;  %v20794_v51 = vld [vmem:[%s20225_s13 + $0xe8] sm:$0xf]  ;;  %v20797_v46 = vld [vmem:[%s20225_s13 + $0xec] sm:$0xf]  ;;  %17040 = vmatpush3.bf16.msra.mxu1 %v19890_v40 }
  0x7b   : > { %v20806_v25 = vld [vmem:[%s20225_s13 + $0x1a0] sm:$0xf]  ;;  %v6816_v39 = vshll.u32 %v20774_v47, 16  ;;  %v20835_v40 = vld [vmem:[%s20225_s13 + $0x1a8] sm:$0xf] }
  0x7c   : > { %24347 = vst [vmem:[#allocation59_spill] sm:$0xff] %v20783_v26  ;;  %v20803_v26 = vld [vmem:[%s20225_s13 + $0x19c] sm:$0xf]  ;;  %24348 = vst [vmem:[#allocation60_spill] sm:$0xff] %v20806_v25  ;;  %v6795_v52 = vsel %vm1824_vm0, %v6790_v53, %v6794_v20  ;;  %v20846_v53 = vld [vmem:[%s20225_s13 + $0x1ac] sm:$0xf] }
  0x7d   : > { %v20812_v48 = vcombine.low %v20803_v26, %v20806_v25  ;;  %v20828_v25 = vcombine.low %v20791_v14, %v20794_v51 }
  0x7f   : > { %16906 = vmatmul.mubr.bf16.gmra.mrb[36].mxu1 %v20762_v34  ;;  %v20800_v34 = vld [vmem:[%s20225_s13 + $0xf0] sm:$0xf]  ;;  %24349 = vst [vmem:[#allocation61_spill] sm:$0xff] %v20812_v48  ;;  %24352 = vst [vmem:[#allocation64_spill] sm:$0xff] %v20828_v25  ;;  %v20870_v48 = vcombine.low %v20607_v24, %v20638_v30 }
  0x80   : > { %17610 = vmatmul.mubr.bf16.gmra.mrb[36].mxu0 %v6779_v41  ;;  %16909 = vmatprep.mubr.bf16.mxu1 %v20766_v23  ;;  %v6810_v41 = vrot.slane %v6808_v58, 1  ;;  %v6798_v23 = vor.u32 %v6796_v60, %v6794_v20  ;;  %v20820_v58 = vcombine.low %v20575_v21, %v20598_v38  ;;  %v20832_v60 = vcombine.low %v20797_v46, %v20800_v34 }
  0x81   : > { %17613 = vmatprep.mubr.bf16.mxu0 %v6787_v13  ;;  %v20823_v13 = vld [vmem:[%s20225_s13 + $0x1a4] sm:$0xf]  ;;  %v6806_v21 = vor.u32 %v6804_v28, %v6802_v7  ;;  %v6818_v38 = vrot.slane %v6816_v39, 1  ;;  %v6820_v20 = vshrl.u32 %v20774_v47, 16  ;;  %v20860_v39 = vcombine.low %v20601_v42, %v20604_v22  ;;  %24358 = vst [vmem:[#allocation70_spill] sm:$0xff] %v20870_v48 }
  0x82   : > { %24351 = vst [vmem:[#allocation63_spill] sm:$0xff] %v20820_v58  ;;  %24353 = vst [vmem:[#allocation65_spill] sm:$0xff] %v20832_v60  ;;  %v6803_v49 = vsel %vm1824_vm0, %v6798_v23, %v6802_v7  ;;  %v20841_v0 = vcombine.low %v20823_v13, %v20835_v40  ;;  %v20849_v23 = vld [vmem:[%s20225_s13 + $0x1b0] sm:$0xf]  ;;  %v6814_v7 = vor.u32 %v6812_v61, %v6810_v41  ;;  %v20880_v61 = vld [vmem:[%s20225_s13 + $0x100] sm:$0xf] }
  0x83   : > { %24355 = vst [vmem:[#allocation67_spill] sm:$0xff] %v20849_v23  ;;  %v20856_v28 = vcombine.low %v20846_v53, %v20849_v23  ;;  %24357 = vst [vmem:[#allocation69_spill] sm:$0xff] %v20860_v39  ;;  %v6811_v47 = vsel %vm1824_vm0, %v6806_v21, %v6810_v41  ;;  %v20883_v42 = vld [vmem:[%s20225_s13 + $0x1b8] sm:$0xf]  ;;  %v20897_v41 = vld [vmem:[%s20225_s13 + $0x1bc] sm:$0xf] }
  0x84   : > { %24354 = vst [vmem:[#allocation66_spill] sm:$0xff] %v20841_v0  ;;  %v6828_v0 = vshrl.u32 %v20828_v25, 16  ;;  %24359 = vst [vmem:[#allocation71_spill] sm:$0xff] %v20883_v42  ;;  %v6819_v22 = vsel %vm1824_vm0, %v6814_v7, %v6818_v38  ;;  %v20900_v21 = vld [vmem:[%s20225_s13 + $0x1c0] sm:$0xf]  ;;  %v6822_v7 = vor.u32 %v6820_v20, %v6818_v38  ;;  %v20916_v38 = vcombine.low %v20650_v33, %v20653_v6 }
  0x85   : > { %24356 = vst [vmem:[#allocation68_spill] sm:$0xff] %v20856_v28  ;;  %v20877_v28 = vld [vmem:[%s20225_s13 + $0xfc] sm:$0xf]  ;;  %24362 = vst [vmem:[#allocation74_spill] sm:$0xff] %v20897_v41  ;;  %v20931_v6 = vld [vmem:[%s20225_s13 + $0x1c4] sm:$0xf] }
  0x86   : > { %24363 = vst [vmem:[#allocation75_spill] sm:$0xff] %v20900_v21  ;;  %24367 = vst [vmem:[#allocation79_spill] sm:$0xff] %v20916_v38  ;;  %v20934_v33 = vld [vmem:[%s20225_s13 + $0x1c8] sm:$0xf] }
  0x87   : > { %16910 = vmatmul.mubr.bf16.gmra.mrb[40].mxu1 %v20816_v11  ;;  %v6824_v11 = vshll.u32 %v20828_v25, 16  ;;  %v20873_v25 = vld [vmem:[%s20225_s13 + $0x1b4] sm:$0xf]  ;;  %24368 = vst [vmem:[#allocation80_spill] sm:$0xff] %v20931_v6  ;;  %24369 = vst [vmem:[#allocation81_spill] sm:$0xff] %v20934_v33 }
  0x88   : > { %17614 = vmatmul.mubr.bf16.gmra.mrb[40].mxu0 %v6795_v52  ;;  %16913 = vmatprep.mubr.bf16.mxu1 %v20820_v58  ;;  %v6832_v52 = vshll.u32 %v20832_v60, 16  ;;  %v20863_v58 = vld [vmem:[%s20225_s13 + $0xf4] sm:$0xf]  ;;  %v20889_v23 = vcombine.low %v20873_v25, %v20883_v42  ;;  %v20953_v42 = vld [vmem:[%s20225_s13 + $0x1cc] sm:$0xf] }
  0x89   : > { %17617 = vmatprep.mubr.bf16.mxu0 %v6803_v49  ;;  %v20866_v49 = vld [vmem:[%s20225_s13 + $0xf8] sm:$0xf]  ;;  %v6826_v30 = vrot.slane %v6824_v11, 1  ;;  %24372 = vst [vmem:[#allocation84_spill] sm:$0xff] %v20953_v42 }
  0x8a   : > { %24360 = vst [vmem:[#allocation72_spill] sm:$0xff] %v20889_v23  ;;  %v20894_v24 = vcombine.low %v20863_v58, %v20866_v49  ;;  %v6834_v11 = vrot.slane %v6832_v52, 1  ;;  %v20912_v23 = vcombine.low %v20641_v35, %v20647_v54  ;;  %v20922_v52 = vld [vmem:[%s20225_s13 + $0x104] sm:$0xf] }
  0x8c   : > { %24361 = vst [vmem:[#allocation73_spill] sm:$0xff] %v20894_v24  ;;  %24366 = vst [vmem:[#allocation78_spill] sm:$0xff] %v20912_v23  ;;  %v6840_v20 = vshll.u32 %v20894_v24, 16  ;;  %v6844_v54 = vshrl.u32 %v20894_v24, 16 }
  0x8f   : > { %16914 = vmatmul.mubr.bf16.gmra.mrb[44].mxu1 %v20860_v39  ;;  %v20908_v39 = vcombine.low %v20877_v28, %v20880_v61 }
  0x90   : > { %17618 = vmatmul.mubr.bf16.gmra.mrb[44].mxu0 %v6811_v47  ;;  %16917 = vmatprep.mubr.bf16.mxu1 %v20870_v48  ;;  %v20904_v47 = vcombine.low %v20897_v41, %v20900_v21  ;;  %v6830_v48 = vor.u32 %v6828_v0, %v6826_v30  ;;  %v6836_v0 = vshrl.u32 %v20832_v60, 16  ;;  %v20945_v60 = vcombine.low %v20931_v6, %v20934_v33 }
  0x91   : > { %17621 = vmatprep.mubr.bf16.mxu0 %v6819_v22  ;;  %24365 = vst [vmem:[#allocation77_spill] sm:$0xff] %v20908_v39  ;;  %v6827_v22 = vsel %vm1824_vm0, %v6822_v7, %v6826_v30  ;;  %v6848_v35 = vshll.u32 %v20908_v39, 16  ;;  %v20938_v30 = vld [vmem:[%s20225_s13 + $0x10c] sm:$0xf]  ;;  %v20941_v7 = vld [vmem:[%s20225_s13 + $0x110] sm:$0xf]  ;;  %v20968_v33 = vcombine.low %v20656_v63, %v20737_v10 }
  0x92   : > { %24364 = vst [vmem:[#allocation76_spill] sm:$0xff] %v20904_v47  ;;  %v20925_v47 = vld [vmem:[%s20225_s13 + $0x108] sm:$0xf]  ;;  %v6835_v21 = vsel %vm1824_vm0, %v6830_v48, %v6834_v11  ;;  %24370 = vst [vmem:[#allocation82_spill] sm:$0xff] %v20945_v60  ;;  %v6842_v48 = vrot.slane %v6840_v20, 1  ;;  %v6838_v41 = vor.u32 %v6836_v0, %v6834_v11  ;;  %v20964_v60 = vcombine.low %v20938_v30, %v20941_v7 }
  0x93   : > { %v20950_v24 = vcombine.low %v20922_v52, %v20925_v47  ;;  %v6850_v20 = vrot.slane %v6848_v35, 1  ;;  %24376 = vst [vmem:[#allocation88_spill] sm:$0xff] %v20968_v33  ;;  %v20978_v35 = vld [vmem:[%s20225_s13 + $0x114] sm:$0xf] }
  0x94   : > { %24375 = vst [vmem:[#allocation87_spill] sm:$0xff] %v20964_v60  ;;  %v6843_v0 = vsel %vm1824_vm0, %v6838_v41, %v6842_v48  ;;  %v6864_v10 = vshll.u32 %v20964_v60, 16  ;;  %v20994_v41 = vld [vmem:[%s20225_s13 + $0x11c] sm:$0xf] }
  0x95   : > { %24371 = vst [vmem:[#allocation83_spill] sm:$0xff] %v20950_v24  ;;  %v6856_v11 = vshll.u32 %v20950_v24, 16  ;;  %v6860_v63 = vshrl.u32 %v20950_v24, 16 }
  0x97   : > { %16918 = vmatmul.mubr.bf16.gmra.mrb[48].mxu1 %v20912_v23  ;;  %v20956_v23 = vld [vmem:[%s20225_s13 + $0x1d0] sm:$0xf] }
  0x98   : > { %17622 = vmatmul.mubr.bf16.gmra.mrb[48].mxu0 %v6827_v22  ;;  %16921 = vmatprep.mubr.bf16.mxu1 %v20916_v38  ;;  %24373 = vst [vmem:[#allocation85_spill] sm:$0xff] %v20956_v23  ;;  %v20960_v22 = vcombine.low %v20953_v42, %v20956_v23  ;;  %v6846_v38 = vor.u32 %v6844_v54, %v6842_v48  ;;  %v6852_v54 = vshrl.u32 %v20908_v39, 16  ;;  %v20997_v48 = vld [vmem:[%s20225_s13 + $0x120] sm:$0xf]  ;;  %v21009_v42 = vld [vmem:[%s20225_s13 + $0x1dc] sm:$0xf] }
  0x99   : > { %17625 = vmatprep.mubr.bf16.mxu0 %v6835_v21  ;;  %v20972_v21 = vcombine.low %v20752_v8, %v20791_v14  ;;  %v20987_v14 = vld [vmem:[%s20225_s13 + $0x1d4] sm:$0xf]  ;;  %v20990_v8 = vld [vmem:[%s20225_s13 + $0x1d8] sm:$0xf]  ;;  %24382 = vst [vmem:[#allocation94_spill] sm:$0xff] %v21009_v42 }
  0x9a   : > { %24374 = vst [vmem:[#allocation86_spill] sm:$0xff] %v20960_v22  ;;  %v20981_v22 = vld [vmem:[%s20225_s13 + $0x118] sm:$0xf]  ;;  %v6851_v23 = vsel %vm1824_vm0, %v6846_v38, %v6850_v20  ;;  %24378 = vst [vmem:[#allocation90_spill] sm:$0xff] %v20987_v14  ;;  %v21001_v39 = vcombine.low %v20987_v14, %v20990_v8  ;;  %v6858_v38 = vrot.slane %v6856_v11, 1  ;;  %v6854_v6 = vor.u32 %v6852_v54, %v6850_v20 }
  0x9b   : > { %24377 = vst [vmem:[#allocation89_spill] sm:$0xff] %v20972_v21  ;;  %24379 = vst [vmem:[#allocation91_spill] sm:$0xff] %v20990_v8  ;;  %v21006_v24 = vcombine.low %v20978_v35, %v20981_v22  ;;  %v6866_v11 = vrot.slane %v6864_v10, 1  ;;  %v21024_v8 = vcombine.low %v20794_v51, %v20797_v46  ;;  %v21034_v10 = vld [vmem:[%s20225_s13 + $0x124] sm:$0xf] }
  0x9c   : > { %24380 = vst [vmem:[#allocation92_spill] sm:$0xff] %v21001_v39  ;;  %v21020_v39 = vcombine.low %v20994_v41, %v20997_v48  ;;  %v6859_v54 = vsel %vm1824_vm0, %v6854_v6, %v6858_v38  ;;  %v21050_v6 = vld [vmem:[%s20225_s13 + $0x12c] sm:$0xf]  ;;  %v21071_v14 = vld [vmem:[%s20225_s13 + $0x1f0] sm:$0xf] }
  0x9d   : > { %24381 = vst [vmem:[#allocation93_spill] sm:$0xff] %v21006_v24  ;;  %24386 = vst [vmem:[#allocation98_spill] sm:$0xff] %v21024_v8  ;;  %v6872_v20 = vshll.u32 %v21006_v24, 16  ;;  %v6876_v51 = vshrl.u32 %v21006_v24, 16 }
  0x9e   : > { %24385 = vst [vmem:[#allocation97_spill] sm:$0xff] %v21020_v39  ;;  %v6880_v46 = vshll.u32 %v21020_v39, 16  ;;  %24393 = vst [vmem:[#allocation105_spill] sm:$0xff] %v21071_v14 }
  0x9f   : > { %16922 = vmatmul.mubr.bf16.gmra.mrb[52].mxu1 %v20968_v33  ;;  %v21012_v33 = vld [vmem:[%s20225_s13 + $0x1e0] sm:$0xf]  ;;  %v6874_v24 = vrot.slane %v6872_v20, 1 }
  0xa0   : > { %17626 = vmatmul.mubr.bf16.gmra.mrb[52].mxu0 %v6843_v0  ;;  %16925 = vmatprep.mubr.bf16.mxu1 %v20972_v21  ;;  %24383 = vst [vmem:[#allocation95_spill] sm:$0xff] %v21012_v33  ;;  %v21016_v0 = vcombine.low %v21009_v42, %v21012_v33  ;;  %v6862_v21 = vor.u32 %v6860_v63, %v6858_v38  ;;  %v6868_v63 = vshrl.u32 %v20964_v60, 16  ;;  %v21053_v38 = vld [vmem:[%s20225_s13 + $0x130] sm:$0xf] }
  0xa1   : > { %17629 = vmatprep.mubr.bf16.mxu0 %v6851_v23  ;;  %v21028_v23 = vcombine.low %v20800_v34, %v20863_v58  ;;  %v21043_v34 = vld [vmem:[%s20225_s13 + $0x1e4] sm:$0xf]  ;;  %v21046_v58 = vld [vmem:[%s20225_s13 + $0x1e8] sm:$0xf]  ;;  %v6878_v20 = vor.u32 %v6876_v51, %v6874_v24 }
  0xa2   : > { %24384 = vst [vmem:[#allocation96_spill] sm:$0xff] %v21016_v0  ;;  %v21037_v0 = vld [vmem:[%s20225_s13 + $0x128] sm:$0xf]  ;;  %v6867_v33 = vsel %vm1824_vm0, %v6862_v21, %v6866_v11  ;;  %24388 = vst [vmem:[#allocation100_spill] sm:$0xff] %v21043_v34  ;;  %v21057_v60 = vcombine.low %v21043_v34, %v21046_v58  ;;  %v19912_v21 = vld [vmem:[%s23846_s1 + $0x70] sm:$0xff]  }
  0xa3   : > { %24387 = vst [vmem:[#allocation99_spill] sm:$0xff] %v21028_v23  ;;  %24389 = vst [vmem:[#allocation101_spill] sm:$0xff] %v21046_v58  ;;  %v21065_v42 = vcombine.low %v21034_v10, %v21037_v0  ;;  %17041 = vmatprep.subr.bf16.mxu1 %v19912_v21  ;;  %v21079_v58 = vcombine.low %v21050_v6, %v21053_v38 }
  0xa4   : > { %24390 = vst [vmem:[#allocation102_spill] sm:$0xff] %v21057_v60  ;;  %v6870_v60 = vor.u32 %v6868_v63, %v6866_v11  ;;  %17042 = vmatpush3.bf16.msra.mxu1 %v19912_v21  ;;  %v21087_v11 = vcombine.low %v20880_v61, %v20922_v52  ;;  %v21102_v61 = vld [vmem:[%s20225_s13 + $0x1f4] sm:$0xf]  ;;  %v21105_v52 = vld [vmem:[%s20225_s13 + $0x1f8] sm:$0xf] }
  0xa5   : > { %24391 = vst [vmem:[#allocation103_spill] sm:$0xff] %v21065_v42  ;;  %24395 = vst [vmem:[#allocation107_spill] sm:$0xff] %v21079_v58  ;;  %v6888_v63 = vshll.u32 %v21065_v42, 16 }
  0xa6   : > { %24397 = vst [vmem:[#allocation109_spill] sm:$0xff] %v21087_v11  ;;  %v6875_v51 = vsel %vm1824_vm0, %v6870_v60, %v6874_v24  ;;  %24398 = vst [vmem:[#allocation110_spill] sm:$0xff] %v21102_v61  ;;  %v21109_v60 = vld [vmem:[%s20225_s13 + $0x13c] sm:$0xf]  ;;  %v21112_v24 = vld [vmem:[%s20225_s13 + $0x140] sm:$0xf] }
  0xa7   : > { %16926 = vmatmul.mubr.bf16.gmra.mrb[56].mxu1 %v21024_v8  ;;  %v21068_v8 = vld [vmem:[%s20225_s13 + $0x1ec] sm:$0xf]  ;;  %24399 = vst [vmem:[#allocation111_spill] sm:$0xff] %v21105_v52 }
  0xa8   : > { %17630 = vmatmul.mubr.bf16.gmra.mrb[56].mxu0 %v6859_v54  ;;  %16929 = vmatprep.mubr.bf16.mxu1 %v21028_v23  ;;  %24392 = vst [vmem:[#allocation104_spill] sm:$0xff] %v21068_v8  ;;  %v21075_v54 = vcombine.low %v21068_v8, %v21071_v14  ;;  %v6882_v23 = vrot.slane %v6880_v46, 1  ;;  %v6884_v46 = vshrl.u32 %v21020_v39, 16  ;;  %v21096_v14 = vld [vmem:[%s20225_s13 + $0x138] sm:$0xf]  ;;  %v21116_v39 = vcombine.low %v21102_v61, %v21105_v52 }
  0xa9   : > { %17633 = vmatprep.mubr.bf16.mxu0 %v6867_v33  ;;  %v21083_v33 = vcombine.low %v20866_v49, %v20877_v28  ;;  %v6892_v28 = vshrl.u32 %v21065_v42, 16  ;;  %v6896_v49 = vshll.u32 %v21079_v58, 16  ;;  %v21124_v8 = vld [vmem:[%s20225_s13 + $0x1fc] sm:$0xf]  ;;  %v21139_v52 = vcombine.low %v20925_v47, %v20938_v30 }
  0xaa   : > { %24394 = vst [vmem:[#allocation106_spill] sm:$0xff] %v21075_v54  ;;  %v21093_v54 = vld [vmem:[%s20225_s13 + $0x134] sm:$0xf]  ;;  %v6883_v21 = vsel %vm1824_vm0, %v6878_v20, %v6882_v23  ;;  %24400 = vst [vmem:[#allocation112_spill] sm:$0xff] %v21116_v39  ;;  %v6890_v20 = vrot.slane %v6888_v63, 1  ;;  %v6886_v34 = vor.u32 %v6884_v46, %v6882_v23  ;;  %v21135_v39 = vcombine.low %v21109_v60, %v21112_v24 }
  0xab   : > { %24396 = vst [vmem:[#allocation108_spill] sm:$0xff] %v21083_v33  ;;  %v21121_v42 = vcombine.low %v21093_v54, %v21096_v14  ;;  %24402 = vst [vmem:[#allocation114_spill] sm:$0xff] %v21124_v8  ;;  %v6898_v63 = vrot.slane %v6896_v49, 1  ;;  %v21143_v23 = vcombine.low %v20941_v7, %v20978_v35  ;;  %v21149_v49 = vld [vmem:[%s20225_s13 + $0x144] sm:$0xf] }
  0xac   : > { %24405 = vst [vmem:[#allocation117_spill] sm:$0xff] %v21135_v39  ;;  %24406 = vst [vmem:[#allocation118_spill] sm:$0xff] %v21139_v52  ;;  %v6912_v30 = vshll.u32 %v21135_v39, 16  ;;  %v21158_v7 = vld [vmem:[%s20225_s13 + $0x204] sm:$0xf] }
  0xad   : > { %24401 = vst [vmem:[#allocation113_spill] sm:$0xff] %v21121_v42  ;;  %24407 = vst [vmem:[#allocation119_spill] sm:$0xff] %v21143_v23  ;;  %v6904_v46 = vshll.u32 %v21121_v42, 16  ;;  %v6908_v47 = vshrl.u32 %v21121_v42, 16  ;;  %v21161_v35 = vld [vmem:[%s20225_s13 + $0x208] sm:$0xf] }
  0xae   : > { %24408 = vst [vmem:[#allocation120_spill] sm:$0xff] %v21161_v35 }
  0xaf   : > { %16930 = vmatmul.mubr.bf16.gmra.mrb[60].mxu1 %v21083_v33  ;;  %v21127_v33 = vld [vmem:[%s20225_s13 + $0x200] sm:$0xf] }
  0xb0   : > { %17634 = vmatmul.mubr.bf16.gmra.mrb[60].mxu0 %v6875_v51  ;;  %16933 = vmatprep.mubr.bf16.mxu1 %v21087_v11  ;;  %24403 = vst [vmem:[#allocation115_spill] sm:$0xff] %v21127_v33  ;;  %v21131_v51 = vcombine.low %v21124_v8, %v21127_v33  ;;  %v6894_v11 = vor.u32 %v6892_v28, %v6890_v20  ;;  %v6900_v28 = vshrl.u32 %v21079_v58, 16  ;;  %v21180_v8 = vld [vmem:[%s20225_s13 + $0x20c] sm:$0xf] }
  0xb1   : > { %17637 = vmatprep.mubr.bf16.mxu0 %v6883_v21  ;;  %v6891_v21 = vsel %vm1824_vm0, %v6886_v34, %v6890_v20  ;;  %v21165_v34 = vld [vmem:[%s20225_s13 + $0x14c] sm:$0xf]  ;;  %v21168_v20 = vld [vmem:[%s20225_s13 + $0x150] sm:$0xf]  ;;  %v21172_v58 = vcombine.low %v21158_v7, %v21161_v35  ;;  %24411 = vst [vmem:[#allocation123_spill] sm:$0xff] %v21180_v8  ;;  %v21195_v35 = vcombine.low %v20981_v22, %v20994_v41 }
  0xb2   : > { %24404 = vst [vmem:[#allocation116_spill] sm:$0xff] %v21131_v51  ;;  %v21152_v51 = vld [vmem:[%s20225_s13 + $0x148] sm:$0xf]  ;;  %v6899_v33 = vsel %vm1824_vm0, %v6894_v11, %v6898_v63  ;;  %v6906_v11 = vrot.slane %v6904_v46, 1  ;;  %v6902_v61 = vor.u32 %v6900_v28, %v6898_v63  ;;  %v21191_v46 = vcombine.low %v21165_v34, %v21168_v20 }
  0xb3   : > { %24409 = vst [vmem:[#allocation121_spill] sm:$0xff] %v21172_v58  ;;  %v21177_v42 = vcombine.low %v21149_v49, %v21152_v51  ;;  %v6914_v58 = vrot.slane %v6912_v30, 1  ;;  %24415 = vst [vmem:[#allocation127_spill] sm:$0xff] %v21195_v35  ;;  %v341_v30 = vld [vmem:[%s20225_s13 + $0x154] sm:$0xf] }
  0xb4   : > { %24414 = vst [vmem:[#allocation126_spill] sm:$0xff] %v21191_v46  ;;  %v6907_v28 = vsel %vm1824_vm0, %v6902_v61, %v6906_v11  ;;  %v6928_v41 = vshll.u32 %v21191_v46, 16 }
  0xb5   : > { %24410 = vst [vmem:[#allocation122_spill] sm:$0xff] %v21177_v42  ;;  %v6920_v63 = vshll.u32 %v21177_v42, 16  ;;  %v6924_v22 = vshrl.u32 %v21177_v42, 16 }
  0xb7   : > { %16934 = vmatmul.mubr.bf16.gmra.mrb[64].mxu1 %v21139_v52  ;;  %v21183_v52 = vld [vmem:[%s20225_s13 + $0x210] sm:$0xf]  ;;  %v6922_v61 = vrot.slane %v6920_v63, 1  ;;  %v21238_v63 = vcombine.low %v21037_v0, %v21050_v6 }
  0xb8   : > { %17638 = vmatmul.mubr.bf16.gmra.mrb[64].mxu0 %v6891_v21  ;;  %16937 = vmatprep.mubr.bf16.mxu1 %v21143_v23  ;;  %24412 = vst [vmem:[#allocation124_spill] sm:$0xff] %v21183_v52  ;;  %v21187_v21 = vcombine.low %v21180_v8, %v21183_v52  ;;  %v6910_v23 = vor.u32 %v6908_v47, %v6906_v11  ;;  %v6916_v47 = vshrl.u32 %v21135_v39, 16  ;;  %v21212_v8 = vld [vmem:[%s20225_s13 + $0x214] sm:$0xf]  ;;  %v21227_v11 = vld [vmem:[%s20225_s13 + $0x220] sm:$0xf] }
  0xb9   : > { %17641 = vmatprep.mubr.bf16.mxu0 %v6899_v33  ;;  %v21199_v33 = vcombine.low %v20997_v48, %v21034_v10  ;;  %v21215_v48 = vld [vmem:[%s20225_s13 + $0x218] sm:$0xf]  ;;  %24418 = vst [vmem:[#allocation130_spill] sm:$0xff] %v21227_v11  ;;  %24421 = vst [vmem:[#allocation133_spill] sm:$0xff] %v21238_v63  ;;  %v21264_v6 = vld [vmem:[%s20225_s13 + $0x230] sm:$0xf] }
  0xba   : > { %24413 = vst [vmem:[#allocation125_spill] sm:$0xff] %v21187_v21  ;;  %v21206_v21 = vld [vmem:[%s20225_s13 + $0x158] sm:$0xf]  ;;  %v6915_v52 = vsel %vm1824_vm0, %v6910_v23, %v6914_v58  ;;  %v21220_v10 = vcombine.low %v21212_v8, %v21215_v48  ;;  %v21224_v23 = vld [vmem:[%s20225_s13 + $0x21c] sm:$0xf]  ;;  %v6918_v42 = vor.u32 %v6916_v47, %v6914_v58 }
  0xbb   : > { %24416 = vst [vmem:[#allocation128_spill] sm:$0xff] %v21199_v33  ;;  %v21230_v39 = vcombine.low %v341_v30, %v21206_v21 }
  0xbc   : > { %24417 = vst [vmem:[#allocation129_spill] sm:$0xff] %v21220_v10  ;;  %v21242_v10 = vcombine.low %v21053_v38, %v21093_v54  ;;  %v6923_v58 = vsel %vm1824_vm0, %v6918_v42, %v6922_v61  ;;  %v21261_v42 = vld [vmem:[%s20225_s13 + $0x22c] sm:$0xf] }
  0xbd   : > { %24419 = vst [vmem:[#allocation131_spill] sm:$0xff] %v21230_v39  ;;  %v6936_v47 = vshll.u32 %v21230_v39, 16 }
  0xbe   : > { %24422 = vst [vmem:[#allocation134_spill] sm:$0xff] %v21242_v10 }
  0xbf   : > { %16938 = vmatmul.mubr.bf16.gmra.mrb[68].mxu1 %v21195_v35  ;;  %v21234_v35 = vcombine.low %v21224_v23, %v21227_v11  ;;  %v21266_v54 = vrot.slane %v6936_v47, 1  ;;  %v21286_v47 = vld [vmem:[%s20225_s13 + $0x234] sm:$0xf] }
  0xc0   : > { %17642 = vmatmul.mubr.bf16.gmra.mrb[68].mxu0 %v6907_v28  ;;  %16941 = vmatprep.mubr.bf16.mxu1 %v21199_v33  ;;  %v6926_v28 = vor.u32 %v6924_v22, %v6922_v61  ;;  %v6930_v33 = vrot.slane %v6928_v41, 1  ;;  %v21252_v22 = vld [vmem:[%s20225_s13 + $0x228] sm:$0xf]  ;;  %v21270_v41 = vcombine.low %v21261_v42, %v21264_v6  ;;  %v8558_v61 = vrot.slane %v20242_v17, 1 }
  0xc1   : > { %17645 = vmatprep.mubr.bf16.mxu0 %v6915_v52  ;;  %24420 = vst [vmem:[#allocation132_spill] sm:$0xff] %v21234_v35  ;;  %v6932_v52 = vshrl.u32 %v21191_v46, 16  ;;  %v21249_v35 = vld [vmem:[%s20225_s13 + $0x224] sm:$0xf]  ;;  %24424 = vst [vmem:[#allocation136_spill] sm:$0xff] %v21266_v54  ;;  %v19891_v17 = vld [vmem:[%s23846_s1 + $0x188] sm:$0xff]  }
  0xc2   : > { %v6931_v11 = vsel %vm1824_vm0, %v6926_v28, %v6930_v33  ;;  %v21257_v0 = vcombine.low %v21249_v35, %v21252_v22  ;;  %24425 = vst [vmem:[#allocation137_spill] sm:$0xff] %v21270_v41  ;;  %v8559_v28 = vrot.slane %v20246_v18, 1  ;;  %v21317_v18 = vcombine.low %v21168_v20, %v341_v30  ;;  %v21340_v20 = vld [vmem:[%s20225_s13 + $0x250] sm:$0xf]  ;;  %v19999_v30 = vld [vmem:[%s23846_s1 + $0x180] sm:$0xff]  }
  0xc3   : > { %v6934_v38 = vor.u32 %v6932_v52, %v6930_v33  ;;  %v21280_v33 = vcombine.low %v21112_v24, %v21149_v49  ;;  %v21301_v24 = vld [vmem:[%s20225_s13 + $0x23c] sm:$0xf]  ;;  %v21304_v49 = vld [vmem:[%s20225_s13 + $0x240] sm:$0xf] }
  0xc4   : > { %24423 = vst [vmem:[#allocation135_spill] sm:$0xff] %v21257_v0  ;;  %v8560_v52 = vsel %vm3767_vm1, %v8558_v61, %v8559_v28  ;;  %v21309_v61 = vcombine.low %v21301_v24, %v21304_v49  ;;  %24431 = vst [vmem:[#allocation143_spill] sm:$0xff] %v21317_v18 }
  0xc5   : > { %24427 = vst [vmem:[#allocation139_spill] sm:$0xff] %v21280_v33 }
  0xc6   : > { %24429 = vst [vmem:[#allocation141_spill] sm:$0xff] %v21309_v61 }
  0xc7   : > { %16942 = vmatmul.mubr.bf16.gmra.mrb[72].mxu1 %v21238_v63 }
  0xc8   : > { %17646 = vmatmul.mubr.bf16.gmra.mrb[72].mxu0 %v6923_v58  ;;  %16945 = vmatprep.mubr.bf16.mxu1 %v21242_v10  ;;  %v21276_v58 = vcombine.low %v21096_v14, %v21109_v60  ;;  %v21289_v10 = vld [vmem:[%s20225_s13 + $0x238] sm:$0xf] }
  0xc9   : > { %17649 = vmatprep.mubr.bf16.mxu0 %v6931_v11  ;;  %v6939_v11 = vsel %vm1824_vm0, %v6934_v38, %v21266_v54  ;;  %v21294_v14 = vcombine.low %v21286_v47, %v21289_v10  ;;  %v19934_v60 = vld [vmem:[%s23846_s1 + $0x78] sm:$0xff]   ;;  %v8561_v38 = vrot.slane %v20265_v27, 1  ;;  %v8563_v54 = vrot.slane %v20286_v37, 1 }
  0xca   : > { %24426 = vst [vmem:[#allocation138_spill] sm:$0xff] %v21276_v58  ;;  %17043 = vmatprep.subr.bf16.mxu1 %v19934_v60  ;;  %v21356_v37 = vcombine.low %v21206_v21, %v20644_v59  ;;  %v8569_v59 = vrot.slane %v20344_v4, 1  ;;  %v21402_v4 = vld [vmem:[%s20225_s13 + $0x264] sm:$0xf] }
  0xcb   : > { %24428 = vst [vmem:[#allocation140_spill] sm:$0xff] %v21294_v14  ;;  %17044 = vmatpush3.bf16.msra.mxu1 %v19934_v60  ;;  %v8564_v27 = vsel %vm3767_vm1, %v8561_v38, %v8563_v54 }
  0xcf   : > { %16946 = vmatmul.mubr.bf16.gmra.mrb[76].mxu1 %v21276_v58  ;;  %v21328_v58 = vld [vmem:[%s20225_s13 + $0x248] sm:$0xf] }
  0xd0   : > { %17650 = vmatmul.mubr.bf16.gmra.mrb[76].mxu0 %v6939_v11  ;;  %16949 = vmatprep.mubr.bf16.mxu1 %v21280_v33  ;;  %v21314_v11 = vcombine.low %v21152_v51, %v21165_v34  ;;  %v21325_v33 = vld [vmem:[%s20225_s13 + $0x244] sm:$0xf]  ;;  %v21337_v34 = vld [vmem:[%s20225_s13 + $0x24c] sm:$0xf] }
  0xd1   : > { %17749 = vmatprep.mubr.bf16.mxu0 %v8560_v52  ;;  %v8562_v52 = vsel %vm3767_vm1, %v8559_v28, %v8561_v38  ;;  %v21333_v51 = vcombine.low %v21325_v33, %v21328_v58  ;;  %v8565_v28 = vrot.slane %v20302_v44, 1  ;;  %v21348_v60 = vcombine.low %v21337_v34, %v21340_v20  ;;  %v19935_v44 = vld [vmem:[%s23846_s1 + $0x198] sm:$0xff]  }
  0xd2   : > { %24430 = vst [vmem:[#allocation142_spill] sm:$0xff] %v21314_v11  ;;  %v8567_v38 = vrot.slane %v20313_v50, 1 }
  0xd3   : > { %24432 = vst [vmem:[#allocation144_spill] sm:$0xff] %v21333_v51  ;;  %24433 = vst [vmem:[#allocation145_spill] sm:$0xff] %v21348_v60 }
  0xd4   : > { %v8568_v50 = vsel %vm3767_vm1, %v8565_v28, %v8567_v38 }
  0xd7   : > { %16950 = vmatmul.mubr.bf16.gmra.mrb[80].mxu1 %v21314_v11  ;;  %v21371_v11 = vld [vmem:[%s20225_s13 + $0x258] sm:$0xf] }
  0xd8   : > { %17750 = vmatmul.mubr.bf16.vlgmr.msra.gmra.mrb[0].mxu0 %v8562_v52  ;;  %16953 = vmatprep.mubr.bf16.mxu1 %v21317_v18  ;;  %v19913_v52 = vld [vmem:[%s23846_s1 + $0x190] sm:$0xff]  }
  0xd9   : > { %17910 = vmatpush3.bf16.msra.mxu0 %v19999_v30  ;;  %17753 = vmatprep.mubr.bf16.mxu0 %v8564_v27  ;;  %v21360_v27 = vcombine.low %v20659_v32, %v20662_v31  ;;  %v8566_v30 = vsel %vm3767_vm1, %v8563_v54, %v8565_v28  ;;  %v21368_v18 = vld [vmem:[%s20225_s13 + $0x254] sm:$0xf]  ;;  %v21383_v32 = vld [vmem:[%s20225_s13 + $0x260] sm:$0xf]  ;;  %v8571_v54 = vrot.slane %v20352_v9, 1  ;;  %v21393_v28 = vcombine.low %v20665_v3, %v20668_v45 }
  0xda   : > { %17911 = vmatprep.subr.bf16.mxu0 %v19891_v17  ;;  %v21376_v31 = vcombine.low %v21368_v18, %v21371_v11  ;;  %v8573_v3 = vrot.slane %v20390_v29, 1  ;;  %v21439_v29 = vld [vmem:[%s20225_s13 + $0x278] sm:$0xf] }
  0xdb   : > { %24434 = vst [vmem:[#allocation146_spill] sm:$0xff] %v21360_v27 }
  0xdc   : > { %24435 = vst [vmem:[#allocation147_spill] sm:$0xff] %v21376_v31  ;;  %v8574_v9 = vsel %vm3767_vm1, %v8571_v54, %v8573_v3 }
  0xdd   : > { %17912 = vmatpush3.bf16.msra.mxu0 %v19891_v17  ;;  %v21380_v17 = vld [vmem:[%s20225_s13 + $0x25c] sm:$0xf] }
  0xde   : > { %17913 = vmatprep.subr.bf16.mxu0 %v19913_v52  ;;  %v21388_v21 = vcombine.low %v21380_v17, %v21383_v32 }
  0xdf   : > { %16954 = vmatmul.mubr.bf16.gmra.mrb[84].mxu1 %v21356_v37 }
  0xe0   : > { %17754 = vmatmul.mubr.bf16.gmra.mrb[4].mxu0 %v8566_v30  ;;  %16957 = vmatprep.mubr.bf16.mxu1 %v21360_v27  ;;  %24436 = vst [vmem:[#allocation148_spill] sm:$0xff] %v21388_v21  ;;  %v21397_v30 = vcombine.low %v20671_v16, %v20682_v43  ;;  %v21405_v27 = vld [vmem:[%s20225_s13 + $0x268] sm:$0xf]  ;;  %v21414_v43 = vld [vmem:[%s20225_s13 + $0x26c] sm:$0xf] }
  0xe1   : > { %17757 = vmatprep.mubr.bf16.mxu0 %v8568_v50  ;;  %17914 = vmatpush3.bf16.msra.mxu0 %v19913_v52  ;;  %v8570_v50 = vsel %vm3767_vm1, %v8567_v38, %v8569_v59  ;;  %v8572_v52 = vsel %vm3767_vm1, %v8569_v59, %v8571_v54  ;;  %v21410_v45 = vcombine.low %v21402_v4, %v21405_v27  ;;  %v8575_v38 = vrot.slane %v20394_v36, 1 }
  0xe2   : > { %17915 = vmatprep.subr.bf16.mxu0 %v19935_v44  ;;  %24437 = vst [vmem:[#allocation149_spill] sm:$0xff] %v21397_v30  ;;  %v21427_v59 = vcombine.low %v20685_v12, %v20696_v56  ;;  %v8577_v56 = vrot.slane %v20435_v55, 1  ;;  %v8579_v12 = vrot.slane %v20439_v62, 1 }
  0xe3   : > { %24438 = vst [vmem:[#allocation150_spill] sm:$0xff] %v21410_v45 }
  0xe4   : > { %v8578_v54 = vsel %vm3767_vm1, %v8575_v38, %v8577_v56 }
  0xe5   : > { %17916 = vmatpush3.bf16.msra.mxu0 %v19935_v44  ;;  %v21417_v44 = vld [vmem:[%s20225_s13 + $0x270] sm:$0xf] }
  0xe6   : > { %v21422_v16 = vcombine.low %v21414_v43, %v21417_v44 }
  0xe7   : > { %16958 = vmatmul.mubr.bf16.gmra.mrb[88].mxu1 %v21393_v28 }
  0xe8   : > { %17758 = vmatmul.mubr.bf16.gmra.mrb[8].mxu0 %v8570_v50  ;;  %16961 = vmatprep.mubr.bf16.mxu1 %v21397_v30  ;;  %24439 = vst [vmem:[#allocation151_spill] sm:$0xff] %v21422_v16  ;;  %v21431_v50 = vcombine.low %v20708_v1, %v20724_v57  ;;  %v21436_v30 = vld [vmem:[%s20225_s13 + $0x274] sm:$0xf]  ;;  %v21451_v57 = vcombine.low %v20732_v19, %v20740_v15  ;;  %v19954_v15 = vld [vmem:[%s23846_s1 + $0x1a0] sm:$0xff]   ;;  %v24442_v19 = vld [vmem:[#allocation25_spill] sm:$0xff] }
  0xe9   : > { %17761 = vmatprep.mubr.bf16.mxu0 %v8572_v52  ;;  %v8576_v52 = vsel %vm3767_vm1, %v8573_v3, %v8575_v38  ;;  %v21444_v36 = vcombine.low %v21436_v30, %v21439_v29  ;;  %v21455_v1 = vcombine.low %v20747_v2, %v20769_v5  ;;  %v8580_v3 = vsel %vm3767_vm1, %v8577_v56, %v8579_v12  ;;  %v24443_v5 = vld [vmem:[#allocation26_spill] sm:$0xff] }
  0xea   : > { %v8581_v2 = vrot.slane %v24442_v19, 1  ;;  %v8583_v38 = vrot.slane %v24443_v5, 1  ;;  %17917 = vmatprep.subr.bf16.mxu0 %v19954_v15  ;;  %v24447_v5 = vld [vmem:[#allocation29_spill] sm:$0xff] }
  0xeb   : > { %24440 = vst [vmem:[#allocation152_spill] sm:$0xff] %v21444_v36  ;;  %24441 = vst [vmem:[#allocation153_spill] sm:$0xff] %v21455_v1  ;;  %17918 = vmatpush3.bf16.msra.mxu0 %v19954_v15  ;;  %v8585_v19 = vrot.slane %v24447_v5, 1  ;;  %v21488_v15 = vcombine.low %v20835_v40, %v20846_v53  ;;  %v24454_v40 = vld [vmem:[#allocation74_spill] sm:$0xff]  ;;  %v24455_v53 = vld [vmem:[#allocation71_spill] sm:$0xff] }
  0xec   : > { %v8582_v55 = vsel %vm3767_vm1, %v8579_v12, %v8581_v2  ;;  %v21502_v5 = vcombine.low %v24455_v53, %v24454_v40  ;;  %v24462_v40 = vld [vmem:[#allocation84_spill] sm:$0xff]  ;;  %v24463_v53 = vld [vmem:[#allocation81_spill] sm:$0xff] }
  0xed   : > { %v8586_v12 = vsel %vm3767_vm1, %v8583_v38, %v8585_v19 }
  0xee   : > { %24456 = vst [vmem:[#allocation74_spill] sm:$0xff] %v21502_v5 }
  0xef   : > { %16962 = vmatmul.mubr.bf16.gmra.mrb[92].mxu1 %v21427_v59 }
  0xf0   : > { %17762 = vmatmul.mubr.bf16.gmra.mrb[12].mxu0 %v8574_v9  ;;  %16965 = vmatprep.mubr.bf16.mxu1 %v21431_v50  ;;  %v21463_v9 = vld [vmem:[%s23846_s1 + $0x80] sm:$0xff]  }
  0xf1   : > { %17765 = vmatprep.mubr.bf16.mxu0 %v8576_v52  ;;  %17205 = vmatprep.subr.bf16.mxu1 %v21463_v9  ;;  %v24444_v52 = vld [vmem:[#allocation58_spill] sm:$0xff] }
  0xf2   : > { %v21474_v56 = vcombine.low %v24444_v52, %v20803_v26 }
  0xf7   : > { %16966 = vmatmul.mubr.bf16.gmra.mrb[96].mxu1 %v21451_v57 }
  0xf8   : > { %17766 = vmatmul.mubr.bf16.gmra.mrb[16].mxu0 %v8578_v54  ;;  %16969 = vmatprep.mubr.bf16.mxu1 %v21455_v1  ;;  %v24445_v54 = vld [vmem:[#allocation60_spill] sm:$0xff]  ;;  %v24448_v1 = vld [vmem:[#allocation30_spill] sm:$0xff] }
  0xf9   : > { %17769 = vmatprep.mubr.bf16.mxu0 %v8580_v3  ;;  %v21478_v62 = vcombine.low %v24445_v54, %v20823_v13  ;;  %v8584_v3 = vsel %vm3767_vm1, %v8581_v2, %v8583_v38  ;;  %v8587_v26 = vrot.slane %v24448_v1, 1  ;;  %24449 = vst [vmem:[#allocation60_spill] sm:$0xff] %v21488_v15  ;;  %v24450_v13 = vld [vmem:[#allocation67_spill] sm:$0xff] }
  0xfa   : > { %v21492_v52 = vcombine.low %v24450_v13, %v20873_v25  ;;  %v24457_v25 = vld [vmem:[#allocation80_spill] sm:$0xff]  ;;  %v24458_v13 = vld [vmem:[#allocation75_spill] sm:$0xff] }
  0xfb   : > { %24446 = vst [vmem:[#allocation58_spill] sm:$0xff] %v21478_v62  ;;  %v8588_v2 = vsel %vm3767_vm1, %v8585_v19, %v8587_v26 }
  0xfc   : > { %24451 = vst [vmem:[#allocation67_spill] sm:$0xff] %v21492_v52 }
  0xff   : > { %16970 = vmatmul.mubr.bf16.gmra.mrb[100].mxu1 %v21474_v56 }
 0x100   : > { %17770 = vmatmul.mubr.bf16.gmra.mrb[20].mxu0 %v8582_v55  ;;  %16973 = vmatprep.mubr.bf16.mxu1 %v21478_v62  ;;  %v24452_v55 = vld [vmem:[#allocation33_spill] sm:$0xff]  ;;  %v21506_v62 = vcombine.low %v24458_v13, %v24457_v25  ;;  %v24464_v25 = vld [vmem:[#allocation90_spill] sm:$0xff] }
 0x101   : > { %17773 = vmatprep.mubr.bf16.mxu0 %v8584_v3  ;;  %v8589_v54 = vrot.slane %v24452_v55, 1  ;;  %v24453_v3 = vld [vmem:[#allocation34_spill] sm:$0xff]  ;;  %v24465_v13 = vld [vmem:[#allocation85_spill] sm:$0xff] }
 0x102   : > { %v8591_v1 = vrot.slane %v24453_v3, 1  ;;  %24459 = vst [vmem:[#allocation71_spill] sm:$0xff] %v21506_v62  ;;  %v24461_v3 = vld [vmem:[#allocation38_spill] sm:$0xff] }
 0x103   : > { %v8590_v19 = vsel %vm3767_vm1, %v8587_v26, %v8589_v54  ;;  %v8595_v55 = vrot.slane %v24461_v3, 1  ;;  %v24468_v3 = vld [vmem:[#allocation42_spill] sm:$0xff] }
 0x104   : > { %v8592_v38 = vsel %vm3767_vm1, %v8589_v54, %v8591_v1 }
 0x107   : > { %16974 = vmatmul.mubr.bf16.gmra.mrb[104].mxu1 %v21488_v15  ;;  %v21520_v15 = vcombine.low %v24465_v13, %v24464_v25  ;;  %v24472_v25 = vld [vmem:[#allocation100_spill] sm:$0xff]  ;;  %v24473_v13 = vld [vmem:[#allocation95_spill] sm:$0xff] }
 0x108   : > { %17774 = vmatmul.mubr.bf16.gmra.mrb[24].mxu0 %v8586_v12  ;;  %16977 = vmatprep.mubr.bf16.mxu1 %v21492_v52  ;;  %v24460_v12 = vld [vmem:[#allocation37_spill] sm:$0xff]  ;;  %v21516_v52 = vcombine.low %v24463_v53, %v24462_v40  ;;  %v24469_v40 = vld [vmem:[#allocation94_spill] sm:$0xff]  ;;  %v24470_v53 = vld [vmem:[#allocation91_spill] sm:$0xff] }
 0x109   : > { %17777 = vmatprep.mubr.bf16.mxu0 %v8588_v2  ;;  %v8593_v2 = vrot.slane %v24460_v12, 1  ;;  %24466 = vst [vmem:[#allocation80_spill] sm:$0xff] %v21520_v15  ;;  %v8599_v12 = vrot.slane %v24468_v3, 1 }
 0x10b   : > { %v8594_v26 = vsel %vm3767_vm1, %v8591_v1, %v8593_v2  ;;  %v8596_v54 = vsel %vm3767_vm1, %v8593_v2, %v8595_v55 }
 0x10f   : > { %16978 = vmatmul.mubr.bf16.gmra.mrb[108].mxu1 %v21502_v5  ;;  %v21534_v5 = vcombine.low %v24473_v13, %v24472_v25  ;;  %v24477_v25 = vld [vmem:[#allocation104_spill] sm:$0xff]  ;;  %v24478_v13 = vld [vmem:[#allocation101_spill] sm:$0xff] }
 0x110   : > { %17778 = vmatmul.mubr.bf16.gmra.mrb[28].mxu0 %v8590_v19  ;;  %16981 = vmatprep.mubr.bf16.mxu1 %v21506_v62  ;;  %v24467_v19 = vld [vmem:[#allocation41_spill] sm:$0xff]  ;;  %v21530_v62 = vcombine.low %v24470_v53, %v24469_v40 }
 0x111   : > { %17781 = vmatprep.mubr.bf16.mxu0 %v8592_v38  ;;  %v8597_v38 = vrot.slane %v24467_v19, 1  ;;  %24474 = vst [vmem:[#allocation84_spill] sm:$0xff] %v21534_v5  ;;  %v24476_v53 = vld [vmem:[#allocation49_spill] sm:$0xff] }
 0x112   : > { %24471 = vst [vmem:[#allocation75_spill] sm:$0xff] %v21530_v62  ;;  %v8603_v3 = vrot.slane %v24476_v53, 1  ;;  %v24480_v19 = vld [vmem:[#allocation105_spill] sm:$0xff] }
 0x113   : > { %v8598_v1 = vsel %vm3767_vm1, %v8595_v55, %v8597_v38  ;;  %v8600_v2 = vsel %vm3767_vm1, %v8597_v38, %v8599_v12  ;;  %v21547_v55 = vcombine.low %v24478_v13, %v24477_v25  ;;  %v24479_v38 = vld [vmem:[#allocation110_spill] sm:$0xff] }
 0x114   : > { %v24484_v13 = vld [vmem:[#allocation114_spill] sm:$0xff] }
 0x117   : > { %16982 = vmatmul.mubr.bf16.gmra.mrb[112].mxu1 %v21516_v52 }
 0x118   : > { %17782 = vmatmul.mubr.bf16.gmra.mrb[32].mxu0 %v8594_v26  ;;  %16985 = vmatprep.mubr.bf16.mxu1 %v21520_v15  ;;  %v19956_v26 = vld [vmem:[%s23846_s1 + $0x1a8] sm:$0xff]  }
 0x119   : > { %17785 = vmatprep.mubr.bf16.mxu0 %v8596_v54  ;;  %v24475_v54 = vld [vmem:[#allocation47_spill] sm:$0xff]  ;;  %17919 = vmatprep.subr.bf16.mxu0 %v19956_v26 }
 0x11a   : > { %v8601_v40 = vrot.slane %v24475_v54, 1  ;;  %17920 = vmatpush3.bf16.msra.mxu0 %v19956_v26  ;;  %v24483_v54 = vld [vmem:[#allocation57_spill] sm:$0xff]  ;;  %v24485_v26 = vld [vmem:[#allocation111_spill] sm:$0xff] }
 0x11b   : > { %v8607_v25 = vrot.slane %v24483_v54, 1  ;;  %v21561_v15 = vcombine.low %v24485_v26, %v24484_v13  ;;  %v24490_v54 = vld [vmem:[#allocation65_spill] sm:$0xff]  ;;  %v24491_v13 = vld [vmem:[#allocation123_spill] sm:$0xff]  ;;  %v24492_v26 = vld [vmem:[#allocation120_spill] sm:$0xff] }
 0x11d   : > { %24486 = vst [vmem:[#allocation90_spill] sm:$0xff] %v21561_v15 }
 0x11f   : > { %16986 = vmatmul.mubr.bf16.gmra.mrb[116].mxu1 %v21530_v62  ;;  %v8604_v62 = vsel %vm3767_vm1, %v8601_v40, %v8603_v3 }
 0x120   : > { %17786 = vmatmul.mubr.bf16.gmra.mrb[36].mxu0 %v8598_v1  ;;  %16989 = vmatprep.mubr.bf16.mxu1 %v21534_v5  ;;  %v21551_v1 = vcombine.low %v24480_v19, %v24479_v38  ;;  %v8602_v5 = vsel %vm3767_vm1, %v8599_v12, %v8601_v40  ;;  %v24487_v19 = vld [vmem:[#allocation115_spill] sm:$0xff] }
 0x121   : > { %17789 = vmatprep.mubr.bf16.mxu0 %v8600_v2  ;;  %v24482_v2 = vld [vmem:[#allocation50_spill] sm:$0xff]  ;;  %v21565_v38 = vcombine.low %v24487_v19, %v21158_v7  ;;  %v24494_v7 = vld [vmem:[#allocation124_spill] sm:$0xff] }
 0x122   : > { %24481 = vst [vmem:[#allocation81_spill] sm:$0xff] %v21551_v1  ;;  %v8605_v53 = vrot.slane %v24482_v2, 1  ;;  %v8611_v2 = vrot.slane %v24490_v54, 1  ;;  %v21579_v19 = vcombine.low %v24494_v7, %v21212_v8  ;;  %v24497_v54 = vld [vmem:[#allocation77_spill] sm:$0xff]  ;;  %v24499_v8 = vld [vmem:[#allocation130_spill] sm:$0xff]  ;;  %v24501_v7 = vld [vmem:[#allocation83_spill] sm:$0xff] }
 0x123   : > { %24488 = vst [vmem:[#allocation85_spill] sm:$0xff] %v21565_v38 }
 0x124   : > { %v8606_v12 = vsel %vm3767_vm1, %v8603_v3, %v8605_v53  ;;  %v8608_v40 = vsel %vm3767_vm1, %v8605_v53, %v8607_v25  ;;  %24495 = vst [vmem:[#allocation91_spill] sm:$0xff] %v21579_v19 }
 0x127   : > { %16990 = vmatmul.mubr.bf16.gmra.mrb[120].mxu1 %v21547_v55 }
 0x128   : > { %17790 = vmatmul.mubr.bf16.gmra.mrb[40].mxu0 %v8602_v5  ;;  %16993 = vmatprep.mubr.bf16.mxu1 %v21551_v1  ;;  %v21575_v1 = vcombine.low %v24492_v26, %v24491_v13  ;;  %v21589_v13 = vcombine.low %v21215_v48, %v21224_v23  ;;  %v21593_v26 = vcombine.low %v24499_v8, %v21249_v35  ;;  %v24506_v8 = vld [vmem:[#allocation97_spill] sm:$0xff] }
 0x129   : > { %17793 = vmatprep.mubr.bf16.mxu0 %v8604_v62  ;;  %v24489_v62 = vld [vmem:[#allocation64_spill] sm:$0xff]  ;;  %v21603_v48 = vcombine.low %v21252_v22, %v21261_v42  ;;  %v21607_v35 = vcombine.low %v21264_v6, %v21286_v47  ;;  %v24505_v22 = vld [vmem:[#allocation93_spill] sm:$0xff]  ;;  %v21620_v6 = vcombine.low %v21289_v10, %v21301_v24  ;;  %v21624_v47 = vcombine.low %v21304_v49, %v21325_v33 }
 0x12a   : > { %v8609_v5 = vrot.slane %v24489_v62, 1  ;;  %24493 = vst [vmem:[#allocation94_spill] sm:$0xff] %v21575_v1  ;;  %v8615_v62 = vrot.slane %v24497_v54, 1  ;;  %24498 = vst [vmem:[#allocation100_spill] sm:$0xff] %v21589_v13  ;;  %v8621_v42 = vrot.slane %v24505_v22, 1  ;;  %v21634_v24 = vcombine.low %v21328_v58, %v21337_v34 }
 0x12b   : > { %24500 = vst [vmem:[#allocation95_spill] sm:$0xff] %v21593_v26  ;;  %24503 = vst [vmem:[#allocation104_spill] sm:$0xff] %v21603_v48  ;;  %v21638_v33 = vcombine.low %v21340_v20, %v21368_v18  ;;  %v21648_v34 = vcombine.low %v21371_v11, %v21380_v17  ;;  %v21652_v18 = vcombine.low %v21383_v32, %v21402_v4  ;;  %v20000_v11 = vld [vmem:[%s20225_s13] sm:$0xff]  }
 0x12c   : > { %v8610_v3 = vsel %vm3767_vm1, %v8607_v25, %v8609_v5  ;;  %v8612_v53 = vsel %vm3767_vm1, %v8609_v5, %v8611_v2  ;;  %24504 = vst [vmem:[#allocation101_spill] sm:$0xff] %v21607_v35  ;;  %24507 = vst [vmem:[#allocation110_spill] sm:$0xff] %v21620_v6  ;;  %v1828_v17 = vshll.u32 %v20000_v11, 16  ;;  %v21663_v4 = vcombine.low %v21405_v27, %v21414_v43 }
 0x12d   : > { %24508 = vst [vmem:[#allocation105_spill] sm:$0xff] %v21624_v47  ;;  %24511 = vst [vmem:[#allocation114_spill] sm:$0xff] %v21634_v24  ;;  %v21667_v32 = vcombine.low %v21417_v44, %v21436_v30  ;;  %v8637_v27 = vrot.slane %v21230_v39, 1  ;;  %v24520_v44 = vld [vmem:[#allocation44_spill] sm:$0xff]  ;;  %v24523_v39 = vld [vmem:[#allocation15_spill] sm:$0xff] }
 0x12e   : > { %24512 = vst [vmem:[#allocation111_spill] sm:$0xff] %v21638_v33  ;;  %24515 = vst [vmem:[#allocation115_spill] sm:$0xff] %v21648_v34 }
 0x12f   : > { %16994 = vmatmul.mubr.bf16.gmra.mrb[124].mxu1 %v21561_v15  ;;  %24516 = vst [vmem:[#allocation123_spill] sm:$0xff] %v21652_v18  ;;  %24518 = vst [vmem:[#allocation120_spill] sm:$0xff] %v21663_v4 }
 0x130   : > { %17794 = vmatmul.mubr.bf16.gmra.mrb[44].mxu0 %v8606_v12  ;;  %16997 = vmatprep.mubr.bf16.mxu1 %v21565_v38  ;;  %v24496_v12 = vld [vmem:[#allocation73_spill] sm:$0xff]  ;;  %24519 = vst [vmem:[#allocation124_spill] sm:$0xff] %v21667_v32  ;;  %v24588_v38 = vld [vmem:[#allocation79_spill] sm:$0xff] }
 0x131   : > { %17797 = vmatprep.mubr.bf16.mxu0 %v8608_v40  ;;  %v8613_v40 = vrot.slane %v24496_v12, 1  ;;  %v24530_v12 = vld [vmem:[#allocation20_spill] sm:$0xff] }
 0x133   : > { %v8614_v25 = vsel %vm3767_vm1, %v8611_v2, %v8613_v40  ;;  %v8616_v5 = vsel %vm3767_vm1, %v8613_v40, %v8615_v62  ;;  %v19958_v40 = vld [vmem:[%s23846_s1 + $0x1b0] sm:$0xff]  }
 0x134   : > { %17921 = vmatprep.subr.bf16.mxu0 %v19958_v40 }
 0x135   : > { %17922 = vmatpush3.bf16.msra.mxu0 %v19958_v40  ;;  %v24513_v40 = vld [vmem:[#allocation113_spill] sm:$0xff] }
 0x137   : > { %16998 = vmatmul.mubr.bf16.gmra.mrb[128].mxu1 %v21575_v1 }
 0x138   : > { %17798 = vmatmul.mubr.bf16.gmra.mrb[48].mxu0 %v8610_v3  ;;  %17001 = vmatprep.mubr.bf16.mxu1 %v21579_v19  ;;  %v8617_v3 = vrot.slane %v24501_v7, 1 }
 0x139   : > { %17801 = vmatprep.mubr.bf16.mxu0 %v8612_v53  ;;  %v24502_v53 = vld [vmem:[#allocation87_spill] sm:$0xff] }
 0x13a   : > { %v8619_v54 = vrot.slane %v24502_v53, 1  ;;  %v8618_v23 = vsel %vm3767_vm1, %v8615_v62, %v8617_v3 }
 0x13c   : > { %v8620_v2 = vsel %vm3767_vm1, %v8617_v3, %v8619_v54  ;;  %v8622_v62 = vsel %vm3767_vm1, %v8619_v54, %v8621_v42  ;;  %v24509_v3 = vld [vmem:[#allocation103_spill] sm:$0xff] }
 0x13f   : > { %17002 = vmatmul.mubr.bf16.gmra.mrb[132].mxu1 %v21589_v13 }
 0x140   : > { %17802 = vmatmul.mubr.bf16.gmra.mrb[52].mxu0 %v8614_v25  ;;  %17005 = vmatprep.mubr.bf16.mxu1 %v21593_v26  ;;  %v8623_v25 = vrot.slane %v24506_v8, 1  ;;  %v24526_v8 = vld [vmem:[#allocation16_spill] sm:$0xff] }
 0x141   : > { %17805 = vmatprep.mubr.bf16.mxu0 %v8616_v5  ;;  %v1857_v22 = vshll.u32 %v24526_v8, 16 }
 0x142   : > { %v8624_v5 = vsel %vm3767_vm1, %v8621_v42, %v8623_v25  ;;  %v8629_v42 = vrot.slane %v24513_v40, 1 }
 0x147   : > { %17006 = vmatmul.mubr.bf16.gmra.mrb[136].mxu1 %v21603_v48 }
 0x148   : > { %17806 = vmatmul.mubr.bf16.gmra.mrb[56].mxu0 %v8618_v23  ;;  %17009 = vmatprep.mubr.bf16.mxu1 %v21607_v35  ;;  %v8625_v23 = vrot.slane %v24509_v3, 1 }
 0x149   : > { %17809 = vmatprep.mubr.bf16.mxu0 %v8620_v2  ;;  %v24510_v2 = vld [vmem:[#allocation107_spill] sm:$0xff] }
 0x14a   : > { %v8627_v10 = vrot.slane %v24510_v2, 1  ;;  %v8626_v49 = vsel %vm3767_vm1, %v8623_v25, %v8625_v23 }
 0x14c   : > { %v8628_v54 = vsel %vm3767_vm1, %v8625_v23, %v8627_v10  ;;  %v8630_v20 = vsel %vm3767_vm1, %v8627_v10, %v8629_v42 }
 0x14f   : > { %17010 = vmatmul.mubr.bf16.gmra.mrb[140].mxu1 %v21620_v6 }
 0x150   : > { %17810 = vmatmul.mubr.bf16.gmra.mrb[60].mxu0 %v8622_v62  ;;  %17013 = vmatprep.mubr.bf16.mxu1 %v21624_v47  ;;  %v24514_v62 = vld [vmem:[#allocation117_spill] sm:$0xff] }
 0x151   : > { %17813 = vmatprep.mubr.bf16.mxu0 %v8624_v5  ;;  %v8631_v58 = vrot.slane %v24514_v62, 1  ;;  %v24517_v5 = vld [vmem:[#allocation122_spill] sm:$0xff] }
 0x152   : > { %v8633_v23 = vrot.slane %v24517_v5, 1 }
 0x153   : > { %v8632_v25 = vsel %vm3767_vm1, %v8629_v42, %v8631_v58  ;;  %v1830_v42 = vrot.slane %v1828_v17, 1 }
 0x154   : > { %v8634_v10 = vsel %vm3767_vm1, %v8631_v58, %v8633_v23  ;;  %v8639_v58 = vrot.slane %v24520_v44, 1 }
 0x156   : > { %v8640_v2 = vsel %vm3767_vm1, %v8637_v27, %v8639_v58 }
 0x157   : > { %17014 = vmatmul.mubr.bf16.gmra.mrb[144].mxu1 %v21634_v24 }
 0x158   : > { %17814 = vmatmul.mubr.bf16.gmra.mrb[64].mxu0 %v8626_v49  ;;  %17017 = vmatprep.mubr.bf16.mxu1 %v21638_v33  ;;  %v8635_v49 = vrot.slane %v21191_v46, 1  ;;  %v21675_v46 = vld [vmem:[%s20225_s13 + $0x27c] sm:$0xf]  ;;  %v24558_v33 = vld [vmem:[#allocation40_spill] sm:$0xff] }
 0x159   : > { %17817 = vmatprep.mubr.bf16.mxu0 %v8628_v54  ;;  %v1826_v54 = vshrl.u32 %v20000_v11, 16  ;;  %v21681_v11 = vcombine.low %v21439_v29, %v21675_v46  ;;  %v1953_v24 = vshll.u32 %v24558_v33, 16 }
 0x15a   : > { %v8636_v5 = vsel %vm3767_vm1, %v8633_v23, %v8635_v49  ;;  %v24522_v23 = vld [vmem:[#allocation12_spill] sm:$0xff] }
 0x15b   : > { %v1831_v30 = vor.u32 %v1830_v42, %v1826_v54  ;;  %24521 = vst [vmem:[#allocation130_spill] sm:$0xff] %v21681_v11  ;;  %v1841_v62 = vshll.u32 %v24522_v23, 16  ;;  %v1849_v54 = vshll.u32 %v24523_v39, 16 }
 0x15d   : > { %v1843_v29 = vrot.slane %v1841_v62, 1  ;;  %v1851_v44 = vrot.slane %v1849_v54, 1  ;;  %v19955_v54 = vld [vmem:[%s23846_s1 + $0x88] sm:$0xff]  }
 0x15f   : > { %17018 = vmatmul.mubr.bf16.gmra.mrb[148].mxu1 %v21648_v34 }
 0x160   : > { %17818 = vmatmul.mubr.bf16.gmra.mrb[68].mxu0 %v8630_v20  ;;  %17021 = vmatprep.mubr.bf16.mxu1 %v21652_v18  ;;  %v20001_v20 = vld [vmem:[%s20225_s13 + $0x8] sm:$0xff]  }
 0x161   : > { %17821 = vmatprep.mubr.bf16.mxu0 %v8632_v25  ;;  %v1833_v25 = vshll.u32 %v20001_v20, 16  ;;  %v1837_v17 = vshrl.u32 %v20001_v20, 16  ;;  %v19960_v20 = vld [vmem:[%s23846_s1 + $0x1b8] sm:$0xff]  }
 0x162   : > { %17923 = vmatprep.subr.bf16.mxu0 %v19960_v20 }
 0x163   : > { %v1835_v43 = vrot.slane %v1833_v25, 1  ;;  %17924 = vmatpush3.bf16.msra.mxu0 %v19960_v20  ;;  %v1859_v20 = vrot.slane %v1857_v22, 1 }
 0x165   : > { %v1836_v40 = vsel %vm1824_vm0, %v1831_v30, %v1835_v43  ;;  %v1839_v42 = vor.u32 %v1837_v17, %v1835_v43  ;;  %v1861_v43 = vshrl.u32 %v24526_v8, 16  ;;  %v24527_v17 = vld [vmem:[#allocation19_spill] sm:$0xff] }
 0x167   : > { %17022 = vmatmul.mubr.bf16.gmra.mrb[152].mxu1 %v21663_v4 }
 0x168   : > { %17822 = vmatmul.mubr.bf16.gmra.mrb[72].mxu0 %v8634_v10  ;;  %17025 = vmatprep.mubr.bf16.mxu1 %v21667_v32  ;;  %v8638_v10 = vsel %vm3767_vm1, %v8635_v49, %v8637_v27  ;;  %v24524_v49 = vld [vmem:[#allocation46_spill] sm:$0xff]  ;;  %v24525_v27 = vld [vmem:[#allocation48_spill] sm:$0xff] }
 0x169   : > { %17825 = vmatprep.mubr.bf16.mxu0 %v8636_v5  ;;  %v1845_v5 = vshrl.u32 %v24522_v23, 16  ;;  %v8641_v25 = vrot.slane %v24524_v49, 1  ;;  %v8643_v3 = vrot.slane %v24525_v27, 1  ;;  %v1863_v27 = vor.u32 %v1861_v43, %v1859_v20 }
 0x16b   : > { %v1847_v30 = vor.u32 %v1845_v5, %v1843_v29  ;;  %v8642_v62 = vsel %vm3767_vm1, %v8639_v58, %v8641_v25  ;;  %v8644_v5 = vsel %vm3767_vm1, %v8641_v25, %v8643_v3  ;;  %v24528_v58 = vld [vmem:[#allocation51_spill] sm:$0xff]  ;;  %v19957_v25 = vld [vmem:[%s23846_s1 + $0x90] sm:$0xff]  }
 0x16d   : > { %v1852_v49 = vsel %vm1824_vm0, %v1847_v30, %v1851_v44  ;;  %v24529_v30 = vld [vmem:[#allocation52_spill] sm:$0xff] }
 0x16e   : > { %v8647_v7 = vrot.slane %v24529_v30, 1 }
 0x16f   : > { %17026 = vmatmul.mubr.bf16.gmra.mrb[156].mxu1 %v21681_v11 }
 0x170   : > { %17826 = vmatmul.mubr.bf16.gmra.mrb[76].mxu0 %v8638_v10  ;;  %17045 = vmatprep.mubr.bf16.mxu1 %v1836_v40  ;;  %v1844_v10 = vsel %vm1824_vm0, %v1839_v42, %v1843_v29  ;;  %v1853_v40 = vshrl.u32 %v24523_v39, 16  ;;  %v8645_v29 = vrot.slane %v24528_v58, 1  ;;  %v24533_v58 = vld [vmem:[#allocation54_spill] sm:$0xff]  ;;  %v24534_v39 = vld [vmem:[#allocation24_spill] sm:$0xff] }
 0x171   : > { %17829 = vmatprep.mubr.bf16.mxu0 %v8640_v2  ;;  %v1865_v2 = vshll.u32 %v24527_v17, 16  ;;  %v8651_v8 = vrot.slane %v24533_v58, 1 }
 0x172   : > { %v1855_v42 = vor.u32 %v1853_v40, %v1851_v44  ;;  %v8646_v44 = vsel %vm3767_vm1, %v8643_v3, %v8645_v29  ;;  %v1877_v40 = vshrl.u32 %v24530_v12, 16  ;;  %v24532_v3 = vld [vmem:[#allocation53_spill] sm:$0xff] }
 0x173   : > { %v1867_v53 = vrot.slane %v1865_v2, 1  ;;  %v8648_v2 = vsel %vm3767_vm1, %v8645_v29, %v8647_v7  ;;  %v1889_v29 = vshll.u32 %v24534_v39, 16 }
 0x174   : > { %v1860_v22 = vsel %vm1824_vm0, %v1855_v42, %v1859_v20  ;;  %v8649_v42 = vrot.slane %v24532_v3, 1  ;;  %v24540_v3 = vld [vmem:[#allocation28_spill] sm:$0xff] }
 0x175   : > { %v1905_v11 = vshll.u32 %v24540_v3, 16 }
 0x177   : > { %17046 = vmatmul.mubr.bf16.vlgmr.msra.gmra.mrb[0].mxu1 %v1844_v10  ;;  %v1873_v10 = vshll.u32 %v24530_v12, 16 }
 0x178   : > { %17830 = vmatmul.mubr.bf16.gmra.mrb[80].mxu0 %v8642_v62  ;;  %17206 = vmatpush3.bf16.msra.mxu1 %v21463_v9  ;;  %v1869_v9 = vshrl.u32 %v24527_v17, 16  ;;  %v24531_v62 = vld [vmem:[#allocation23_spill] sm:$0xff] }
 0x179   : > { %17049 = vmatprep.mubr.bf16.mxu1 %v1852_v49  ;;  %17833 = vmatprep.mubr.bf16.mxu0 %v8644_v5  ;;  %v1868_v49 = vsel %vm1824_vm0, %v1863_v27, %v1867_v53  ;;  %v1881_v43 = vshll.u32 %v24531_v62, 16  ;;  %v19959_v5 = vld [vmem:[%s23846_s1 + $0x98] sm:$0xff]   ;;  %v1875_v20 = vrot.slane %v1873_v10, 1  ;;  %v8650_v10 = vsel %vm3767_vm1, %v8647_v7, %v8649_v42 }
 0x17a   : > { %17207 = vmatprep.subr.bf16.mxu1 %v19955_v54 }
 0x17b   : > { %v1879_v27 = vor.u32 %v1877_v40, %v1875_v20  ;;  %v1883_v30 = vrot.slane %v1881_v43, 1  ;;  %v1891_v40 = vrot.slane %v1889_v29, 1 }
 0x17c   : > { %17208 = vmatpush3.bf16.msra.mxu1 %v19955_v54  ;;  %v1871_v54 = vor.u32 %v1869_v9, %v1867_v53  ;;  %v1893_v9 = vshrl.u32 %v24534_v39, 16 }
 0x17d   : > { %17209 = vmatprep.subr.bf16.mxu1 %v19957_v25  ;;  %v21732_v53 = vsel %vm1824_vm0, %v1879_v27, %v1883_v30  ;;  %v24539_v27 = vld [vmem:[#allocation61_spill] sm:$0xff] }
 0x17e   : > { %v21727_v23 = vsel %vm1824_vm0, %v1871_v54, %v1875_v20  ;;  %24536 = vst [vmem:[#allocation20_spill] sm:$0xff] %v21732_v53  ;;  %v1895_v20 = vor.u32 %v1893_v9, %v1891_v40  ;;  %v8655_v58 = vrot.slane %v24539_v27, 1 }
 0x17f   : > { %17050 = vmatmul.mubr.bf16.gmra.mrb[4].mxu1 %v1860_v22  ;;  %24535 = vst [vmem:[#allocation19_spill] sm:$0xff] %v21727_v23  ;;  %v1885_v22 = vshrl.u32 %v24531_v62, 16 }
 0x180   : > { %17834 = vmatmul.mubr.bf16.gmra.mrb[84].mxu0 %v8646_v44  ;;  %17053 = vmatprep.mubr.bf16.mxu1 %v1868_v49  ;;  %v24537_v44 = vld [vmem:[#allocation27_spill] sm:$0xff] }
 0x181   : > { %17837 = vmatprep.mubr.bf16.mxu0 %v8648_v2  ;;  %17210 = vmatpush3.bf16.msra.mxu1 %v19957_v25  ;;  %v1897_v49 = vshll.u32 %v24537_v44, 16  ;;  %v8652_v25 = vsel %vm3767_vm1, %v8649_v42, %v8651_v8  ;;  %v1887_v43 = vor.u32 %v1885_v22, %v1883_v30  ;;  %v24538_v2 = vld [vmem:[#allocation59_spill] sm:$0xff]  ;;  %v1901_v42 = vshrl.u32 %v24537_v44, 16 }
 0x182   : > { %17211 = vmatprep.subr.bf16.mxu1 %v19959_v5  ;;  %v8653_v7 = vrot.slane %v24538_v2, 1  ;;  %v1909_v30 = vshrl.u32 %v24540_v3, 16  ;;  %v24543_v22 = vld [vmem:[#allocation31_spill] sm:$0xff] }
 0x183   : > { %v1899_v54 = vrot.slane %v1897_v49, 1  ;;  %v1907_v49 = vrot.slane %v1905_v11, 1 }
 0x184   : > { %v8654_v29 = vsel %vm3767_vm1, %v8651_v8, %v8653_v7  ;;  %v8656_v9 = vsel %vm3767_vm1, %v8653_v7, %v8655_v58  ;;  %v1917_v7 = vshrl.u32 %v24543_v22, 16 }
 0x185   : > { %17212 = vmatpush3.bf16.msra.mxu1 %v19959_v5  ;;  %v21743_v5 = vsel %vm1824_vm0, %v1887_v43, %v1891_v40  ;;  %v1903_v40 = vor.u32 %v1901_v42, %v1899_v54  ;;  %v24544_v43 = vld [vmem:[#allocation66_spill] sm:$0xff]  ;;  %v1911_v8 = vor.u32 %v1909_v30, %v1907_v49  ;;  %v24549_v42 = vld [vmem:[#allocation35_spill] sm:$0xff] }
 0x186   : > { %24541 = vst [vmem:[#allocation23_spill] sm:$0xff] %v21743_v5  ;;  %v8657_v27 = vrot.slane %v24544_v43, 1 }
 0x187   : > { %17054 = vmatmul.mubr.bf16.gmra.mrb[8].mxu1 %v21727_v23  ;;  %v24546_v23 = vld [vmem:[#allocation32_spill] sm:$0xff]  ;;  %v21759_v4 = vsel %vm1824_vm0, %v1903_v40, %v1907_v49  ;;  %v19964_v49 = vld [vmem:[%s23846_s1 + $0xa0] sm:$0xff]  }
 0x188   : > { %17838 = vmatmul.mubr.bf16.gmra.mrb[88].mxu0 %v8650_v10  ;;  %17057 = vmatprep.mubr.bf16.mxu1 %v21732_v53  ;;  %v21748_v10 = vsel %vm1824_vm0, %v1895_v20, %v1899_v54  ;;  %v24545_v20 = vld [vmem:[#allocation68_spill] sm:$0xff]  ;;  %v1921_v32 = vshll.u32 %v24546_v23, 16  ;;  %24547 = vst [vmem:[#allocation27_spill] sm:$0xff] %v21759_v4  ;;  %v8658_v11 = vsel %vm3767_vm1, %v8655_v58, %v8657_v27  ;;  %v1925_v54 = vshrl.u32 %v24546_v23, 16  ;;  %v21777_v40 = vld [vmem:[%s23846_s1 + $0x1c0] sm:$0xff]  }
 0x189   : > { %17841 = vmatprep.mubr.bf16.mxu0 %v8652_v25  ;;  %24542 = vst [vmem:[#allocation24_spill] sm:$0xff] %v21748_v10  ;;  %v1913_v25 = vshll.u32 %v24543_v22, 16  ;;  %v8659_v53 = vrot.slane %v24545_v20, 1  ;;  %17213 = vmatprep.subr.bf16.mxu1 %v19964_v49 }
 0x18a   : > { %18085 = vmatprep.subr.bf16.mxu0 %v21777_v40  ;;  %17214 = vmatpush3.bf16.msra.mxu1 %v19964_v49 }
 0x18b   : > { %v1915_v2 = vrot.slane %v1913_v25, 1  ;;  %v8660_v30 = vsel %vm3767_vm1, %v8657_v27, %v8659_v53  ;;  %v1923_v25 = vrot.slane %v1921_v32, 1  ;;  %v24551_v32 = vld [vmem:[#allocation76_spill] sm:$0xff] }
 0x18d   : > { %v1919_v58 = vor.u32 %v1917_v7, %v1915_v2  ;;  %v1927_v27 = vor.u32 %v1925_v54, %v1923_v25  ;;  %v1933_v7 = vshrl.u32 %v24549_v42, 16 }
 0x18f   : > { %17058 = vmatmul.mubr.bf16.gmra.mrb[12].mxu1 %v21743_v5 }
 0x190   : > { %17842 = vmatmul.mubr.bf16.gmra.mrb[92].mxu0 %v8654_v29  ;;  %17061 = vmatprep.mubr.bf16.mxu1 %v21748_v10  ;;  %v21764_v29 = vsel %vm1824_vm0, %v1911_v8, %v1915_v2  ;;  %v24550_v8 = vld [vmem:[#allocation72_spill] sm:$0xff]  ;;  %v21784_v2 = vsel %vm1824_vm0, %v1919_v58, %v1923_v25  ;;  %v24556_v58 = vld [vmem:[#allocation82_spill] sm:$0xff] }
 0x191   : > { %17845 = vmatprep.mubr.bf16.mxu0 %v8656_v9  ;;  %24548 = vst [vmem:[#allocation28_spill] sm:$0xff] %v21764_v29  ;;  %v1929_v9 = vshll.u32 %v24549_v42, 16  ;;  %v8661_v20 = vrot.slane %v24550_v8, 1  ;;  %24553 = vst [vmem:[#allocation31_spill] sm:$0xff] %v21784_v2  ;;  %v8665_v5 = vrot.slane %v24556_v58, 1 }
 0x193   : > { %v1931_v43 = vrot.slane %v1929_v9, 1  ;;  %v24555_v9 = vld [vmem:[#allocation39_spill] sm:$0xff] }
 0x194   : > { %v1945_v8 = vshll.u32 %v24555_v9, 16 }
 0x195   : > { %v1935_v25 = vor.u32 %v1933_v7, %v1931_v43 }
 0x196   : > { %v1947_v18 = vrot.slane %v1945_v8, 1 }
 0x197   : > { %17062 = vmatmul.mubr.bf16.gmra.mrb[16].mxu1 %v21759_v4  ;;  %v8663_v4 = vrot.slane %v24551_v32, 1 }
 0x198   : > { %17846 = vmatmul.mubr.bf16.gmra.mrb[96].mxu0 %v8658_v11  ;;  %17065 = vmatprep.mubr.bf16.mxu1 %v21764_v29  ;;  %v24552_v11 = vld [vmem:[#allocation36_spill] sm:$0xff]  ;;  %v8662_v29 = vsel %vm3767_vm1, %v8659_v53, %v8661_v20 }
 0x199   : > { %17849 = vmatprep.mubr.bf16.mxu0 %v8660_v30  ;;  %v1937_v10 = vshll.u32 %v24552_v11, 16  ;;  %v21789_v30 = vsel %vm1824_vm0, %v1927_v27, %v1931_v43  ;;  %v1941_v54 = vshrl.u32 %v24552_v11, 16  ;;  %v8664_v32 = vsel %vm3767_vm1, %v8661_v20, %v8663_v4  ;;  %v24557_v27 = vld [vmem:[#allocation86_spill] sm:$0xff] }
 0x19a   : > { %24554 = vst [vmem:[#allocation32_spill] sm:$0xff] %v21789_v30  ;;  %v8667_v34 = vrot.slane %v24557_v27, 1  ;;  %v1949_v20 = vshrl.u32 %v24555_v9, 16  ;;  %v1957_v43 = vshrl.u32 %v24558_v33, 16 }
 0x19b   : > { %v1939_v49 = vrot.slane %v1937_v10, 1  ;;  %v8666_v10 = vsel %vm3767_vm1, %v8663_v4, %v8665_v5 }
 0x19c   : > { %v8668_v8 = vsel %vm3767_vm1, %v8665_v5, %v8667_v34 }
 0x19d   : > { %v1943_v53 = vor.u32 %v1941_v54, %v1939_v49  ;;  %v21800_v47 = vsel %vm1824_vm0, %v1935_v25, %v1939_v49  ;;  %v1955_v54 = vrot.slane %v1953_v24, 1  ;;  %v1951_v49 = vor.u32 %v1949_v20, %v1947_v18  ;;  %v24562_v25 = vld [vmem:[#allocation92_spill] sm:$0xff]  ;;  %v24567_v20 = vld [vmem:[#allocation55_spill] sm:$0xff] }
 0x19e   : > { %24559 = vst [vmem:[#allocation40_spill] sm:$0xff] %v21800_v47  ;;  %v8669_v27 = vrot.slane %v24562_v25, 1 }
 0x19f   : > { %17066 = vmatmul.mubr.bf16.gmra.mrb[20].mxu1 %v21784_v2  ;;  %v1959_v4 = vor.u32 %v1957_v43, %v1955_v54  ;;  %v24564_v2 = vld [vmem:[#allocation45_spill] sm:$0xff]  ;;  %v21816_v35 = vsel %vm1824_vm0, %v1951_v49, %v1955_v54  ;;  %v24568_v49 = vld [vmem:[#allocation102_spill] sm:$0xff] }
 0x1a0   : > { %17850 = vmatmul.mubr.bf16.gmra.mrb[100].mxu0 %v8662_v29  ;;  %17069 = vmatprep.mubr.bf16.mxu1 %v21789_v30  ;;  %v21805_v29 = vsel %vm1824_vm0, %v1943_v53, %v1947_v18  ;;  %v24563_v53 = vld [vmem:[#allocation96_spill] sm:$0xff]  ;;  %v1969_v6 = vshll.u32 %v24564_v2, 16  ;;  %24565 = vst [vmem:[#allocation155_spill] sm:$0xff] %v21816_v35  ;;  %v8670_v24 = vsel %vm3767_vm1, %v8667_v34, %v8669_v27  ;;  %v1973_v18 = vshrl.u32 %v24564_v2, 16 }
 0x1a1   : > { %17853 = vmatprep.mubr.bf16.mxu0 %v8664_v32  ;;  %24560 = vst [vmem:[#allocation154_spill] sm:$0xff] %v21805_v29  ;;  %v24561_v32 = vld [vmem:[#allocation43_spill] sm:$0xff]  ;;  %v8671_v30 = vrot.slane %v24563_v53, 1  ;;  %v8673_v53 = vrot.slane %v24568_v49, 1 }
 0x1a2   : > { %v1961_v7 = vshll.u32 %v24561_v32, 16  ;;  %v1965_v5 = vshrl.u32 %v24561_v32, 16 }
 0x1a3   : > { %v8672_v43 = vsel %vm3767_vm1, %v8669_v27, %v8671_v30  ;;  %v1981_v27 = vshrl.u32 %v24567_v20, 16 }
 0x1a4   : > { %v1963_v58 = vrot.slane %v1961_v7, 1  ;;  %v1971_v7 = vrot.slane %v1969_v6, 1  ;;  %v8674_v6 = vsel %vm3767_vm1, %v8671_v30, %v8673_v53 }
 0x1a6   : > { %v1967_v54 = vor.u32 %v1965_v5, %v1963_v58  ;;  %v1975_v34 = vor.u32 %v1973_v18, %v1971_v7  ;;  %v24573_v5 = vld [vmem:[#allocation62_spill] sm:$0xff] }
 0x1a7   : > { %17070 = vmatmul.mubr.bf16.gmra.mrb[24].mxu1 %v21800_v47  ;;  %v24570_v47 = vld [vmem:[#allocation56_spill] sm:$0xff] }
 0x1a8   : > { %17854 = vmatmul.mubr.bf16.gmra.mrb[104].mxu0 %v8666_v10  ;;  %17073 = vmatprep.mubr.bf16.mxu1 %v21805_v29  ;;  %v21821_v10 = vsel %vm1824_vm0, %v1959_v4, %v1963_v58  ;;  %v24569_v4 = vld [vmem:[#allocation106_spill] sm:$0xff]  ;;  %v1985_v48 = vshll.u32 %v24570_v47, 16  ;;  %v21832_v26 = vsel %vm1824_vm0, %v1967_v54, %v1971_v7  ;;  %v1989_v58 = vshrl.u32 %v24570_v47, 16  ;;  %v24574_v54 = vld [vmem:[#allocation112_spill] sm:$0xff] }
 0x1a9   : > { %17857 = vmatprep.mubr.bf16.mxu0 %v8668_v8  ;;  %24566 = vst [vmem:[#allocation156_spill] sm:$0xff] %v21821_v10  ;;  %v1977_v8 = vshll.u32 %v24567_v20, 16  ;;  %v8675_v29 = vrot.slane %v24569_v4, 1  ;;  %24571 = vst [vmem:[#allocation56_spill] sm:$0xff] %v21832_v26  ;;  %v8677_v4 = vrot.slane %v24574_v54, 1 }
 0x1ab   : > { %v1979_v25 = vrot.slane %v1977_v8, 1  ;;  %v8676_v18 = vsel %vm3767_vm1, %v8673_v53, %v8675_v29  ;;  %v1987_v8 = vrot.slane %v1985_v48, 1  ;;  %v1997_v53 = vshrl.u32 %v24573_v5, 16 }
 0x1ac   : > { %v8678_v48 = vsel %vm3767_vm1, %v8675_v29, %v8677_v4 }
 0x1ad   : > { %v1983_v7 = vor.u32 %v1981_v27, %v1979_v25  ;;  %v1991_v30 = vor.u32 %v1989_v58, %v1987_v8  ;;  %v24579_v27 = vld [vmem:[#allocation69_spill] sm:$0xff] }
 0x1ae   : > { %v2013_v1 = vshrl.u32 %v24579_v27, 16 }
 0x1af   : > { %17074 = vmatmul.mubr.bf16.gmra.mrb[28].mxu1 %v21816_v35  ;;  %v24576_v35 = vld [vmem:[#allocation63_spill] sm:$0xff]  ;;  %v21848_v19 = vsel %vm1824_vm0, %v1983_v7, %v1987_v8  ;;  %v24580_v7 = vld [vmem:[#allocation121_spill] sm:$0xff] }
 0x1b0   : > { %17858 = vmatmul.mubr.bf16.gmra.mrb[108].mxu0 %v8670_v24  ;;  %17077 = vmatprep.mubr.bf16.mxu1 %v21821_v10  ;;  %v21837_v24 = vsel %vm1824_vm0, %v1975_v34, %v1979_v25  ;;  %v24575_v34 = vld [vmem:[#allocation116_spill] sm:$0xff]  ;;  %v2001_v13 = vshll.u32 %v24576_v35, 16  ;;  %24577 = vst [vmem:[#allocation158_spill] sm:$0xff] %v21848_v19  ;;  %v2005_v25 = vshrl.u32 %v24576_v35, 16  ;;  %v19966_v8 = vld [vmem:[%s23846_s1 + $0xa8] sm:$0xff]  }
 0x1b1   : > { %17861 = vmatprep.mubr.bf16.mxu0 %v8672_v43  ;;  %24572 = vst [vmem:[#allocation157_spill] sm:$0xff] %v21837_v24  ;;  %v1993_v43 = vshll.u32 %v24573_v5, 16  ;;  %v8679_v10 = vrot.slane %v24575_v34, 1  ;;  %17215 = vmatprep.subr.bf16.mxu1 %v19966_v8 }
 0x1b2   : > { %17216 = vmatpush3.bf16.msra.mxu1 %v19966_v8 }
 0x1b3   : > { %v1995_v49 = vrot.slane %v1993_v43, 1  ;;  %v8680_v58 = vsel %vm3767_vm1, %v8677_v4, %v8679_v10  ;;  %v2003_v43 = vrot.slane %v2001_v13, 1  ;;  %v24582_v4 = vld [vmem:[#allocation70_spill] sm:$0xff] }
 0x1b5   : > { %v1999_v29 = vor.u32 %v1997_v53, %v1995_v49  ;;  %v2007_v34 = vor.u32 %v2005_v25, %v2003_v43  ;;  %v2021_v53 = vshrl.u32 %v24582_v4, 16  ;;  %v24585_v25 = vld [vmem:[#allocation78_spill] sm:$0xff] }
 0x1b7   : > { %17078 = vmatmul.mubr.bf16.gmra.mrb[32].mxu1 %v21832_v26  ;;  %v21867_v13 = vsel %vm1824_vm0, %v1999_v29, %v2003_v43  ;;  %v24586_v29 = vld [vmem:[#allocation129_spill] sm:$0xff] }
 0x1b8   : > { %17862 = vmatmul.mubr.bf16.gmra.mrb[112].mxu0 %v8674_v6  ;;  %17081 = vmatprep.mubr.bf16.mxu1 %v21837_v24  ;;  %v21853_v6 = vsel %vm1824_vm0, %v1991_v30, %v1995_v49  ;;  %v8681_v30 = vrot.slane %v24580_v7, 1  ;;  %v24581_v24 = vld [vmem:[#allocation125_spill] sm:$0xff]  ;;  %24583 = vst [vmem:[#allocation160_spill] sm:$0xff] %v21867_v13 }
 0x1b9   : > { %17865 = vmatprep.mubr.bf16.mxu0 %v8676_v18  ;;  %24578 = vst [vmem:[#allocation159_spill] sm:$0xff] %v21853_v6  ;;  %v2009_v18 = vshll.u32 %v24579_v27, 16  ;;  %v8683_v26 = vrot.slane %v24581_v24, 1  ;;  %v8685_v24 = vrot.slane %v24586_v29, 1  ;;  %v24592_v29 = vld [vmem:[#allocation89_spill] sm:$0xff] }
 0x1bb   : > { %v2011_v54 = vrot.slane %v2009_v18, 1  ;;  %v2025_v18 = vshll.u32 %v24585_v25, 16 }
 0x1bd   : > { %v21872_v49 = vsel %vm1824_vm0, %v2007_v34, %v2011_v54  ;;  %v2015_v43 = vor.u32 %v2013_v1, %v2011_v54  ;;  %v2027_v7 = vrot.slane %v2025_v18, 1  ;;  %v24587_v34 = vld [vmem:[#allocation132_spill] sm:$0xff]  ;;  %v2037_v1 = vshrl.u32 %v24588_v38, 16 }
 0x1be   : > { %24584 = vst [vmem:[#allocation161_spill] sm:$0xff] %v21872_v49  ;;  %v24591_v54 = vld [vmem:[#allocation88_spill] sm:$0xff] }
 0x1bf   : > { %17082 = vmatmul.mubr.bf16.gmra.mrb[36].mxu1 %v21848_v19  ;;  %v2017_v19 = vshll.u32 %v24582_v4, 16  ;;  %v2033_v4 = vshll.u32 %v24588_v38, 16 }
 0x1c0   : > { %17866 = vmatmul.mubr.bf16.gmra.mrb[116].mxu0 %v8678_v48  ;;  %17085 = vmatprep.mubr.bf16.mxu1 %v21853_v6  ;;  %v8682_v48 = vsel %vm3767_vm1, %v8679_v10, %v8681_v30  ;;  %v8687_v6 = vrot.slane %v24587_v34, 1 }
 0x1c1   : > { %17869 = vmatprep.mubr.bf16.mxu0 %v8680_v58  ;;  %v8684_v58 = vsel %vm3767_vm1, %v8681_v30, %v8683_v26  ;;  %v2019_v8 = vrot.slane %v2017_v19, 1  ;;  %v2029_v30 = vshrl.u32 %v24585_v25, 16  ;;  %v8686_v19 = vsel %vm3767_vm1, %v8683_v26, %v8685_v24 }
 0x1c2   : > { %v2035_v18 = vrot.slane %v2033_v4, 1 }
 0x1c3   : > { %v2023_v10 = vor.u32 %v2021_v53, %v2019_v8  ;;  %v21883_v15 = vsel %vm1824_vm0, %v2015_v43, %v2019_v8  ;;  %v8688_v53 = vsel %vm3767_vm1, %v8685_v24, %v8687_v6  ;;  %v2031_v8 = vor.u32 %v2029_v30, %v2027_v7  ;;  %v24595_v30 = vld [vmem:[#allocation98_spill] sm:$0xff] }
 0x1c4   : > { %24589 = vst [vmem:[#allocation162_spill] sm:$0xff] %v21883_v15  ;;  %v8689_v43 = vrot.slane %v21257_v0, 1  ;;  %v2039_v26 = vor.u32 %v2037_v1, %v2035_v18  ;;  %v2045_v24 = vshrl.u32 %v24591_v54, 16  ;;  %v24596_v0 = vld [vmem:[#allocation99_spill] sm:$0xff] }
 0x1c6   : > { %v8690_v4 = vsel %vm3767_vm1, %v8687_v6, %v8689_v43 }
 0x1c7   : > { %17086 = vmatmul.mubr.bf16.gmra.mrb[40].mxu1 %v21867_v13  ;;  %v21899_v13 = vsel %vm1824_vm0, %v2031_v8, %v2035_v18  ;;  %v8693_v8 = vrot.slane %v21294_v14, 1  ;;  %v24600_v14 = vld [vmem:[#allocation109_spill] sm:$0xff] }
 0x1c8   : > { %17870 = vmatmul.mubr.bf16.gmra.mrb[120].mxu0 %v8682_v48  ;;  %17089 = vmatprep.mubr.bf16.mxu1 %v21872_v49  ;;  %v21888_v48 = vsel %vm1824_vm0, %v2023_v10, %v2027_v7  ;;  %v8691_v10 = vrot.slane %v21270_v41, 1  ;;  %v2049_v49 = vshll.u32 %v24592_v29, 16  ;;  %24593 = vst [vmem:[#allocation164_spill] sm:$0xff] %v21899_v13  ;;  %v2053_v7 = vshrl.u32 %v24592_v29, 16 }
 0x1c9   : > { %17873 = vmatprep.mubr.bf16.mxu0 %v8684_v58  ;;  %24590 = vst [vmem:[#allocation163_spill] sm:$0xff] %v21888_v48  ;;  %v2041_v58 = vshll.u32 %v24591_v54, 16 }
 0x1ca   : > { %v8692_v1 = vsel %vm3767_vm1, %v8689_v43, %v8691_v10  ;;  %v2061_v43 = vshrl.u32 %v24595_v30, 16 }
 0x1cb   : > { %v2043_v34 = vrot.slane %v2041_v58, 1  ;;  %v2051_v58 = vrot.slane %v2049_v49, 1  ;;  %v8694_v49 = vsel %vm3767_vm1, %v8691_v10, %v8693_v8 }
 0x1cd   : > { %v2047_v18 = vor.u32 %v2045_v24, %v2043_v34  ;;  %v2055_v6 = vor.u32 %v2053_v7, %v2051_v58  ;;  %v24599_v24 = vld [vmem:[#allocation108_spill] sm:$0xff] }
 0x1cf   : > { %17090 = vmatmul.mubr.bf16.gmra.mrb[44].mxu1 %v21883_v15  ;;  %v21915_v15 = vsel %vm1824_vm0, %v2047_v18, %v2051_v58  ;;  %v8697_v18 = vrot.slane %v21333_v51, 1  ;;  %v8703_v51 = vrot.slane %v21388_v21, 1 }
 0x1d0   : > { %17874 = vmatmul.mubr.bf16.gmra.mrb[124].mxu0 %v8686_v19  ;;  %17093 = vmatprep.mubr.bf16.mxu1 %v21888_v48  ;;  %v21904_v19 = vsel %vm1824_vm0, %v2039_v26, %v2043_v34  ;;  %v8695_v26 = vrot.slane %v21309_v61, 1  ;;  %v2065_v48 = vshll.u32 %v24596_v0, 16  ;;  %24597 = vst [vmem:[#allocation166_spill] sm:$0xff] %v21915_v15  ;;  %v2069_v34 = vshrl.u32 %v24596_v0, 16 }
 0x1d1   : > { %17877 = vmatprep.mubr.bf16.mxu0 %v8688_v53  ;;  %24594 = vst [vmem:[#allocation165_spill] sm:$0xff] %v21904_v19  ;;  %v2057_v53 = vshll.u32 %v24595_v30, 16 }
 0x1d2   : > { %v8696_v7 = vsel %vm3767_vm1, %v8693_v8, %v8695_v26  ;;  %v2077_v8 = vshrl.u32 %v24599_v24, 16 }
 0x1d3   : > { %v2059_v41 = vrot.slane %v2057_v53, 1  ;;  %v2067_v53 = vrot.slane %v2065_v48, 1  ;;  %v8698_v48 = vsel %vm3767_vm1, %v8695_v26, %v8697_v18 }
 0x1d5   : > { %v2063_v58 = vor.u32 %v2061_v43, %v2059_v41  ;;  %v2071_v10 = vor.u32 %v2069_v34, %v2067_v53  ;;  %v24603_v43 = vld [vmem:[#allocation118_spill] sm:$0xff] }
 0x1d7   : > { %17094 = vmatmul.mubr.bf16.gmra.mrb[48].mxu1 %v21899_v13  ;;  %v21931_v13 = vsel %vm1824_vm0, %v2063_v58, %v2067_v53  ;;  %v19968_v53 = vld [vmem:[%s23846_s1 + $0xb0] sm:$0xff]   ;;  %v8701_v58 = vrot.slane %v21376_v31, 1  ;;  %v21965_v31 = vld [vmem:[%s20225_s13 + $0x280] sm:$0xf] }
 0x1d8   : > { %17878 = vmatmul.mubr.bf16.gmra.mrb[128].mxu0 %v8690_v4  ;;  %17097 = vmatprep.mubr.bf16.mxu1 %v21904_v19  ;;  %v21920_v4 = vsel %vm1824_vm0, %v2055_v6, %v2059_v41  ;;  %v8699_v6 = vrot.slane %v21348_v60, 1  ;;  %v2081_v19 = vshll.u32 %v24600_v14, 16  ;;  %24601 = vst [vmem:[#allocation168_spill] sm:$0xff] %v21931_v13  ;;  %v2085_v41 = vshrl.u32 %v24600_v14, 16  ;;  %24608 = vst [vmem:[#allocation172_spill] sm:$0xff] %v21965_v31 }
 0x1d9   : > { %17881 = vmatprep.mubr.bf16.mxu0 %v8692_v1  ;;  %24598 = vst [vmem:[#allocation167_spill] sm:$0xff] %v21920_v4  ;;  %v2073_v1 = vshll.u32 %v24599_v24, 16  ;;  %17217 = vmatprep.subr.bf16.mxu1 %v19968_v53 }
 0x1da   : > { %v8700_v34 = vsel %vm3767_vm1, %v8697_v18, %v8699_v6  ;;  %17218 = vmatpush3.bf16.msra.mxu1 %v19968_v53  ;;  %v24604_v18 = vld [vmem:[#allocation119_spill] sm:$0xff] }
 0x1db   : > { %v2075_v61 = vrot.slane %v2073_v1, 1  ;;  %v2083_v1 = vrot.slane %v2081_v19, 1 }
 0x1dd   : > { %v2079_v26 = vor.u32 %v2077_v8, %v2075_v61  ;;  %v2101_v8 = vshrl.u32 %v24604_v18, 16 }
 0x1df   : > { %17098 = vmatmul.mubr.bf16.gmra.mrb[52].mxu1 %v21915_v15  ;;  %v21950_v19 = vsel %vm1824_vm0, %v2079_v26, %v2083_v1  ;;  %v8705_v26 = vrot.slane %v21410_v45, 1  ;;  %v417_v45 = vld [vmem:[%s20225_s13 + $0x284] sm:$0xf] }
 0x1e0   : > { %17882 = vmatmul.mubr.bf16.gmra.mrb[132].mxu0 %v8694_v49  ;;  %17101 = vmatprep.mubr.bf16.mxu1 %v21920_v4  ;;  %v21936_v49 = vsel %vm1824_vm0, %v2071_v10, %v2075_v61  ;;  %v2087_v10 = vor.u32 %v2085_v41, %v2083_v1  ;;  %24605 = vst [vmem:[#allocation170_spill] sm:$0xff] %v21950_v19  ;;  %v2093_v4 = vshrl.u32 %v24603_v43, 16  ;;  %v24607_v41 = vld [vmem:[#allocation127_spill] sm:$0xff] }
 0x1e1   : > { %17885 = vmatprep.mubr.bf16.mxu0 %v8696_v7  ;;  %24602 = vst [vmem:[#allocation169_spill] sm:$0xff] %v21936_v49  ;;  %v2089_v7 = vshll.u32 %v24603_v43, 16 }
 0x1e3   : > { %v2091_v60 = vrot.slane %v2089_v7, 1  ;;  %v2105_v7 = vshll.u32 %v24607_v41, 16 }
 0x1e5   : > { %v21955_v61 = vsel %vm1824_vm0, %v2087_v10, %v2091_v60  ;;  %v2095_v1 = vor.u32 %v2093_v4, %v2091_v60  ;;  %v2107_v21 = vrot.slane %v2105_v7, 1  ;;  %v8707_v10 = vrot.slane %v21422_v16, 1 }
 0x1e6   : > { %24606 = vst [vmem:[#allocation171_spill] sm:$0xff] %v21955_v61  ;;  %v21980_v7 = vcombine.low %v21675_v46, %v21965_v31 }
 0x1e7   : > { %17102 = vmatmul.mubr.bf16.gmra.mrb[56].mxu1 %v21931_v13  ;;  %v2097_v13 = vshll.u32 %v24604_v18, 16 }
 0x1e8   : > { %17886 = vmatmul.mubr.bf16.gmra.mrb[136].mxu0 %v8698_v48  ;;  %17105 = vmatprep.mubr.bf16.mxu1 %v21936_v49  ;;  %v8702_v48 = vsel %vm3767_vm1, %v8699_v6, %v8701_v58  ;;  %v24609_v49 = vld [vmem:[#allocation128_spill] sm:$0xff]  ;;  %24612 = vst [vmem:[#allocation175_spill] sm:$0xff] %v21980_v7  ;;  %v8711_v46 = vrot.slane %v21980_v7, 1 }
 0x1e9   : > { %17889 = vmatprep.mubr.bf16.mxu0 %v8700_v34  ;;  %v8704_v34 = vsel %vm3767_vm1, %v8701_v58, %v8703_v51  ;;  %v2099_v53 = vrot.slane %v2097_v13, 1  ;;  %v2113_v15 = vshll.u32 %v24609_v49, 16  ;;  %v2109_v13 = vshrl.u32 %v24607_v41, 16 }
 0x1ea   : > { %v2117_v4 = vshrl.u32 %v24609_v49, 16  ;;  %v419_v49 = vld [vmem:[%s20225_s13 + $0x28c] sm:$0xf] }
 0x1eb   : > { %v2103_v6 = vor.u32 %v2101_v8, %v2099_v53  ;;  %v21969_v58 = vsel %vm1824_vm0, %v2095_v1, %v2099_v53  ;;  %v2121_v8 = vshll.u32 %v21238_v63, 16  ;;  %v2115_v53 = vrot.slane %v2113_v15, 1 }
 0x1ec   : > { %24610 = vst [vmem:[#allocation173_spill] sm:$0xff] %v21969_v58  ;;  %v8709_v1 = vrot.slane %v21444_v36, 1  ;;  %v2125_v15 = vshrl.u32 %v21238_v63, 16 }
 0x1ed   : > { %v21974_v60 = vsel %vm1824_vm0, %v2103_v6, %v2107_v21  ;;  %v2119_v6 = vor.u32 %v2117_v4, %v2115_v53  ;;  %v2123_v16 = vrot.slane %v2121_v8, 1  ;;  %v24617_v8 = vld [vmem:[#allocation138_spill] sm:$0xff] }
 0x1ee   : > { %24611 = vst [vmem:[#allocation174_spill] sm:$0xff] %v21974_v60  ;;  %v8712_v7 = vsel %vm3767_vm1, %v8709_v1, %v8711_v46 }
 0x1ef   : > { %17106 = vmatmul.mubr.bf16.gmra.mrb[60].mxu1 %v21950_v19  ;;  %v24613_v19 = vld [vmem:[#allocation134_spill] sm:$0xff] }
 0x1f0   : > { %17890 = vmatmul.mubr.bf16.gmra.mrb[140].mxu0 %v8702_v48  ;;  %17109 = vmatprep.mubr.bf16.mxu1 %v21955_v61  ;;  %v8706_v48 = vsel %vm3767_vm1, %v8703_v51, %v8705_v26  ;;  %v2111_v51 = vor.u32 %v2109_v13, %v2107_v21  ;;  %v418_v61 = vld [vmem:[%s20225_s13 + $0x288] sm:$0xf]  ;;  %v2129_v31 = vshll.u32 %v24613_v19, 16  ;;  %v8710_v21 = vsel %vm3767_vm1, %v8707_v10, %v8709_v1 }
 0x1f1   : > { %17893 = vmatprep.mubr.bf16.mxu0 %v8704_v34  ;;  %v8708_v34 = vsel %vm3767_vm1, %v8705_v26, %v8707_v10  ;;  %v420_v26 = vld [vmem:[%s20225_s13 + $0x290] sm:$0xf]  ;;  %v22000_v13 = vsel %vm1824_vm0, %v2119_v6, %v2123_v16  ;;  %v2133_v4 = vshrl.u32 %v24613_v19, 16  ;;  %v24620_v19 = vld [vmem:[#allocation139_spill] sm:$0xff] }
 0x1f2   : > { %24616 = vst [vmem:[#allocation178_spill] sm:$0xff] %v22000_v13  ;;  %v22005_v36 = vcombine.low %v419_v49, %v420_v26  ;;  %v2145_v1 = vshll.u32 %v24620_v19, 16  ;;  %v2141_v26 = vshrl.u32 %v24617_v8, 16 }
 0x1f4   : > { %24618 = vst [vmem:[#allocation138_spill] sm:$0xff] %v22005_v36  ;;  %v8715_v6 = vrot.slane %v22005_v36, 1 }
 0x1f7   : > { %17110 = vmatmul.mubr.bf16.gmra.mrb[64].mxu1 %v21969_v58  ;;  %v21993_v58 = vsel %vm1824_vm0, %v2111_v51, %v2115_v53  ;;  %v2131_v53 = vrot.slane %v2129_v31, 1 }
 0x1f8   : > { %17894 = vmatmul.mubr.bf16.gmra.mrb[144].mxu0 %v8706_v48  ;;  %17113 = vmatprep.mubr.bf16.mxu1 %v21974_v60  ;;  %24614 = vst [vmem:[#allocation176_spill] sm:$0xff] %v21993_v58  ;;  %v21996_v48 = vcombine.low %v417_v45, %v418_v61  ;;  %v2127_v45 = vor.u32 %v2125_v15, %v2123_v16  ;;  %v22012_v60 = vld [vmem:[%s20225_s13 + $0x294] sm:$0xf]  ;;  %v2149_v15 = vshrl.u32 %v24620_v19, 16 }
 0x1f9   : > { %17897 = vmatprep.mubr.bf16.mxu0 %v8708_v34  ;;  %v2137_v34 = vshll.u32 %v24617_v8, 16  ;;  %v2135_v10 = vor.u32 %v2133_v4, %v2131_v53  ;;  %24619 = vst [vmem:[#allocation179_spill] sm:$0xff] %v22012_v60 }
 0x1fa   : > { %24615 = vst [vmem:[#allocation177_spill] sm:$0xff] %v21996_v48  ;;  %v8713_v61 = vrot.slane %v21996_v48, 1  ;;  %v22016_v49 = vsel %vm1824_vm0, %v2127_v45, %v2131_v53  ;;  %v2147_v53 = vrot.slane %v2145_v1, 1  ;;  %v24625_v48 = vld [vmem:[#allocation143_spill] sm:$0xff] }
 0x1fb   : > { %v2139_v51 = vrot.slane %v2137_v34, 1  ;;  %24621 = vst [vmem:[#allocation139_spill] sm:$0xff] %v22016_v49 }
 0x1fc   : > { %v8714_v31 = vsel %vm3767_vm1, %v8711_v46, %v8713_v61  ;;  %v8716_v34 = vsel %vm3767_vm1, %v8713_v61, %v8715_v6 }
 0x1fd   : > { %v22021_v16 = vsel %vm1824_vm0, %v2135_v10, %v2139_v51  ;;  %v2143_v46 = vor.u32 %v2141_v26, %v2139_v51  ;;  %v2151_v10 = vor.u32 %v2149_v15, %v2147_v53  ;;  %v2169_v51 = vshll.u32 %v21356_v37, 16  ;;  %v19970_v15 = vld [vmem:[%s23846_s1 + $0xb8] sm:$0xff]  }
 0x1fe   : > { %24622 = vst [vmem:[#allocation180_spill] sm:$0xff] %v22021_v16  ;;  %17219 = vmatprep.subr.bf16.mxu1 %v19970_v15 }
 0x1ff   : > { %17114 = vmatmul.mubr.bf16.gmra.mrb[68].mxu1 %v21993_v58  ;;  %v22035_v58 = vsel %vm1824_vm0, %v2143_v46, %v2147_v53  ;;  %v24628_v53 = vld [vmem:[#allocation146_spill] sm:$0xff] }
 0x200   : > { %17898 = vmatmul.mubr.bf16.gmra.mrb[148].mxu0 %v8710_v21  ;;  %17117 = vmatprep.mubr.bf16.mxu1 %v22000_v13  ;;  %v24624_v21 = vld [vmem:[#allocation142_spill] sm:$0xff]  ;;  %v2161_v13 = vshll.u32 %v24625_v48, 16  ;;  %v2177_v46 = vshll.u32 %v24628_v53, 16 }
 0x201   : > { %17901 = vmatprep.mubr.bf16.mxu0 %v8712_v7  ;;  %v22025_v7 = vcombine.low %v22012_v60, %v22012_v60  ;;  %v2153_v4 = vshll.u32 %v24624_v21, 16  ;;  %24626 = vst [vmem:[#allocation142_spill] sm:$0xff] %v22035_v58  ;;  %v2157_v60 = vshrl.u32 %v24624_v21, 16  ;;  %17220 = vmatpush3.bf16.msra.mxu1 %v19970_v15 }
 0x202   : > { %v2163_v26 = vrot.slane %v2161_v13, 1  ;;  %v2173_v13 = vshrl.u32 %v21356_v37, 16 }
 0x203   : > { %24623 = vst [vmem:[#allocation181_spill] sm:$0xff] %v22025_v7  ;;  %v8717_v45 = vrot.slane %v22025_v7, 1  ;;  %v2155_v36 = vrot.slane %v2153_v4, 1 }
 0x205   : > { %v8718_v61 = vsel %vm3767_vm1, %v8715_v6, %v8717_v45  ;;  %v22040_v1 = vsel %vm1824_vm0, %v2151_v10, %v2155_v36  ;;  %v2159_v4 = vor.u32 %v2157_v60, %v2155_v36  ;;  %v2185_v36 = vshll.u32 %v21393_v28, 16  ;;  %v19967_v60 = vld [vmem:[%s23846_s1 + $0x1c8] sm:$0xff]  }
 0x206   : > { %24627 = vst [vmem:[#allocation143_spill] sm:$0xff] %v22040_v1 }
 0x207   : > { %17118 = vmatmul.mubr.bf16.gmra.mrb[72].mxu1 %v22016_v49  ;;  %v22052_v45 = vsel %vm1824_vm0, %v2159_v4, %v2163_v26  ;;  %v2187_v15 = vrot.slane %v2185_v36, 1  ;;  %v19969_v4 = vld [vmem:[%s23846_s1 + $0x1d0] sm:$0xff]  }
 0x208   : > { %17902 = vmatmul.mubr.bf16.gmra.mrb[152].mxu0 %v8714_v31  ;;  %17121 = vmatprep.mubr.bf16.mxu1 %v22021_v16  ;;  %v2165_v31 = vshrl.u32 %v24625_v48, 16  ;;  %24629 = vst [vmem:[#allocation146_spill] sm:$0xff] %v22052_v45 }
 0x209   : > { %17905 = vmatprep.mubr.bf16.mxu0 %v8716_v34  ;;  %v2171_v34 = vrot.slane %v2169_v51, 1 }
 0x20a   : > { %v2167_v6 = vor.u32 %v2165_v31, %v2163_v26  ;;  %v2179_v31 = vrot.slane %v2177_v46, 1 }
 0x20b   : > { %v2175_v51 = vor.u32 %v2173_v13, %v2171_v34  ;;  %v2201_v13 = vshll.u32 %v21427_v59, 16 }
 0x20c   : > { %v22056_v10 = vsel %vm1824_vm0, %v2167_v6, %v2171_v34  ;;  %v24631_v6 = vld [vmem:[#allocation149_spill] sm:$0xff] }
 0x20d   : > { %24630 = vst [vmem:[#allocation182_spill] sm:$0xff] %v22056_v10  ;;  %v2193_v7 = vshll.u32 %v24631_v6, 16  ;;  %v22073_v46 = vsel %vm1824_vm0, %v2175_v51, %v2179_v31 }
 0x20e   : > { %24632 = vst [vmem:[#allocation149_spill] sm:$0xff] %v22073_v46 }
 0x20f   : > { %17122 = vmatmul.mubr.bf16.gmra.mrb[76].mxu1 %v22035_v58  ;;  %v2195_v36 = vrot.slane %v2193_v7, 1 }
 0x210   : > { %17906 = vmatmul.mubr.bf16.gmra.mrb[156].mxu0 %v8718_v61  ;;  %17125 = vmatprep.mubr.bf16.mxu1 %v22040_v1  ;;  %v2181_v61 = vshrl.u32 %v24628_v53, 16  ;;  %v2205_v1 = vshrl.u32 %v21427_v59, 16 }
 0x211   : > { %17925 = vmatprep.mubr.bf16.mxu0 %v24527_v17 }
 0x212   : > { %v2183_v26 = vor.u32 %v2181_v61, %v2179_v31  ;;  %v19971_v61 = vld [vmem:[%s23846_s1 + $0x1d8] sm:$0xff]  }
 0x214   : > { %v22077_v34 = vsel %vm1824_vm0, %v2183_v26, %v2187_v15  ;;  %v2203_v26 = vrot.slane %v2201_v13, 1 }
 0x215   : > { %24633 = vst [vmem:[#allocation183_spill] sm:$0xff] %v22077_v34 }
 0x217   : > { %17126 = vmatmul.mubr.bf16.gmra.mrb[80].mxu1 %v22052_v45  ;;  %v2189_v45 = vshrl.u32 %v21393_v28, 16 }
 0x218   : > { %17926 = vmatmul.mubr.bf16.vlgmr.msra.gmra.mrb[0].mxu0 %v24530_v12  ;;  %17129 = vmatprep.mubr.bf16.mxu1 %v22056_v10 }
 0x219   : > { %18086 = vmatpush3.bf16.msra.mxu0 %v21777_v40  ;;  %17929 = vmatprep.mubr.bf16.mxu0 %v24531_v62  ;;  %v2197_v40 = vshrl.u32 %v24631_v6, 16  ;;  %v2191_v31 = vor.u32 %v2189_v45, %v2187_v15  ;;  %v2217_v45 = vshll.u32 %v21451_v57, 16 }
 0x21a   : > { %18087 = vmatprep.subr.bf16.mxu0 %v19967_v60 }
 0x21b   : > { %v2199_v51 = vor.u32 %v2197_v40, %v2195_v36  ;;  %v22090_v10 = vsel %vm1824_vm0, %v2191_v31, %v2195_v36  ;;  %v2219_v13 = vrot.slane %v2217_v45, 1  ;;  %v24636_v36 = vld [vmem:[#allocation153_spill] sm:$0xff] }
 0x21c   : > { %24634 = vst [vmem:[#allocation184_spill] sm:$0xff] %v22090_v10  ;;  %v2225_v31 = vshll.u32 %v24636_v36, 16 }
 0x21d   : > { %18088 = vmatpush3.bf16.msra.mxu0 %v19967_v60  ;;  %v2209_v60 = vshll.u32 %v21431_v50, 16  ;;  %v22094_v7 = vsel %vm1824_vm0, %v2199_v51, %v2203_v26 }
 0x21e   : > { %18089 = vmatprep.subr.bf16.mxu0 %v19969_v4  ;;  %24635 = vst [vmem:[#allocation185_spill] sm:$0xff] %v22094_v7 }
 0x21f   : > { %17130 = vmatmul.mubr.bf16.gmra.mrb[84].mxu1 %v22073_v46  ;;  %v2213_v46 = vshrl.u32 %v21431_v50, 16  ;;  %v2211_v15 = vrot.slane %v2209_v60, 1  ;;  %v2229_v60 = vshrl.u32 %v24636_v36, 16 }
 0x220   : > { %17930 = vmatmul.mubr.bf16.gmra.mrb[4].mxu0 %v24534_v39  ;;  %17133 = vmatprep.mubr.bf16.mxu1 %v22077_v34  ;;  %v2221_v34 = vshrl.u32 %v21451_v57, 16 }
 0x221   : > { %17933 = vmatprep.mubr.bf16.mxu0 %v24537_v44  ;;  %18090 = vmatpush3.bf16.msra.mxu0 %v19969_v4  ;;  %v2207_v4 = vor.u32 %v2205_v1, %v2203_v26  ;;  %v2215_v40 = vor.u32 %v2213_v46, %v2211_v15  ;;  %v2227_v1 = vrot.slane %v2225_v31, 1 }
 0x222   : > { %18091 = vmatprep.subr.bf16.mxu0 %v19971_v61  ;;  %v2223_v46 = vor.u32 %v2221_v34, %v2219_v13 }
 0x223   : > { %v22104_v51 = vsel %vm1824_vm0, %v2207_v4, %v2211_v15  ;;  %v2231_v26 = vor.u32 %v2229_v60, %v2227_v1  ;;  %v24639_v15 = vld [vmem:[#allocation58_spill] sm:$0xff] }
 0x224   : > { %24637 = vst [vmem:[#allocation153_spill] sm:$0xff] %v22104_v51  ;;  %v2241_v4 = vshll.u32 %v24639_v15, 16  ;;  %v2245_v31 = vshrl.u32 %v24639_v15, 16  ;;  %v19974_v60 = vld [vmem:[%s23846_s1 + $0x1e0] sm:$0xff]  }
 0x225   : > { %18092 = vmatpush3.bf16.msra.mxu0 %v19971_v61  ;;  %v22108_v61 = vsel %vm1824_vm0, %v2215_v40, %v2219_v13  ;;  %v22118_v40 = vsel %vm1824_vm0, %v2223_v46, %v2227_v1 }
 0x226   : > { %24638 = vst [vmem:[#allocation186_spill] sm:$0xff] %v22108_v61  ;;  %24640 = vst [vmem:[#allocation58_spill] sm:$0xff] %v22118_v40  ;;  %v2243_v34 = vrot.slane %v2241_v4, 1  ;;  %18093 = vmatprep.subr.bf16.mxu0 %v19974_v60 }
 0x227   : > { %17134 = vmatmul.mubr.bf16.gmra.mrb[88].mxu1 %v22090_v10  ;;  %v2233_v10 = vshll.u32 %v21474_v56, 16 }
 0x228   : > { %17934 = vmatmul.mubr.bf16.gmra.mrb[8].mxu0 %v24540_v3  ;;  %17137 = vmatprep.mubr.bf16.mxu1 %v22094_v7  ;;  %v2237_v7 = vshrl.u32 %v21474_v56, 16  ;;  %v2247_v1 = vor.u32 %v2245_v31, %v2243_v34 }
 0x229   : > { %17937 = vmatprep.mubr.bf16.mxu0 %v24543_v22  ;;  %v2235_v45 = vrot.slane %v2233_v10, 1  ;;  %v22130_v10 = vld [vmem:[%s23846_s1 + $0xc0] sm:$0xff]   ;;  %18094 = vmatpush3.bf16.msra.mxu0 %v19974_v60  ;;  %v24647_v60 = vld [vmem:[#allocation71_spill] sm:$0xff] }
 0x22a   : > { %17381 = vmatprep.subr.bf16.mxu1 %v22130_v10 }
 0x22b   : > { %v22122_v58 = vsel %vm1824_vm0, %v2231_v26, %v2235_v45  ;;  %v2239_v13 = vor.u32 %v2237_v7, %v2235_v45  ;;  %v24643_v26 = vld [vmem:[#allocation67_spill] sm:$0xff] }
 0x22c   : > { %24641 = vst [vmem:[#allocation187_spill] sm:$0xff] %v22122_v58  ;;  %v2257_v4 = vshll.u32 %v24643_v26, 16  ;;  %v2261_v45 = vshrl.u32 %v24643_v26, 16 }
 0x22f   : > { %17138 = vmatmul.mubr.bf16.gmra.mrb[92].mxu1 %v22104_v51  ;;  %v24642_v51 = vld [vmem:[#allocation60_spill] sm:$0xff] }
 0x230   : > { %17938 = vmatmul.mubr.bf16.gmra.mrb[12].mxu0 %v24546_v23  ;;  %17141 = vmatprep.mubr.bf16.mxu1 %v22108_v61  ;;  %v2249_v16 = vshll.u32 %v24642_v51, 16  ;;  %v24646_v61 = vld [vmem:[#allocation74_spill] sm:$0xff] }
 0x231   : > { %17941 = vmatprep.mubr.bf16.mxu0 %v24549_v42  ;;  %v2265_v49 = vshll.u32 %v24646_v61, 16 }
 0x232   : > { %v2251_v46 = vrot.slane %v2249_v16, 1  ;;  %v2259_v16 = vrot.slane %v2257_v4, 1  ;;  %v2277_v4 = vshrl.u32 %v24647_v60, 16 }
 0x234   : > { %v22145_v7 = vsel %vm1824_vm0, %v2247_v1, %v2251_v46 }
 0x235   : > { %24645 = vst [vmem:[#allocation67_spill] sm:$0xff] %v22145_v7 }
 0x237   : > { %17142 = vmatmul.mubr.bf16.gmra.mrb[96].mxu1 %v22118_v40  ;;  %v22141_v40 = vsel %vm1824_vm0, %v2239_v13, %v2243_v34  ;;  %v2263_v34 = vor.u32 %v2261_v45, %v2259_v16  ;;  %v2267_v13 = vrot.slane %v2265_v49, 1 }
 0x238   : > { %17942 = vmatmul.mubr.bf16.gmra.mrb[16].mxu0 %v24552_v11  ;;  %17145 = vmatprep.mubr.bf16.mxu1 %v22122_v58  ;;  %24644 = vst [vmem:[#allocation60_spill] sm:$0xff] %v22141_v40  ;;  %v2253_v58 = vshrl.u32 %v24642_v51, 16  ;;  %v2269_v11 = vshrl.u32 %v24646_v61, 16 }
 0x239   : > { %17945 = vmatprep.mubr.bf16.mxu0 %v24555_v9  ;;  %v2273_v9 = vshll.u32 %v24647_v60, 16  ;;  %v22159_v42 = vsel %vm1824_vm0, %v2263_v34, %v2267_v13 }
 0x23a   : > { %v2255_v31 = vor.u32 %v2253_v58, %v2251_v46  ;;  %24649 = vst [vmem:[#allocation71_spill] sm:$0xff] %v22159_v42  ;;  %v2271_v49 = vor.u32 %v2269_v11, %v2267_v13 }
 0x23b   : > { %v2275_v58 = vrot.slane %v2273_v9, 1 }
 0x23c   : > { %v22155_v1 = vsel %vm1824_vm0, %v2255_v31, %v2259_v16  ;;  %v24650_v16 = vld [vmem:[#allocation80_spill] sm:$0xff] }
 0x23d   : > { %24648 = vst [vmem:[#allocation74_spill] sm:$0xff] %v22155_v1  ;;  %v2279_v46 = vor.u32 %v2277_v4, %v2275_v58  ;;  %v2289_v31 = vshll.u32 %v24650_v16, 16  ;;  %v22169_v34 = vsel %vm1824_vm0, %v2271_v49, %v2275_v58  ;;  %v2293_v9 = vshrl.u32 %v24650_v16, 16  ;;  %v24654_v58 = vld [vmem:[#allocation84_spill] sm:$0xff] }
 0x23e   : > { %24651 = vst [vmem:[#allocation80_spill] sm:$0xff] %v22169_v34  ;;  %v2305_v49 = vshll.u32 %v24654_v58, 16 }
 0x23f   : > { %17146 = vmatmul.mubr.bf16.gmra.mrb[100].mxu1 %v22141_v40  ;;  %v2281_v40 = vshll.u32 %v21516_v52, 16  ;;  %v2291_v11 = vrot.slane %v2289_v31, 1  ;;  %v2309_v31 = vshrl.u32 %v24654_v58, 16 }
 0x240   : > { %17946 = vmatmul.mubr.bf16.gmra.mrb[20].mxu0 %v24558_v33  ;;  %17149 = vmatprep.mubr.bf16.mxu1 %v22145_v7  ;;  %v2285_v7 = vshrl.u32 %v21516_v52, 16 }
 0x241   : > { %17949 = vmatprep.mubr.bf16.mxu0 %v24561_v32  ;;  %v2283_v45 = vrot.slane %v2281_v40, 1  ;;  %v2295_v13 = vor.u32 %v2293_v9, %v2291_v11 }
 0x243   : > { %v22173_v32 = vsel %vm1824_vm0, %v2279_v46, %v2283_v45  ;;  %v2287_v40 = vor.u32 %v2285_v7, %v2283_v45  ;;  %v2307_v7 = vrot.slane %v2305_v49, 1 }
 0x244   : > { %24652 = vst [vmem:[#allocation188_spill] sm:$0xff] %v22173_v32 }
 0x245   : > { %v22183_v46 = vsel %vm1824_vm0, %v2287_v40, %v2291_v11  ;;  %v2311_v45 = vor.u32 %v2309_v31, %v2307_v7  ;;  %v24657_v11 = vld [vmem:[#allocation81_spill] sm:$0xff]  ;;  %v19976_v31 = vld [vmem:[%s23846_s1 + $0x1e8] sm:$0xff]  }
 0x246   : > { %v2321_v40 = vshll.u32 %v24657_v11, 16  ;;  %v2325_v49 = vshrl.u32 %v24657_v11, 16  ;;  %18095 = vmatprep.subr.bf16.mxu0 %v19976_v31 }
 0x247   : > { %17150 = vmatmul.mubr.bf16.gmra.mrb[104].mxu1 %v22155_v1  ;;  %v24653_v1 = vld [vmem:[#allocation75_spill] sm:$0xff]  ;;  %18096 = vmatpush3.bf16.msra.mxu0 %v19976_v31 }
 0x248   : > { %17950 = vmatmul.mubr.bf16.gmra.mrb[24].mxu0 %v24564_v2  ;;  %17153 = vmatprep.mubr.bf16.mxu1 %v22159_v42  ;;  %v2297_v2 = vshll.u32 %v24653_v1, 16  ;;  %24655 = vst [vmem:[#allocation75_spill] sm:$0xff] %v22183_v46  ;;  %v2301_v42 = vshrl.u32 %v24653_v1, 16  ;;  %v24666_v31 = vld [vmem:[#allocation91_spill] sm:$0xff] }
 0x249   : > { %17953 = vmatprep.mubr.bf16.mxu0 %v24567_v20 }
 0x24a   : > { %v2299_v4 = vrot.slane %v2297_v2, 1 }
 0x24c   : > { %v22187_v20 = vsel %vm1824_vm0, %v2295_v13, %v2299_v4  ;;  %v2303_v2 = vor.u32 %v2301_v42, %v2299_v4  ;;  %v2323_v42 = vrot.slane %v2321_v40, 1  ;;  %v24661_v4 = vld [vmem:[#allocation70_spill] sm:$0xff] }
 0x24d   : > { %24656 = vst [vmem:[#allocation84_spill] sm:$0xff] %v22187_v20 }
 0x24e   : > { %v22197_v13 = vsel %vm1824_vm0, %v2303_v2, %v2307_v7  ;;  %v2327_v7 = vor.u32 %v2325_v49, %v2323_v42 }
 0x24f   : > { %17154 = vmatmul.mubr.bf16.gmra.mrb[108].mxu1 %v22169_v34  ;;  %v2313_v34 = vshll.u32 %v21547_v55, 16  ;;  %24658 = vst [vmem:[#allocation81_spill] sm:$0xff] %v22197_v13 }
 0x250   : > { %17954 = vmatmul.mubr.bf16.gmra.mrb[28].mxu0 %v24570_v47  ;;  %17157 = vmatprep.mubr.bf16.mxu1 %v22173_v32  ;;  %v2317_v32 = vshrl.u32 %v21547_v55, 16 }
 0x251   : > { %17957 = vmatprep.mubr.bf16.mxu0 %v24573_v5  ;;  %v2315_v9 = vrot.slane %v2313_v34, 1 }
 0x253   : > { %v22201_v5 = vsel %vm1824_vm0, %v2311_v45, %v2315_v9  ;;  %v2319_v34 = vor.u32 %v2317_v32, %v2315_v9  ;;  %v24662_v45 = vld [vmem:[#allocation85_spill] sm:$0xff]  ;;  %v24665_v9 = vld [vmem:[#allocation94_spill] sm:$0xff] }
 0x254   : > { %24659 = vst [vmem:[#allocation189_spill] sm:$0xff] %v22201_v5  ;;  %v2341_v32 = vshrl.u32 %v24662_v45, 16 }
 0x257   : > { %17158 = vmatmul.mubr.bf16.gmra.mrb[112].mxu1 %v22183_v46  ;;  %v24660_v46 = vld [vmem:[#allocation90_spill] sm:$0xff] }
 0x258   : > { %17958 = vmatmul.mubr.bf16.gmra.mrb[32].mxu0 %v24576_v35  ;;  %17161 = vmatprep.mubr.bf16.mxu1 %v22187_v20  ;;  %v2329_v35 = vshll.u32 %v24660_v46, 16  ;;  %v2337_v20 = vshll.u32 %v24662_v45, 16  ;;  %v2333_v40 = vshrl.u32 %v24660_v46, 16 }
 0x259   : > { %17961 = vmatprep.mubr.bf16.mxu0 %v24579_v27  ;;  %v2349_v27 = vshrl.u32 %v24665_v9, 16 }
 0x25a   : > { %v2331_v2 = vrot.slane %v2329_v35, 1  ;;  %v2339_v49 = vrot.slane %v2337_v20, 1  ;;  %v2357_v20 = vshrl.u32 %v24666_v31, 16 }
 0x25c   : > { %v2335_v35 = vor.u32 %v2333_v40, %v2331_v2 }
 0x25f   : > { %17162 = vmatmul.mubr.bf16.gmra.mrb[116].mxu1 %v22197_v13  ;;  %v22214_v13 = vsel %vm1824_vm0, %v2319_v34, %v2323_v42  ;;  %v2343_v42 = vor.u32 %v2341_v32, %v2339_v49 }
 0x260   : > { %17962 = vmatmul.mubr.bf16.gmra.mrb[36].mxu0 %v24661_v4  ;;  %17165 = vmatprep.mubr.bf16.mxu1 %v22201_v5  ;;  %24663 = vst [vmem:[#allocation90_spill] sm:$0xff] %v22214_v13  ;;  %v22218_v5 = vsel %vm1824_vm0, %v2327_v7, %v2331_v2  ;;  %v2345_v4 = vshll.u32 %v24665_v9, 16  ;;  %v22228_v7 = vsel %vm1824_vm0, %v2335_v35, %v2339_v49  ;;  %v24670_v49 = vld [vmem:[#allocation95_spill] sm:$0xff] }
 0x261   : > { %17965 = vmatprep.mubr.bf16.mxu0 %v24585_v25  ;;  %24664 = vst [vmem:[#allocation190_spill] sm:$0xff] %v22218_v5  ;;  %v2353_v25 = vshll.u32 %v24666_v31, 16  ;;  %24667 = vst [vmem:[#allocation94_spill] sm:$0xff] %v22228_v7  ;;  %v2369_v35 = vshll.u32 %v24670_v49, 16 }
 0x262   : > { %v2347_v34 = vrot.slane %v2345_v4, 1 }
 0x263   : > { %v2355_v2 = vrot.slane %v2353_v25, 1  ;;  %v2373_v25 = vshrl.u32 %v24670_v49, 16 }
 0x264   : > { %v22232_v45 = vsel %vm1824_vm0, %v2343_v42, %v2347_v34  ;;  %v2351_v4 = vor.u32 %v2349_v27, %v2347_v34  ;;  %v2371_v27 = vrot.slane %v2369_v35, 1 }
 0x265   : > { %24668 = vst [vmem:[#allocation91_spill] sm:$0xff] %v22232_v45  ;;  %v2359_v40 = vor.u32 %v2357_v20, %v2355_v2 }
 0x266   : > { %v22242_v42 = vsel %vm1824_vm0, %v2351_v4, %v2355_v2  ;;  %v2375_v34 = vor.u32 %v2373_v25, %v2371_v27  ;;  %v24674_v2 = vld [vmem:[#allocation101_spill] sm:$0xff] }
 0x267   : > { %17166 = vmatmul.mubr.bf16.gmra.mrb[120].mxu1 %v22214_v13  ;;  %v24669_v13 = vld [vmem:[#allocation100_spill] sm:$0xff]  ;;  %v2385_v4 = vshll.u32 %v24674_v2, 16  ;;  %v2389_v35 = vshrl.u32 %v24674_v2, 16 }
 0x268   : > { %17966 = vmatmul.mubr.bf16.gmra.mrb[40].mxu0 %v24588_v38  ;;  %17169 = vmatprep.mubr.bf16.mxu1 %v22218_v5  ;;  %v2361_v38 = vshll.u32 %v24669_v13, 16  ;;  %24671 = vst [vmem:[#allocation100_spill] sm:$0xff] %v22242_v42  ;;  %v2365_v5 = vshrl.u32 %v24669_v13, 16 }
 0x269   : > { %17969 = vmatprep.mubr.bf16.mxu0 %v24591_v54 }
 0x26a   : > { %v2363_v32 = vrot.slane %v2361_v38, 1 }
 0x26c   : > { %v22246_v54 = vsel %vm1824_vm0, %v2359_v40, %v2363_v32  ;;  %v2367_v38 = vor.u32 %v2365_v5, %v2363_v32  ;;  %v2387_v5 = vrot.slane %v2385_v4, 1 }
 0x26d   : > { %24672 = vst [vmem:[#allocation95_spill] sm:$0xff] %v22246_v54 }
 0x26e   : > { %v22256_v40 = vsel %vm1824_vm0, %v2367_v38, %v2371_v27  ;;  %v2391_v32 = vor.u32 %v2389_v35, %v2387_v5  ;;  %v24678_v27 = vld [vmem:[#allocation105_spill] sm:$0xff] }
 0x26f   : > { %17170 = vmatmul.mubr.bf16.gmra.mrb[124].mxu1 %v22228_v7  ;;  %v24673_v7 = vld [vmem:[#allocation104_spill] sm:$0xff]  ;;  %v2401_v38 = vshll.u32 %v24678_v27, 16  ;;  %v2405_v4 = vshrl.u32 %v24678_v27, 16 }
 0x270   : > { %17970 = vmatmul.mubr.bf16.gmra.mrb[44].mxu0 %v24592_v29  ;;  %17173 = vmatprep.mubr.bf16.mxu1 %v22232_v45  ;;  %v2377_v29 = vshll.u32 %v24673_v7, 16  ;;  %24675 = vst [vmem:[#allocation104_spill] sm:$0xff] %v22256_v40  ;;  %v2381_v45 = vshrl.u32 %v24673_v7, 16 }
 0x271   : > { %17973 = vmatprep.mubr.bf16.mxu0 %v24595_v30 }
 0x272   : > { %v2379_v20 = vrot.slane %v2377_v29, 1 }
 0x274   : > { %v22260_v30 = vsel %vm1824_vm0, %v2375_v34, %v2379_v20  ;;  %v2383_v29 = vor.u32 %v2381_v45, %v2379_v20  ;;  %v2403_v45 = vrot.slane %v2401_v38, 1  ;;  %v19978_v20 = vld [vmem:[%s23846_s1 + $0x1f0] sm:$0xff]  }
 0x275   : > { %24676 = vst [vmem:[#allocation101_spill] sm:$0xff] %v22260_v30  ;;  %18097 = vmatprep.subr.bf16.mxu0 %v19978_v20 }
 0x276   : > { %v22270_v34 = vsel %vm1824_vm0, %v2383_v29, %v2387_v5  ;;  %v2407_v35 = vor.u32 %v2405_v4, %v2403_v45  ;;  %v24682_v29 = vld [vmem:[#allocation111_spill] sm:$0xff]  ;;  %18098 = vmatpush3.bf16.msra.mxu0 %v19978_v20 }
 0x277   : > { %17174 = vmatmul.mubr.bf16.gmra.mrb[128].mxu1 %v22242_v42  ;;  %v24677_v42 = vld [vmem:[#allocation110_spill] sm:$0xff] }
 0x278   : > { %17974 = vmatmul.mubr.bf16.gmra.mrb[48].mxu0 %v24596_v0  ;;  %17177 = vmatprep.mubr.bf16.mxu1 %v22246_v54  ;;  %v2393_v0 = vshll.u32 %v24677_v42, 16  ;;  %24679 = vst [vmem:[#allocation110_spill] sm:$0xff] %v22270_v34  ;;  %v2397_v54 = vshrl.u32 %v24677_v42, 16 }
 0x279   : > { %17977 = vmatprep.mubr.bf16.mxu0 %v24599_v24 }
 0x27a   : > { %v2395_v25 = vrot.slane %v2393_v0, 1 }
 0x27c   : > { %v22274_v24 = vsel %vm1824_vm0, %v2391_v32, %v2395_v25  ;;  %v2399_v0 = vor.u32 %v2397_v54, %v2395_v25  ;;  %v2417_v32 = vshll.u32 %v24682_v29, 16  ;;  %v2421_v54 = vshrl.u32 %v24682_v29, 16  ;;  %v24685_v25 = vld [vmem:[#allocation115_spill] sm:$0xff] }
 0x27d   : > { %24680 = vst [vmem:[#allocation105_spill] sm:$0xff] %v22274_v24 }
 0x27e   : > { %v2419_v4 = vrot.slane %v2417_v32, 1 }
 0x27f   : > { %17178 = vmatmul.mubr.bf16.gmra.mrb[132].mxu1 %v22256_v40  ;;  %v24681_v40 = vld [vmem:[#allocation114_spill] sm:$0xff] }
 0x280   : > { %17978 = vmatmul.mubr.bf16.gmra.mrb[52].mxu0 %v24600_v14  ;;  %17181 = vmatprep.mubr.bf16.mxu1 %v22260_v30  ;;  %v2409_v14 = vshll.u32 %v24681_v40, 16  ;;  %v2413_v38 = vshrl.u32 %v24681_v40, 16  ;;  %v2425_v30 = vshll.u32 %v24685_v25, 16 }
 0x281   : > { %17981 = vmatprep.mubr.bf16.mxu0 %v24603_v43  ;;  %v2429_v43 = vshrl.u32 %v24685_v25, 16 }
 0x282   : > { %v2411_v5 = vrot.slane %v2409_v14, 1  ;;  %v24686_v14 = vld [vmem:[#allocation128_spill] sm:$0xff] }
 0x284   : > { %v2415_v20 = vor.u32 %v2413_v38, %v2411_v5  ;;  %v24690_v38 = vld [vmem:[#allocation134_spill] sm:$0xff] }
 0x287   : > { %17182 = vmatmul.mubr.bf16.gmra.mrb[136].mxu1 %v22270_v34  ;;  %v22287_v34 = vsel %vm1824_vm0, %v2399_v0, %v2403_v45  ;;  %v2423_v45 = vor.u32 %v2421_v54, %v2419_v4  ;;  %v2427_v0 = vrot.slane %v2425_v30, 1 }
 0x288   : > { %17982 = vmatmul.mubr.bf16.gmra.mrb[56].mxu0 %v24604_v18  ;;  %17185 = vmatprep.mubr.bf16.mxu1 %v22274_v24  ;;  %24683 = vst [vmem:[#allocation114_spill] sm:$0xff] %v22287_v34  ;;  %v22291_v24 = vsel %vm1824_vm0, %v2407_v35, %v2411_v5  ;;  %v22301_v35 = vsel %vm1824_vm0, %v2415_v20, %v2419_v4  ;;  %v24691_v20 = vld [vmem:[#allocation124_spill] sm:$0xff] }
 0x289   : > { %17985 = vmatprep.mubr.bf16.mxu0 %v24607_v41  ;;  %24684 = vst [vmem:[#allocation191_spill] sm:$0xff] %v22291_v24  ;;  %v24687_v41 = vld [vmem:[#allocation123_spill] sm:$0xff]  ;;  %24688 = vst [vmem:[#allocation115_spill] sm:$0xff] %v22301_v35  ;;  %v22305_v29 = vsel %vm1824_vm0, %v2423_v45, %v2427_v0  ;;  %v2431_v30 = vor.u32 %v2429_v43, %v2427_v0  ;;  %v24695_v0 = vld [vmem:[#allocation172_spill] sm:$0xff] }
 0x28a   : > { %v2433_v18 = vshll.u32 %v24687_v41, 16  ;;  %v2437_v32 = vshrl.u32 %v24687_v41, 16 }
 0x28c   : > { %v2435_v5 = vrot.slane %v2433_v18, 1  ;;  %v2453_v18 = vshrl.u32 %v24691_v20, 16 }
 0x28e   : > { %v2439_v54 = vor.u32 %v2437_v32, %v2435_v5  ;;  %v22315_v45 = vsel %vm1824_vm0, %v2431_v30, %v2435_v5  ;;  %v22328_v32 = vcombine.low %v24695_v0, %v24695_v0 }
 0x28f   : > { %17186 = vmatmul.mubr.bf16.gmra.mrb[140].mxu1 %v22287_v34  ;;  %v24689_v34 = vld [vmem:[#allocation120_spill] sm:$0xff] }
 0x290   : > { %17986 = vmatmul.mubr.bf16.gmra.mrb[60].mxu0 %v24686_v14  ;;  %17189 = vmatprep.mubr.bf16.mxu1 %v22291_v24  ;;  %v2441_v14 = vshll.u32 %v24689_v34, 16  ;;  %v2449_v24 = vshll.u32 %v24691_v20, 16  ;;  %24692 = vst [vmem:[#allocation120_spill] sm:$0xff] %v22315_v45 }
 0x291   : > { %17989 = vmatprep.mubr.bf16.mxu0 %v21238_v63  ;;  %v2445_v63 = vshrl.u32 %v24689_v34, 16 }
 0x292   : > { %v2443_v4 = vrot.slane %v2441_v14, 1  ;;  %v2451_v43 = vrot.slane %v2449_v24, 1 }
 0x294   : > { %v22319_v41 = vsel %vm1824_vm0, %v2439_v54, %v2443_v4  ;;  %v2447_v14 = vor.u32 %v2445_v63, %v2443_v4  ;;  %v2455_v5 = vor.u32 %v2453_v18, %v2451_v43 }
 0x295   : > { %24693 = vst [vmem:[#allocation124_spill] sm:$0xff] %v22319_v41 }
 0x296   : > { %v22332_v54 = vsel %vm1824_vm0, %v2447_v14, %v2451_v43  ;;  %v20003_v43 = vld [vmem:[%s20225_s13 + $0x8] sm:$0xff]  }
 0x297   : > { %17190 = vmatmul.mubr.bf16.gmra.mrb[144].mxu1 %v22301_v35  ;;  %v24694_v35 = vld [vmem:[#allocation130_spill] sm:$0xff]  ;;  %v3769_v14 = vrot.slane %v20003_v43, 1 }
 0x298   : > { %17990 = vmatmul.mubr.bf16.gmra.mrb[64].mxu0 %v24690_v38  ;;  %17193 = vmatprep.mubr.bf16.mxu1 %v22305_v29  ;;  %v2457_v38 = vshll.u32 %v24694_v35, 16  ;;  %24696 = vst [vmem:[#allocation130_spill] sm:$0xff] %v22332_v54  ;;  %v2461_v24 = vshrl.u32 %v24694_v35, 16 }
 0x299   : > { %17993 = vmatprep.mubr.bf16.mxu0 %v24617_v8 }
 0x29a   : > { %v2459_v30 = vrot.slane %v2457_v38, 1  ;;  %v20002_v38 = vld [vmem:[%s20225_s13] sm:$0xff]  }
 0x29b   : > { %v3768_v18 = vrot.slane %v20002_v38, 1 }
 0x29c   : > { %v22342_v63 = vor.u32 %v2461_v24, %v2459_v30 }
 0x29f   : > { %17194 = vmatmul.mubr.bf16.gmra.mrb[148].mxu1 %v22315_v45  ;;  %v2465_v45 = vshll.u32 %v22328_v32, 16 }
 0x2a0   : > { %17994 = vmatmul.mubr.bf16.gmra.mrb[68].mxu0 %v24620_v19  ;;  %17197 = vmatprep.mubr.bf16.mxu1 %v22319_v41  ;;  %v22337_v41 = vsel %vm1824_vm0, %v2455_v5, %v2459_v30  ;;  %v3770_v5 = vsel %vm3767_vm1, %v3768_v18, %v3769_v14  ;;  %v24699_v30 = vld [vmem:[#allocation15_spill] sm:$0xff] }
 0x2a1   : > { %17997 = vmatprep.mubr.bf16.mxu0 %v24624_v21  ;;  %24697 = vst [vmem:[#allocation172_spill] sm:$0xff] %v22337_v41  ;;  %v2467_v4 = vrot.slane %v2465_v45, 1  ;;  %v19980_v45 = vld [vmem:[%s23846_s1 + $0x1f8] sm:$0xff]   ;;  %v3773_v24 = vrot.slane %v24699_v30, 1  ;;  %v19975_v18 = vld [vmem:[%s23846_s1 + $0xc8] sm:$0xff]  }
 0x2a2   : > { %18099 = vmatprep.subr.bf16.mxu0 %v19980_v45 }
 0x2a3   : > { %v2468_v0 = vsel %vm1824_vm0, %v22342_v63, %v2467_v4  ;;  %18100 = vmatpush3.bf16.msra.mxu0 %v19980_v45  ;;  %v3781_v45 = vrot.slane %v24531_v62, 1  ;;  %v3785_v62 = vrot.slane %v24537_v44, 1 }
 0x2a7   : > { %17198 = vmatmul.mubr.bf16.gmra.mrb[152].mxu1 %v22332_v54  ;;  %v24698_v54 = vld [vmem:[#allocation12_spill] sm:$0xff] }
 0x2a8   : > { %17998 = vmatmul.mubr.bf16.gmra.mrb[72].mxu0 %v24625_v48  ;;  %17201 = vmatprep.mubr.bf16.mxu1 %v22337_v41  ;;  %v3771_v41 = vrot.slane %v24698_v54, 1  ;;  %v24700_v54 = vld [vmem:[#allocation16_spill] sm:$0xff] }
 0x2a9   : > { %18001 = vmatprep.mubr.bf16.mxu0 %v21356_v37  ;;  %v3775_v43 = vrot.slane %v24700_v54, 1 }
 0x2aa   : > { %v3772_v4 = vsel %vm3767_vm1, %v3769_v14, %v3771_v41  ;;  %v3774_v38 = vsel %vm3767_vm1, %v3771_v41, %v3773_v24  ;;  %v19977_v41 = vld [vmem:[%s23846_s1 + $0xd0] sm:$0xff]  }
 0x2ab   : > { %v3776_v14 = vsel %vm3767_vm1, %v3773_v24, %v3775_v43 }
 0x2af   : > { %17202 = vmatmul.mubr.bf16.gmra.mrb[156].mxu1 %v2468_v0  ;;  %v3777_v0 = vrot.slane %v24527_v17, 1  ;;  %v3779_v17 = vrot.slane %v24530_v12, 1  ;;  %v3783_v12 = vrot.slane %v24534_v39, 1  ;;  %v3789_v39 = vrot.slane %v24543_v22, 1  ;;  %v22419_v22 = vld [vmem:[%s23846_s1 + $0x200] sm:$0xff]  }
 0x2b0   : > { %18002 = vmatmul.mubr.bf16.gmra.mrb[76].mxu0 %v24628_v53  ;;  %17221 = vmatprep.mubr.bf16.mxu1 %v3770_v5 }
 0x2b1   : > { %18005 = vmatprep.mubr.bf16.mxu0 %v21393_v28  ;;  %v3778_v5 = vsel %vm3767_vm1, %v3775_v43, %v3777_v0  ;;  %v22380_v30 = vsel %vm3767_vm1, %v3777_v0, %v3779_v17  ;;  %v22383_v24 = vsel %vm3767_vm1, %v3779_v17, %v3781_v45  ;;  %v19986_v43 = vld [vmem:[%s23846_s1 + $0xe0] sm:$0xff]   ;;  %v24701_v0 = vld [vmem:[#allocation35_spill] sm:$0xff]  ;;  %18261 = vmatprep.subr.bf16.mxu0 %v22419_v22 }
 0x2b2   : > { %v24705_v17 = vld [vmem:[#allocation39_spill] sm:$0xff] }
 0x2b7   : > { %17222 = vmatmul.mubr.bf16.vlgmr.msra.gmra.mrb[0].mxu1 %v3772_v4  ;;  %v22392_v4 = vsel %vm3767_vm1, %v3781_v45, %v3783_v12  ;;  %v3797_v45 = vrot.slane %v24705_v17, 1 }
 0x2b8   : > { %18006 = vmatmul.mubr.bf16.gmra.mrb[80].mxu0 %v24631_v6  ;;  %17382 = vmatpush3.bf16.msra.mxu1 %v22130_v10  ;;  %v19979_v10 = vld [vmem:[%s23846_s1 + $0xd8] sm:$0xff]  }
 0x2b9   : > { %17225 = vmatprep.mubr.bf16.mxu1 %v3774_v38  ;;  %18009 = vmatprep.mubr.bf16.mxu0 %v21427_v59  ;;  %v22395_v38 = vsel %vm3767_vm1, %v3783_v12, %v3785_v62 }
 0x2ba   : > { %17383 = vmatprep.subr.bf16.mxu1 %v19975_v18 }
 0x2bc   : > { %17384 = vmatpush3.bf16.msra.mxu1 %v19975_v18  ;;  %v3787_v18 = vrot.slane %v24540_v3, 1  ;;  %v3791_v3 = vrot.slane %v24546_v23, 1  ;;  %v24704_v23 = vld [vmem:[#allocation36_spill] sm:$0xff] }
 0x2bd   : > { %17385 = vmatprep.subr.bf16.mxu1 %v19977_v41 }
 0x2be   : > { %v22404_v44 = vsel %vm3767_vm1, %v3785_v62, %v3787_v18  ;;  %v22407_v54 = vsel %vm3767_vm1, %v3787_v18, %v3789_v39  ;;  %v3799_v18 = vrot.slane %v24558_v33, 1  ;;  %v24712_v33 = vld [vmem:[#allocation55_spill] sm:$0xff] }
 0x2bf   : > { %17226 = vmatmul.mubr.bf16.gmra.mrb[4].mxu1 %v3776_v14  ;;  %v22425_v14 = vsel %vm3767_vm1, %v3789_v39, %v3791_v3  ;;  %v24708_v39 = vld [vmem:[#allocation43_spill] sm:$0xff] }
 0x2c0   : > { %18010 = vmatmul.mubr.bf16.gmra.mrb[84].mxu0 %v21431_v50  ;;  %17229 = vmatprep.mubr.bf16.mxu1 %v3778_v5  ;;  %24702 = vst [vmem:[#allocation12_spill] sm:$0xff] %v22425_v14 }
 0x2c1   : > { %18013 = vmatprep.mubr.bf16.mxu0 %v21451_v57  ;;  %17386 = vmatpush3.bf16.msra.mxu1 %v19977_v41  ;;  %v3793_v41 = vrot.slane %v24701_v0, 1 }
 0x2c2   : > { %17387 = vmatprep.subr.bf16.mxu1 %v19979_v10 }
 0x2c3   : > { %v22428_v5 = vsel %vm3767_vm1, %v3791_v3, %v3793_v41  ;;  %v22449_v3 = vsel %vm3767_vm1, %v3797_v45, %v3799_v18 }
 0x2c4   : > { %24703 = vst [vmem:[#allocation15_spill] sm:$0xff] %v22428_v5  ;;  %24709 = vst [vmem:[#allocation36_spill] sm:$0xff] %v22449_v3 }
 0x2c5   : > { %17388 = vmatpush3.bf16.msra.mxu1 %v19979_v10  ;;  %v3795_v10 = vrot.slane %v24704_v23, 1 }
 0x2c6   : > { %17389 = vmatprep.subr.bf16.mxu1 %v19986_v43 }
 0x2c7   : > { %17230 = vmatmul.mubr.bf16.gmra.mrb[8].mxu1 %v22380_v30  ;;  %v22437_v12 = vsel %vm3767_vm1, %v3793_v41, %v3795_v10  ;;  %v22440_v62 = vsel %vm3767_vm1, %v3795_v10, %v3797_v45  ;;  %v24711_v41 = vld [vmem:[#allocation45_spill] sm:$0xff]  ;;  %v3805_v10 = vrot.slane %v24712_v33, 1 }
 0x2c8   : > { %18014 = vmatmul.mubr.bf16.gmra.mrb[88].mxu0 %v24636_v36  ;;  %17233 = vmatprep.mubr.bf16.mxu1 %v22383_v24  ;;  %24706 = vst [vmem:[#allocation16_spill] sm:$0xff] %v22437_v12  ;;  %24707 = vst [vmem:[#allocation35_spill] sm:$0xff] %v22440_v62  ;;  %v3803_v23 = vrot.slane %v24711_v41, 1 }
 0x2c9   : > { %18017 = vmatprep.mubr.bf16.mxu0 %v21474_v56  ;;  %17390 = vmatpush3.bf16.msra.mxu1 %v19986_v43  ;;  %v3801_v43 = vrot.slane %v24708_v39, 1  ;;  %v24715_v39 = vld [vmem:[#allocation62_spill] sm:$0xff] }
 0x2ca   : > { %v22464_v45 = vsel %vm3767_vm1, %v3803_v23, %v3805_v10  ;;  %v3809_v41 = vrot.slane %v24715_v39, 1  ;;  %v24720_v39 = vld [vmem:[#allocation69_spill] sm:$0xff] }
 0x2cb   : > { %v22452_v0 = vsel %vm3767_vm1, %v3799_v18, %v3801_v43  ;;  %v22461_v17 = vsel %vm3767_vm1, %v3801_v43, %v3803_v23  ;;  %24714 = vst [vmem:[#allocation45_spill] sm:$0xff] %v22464_v45  ;;  %v3807_v18 = vrot.slane %v24570_v47, 1  ;;  %v19988_v23 = vld [vmem:[%s23846_s1 + $0xe8] sm:$0xff]  }
 0x2cc   : > { %24710 = vst [vmem:[#allocation39_spill] sm:$0xff] %v22452_v0  ;;  %24713 = vst [vmem:[#allocation43_spill] sm:$0xff] %v22461_v17  ;;  %v24719_v47 = vld [vmem:[#allocation63_spill] sm:$0xff]  ;;  %17391 = vmatprep.subr.bf16.mxu1 %v19988_v23 }
 0x2cd   : > { %v22473_v33 = vsel %vm3767_vm1, %v3805_v10, %v3807_v18  ;;  %v22476_v43 = vsel %vm3767_vm1, %v3807_v18, %v3809_v41  ;;  %v3813_v10 = vrot.slane %v24720_v39, 1  ;;  %17392 = vmatpush3.bf16.msra.mxu1 %v19988_v23 }
 0x2ce   : > { %24716 = vst [vmem:[#allocation55_spill] sm:$0xff] %v22473_v33  ;;  %24717 = vst [vmem:[#allocation62_spill] sm:$0xff] %v22476_v43 }
 0x2cf   : > { %17234 = vmatmul.mubr.bf16.gmra.mrb[12].mxu1 %v22392_v4 }
 0x2d0   : > { %18018 = vmatmul.mubr.bf16.gmra.mrb[92].mxu0 %v24639_v15  ;;  %17237 = vmatprep.mubr.bf16.mxu1 %v22395_v38 }
 0x2d1   : > { %18021 = vmatprep.mubr.bf16.mxu0 %v24642_v51 }
 0x2d7   : > { %17238 = vmatmul.mubr.bf16.gmra.mrb[16].mxu1 %v22404_v44 }
 0x2d8   : > { %18022 = vmatmul.mubr.bf16.gmra.mrb[96].mxu0 %v24643_v26  ;;  %17241 = vmatprep.mubr.bf16.mxu1 %v22407_v54 }
 0x2d9   : > { %18025 = vmatprep.mubr.bf16.mxu0 %v24646_v61 }
 0x2df   : > { %17242 = vmatmul.mubr.bf16.gmra.mrb[20].mxu1 %v22425_v14 }
 0x2e0   : > { %18026 = vmatmul.mubr.bf16.gmra.mrb[100].mxu0 %v24647_v60  ;;  %17245 = vmatprep.mubr.bf16.mxu1 %v22428_v5  ;;  %v20006_v5 = vld [vmem:[%s20225_s13 + $0x288] sm:$0xf] }
 0x2e1   : > { %18029 = vmatprep.mubr.bf16.mxu0 %v21516_v52 }
 0x2e7   : > { %17246 = vmatmul.mubr.bf16.gmra.mrb[24].mxu1 %v22437_v12  ;;  %v20005_v12 = vld [vmem:[%s20225_s13 + $0x284] sm:$0xf] }
 0x2e8   : > { %18030 = vmatmul.mubr.bf16.gmra.mrb[104].mxu0 %v24650_v16  ;;  %17249 = vmatprep.mubr.bf16.mxu1 %v22440_v62 }
 0x2e9   : > { %18033 = vmatprep.mubr.bf16.mxu0 %v24653_v1 }
 0x2ef   : > { %17250 = vmatmul.mubr.bf16.gmra.mrb[28].mxu1 %v22449_v3  ;;  %v24744_v3 = vld [vmem:[#allocation123_spill] sm:$0xff] }
 0x2f0   : > { %18034 = vmatmul.mubr.bf16.gmra.mrb[108].mxu0 %v24654_v58  ;;  %17253 = vmatprep.mubr.bf16.mxu1 %v22452_v0  ;;  %v24724_v0 = vld [vmem:[#allocation78_spill] sm:$0xff] }
 0x2f1   : > { %18037 = vmatprep.mubr.bf16.mxu0 %v21547_v55  ;;  %v3817_v39 = vrot.slane %v24724_v0, 1 }
 0x2f7   : > { %17254 = vmatmul.mubr.bf16.gmra.mrb[32].mxu1 %v22461_v17  ;;  %v24718_v17 = vld [vmem:[#allocation85_spill] sm:$0xff] }
 0x2f8   : > { %18038 = vmatmul.mubr.bf16.gmra.mrb[112].mxu0 %v24657_v11  ;;  %17257 = vmatprep.mubr.bf16.mxu1 %v22464_v45  ;;  %v3811_v45 = vrot.slane %v24719_v47, 1 }
 0x2f9   : > { %18041 = vmatprep.mubr.bf16.mxu0 %v24660_v46 }
 0x2fa   : > { %v22488_v18 = vsel %vm3767_vm1, %v3809_v41, %v3811_v45 }
 0x2fb   : > { %24721 = vst [vmem:[#allocation85_spill] sm:$0xff] %v22488_v18 }
 0x2ff   : > { %17258 = vmatmul.mubr.bf16.gmra.mrb[36].mxu1 %v22473_v33  ;;  %v22491_v33 = vsel %vm3767_vm1, %v3811_v45, %v3813_v10  ;;  %v24727_v45 = vld [vmem:[#allocation79_spill] sm:$0xff] }
 0x300   : > { %18042 = vmatmul.mubr.bf16.gmra.mrb[116].mxu0 %v24718_v17  ;;  %17261 = vmatprep.mubr.bf16.mxu1 %v22476_v43  ;;  %24722 = vst [vmem:[#allocation63_spill] sm:$0xff] %v22491_v33  ;;  %v24723_v43 = vld [vmem:[#allocation70_spill] sm:$0xff] }
 0x301   : > { %18045 = vmatprep.mubr.bf16.mxu0 %v24665_v9  ;;  %v3815_v47 = vrot.slane %v24723_v43, 1  ;;  %v24728_v43 = vld [vmem:[#allocation88_spill] sm:$0xff] }
 0x303   : > { %v22500_v23 = vsel %vm3767_vm1, %v3813_v10, %v3815_v47  ;;  %v22503_v41 = vsel %vm3767_vm1, %v3815_v47, %v3817_v39  ;;  %v24731_v47 = vld [vmem:[#allocation89_spill] sm:$0xff] }
 0x304   : > { %24725 = vst [vmem:[#allocation69_spill] sm:$0xff] %v22500_v23  ;;  %24726 = vst [vmem:[#allocation70_spill] sm:$0xff] %v22503_v41 }
 0x307   : > { %17262 = vmatmul.mubr.bf16.gmra.mrb[40].mxu1 %v22488_v18  ;;  %v3821_v18 = vrot.slane %v24728_v43, 1 }
 0x308   : > { %18046 = vmatmul.mubr.bf16.gmra.mrb[120].mxu0 %v24666_v31  ;;  %17265 = vmatprep.mubr.bf16.mxu1 %v22491_v33  ;;  %v3819_v33 = vrot.slane %v24727_v45, 1  ;;  %v24732_v45 = vld [vmem:[#allocation98_spill] sm:$0xff] }
 0x309   : > { %18049 = vmatprep.mubr.bf16.mxu0 %v24669_v13 }
 0x30a   : > { %v22512_v0 = vsel %vm3767_vm1, %v3817_v39, %v3819_v33  ;;  %v22515_v10 = vsel %vm3767_vm1, %v3819_v33, %v3821_v18  ;;  %v24735_v33 = vld [vmem:[#allocation99_spill] sm:$0xff] }
 0x30b   : > { %24729 = vst [vmem:[#allocation78_spill] sm:$0xff] %v22512_v0  ;;  %24730 = vst [vmem:[#allocation79_spill] sm:$0xff] %v22515_v10 }
 0x30f   : > { %17266 = vmatmul.mubr.bf16.gmra.mrb[44].mxu1 %v22500_v23  ;;  %v3825_v23 = vrot.slane %v24732_v45, 1 }
 0x310   : > { %18050 = vmatmul.mubr.bf16.gmra.mrb[124].mxu0 %v24670_v49  ;;  %17269 = vmatprep.mubr.bf16.mxu1 %v22503_v41  ;;  %v3823_v41 = vrot.slane %v24731_v47, 1  ;;  %v24736_v47 = vld [vmem:[#allocation108_spill] sm:$0xff] }
 0x311   : > { %18053 = vmatprep.mubr.bf16.mxu0 %v24673_v7 }
 0x312   : > { %v22524_v43 = vsel %vm3767_vm1, %v3821_v18, %v3823_v41  ;;  %v22527_v39 = vsel %vm3767_vm1, %v3823_v41, %v3825_v23  ;;  %v19990_v41 = vld [vmem:[%s23846_s1 + $0xf0] sm:$0xff]  }
 0x313   : > { %24733 = vst [vmem:[#allocation88_spill] sm:$0xff] %v22524_v43  ;;  %24734 = vst [vmem:[#allocation89_spill] sm:$0xff] %v22527_v39  ;;  %17393 = vmatprep.subr.bf16.mxu1 %v19990_v41 }
 0x314   : > { %17394 = vmatpush3.bf16.msra.mxu1 %v19990_v41  ;;  %v24746_v41 = vld [vmem:[#allocation127_spill] sm:$0xff] }
 0x317   : > { %17270 = vmatmul.mubr.bf16.gmra.mrb[48].mxu1 %v22512_v0  ;;  %v3829_v0 = vrot.slane %v24736_v47, 1  ;;  %v24741_v47 = vld [vmem:[#allocation118_spill] sm:$0xff] }
 0x318   : > { %18054 = vmatmul.mubr.bf16.gmra.mrb[128].mxu0 %v24674_v2  ;;  %17273 = vmatprep.mubr.bf16.mxu1 %v22515_v10  ;;  %v3827_v10 = vrot.slane %v24735_v33, 1  ;;  %v24740_v33 = vld [vmem:[#allocation109_spill] sm:$0xff] }
 0x319   : > { %18057 = vmatprep.mubr.bf16.mxu0 %v24677_v42 }
 0x31a   : > { %v22536_v45 = vsel %vm3767_vm1, %v3825_v23, %v3827_v10  ;;  %v22539_v18 = vsel %vm3767_vm1, %v3827_v10, %v3829_v0  ;;  %v3833_v23 = vrot.slane %v24741_v47, 1 }
 0x31b   : > { %24737 = vst [vmem:[#allocation98_spill] sm:$0xff] %v22536_v45  ;;  %24738 = vst [vmem:[#allocation99_spill] sm:$0xff] %v22539_v18 }
 0x31f   : > { %17274 = vmatmul.mubr.bf16.gmra.mrb[52].mxu1 %v22524_v43  ;;  %v24739_v43 = vld [vmem:[#allocation111_spill] sm:$0xff] }
 0x320   : > { %18058 = vmatmul.mubr.bf16.gmra.mrb[132].mxu0 %v24678_v27  ;;  %17277 = vmatprep.mubr.bf16.mxu1 %v22527_v39  ;;  %v3831_v39 = vrot.slane %v24740_v33, 1  ;;  %v24745_v33 = vld [vmem:[#allocation119_spill] sm:$0xff] }
 0x321   : > { %18061 = vmatprep.mubr.bf16.mxu0 %v24681_v40 }
 0x322   : > { %v22551_v10 = vsel %vm3767_vm1, %v3829_v0, %v3831_v39  ;;  %v3837_v0 = vrot.slane %v24746_v41, 1 }
 0x323   : > { %24742 = vst [vmem:[#allocation108_spill] sm:$0xff] %v22551_v10 }
 0x327   : > { %17278 = vmatmul.mubr.bf16.gmra.mrb[56].mxu1 %v22536_v45  ;;  %v22554_v45 = vsel %vm3767_vm1, %v3831_v39, %v3833_v23 }
 0x328   : > { %18062 = vmatmul.mubr.bf16.gmra.mrb[136].mxu0 %v24739_v43  ;;  %17281 = vmatprep.mubr.bf16.mxu1 %v22539_v18  ;;  %24743 = vst [vmem:[#allocation111_spill] sm:$0xff] %v22554_v45  ;;  %v3835_v18 = vrot.slane %v24745_v33, 1 }
 0x329   : > { %18065 = vmatprep.mubr.bf16.mxu0 %v24685_v25 }
 0x32a   : > { %v22563_v47 = vsel %vm3767_vm1, %v3833_v23, %v3835_v18  ;;  %v22566_v39 = vsel %vm3767_vm1, %v3835_v18, %v3837_v0  ;;  %v20004_v23 = vld [vmem:[%s20225_s13 + $0x280] sm:$0xf] }
 0x32b   : > { %24747 = vst [vmem:[#allocation109_spill] sm:$0xff] %v22563_v47  ;;  %24748 = vst [vmem:[#allocation118_spill] sm:$0xff] %v22566_v39  ;;  %v22579_v18 = vcombine.low %v20004_v23, %v20005_v12  ;;  %v3845_v12 = vrot.slane %v24617_v8, 1  ;;  %v24755_v23 = vld [vmem:[#allocation179_spill] sm:$0xff]  ;;  %v3847_v8 = vrot.slane %v24620_v19, 1  ;;  %v3851_v19 = vrot.slane %v24625_v48, 1 }
 0x32c   : > { %v19989_v48 = vld [vmem:[%s23846_s1 + $0x208] sm:$0xff]  }
 0x32d   : > { %24752 = vst [vmem:[#allocation119_spill] sm:$0xff] %v22579_v18 }
 0x32f   : > { %17282 = vmatmul.mubr.bf16.gmra.mrb[60].mxu1 %v22551_v10  ;;  %v24750_v10 = vld [vmem:[#allocation133_spill] sm:$0xff] }
 0x330   : > { %18066 = vmatmul.mubr.bf16.gmra.mrb[140].mxu0 %v24744_v3  ;;  %17285 = vmatprep.mubr.bf16.mxu1 %v22554_v45  ;;  %v24749_v45 = vld [vmem:[#allocation128_spill] sm:$0xff]  ;;  %v3841_v62 = vrot.slane %v24750_v10, 1 }
 0x331   : > { %18069 = vmatprep.mubr.bf16.mxu0 %v24689_v34  ;;  %v3839_v33 = vrot.slane %v24749_v45, 1  ;;  %v24754_v45 = vld [vmem:[#allocation134_spill] sm:$0xff] }
 0x332   : > { %v3843_v10 = vrot.slane %v24754_v45, 1  ;;  %v22614_v45 = vsel %vm3767_vm1, %v3845_v12, %v3847_v8 }
 0x333   : > { %v22575_v41 = vsel %vm3767_vm1, %v3837_v0, %v3839_v33  ;;  %24758 = vst [vmem:[#allocation134_spill] sm:$0xff] %v22614_v45 }
 0x334   : > { %24751 = vst [vmem:[#allocation123_spill] sm:$0xff] %v22575_v41  ;;  %v22595_v0 = vsel %vm3767_vm1, %v3841_v62, %v3843_v10 }
 0x337   : > { %17286 = vmatmul.mubr.bf16.gmra.mrb[64].mxu1 %v22563_v47  ;;  %v22582_v47 = vsel %vm3767_vm1, %v3839_v33, %v3841_v62  ;;  %v20008_v33 = vld [vmem:[%s20225_s13 + $0x290] sm:$0xf]  ;;  %v3849_v62 = vrot.slane %v24624_v21, 1  ;;  %v24760_v21 = vld [vmem:[#allocation19_spill] sm:$0xff] }
 0x338   : > { %18070 = vmatmul.mubr.bf16.gmra.mrb[144].mxu0 %v24691_v20  ;;  %17289 = vmatprep.mubr.bf16.mxu1 %v22566_v39  ;;  %v20007_v39 = vld [vmem:[%s20225_s13 + $0x28c] sm:$0xf] }
 0x339   : > { %18073 = vmatprep.mubr.bf16.mxu0 %v24694_v35  ;;  %v22586_v14 = vcombine.low %v20006_v5, %v20007_v39  ;;  %v22599_v5 = vcombine.low %v20008_v33, %v24755_v23  ;;  %v22602_v39 = vsel %vm3767_vm1, %v3843_v10, %v3845_v12  ;;  %v22617_v33 = vld [vmem:[%s20225_s13 + $0x2a0] sm:$0xff]   ;;  %v22620_v10 = vsel %vm3767_vm1, %v3847_v8, %v3849_v62  ;;  %v19992_v23 = vld [vmem:[%s23846_s1 + $0xf8] sm:$0xff]  }
 0x33a   : > { %24757 = vst [vmem:[#allocation133_spill] sm:$0xff] %v22602_v39  ;;  %24759 = vst [vmem:[#allocation179_spill] sm:$0xff] %v22620_v10  ;;  %v3853_v12 = vrot.slane %v21356_v37, 1  ;;  %17395 = vmatprep.subr.bf16.mxu1 %v19992_v23  ;;  %v22634_v8 = vld [vmem:[%s23846_s1 + $0x100] sm:$0xff]   ;;  %v24761_v37 = vld [vmem:[#allocation20_spill] sm:$0xff] }
 0x33b   : > { %24753 = vst [vmem:[#allocation127_spill] sm:$0xff] %v22586_v14  ;;  %24756 = vst [vmem:[#allocation128_spill] sm:$0xff] %v22599_v5  ;;  %17396 = vmatpush3.bf16.msra.mxu1 %v19992_v23  ;;  %v3855_v23 = vrot.slane %v24628_v53, 1  ;;  %v19993_v53 = vld [vmem:[%s23846_s1 + $0x218] sm:$0xff]  }
 0x33c   : > { %18437 = vmatprep.subr.bf16.mxu1 %v22634_v8 }
 0x33f   : > { %17290 = vmatmul.mubr.bf16.gmra.mrb[68].mxu1 %v22575_v41  ;;  %v22605_v41 = vld [vmem:[%s20225_s13 + $0x298] sm:$0xff]  }
 0x340   : > { %18074 = vmatmul.mubr.bf16.gmra.mrb[148].mxu0 %v22579_v18  ;;  %17293 = vmatprep.mubr.bf16.mxu1 %v22582_v47 }
 0x341   : > { %18077 = vmatprep.mubr.bf16.mxu0 %v22586_v14 }
 0x347   : > { %17294 = vmatmul.mubr.bf16.gmra.mrb[72].mxu1 %v22595_v0 }
 0x348   : > { %18078 = vmatmul.mubr.bf16.gmra.mrb[152].mxu0 %v22599_v5  ;;  %17297 = vmatprep.mubr.bf16.mxu1 %v22602_v39  ;;  %v22657_v39 = vsel %vm3767_vm1, %v3853_v12, %v3855_v23 }
 0x349   : > { %18081 = vmatprep.mubr.bf16.mxu0 %v22605_v41 }
 0x34f   : > { %17298 = vmatmul.mubr.bf16.gmra.mrb[76].mxu1 %v22614_v45  ;;  %v22638_v45 = vsel %vm3767_vm1, %v3849_v62, %v3851_v19  ;;  %v3857_v62 = vrot.slane %v21393_v28, 1  ;;  %v24763_v28 = vld [vmem:[#allocation24_spill] sm:$0xff] }
 0x350   : > { %18082 = vmatmul.mubr.bf16.gmra.mrb[156].mxu0 %v22617_v33  ;;  %17301 = vmatprep.mubr.bf16.mxu1 %v22620_v10  ;;  %v22641_v10 = vsel %vm3767_vm1, %v3851_v19, %v3853_v12  ;;  %v19991_v19 = vld [vmem:[%s23846_s1 + $0x210] sm:$0xff]   ;;  %v3861_v12 = vrot.slane %v21427_v59, 1  ;;  %v3865_v59 = vrot.slane %v21451_v57, 1 }
 0x351   : > { %18101 = vmatprep.mubr.bf16.mxu0 %v24760_v21  ;;  %v24762_v21 = vld [vmem:[#allocation23_spill] sm:$0xff] }
 0x357   : > { %17302 = vmatmul.mubr.bf16.gmra.mrb[80].mxu1 %v22638_v45 }
 0x358   : > { %18102 = vmatmul.mubr.bf16.vlgmr.msra.gmra.mrb[0].mxu0 %v24761_v37  ;;  %17305 = vmatprep.mubr.bf16.mxu1 %v22641_v10  ;;  %v22660_v37 = vsel %vm3767_vm1, %v3855_v23, %v3857_v62 }
 0x359   : > { %18262 = vmatpush3.bf16.msra.mxu0 %v22419_v22  ;;  %18105 = vmatprep.mubr.bf16.mxu0 %v24762_v21  ;;  %v3859_v22 = vrot.slane %v24631_v6, 1  ;;  %v24764_v21 = vld [vmem:[#allocation27_spill] sm:$0xff]  ;;  %v3863_v6 = vrot.slane %v21431_v50, 1  ;;  %v3869_v50 = vrot.slane %v21474_v56, 1  ;;  %v3873_v56 = vrot.slane %v24642_v51, 1 }
 0x35a   : > { %18263 = vmatprep.subr.bf16.mxu0 %v19989_v48  ;;  %v3877_v51 = vrot.slane %v24646_v61, 1 }
 0x35b   : > { %v22675_v23 = vsel %vm3767_vm1, %v3859_v22, %v3861_v12 }
 0x35d   : > { %18264 = vmatpush3.bf16.msra.mxu0 %v19989_v48  ;;  %v22672_v48 = vsel %vm3767_vm1, %v3857_v62, %v3859_v22  ;;  %v22687_v62 = vsel %vm3767_vm1, %v3863_v6, %v3865_v59  ;;  %v3867_v22 = vrot.slane %v24636_v36, 1  ;;  %v19994_v36 = vld [vmem:[%s23846_s1 + $0x220] sm:$0xff]  }
 0x35e   : > { %18265 = vmatprep.subr.bf16.mxu0 %v19991_v19 }
 0x35f   : > { %17306 = vmatmul.mubr.bf16.gmra.mrb[84].mxu1 %v22657_v39  ;;  %v22696_v57 = vsel %vm3767_vm1, %v3865_v59, %v3867_v22 }
 0x360   : > { %18106 = vmatmul.mubr.bf16.gmra.mrb[4].mxu0 %v24763_v28  ;;  %17309 = vmatprep.mubr.bf16.mxu1 %v22660_v37  ;;  %v24765_v28 = vld [vmem:[#allocation28_spill] sm:$0xff] }
 0x361   : > { %18109 = vmatprep.mubr.bf16.mxu0 %v24764_v21  ;;  %18266 = vmatpush3.bf16.msra.mxu0 %v19991_v19  ;;  %v24766_v21 = vld [vmem:[#allocation31_spill] sm:$0xff]  ;;  %v22684_v19 = vsel %vm3767_vm1, %v3861_v12, %v3863_v6  ;;  %v22699_v12 = vsel %vm3767_vm1, %v3867_v22, %v3869_v50  ;;  %v24769_v6 = vld [vmem:[#allocation154_spill] sm:$0xff] }
 0x362   : > { %18267 = vmatprep.subr.bf16.mxu0 %v19993_v53 }
 0x365   : > { %18268 = vmatpush3.bf16.msra.mxu0 %v19993_v53  ;;  %v24767_v53 = vld [vmem:[#allocation32_spill] sm:$0xff] }
 0x366   : > { %18269 = vmatprep.subr.bf16.mxu0 %v19994_v36 }
 0x367   : > { %17310 = vmatmul.mubr.bf16.gmra.mrb[88].mxu1 %v22672_v48 }
 0x368   : > { %18110 = vmatmul.mubr.bf16.gmra.mrb[8].mxu0 %v24765_v28  ;;  %17313 = vmatprep.mubr.bf16.mxu1 %v22675_v23  ;;  %v24768_v28 = vld [vmem:[#allocation40_spill] sm:$0xff] }
 0x369   : > { %18113 = vmatprep.mubr.bf16.mxu0 %v24766_v21  ;;  %v3871_v21 = vrot.slane %v24639_v15, 1  ;;  %18270 = vmatpush3.bf16.msra.mxu0 %v19994_v36  ;;  %v3875_v15 = vrot.slane %v24643_v26, 1  ;;  %v3881_v26 = vrot.slane %v21516_v52, 1 }
 0x36b   : > { %v22711_v59 = vsel %vm3767_vm1, %v3869_v50, %v3871_v21  ;;  %v22714_v22 = vsel %vm3767_vm1, %v3871_v21, %v3873_v56  ;;  %v22723_v36 = vsel %vm3767_vm1, %v3873_v56, %v3875_v15  ;;  %v22726_v50 = vsel %vm3767_vm1, %v3875_v15, %v3877_v51  ;;  %v24773_v21 = vld [vmem:[#allocation157_spill] sm:$0xff]  ;;  %v24775_v15 = vld [vmem:[#allocation159_spill] sm:$0xff] }
 0x36f   : > { %17314 = vmatmul.mubr.bf16.gmra.mrb[92].mxu1 %v22684_v19 }
 0x370   : > { %18114 = vmatmul.mubr.bf16.gmra.mrb[12].mxu0 %v24767_v53  ;;  %17317 = vmatprep.mubr.bf16.mxu1 %v22687_v62  ;;  %v24770_v53 = vld [vmem:[#allocation155_spill] sm:$0xff] }
 0x371   : > { %18117 = vmatprep.mubr.bf16.mxu0 %v24768_v28  ;;  %v24771_v28 = vld [vmem:[#allocation156_spill] sm:$0xff] }
 0x377   : > { %17318 = vmatmul.mubr.bf16.gmra.mrb[96].mxu1 %v22696_v57 }
 0x378   : > { %18118 = vmatmul.mubr.bf16.gmra.mrb[16].mxu0 %v24769_v6  ;;  %17321 = vmatprep.mubr.bf16.mxu1 %v22699_v12  ;;  %v24772_v6 = vld [vmem:[#allocation56_spill] sm:$0xff] }
 0x379   : > { %18121 = vmatprep.mubr.bf16.mxu0 %v24770_v53  ;;  %v3879_v53 = vrot.slane %v24647_v60, 1  ;;  %v3885_v60 = vrot.slane %v24653_v1, 1 }
 0x37b   : > { %v22735_v61 = vsel %vm3767_vm1, %v3877_v51, %v3879_v53  ;;  %v22738_v56 = vsel %vm3767_vm1, %v3879_v53, %v3881_v26  ;;  %v24777_v53 = vld [vmem:[#allocation161_spill] sm:$0xff] }
 0x37f   : > { %17322 = vmatmul.mubr.bf16.gmra.mrb[100].mxu1 %v22711_v59 }
 0x380   : > { %18122 = vmatmul.mubr.bf16.gmra.mrb[20].mxu0 %v24771_v28  ;;  %17325 = vmatprep.mubr.bf16.mxu1 %v22714_v22  ;;  %v24774_v28 = vld [vmem:[#allocation158_spill] sm:$0xff] }
 0x381   : > { %18125 = vmatprep.mubr.bf16.mxu0 %v24772_v6  ;;  %v3883_v6 = vrot.slane %v24650_v16, 1  ;;  %v3889_v16 = vrot.slane %v21547_v55, 1  ;;  %v3893_v55 = vrot.slane %v24660_v46, 1  ;;  %v3897_v46 = vrot.slane %v24665_v9, 1 }
 0x383   : > { %v22747_v52 = vsel %vm3767_vm1, %v3881_v26, %v3883_v6  ;;  %v22750_v51 = vsel %vm3767_vm1, %v3883_v6, %v3885_v60  ;;  %v24779_v6 = vld [vmem:[#allocation163_spill] sm:$0xff] }
 0x387   : > { %17326 = vmatmul.mubr.bf16.gmra.mrb[104].mxu1 %v22723_v36 }
 0x388   : > { %18126 = vmatmul.mubr.bf16.gmra.mrb[24].mxu0 %v24773_v21  ;;  %17329 = vmatprep.mubr.bf16.mxu1 %v22726_v50  ;;  %v24776_v21 = vld [vmem:[#allocation160_spill] sm:$0xff] }
 0x389   : > { %18129 = vmatprep.mubr.bf16.mxu0 %v24774_v28  ;;  %v3887_v28 = vrot.slane %v24654_v58, 1  ;;  %v19995_v58 = vld [vmem:[%s23846_s1 + $0x228] sm:$0xff]  }
 0x38a   : > { %18271 = vmatprep.subr.bf16.mxu0 %v19995_v58 }
 0x38b   : > { %v22759_v1 = vsel %vm3767_vm1, %v3885_v60, %v3887_v28  ;;  %v22762_v26 = vsel %vm3767_vm1, %v3887_v28, %v3889_v16  ;;  %18272 = vmatpush3.bf16.msra.mxu0 %v19995_v58 }
 0x38f   : > { %17330 = vmatmul.mubr.bf16.gmra.mrb[108].mxu1 %v22735_v61 }
 0x390   : > { %18130 = vmatmul.mubr.bf16.gmra.mrb[28].mxu0 %v24775_v15  ;;  %17333 = vmatprep.mubr.bf16.mxu1 %v22738_v56  ;;  %v24778_v15 = vld [vmem:[#allocation162_spill] sm:$0xff] }
 0x391   : > { %18133 = vmatprep.mubr.bf16.mxu0 %v24776_v21  ;;  %v3891_v21 = vrot.slane %v24657_v11, 1  ;;  %v3895_v11 = vrot.slane %v24718_v17, 1  ;;  %v3901_v17 = vrot.slane %v24669_v13, 1 }
 0x393   : > { %v22774_v60 = vsel %vm3767_vm1, %v3889_v16, %v3891_v21  ;;  %v22777_v28 = vsel %vm3767_vm1, %v3891_v21, %v3893_v55  ;;  %v22786_v58 = vsel %vm3767_vm1, %v3893_v55, %v3895_v11  ;;  %v22789_v16 = vsel %vm3767_vm1, %v3895_v11, %v3897_v46  ;;  %v24786_v21 = vld [vmem:[#allocation167_spill] sm:$0xff]  ;;  %v24790_v11 = vld [vmem:[#allocation169_spill] sm:$0xff] }
 0x394   : > { %24781 = vst [vmem:[#allocation19_spill] sm:$0xff] %v22777_v28  ;;  %24784 = vst [vmem:[#allocation20_spill] sm:$0xff] %v22786_v58 }
 0x395   : > { %24785 = vst [vmem:[#allocation23_spill] sm:$0xff] %v22789_v16 }
 0x397   : > { %17334 = vmatmul.mubr.bf16.gmra.mrb[112].mxu1 %v22747_v52 }
 0x398   : > { %18134 = vmatmul.mubr.bf16.gmra.mrb[32].mxu0 %v24777_v53  ;;  %17337 = vmatprep.mubr.bf16.mxu1 %v22750_v51  ;;  %v24780_v53 = vld [vmem:[#allocation164_spill] sm:$0xff] }
 0x399   : > { %18137 = vmatprep.mubr.bf16.mxu0 %v24778_v15  ;;  %v24782_v15 = vld [vmem:[#allocation165_spill] sm:$0xff] }
 0x39f   : > { %17338 = vmatmul.mubr.bf16.gmra.mrb[116].mxu1 %v22759_v1 }
 0x3a0   : > { %18138 = vmatmul.mubr.bf16.gmra.mrb[36].mxu0 %v24779_v6  ;;  %17341 = vmatprep.mubr.bf16.mxu1 %v22762_v26  ;;  %v24783_v6 = vld [vmem:[#allocation166_spill] sm:$0xff] }
 0x3a1   : > { %18141 = vmatprep.mubr.bf16.mxu0 %v24780_v53  ;;  %v3899_v53 = vrot.slane %v24666_v31, 1  ;;  %v3905_v31 = vrot.slane %v24673_v7, 1 }
 0x3a3   : > { %v22798_v9 = vsel %vm3767_vm1, %v3897_v46, %v3899_v53  ;;  %v22801_v55 = vsel %vm3767_vm1, %v3899_v53, %v3901_v17  ;;  %v24794_v53 = vld [vmem:[#allocation171_spill] sm:$0xff] }
 0x3a4   : > { %24788 = vst [vmem:[#allocation24_spill] sm:$0xff] %v22798_v9  ;;  %24789 = vst [vmem:[#allocation27_spill] sm:$0xff] %v22801_v55 }
 0x3a7   : > { %17342 = vmatmul.mubr.bf16.gmra.mrb[120].mxu1 %v22774_v60 }
 0x3a8   : > { %18142 = vmatmul.mubr.bf16.gmra.mrb[40].mxu0 %v24782_v15  ;;  %17345 = vmatprep.mubr.bf16.mxu1 %v22777_v28  ;;  %v24787_v15 = vld [vmem:[#allocation168_spill] sm:$0xff] }
 0x3a9   : > { %18145 = vmatprep.mubr.bf16.mxu0 %v24783_v6  ;;  %v3903_v6 = vrot.slane %v24670_v49, 1  ;;  %v3909_v49 = vrot.slane %v24677_v42, 1  ;;  %v3913_v42 = vrot.slane %v24681_v40, 1  ;;  %v3917_v40 = vrot.slane %v24685_v25, 1 }
 0x3ab   : > { %v22810_v13 = vsel %vm3767_vm1, %v3901_v17, %v3903_v6  ;;  %v22813_v46 = vsel %vm3767_vm1, %v3903_v6, %v3905_v31  ;;  %v24798_v6 = vld [vmem:[#allocation174_spill] sm:$0xff] }
 0x3ac   : > { %24792 = vst [vmem:[#allocation28_spill] sm:$0xff] %v22810_v13  ;;  %24793 = vst [vmem:[#allocation31_spill] sm:$0xff] %v22813_v46 }
 0x3af   : > { %17346 = vmatmul.mubr.bf16.gmra.mrb[124].mxu1 %v22786_v58  ;;  %v24943_v58 = vld [vmem:[#allocation98_spill] sm:$0xff] }
 0x3b0   : > { %18146 = vmatmul.mubr.bf16.gmra.mrb[44].mxu0 %v24786_v21  ;;  %17349 = vmatprep.mubr.bf16.mxu1 %v22789_v16  ;;  %v24791_v21 = vld [vmem:[#allocation170_spill] sm:$0xff]  ;;  %v24933_v16 = vld [vmem:[#allocation116_spill] sm:$0xff] }
 0x3b1   : > { %18149 = vmatprep.mubr.bf16.mxu0 %v24787_v15  ;;  %v3907_v15 = vrot.slane %v24674_v2, 1  ;;  %v19996_v2 = vld [vmem:[%s23846_s1 + $0x230] sm:$0xff]  }
 0x3b2   : > { %18273 = vmatprep.subr.bf16.mxu0 %v19996_v2 }
 0x3b3   : > { %v22822_v7 = vsel %vm3767_vm1, %v3905_v31, %v3907_v15  ;;  %v22825_v17 = vsel %vm3767_vm1, %v3907_v15, %v3909_v49  ;;  %18274 = vmatpush3.bf16.msra.mxu0 %v19996_v2 }
 0x3b4   : > { %24796 = vst [vmem:[#allocation32_spill] sm:$0xff] %v22822_v7  ;;  %24797 = vst [vmem:[#allocation40_spill] sm:$0xff] %v22825_v17 }
 0x3b7   : > { %17350 = vmatmul.mubr.bf16.gmra.mrb[128].mxu1 %v22798_v9 }
 0x3b8   : > { %18150 = vmatmul.mubr.bf16.gmra.mrb[48].mxu0 %v24790_v11  ;;  %17353 = vmatprep.mubr.bf16.mxu1 %v22801_v55  ;;  %v24795_v11 = vld [vmem:[#allocation173_spill] sm:$0xff] }
 0x3b9   : > { %18153 = vmatprep.mubr.bf16.mxu0 %v24791_v21  ;;  %v3911_v21 = vrot.slane %v24678_v27, 1  ;;  %v3915_v27 = vrot.slane %v24739_v43, 1  ;;  %v3921_v43 = vrot.slane %v24689_v34, 1 }
 0x3bb   : > { %v22837_v31 = vsel %vm3767_vm1, %v3909_v49, %v3911_v21  ;;  %v22840_v15 = vsel %vm3767_vm1, %v3911_v21, %v3913_v42  ;;  %v22849_v2 = vsel %vm3767_vm1, %v3913_v42, %v3915_v27  ;;  %v22852_v49 = vsel %vm3767_vm1, %v3915_v27, %v3917_v40  ;;  %v24806_v21 = vld [vmem:[#allocation180_spill] sm:$0xff]  ;;  %v24810_v27 = vld [vmem:[#allocation143_spill] sm:$0xff] }
 0x3bc   : > { %24800 = vst [vmem:[#allocation154_spill] sm:$0xff] %v22837_v31  ;;  %24801 = vst [vmem:[#allocation155_spill] sm:$0xff] %v22840_v15 }
 0x3bd   : > { %24804 = vst [vmem:[#allocation156_spill] sm:$0xff] %v22849_v2  ;;  %24805 = vst [vmem:[#allocation56_spill] sm:$0xff] %v22852_v49 }
 0x3bf   : > { %17354 = vmatmul.mubr.bf16.gmra.mrb[132].mxu1 %v22810_v13  ;;  %v24929_v13 = vld [vmem:[#allocation78_spill] sm:$0xff] }
 0x3c0   : > { %18154 = vmatmul.mubr.bf16.gmra.mrb[52].mxu0 %v24794_v53  ;;  %17357 = vmatprep.mubr.bf16.mxu1 %v22813_v46  ;;  %v24799_v53 = vld [vmem:[#allocation176_spill] sm:$0xff] }
 0x3c1   : > { %18157 = vmatprep.mubr.bf16.mxu0 %v24795_v11  ;;  %v24802_v11 = vld [vmem:[#allocation178_spill] sm:$0xff]  ;;  %v24928_v46 = vld [vmem:[#allocation112_spill] sm:$0xff] }
 0x3c7   : > { %17358 = vmatmul.mubr.bf16.gmra.mrb[136].mxu1 %v22822_v7  ;;  %v24927_v7 = vld [vmem:[#allocation70_spill] sm:$0xff] }
 0x3c8   : > { %18158 = vmatmul.mubr.bf16.gmra.mrb[56].mxu0 %v24798_v6  ;;  %17361 = vmatprep.mubr.bf16.mxu1 %v22825_v17  ;;  %v24803_v6 = vld [vmem:[#allocation139_spill] sm:$0xff] }
 0x3c9   : > { %18161 = vmatprep.mubr.bf16.mxu0 %v24799_v53  ;;  %v3919_v53 = vrot.slane %v24744_v3, 1  ;;  %v22872_v3 = vrot.slane %v24694_v35, 1 }
 0x3cb   : > { %v22861_v25 = vsel %vm3767_vm1, %v3917_v40, %v3919_v53  ;;  %v22864_v42 = vsel %vm3767_vm1, %v3919_v53, %v3921_v43  ;;  %24812 = vst [vmem:[#allocation159_spill] sm:$0xff] %v22872_v3  ;;  %v24815_v53 = vld [vmem:[#allocation182_spill] sm:$0xff] }
 0x3cc   : > { %24808 = vst [vmem:[#allocation157_spill] sm:$0xff] %v22861_v25  ;;  %24809 = vst [vmem:[#allocation158_spill] sm:$0xff] %v22864_v42 }
 0x3cf   : > { %17362 = vmatmul.mubr.bf16.gmra.mrb[140].mxu1 %v22837_v31 }
 0x3d0   : > { %18162 = vmatmul.mubr.bf16.gmra.mrb[60].mxu0 %v24802_v11  ;;  %17365 = vmatprep.mubr.bf16.mxu1 %v22840_v15  ;;  %v24807_v11 = vld [vmem:[#allocation142_spill] sm:$0xff]  ;;  %v24922_v15 = vld [vmem:[#allocation69_spill] sm:$0xff] }
 0x3d1   : > { %18165 = vmatprep.mubr.bf16.mxu0 %v24803_v6  ;;  %v3923_v6 = vrot.slane %v24691_v20, 1  ;;  %v3927_v20 = vrot.slane %v22328_v32, 1  ;;  %v24821_v32 = vld [vmem:[#allocation185_spill] sm:$0xff] }
 0x3d3   : > { %v22875_v34 = vsel %vm3767_vm1, %v3921_v43, %v3923_v6  ;;  %v22879_v40 = vsel %vm3767_vm1, %v3923_v6, %v22872_v3  ;;  %v3928_v35 = vsel %vm3767_vm1, %v22872_v3, %v3927_v20  ;;  %v24817_v43 = vld [vmem:[#allocation183_spill] sm:$0xff]  ;;  %v19997_v6 = vld [vmem:[%s23846_s1 + $0x238] sm:$0xff]   ;;  %v24822_v20 = vld [vmem:[#allocation8_spill] sm:$0xff] }
 0x3d4   : > { %24813 = vst [vmem:[#allocation160_spill] sm:$0xff] %v22875_v34  ;;  %24814 = vst [vmem:[#allocation161_spill] sm:$0xff] %v22879_v40  ;;  %18275 = vmatprep.subr.bf16.mxu0 %v19997_v6 }
 0x3d5   : > { %18276 = vmatpush3.bf16.msra.mxu0 %v19997_v6  ;;  %v24825_v6 = vld [vmem:[#allocation186_spill] sm:$0xff] }
 0x3d7   : > { %17366 = vmatmul.mubr.bf16.gmra.mrb[144].mxu1 %v22849_v2  ;;  %v24921_v2 = vld [vmem:[#allocation102_spill] sm:$0xff] }
 0x3d8   : > { %18166 = vmatmul.mubr.bf16.gmra.mrb[64].mxu0 %v24806_v21  ;;  %17369 = vmatprep.mubr.bf16.mxu1 %v22852_v49  ;;  %v24811_v21 = vld [vmem:[#allocation146_spill] sm:$0xff]  ;;  %v24920_v49 = vld [vmem:[#allocation63_spill] sm:$0xff] }
 0x3d9   : > { %18169 = vmatprep.mubr.bf16.mxu0 %v24807_v11  ;;  %v24816_v11 = vld [vmem:[#allocation149_spill] sm:$0xff] }
 0x3df   : > { %17370 = vmatmul.mubr.bf16.gmra.mrb[148].mxu1 %v22861_v25  ;;  %v24919_v25 = vld [vmem:[#allocation96_spill] sm:$0xff] }
 0x3e0   : > { %18170 = vmatmul.mubr.bf16.gmra.mrb[68].mxu0 %v24810_v27  ;;  %17373 = vmatprep.mubr.bf16.mxu1 %v22864_v42  ;;  %v24818_v27 = vld [vmem:[#allocation6_spill] sm:$0xff]  ;;  %v24886_v42 = vld [vmem:[#allocation107_spill] sm:$0xff] }
 0x3e1   : > { %18173 = vmatprep.mubr.bf16.mxu0 %v24811_v21  ;;  %v24819_v21 = vld [vmem:[#allocation184_spill] sm:$0xff] }
 0x3e7   : > { %17374 = vmatmul.mubr.bf16.gmra.mrb[152].mxu1 %v22875_v34 }
 0x3e8   : > { %18174 = vmatmul.mubr.bf16.gmra.mrb[72].mxu0 %v24815_v53  ;;  %17377 = vmatprep.mubr.bf16.mxu1 %v22879_v40  ;;  %v24820_v53 = vld [vmem:[#allocation7_spill] sm:$0xff]  ;;  %v24845_v40 = vld [vmem:[#allocation84_spill] sm:$0xff] }
 0x3e9   : > { %18177 = vmatprep.mubr.bf16.mxu0 %v24816_v11  ;;  %v24823_v11 = vld [vmem:[#allocation153_spill] sm:$0xff] }
 0x3ef   : > { %17378 = vmatmul.mubr.bf16.gmra.mrb[156].mxu1 %v3928_v35  ;;  %v20010_v35 = vld [vmem:[%s23846_s1 + $0x108] sm:$0xff]  }
 0x3f0   : > { %18178 = vmatmul.mubr.bf16.gmra.mrb[76].mxu0 %v24817_v43  ;;  %17397 = vmatprep.mubr.bf16.mxu1 %v24818_v27  ;;  %v20011_v43 = vld [vmem:[%s23846_s1 + $0x110] sm:$0xff]   ;;  %v24824_v27 = vld [vmem:[#allocation9_spill] sm:$0xff] }
 0x3f1   : > { %18181 = vmatprep.mubr.bf16.mxu0 %v24819_v21  ;;  %v24827_v21 = vld [vmem:[#allocation58_spill] sm:$0xff] }
 0x3f7   : > { %17398 = vmatmul.mubr.bf16.vlgmr.msra.gmra.mrb[0].mxu1 %v24820_v53  ;;  %v20012_v53 = vld [vmem:[%s23846_s1 + $0x118] sm:$0xff]  }
 0x3f8   : > { %18182 = vmatmul.mubr.bf16.gmra.mrb[80].mxu0 %v24821_v32  ;;  %18445 = vmatpush3.bf16.msra.mxu1 %v22634_v8  ;;  %v24826_v8 = vld [vmem:[#allocation10_spill] sm:$0xff] }
 0x3f9   : > { %17401 = vmatprep.mubr.bf16.mxu1 %v24822_v20  ;;  %18185 = vmatprep.mubr.bf16.mxu0 %v24823_v11  ;;  %v20013_v32 = vld [vmem:[%s23846_s1 + $0x120] sm:$0xff]   ;;  %v24828_v20 = vld [vmem:[#allocation11_spill] sm:$0xff] }
 0x3fa   : > { %18438 = vmatprep.subr.bf16.mxu1 %v20010_v35  ;;  %v24829_v11 = vld [vmem:[#allocation187_spill] sm:$0xff] }
 0x3fc   : > { %18446 = vmatpush3.bf16.msra.mxu1 %v20010_v35  ;;  %v24830_v35 = vld [vmem:[#allocation13_spill] sm:$0xff] }
 0x3fd   : > { %18439 = vmatprep.subr.bf16.mxu1 %v20011_v43 }
 0x3ff   : > { %17402 = vmatmul.mubr.bf16.gmra.mrb[4].mxu1 %v24824_v27  ;;  %v24831_v27 = vld [vmem:[#allocation60_spill] sm:$0xff] }
 0x400   : > { %18186 = vmatmul.mubr.bf16.gmra.mrb[84].mxu0 %v24825_v6  ;;  %17405 = vmatprep.mubr.bf16.mxu1 %v24826_v8  ;;  %v20015_v6 = vld [vmem:[%s23846_s1 + $0x130] sm:$0xff]   ;;  %v24832_v8 = vld [vmem:[#allocation14_spill] sm:$0xff] }
 0x401   : > { %18189 = vmatprep.mubr.bf16.mxu0 %v24827_v21  ;;  %18447 = vmatpush3.bf16.msra.mxu1 %v20011_v43  ;;  %v20014_v43 = vld [vmem:[%s23846_s1 + $0x128] sm:$0xff]  }
 0x402   : > { %18440 = vmatprep.subr.bf16.mxu1 %v20012_v53  ;;  %v24833_v21 = vld [vmem:[#allocation67_spill] sm:$0xff] }
 0x405   : > { %18448 = vmatpush3.bf16.msra.mxu1 %v20012_v53  ;;  %v24834_v53 = vld [vmem:[#allocation17_spill] sm:$0xff] }
 0x406   : > { %18441 = vmatprep.subr.bf16.mxu1 %v20013_v32 }
 0x407   : > { %17406 = vmatmul.mubr.bf16.gmra.mrb[8].mxu1 %v24828_v20  ;;  %v24835_v20 = vld [vmem:[#allocation74_spill] sm:$0xff] }
 0x408   : > { %18190 = vmatmul.mubr.bf16.gmra.mrb[88].mxu0 %v24829_v11  ;;  %17409 = vmatprep.mubr.bf16.mxu1 %v24830_v35  ;;  %v24836_v11 = vld [vmem:[#allocation18_spill] sm:$0xff]  ;;  %v24837_v35 = vld [vmem:[#allocation71_spill] sm:$0xff] }
 0x409   : > { %18193 = vmatprep.mubr.bf16.mxu0 %v24831_v27  ;;  %18449 = vmatpush3.bf16.msra.mxu1 %v20013_v32  ;;  %v20016_v32 = vld [vmem:[%s23846_s1 + $0x138] sm:$0xff]  }
 0x40a   : > { %18442 = vmatprep.subr.bf16.mxu1 %v20014_v43  ;;  %v24838_v27 = vld [vmem:[#allocation21_spill] sm:$0xff] }
 0x40d   : > { %18450 = vmatpush3.bf16.msra.mxu1 %v20014_v43  ;;  %v24839_v43 = vld [vmem:[#allocation80_spill] sm:$0xff] }
 0x40e   : > { %18443 = vmatprep.subr.bf16.mxu1 %v20015_v6 }
 0x40f   : > { %17410 = vmatmul.mubr.bf16.gmra.mrb[12].mxu1 %v24832_v8  ;;  %v24840_v8 = vld [vmem:[#allocation22_spill] sm:$0xff] }
 0x410   : > { %18194 = vmatmul.mubr.bf16.gmra.mrb[92].mxu0 %v24833_v21  ;;  %17413 = vmatprep.mubr.bf16.mxu1 %v24834_v53  ;;  %v24841_v21 = vld [vmem:[#allocation188_spill] sm:$0xff]  ;;  %v24842_v53 = vld [vmem:[#allocation25_spill] sm:$0xff] }
 0x411   : > { %18197 = vmatprep.mubr.bf16.mxu0 %v24835_v20  ;;  %18451 = vmatpush3.bf16.msra.mxu1 %v20015_v6  ;;  %v24843_v6 = vld [vmem:[#allocation75_spill] sm:$0xff]  ;;  %v24844_v20 = vld [vmem:[#allocation26_spill] sm:$0xff] }
 0x412   : > { %18444 = vmatprep.subr.bf16.mxu1 %v20016_v32 }
 0x415   : > { %18452 = vmatpush3.bf16.msra.mxu1 %v20016_v32  ;;  %v24846_v32 = vld [vmem:[#allocation29_spill] sm:$0xff] }
 0x417   : > { %17414 = vmatmul.mubr.bf16.gmra.mrb[16].mxu1 %v24836_v11  ;;  %v24847_v11 = vld [vmem:[#allocation81_spill] sm:$0xff] }
 0x418   : > { %18198 = vmatmul.mubr.bf16.gmra.mrb[96].mxu0 %v24837_v35  ;;  %17417 = vmatprep.mubr.bf16.mxu1 %v24838_v27  ;;  %v24848_v35 = vld [vmem:[#allocation30_spill] sm:$0xff]  ;;  %v24849_v27 = vld [vmem:[#allocation189_spill] sm:$0xff] }
 0x419   : > { %18201 = vmatprep.mubr.bf16.mxu0 %v24839_v43  ;;  %v24850_v43 = vld [vmem:[#allocation33_spill] sm:$0xff] }
 0x41f   : > { %17418 = vmatmul.mubr.bf16.gmra.mrb[20].mxu1 %v24840_v8  ;;  %v24851_v8 = vld [vmem:[#allocation90_spill] sm:$0xff] }
 0x420   : > { %18202 = vmatmul.mubr.bf16.gmra.mrb[100].mxu0 %v24841_v21  ;;  %17421 = vmatprep.mubr.bf16.mxu1 %v24842_v53  ;;  %v24852_v21 = vld [vmem:[#allocation34_spill] sm:$0xff] }
 0x421   : > { %18205 = vmatprep.mubr.bf16.mxu0 %v24843_v6  ;;  %v24853_v53 = vld [vmem:[#allocation190_spill] sm:$0xff]  ;;  %v24854_v6 = vld [vmem:[#allocation37_spill] sm:$0xff] }
 0x427   : > { %17422 = vmatmul.mubr.bf16.gmra.mrb[24].mxu1 %v24844_v20  ;;  %v24855_v20 = vld [vmem:[#allocation94_spill] sm:$0xff] }
 0x428   : > { %18206 = vmatmul.mubr.bf16.gmra.mrb[104].mxu0 %v24845_v40  ;;  %17425 = vmatprep.mubr.bf16.mxu1 %v24846_v32  ;;  %v24856_v40 = vld [vmem:[#allocation38_spill] sm:$0xff]  ;;  %v24857_v32 = vld [vmem:[#allocation91_spill] sm:$0xff] }
 0x429   : > { %18209 = vmatprep.mubr.bf16.mxu0 %v24847_v11  ;;  %v24858_v11 = vld [vmem:[#allocation41_spill] sm:$0xff] }
 0x42f   : > { %17426 = vmatmul.mubr.bf16.gmra.mrb[28].mxu1 %v24848_v35  ;;  %v24859_v35 = vld [vmem:[#allocation100_spill] sm:$0xff] }
 0x430   : > { %18210 = vmatmul.mubr.bf16.gmra.mrb[108].mxu0 %v24849_v27  ;;  %17429 = vmatprep.mubr.bf16.mxu1 %v24850_v43  ;;  %v24860_v27 = vld [vmem:[#allocation42_spill] sm:$0xff]  ;;  %v24861_v43 = vld [vmem:[#allocation95_spill] sm:$0xff] }
 0x431   : > { %18213 = vmatprep.mubr.bf16.mxu0 %v24851_v8  ;;  %v24862_v8 = vld [vmem:[#allocation47_spill] sm:$0xff] }
 0x437   : > { %17430 = vmatmul.mubr.bf16.gmra.mrb[32].mxu1 %v24852_v21  ;;  %v24863_v21 = vld [vmem:[#allocation104_spill] sm:$0xff] }
 0x438   : > { %18214 = vmatmul.mubr.bf16.gmra.mrb[112].mxu0 %v24853_v53  ;;  %17433 = vmatprep.mubr.bf16.mxu1 %v24854_v6  ;;  %v24864_v53 = vld [vmem:[#allocation49_spill] sm:$0xff] }
 0x439   : > { %18217 = vmatprep.mubr.bf16.mxu0 %v24855_v20  ;;  %v24865_v6 = vld [vmem:[#allocation101_spill] sm:$0xff]  ;;  %v24866_v20 = vld [vmem:[#allocation50_spill] sm:$0xff] }
 0x43f   : > { %17434 = vmatmul.mubr.bf16.gmra.mrb[36].mxu1 %v24856_v40  ;;  %v24867_v40 = vld [vmem:[#allocation110_spill] sm:$0xff] }
 0x440   : > { %18218 = vmatmul.mubr.bf16.gmra.mrb[116].mxu0 %v24857_v32  ;;  %17437 = vmatprep.mubr.bf16.mxu1 %v24858_v11  ;;  %v24868_v32 = vld [vmem:[#allocation57_spill] sm:$0xff] }
 0x441   : > { %18221 = vmatprep.mubr.bf16.mxu0 %v24859_v35  ;;  %v24869_v11 = vld [vmem:[#allocation105_spill] sm:$0xff]  ;;  %v24870_v35 = vld [vmem:[#allocation64_spill] sm:$0xff] }
 0x447   : > { %17438 = vmatmul.mubr.bf16.gmra.mrb[40].mxu1 %v24860_v27  ;;  %v24871_v27 = vld [vmem:[#allocation114_spill] sm:$0xff] }
 0x448   : > { %18222 = vmatmul.mubr.bf16.gmra.mrb[120].mxu0 %v24861_v43  ;;  %17441 = vmatprep.mubr.bf16.mxu1 %v24862_v8  ;;  %v24872_v43 = vld [vmem:[#allocation65_spill] sm:$0xff]  ;;  %v24873_v8 = vld [vmem:[#allocation191_spill] sm:$0xff] }
 0x449   : > { %18225 = vmatprep.mubr.bf16.mxu0 %v24863_v21  ;;  %v24874_v21 = vld [vmem:[#allocation73_spill] sm:$0xff] }
 0x44f   : > { %17442 = vmatmul.mubr.bf16.gmra.mrb[44].mxu1 %v24864_v53  ;;  %v24875_v53 = vld [vmem:[#allocation115_spill] sm:$0xff] }
 0x450   : > { %18226 = vmatmul.mubr.bf16.gmra.mrb[124].mxu0 %v24865_v6  ;;  %17445 = vmatprep.mubr.bf16.mxu1 %v24866_v20  ;;  %v24876_v6 = vld [vmem:[#allocation77_spill] sm:$0xff]  ;;  %v24877_v20 = vld [vmem:[#allocation83_spill] sm:$0xff] }
 0x451   : > { %18229 = vmatprep.mubr.bf16.mxu0 %v24867_v40  ;;  %v24878_v40 = vld [vmem:[#allocation120_spill] sm:$0xff] }
 0x457   : > { %17446 = vmatmul.mubr.bf16.gmra.mrb[48].mxu1 %v24868_v32  ;;  %v11257_v32 = vshll.u32 %v22579_v18, 16 }
 0x458   : > { %18230 = vmatmul.mubr.bf16.gmra.mrb[128].mxu0 %v24869_v11  ;;  %17449 = vmatprep.mubr.bf16.mxu1 %v24870_v35  ;;  %v24879_v11 = vld [vmem:[#allocation87_spill] sm:$0xff]  ;;  %v24880_v35 = vld [vmem:[#allocation124_spill] sm:$0xff] }
 0x459   : > { %18233 = vmatprep.mubr.bf16.mxu0 %v24871_v27  ;;  %v24881_v27 = vld [vmem:[#allocation93_spill] sm:$0xff] }
 0x45f   : > { %17450 = vmatmul.mubr.bf16.gmra.mrb[52].mxu1 %v24872_v43  ;;  %v24882_v43 = vld [vmem:[#allocation130_spill] sm:$0xff] }
 0x460   : > { %18234 = vmatmul.mubr.bf16.gmra.mrb[132].mxu0 %v24873_v8  ;;  %17453 = vmatprep.mubr.bf16.mxu1 %v24874_v21  ;;  %v11259_v8 = vrot.slane %v11257_v32, 1  ;;  %v11265_v21 = vshll.u32 %v22586_v14, 16 }
 0x461   : > { %18237 = vmatprep.mubr.bf16.mxu0 %v24875_v53  ;;  %v11261_v53 = vshrl.u32 %v22579_v18, 16  ;;  %v11281_v18 = vshll.u32 %v22605_v41, 16 }
 0x463   : > { %v11263_v32 = vor.u32 %v11261_v53, %v11259_v8 }
 0x467   : > { %17454 = vmatmul.mubr.bf16.gmra.mrb[56].mxu1 %v24876_v6  ;;  %v11269_v6 = vshrl.u32 %v22586_v14, 16  ;;  %v11277_v14 = vshrl.u32 %v22599_v5, 16 }
 0x468   : > { %18238 = vmatmul.mubr.bf16.gmra.mrb[136].mxu0 %v22305_v29  ;;  %17457 = vmatprep.mubr.bf16.mxu1 %v24877_v20  ;;  %v11260_v29 = vsel %vm1824_vm0, %v22342_v63, %v11259_v8  ;;  %v11273_v20 = vshll.u32 %v22599_v5, 16  ;;  %v11283_v8 = vrot.slane %v11281_v18, 1 }
 0x469   : > { %18241 = vmatprep.mubr.bf16.mxu0 %v24878_v40  ;;  %v24883_v40 = vld [vmem:[#allocation97_spill] sm:$0xff] }
 0x46a   : > { %v11275_v3 = vrot.slane %v11273_v20, 1 }
 0x46c   : > { %v11279_v53 = vor.u32 %v11277_v14, %v11275_v3 }
 0x46f   : > { %17458 = vmatmul.mubr.bf16.gmra.mrb[60].mxu1 %v24879_v11  ;;  %v24884_v11 = vld [vmem:[#allocation172_spill] sm:$0xff] }
 0x470   : > { %18242 = vmatmul.mubr.bf16.gmra.mrb[140].mxu0 %v24880_v35  ;;  %17461 = vmatprep.mubr.bf16.mxu1 %v24881_v27  ;;  %v24885_v35 = vld [vmem:[#allocation103_spill] sm:$0xff]  ;;  %v11267_v27 = vrot.slane %v11265_v21, 1  ;;  %v24887_v21 = vld [vmem:[#allocation113_spill] sm:$0xff] }
 0x471   : > { %18245 = vmatprep.mubr.bf16.mxu0 %v24882_v43 }
 0x472   : > { %v11271_v43 = vor.u32 %v11269_v6, %v11267_v27  ;;  %v11268_v63 = vsel %vm1824_vm0, %v11263_v32, %v11267_v27  ;;  %v11293_v27 = vshrl.u32 %v22617_v33, 16 }
 0x474   : > { %v11276_v34 = vsel %vm1824_vm0, %v11271_v43, %v11275_v3  ;;  %v24888_v43 = vld [vmem:[#allocation117_spill] sm:$0xff]  ;;  %v24890_v3 = vld [vmem:[#allocation126_spill] sm:$0xff] }
 0x477   : > { %17462 = vmatmul.mubr.bf16.gmra.mrb[64].mxu1 %v24883_v40  ;;  %v11285_v40 = vshrl.u32 %v22605_v41, 16 }
 0x478   : > { %18246 = vmatmul.mubr.bf16.gmra.mrb[144].mxu0 %v24884_v11  ;;  %17465 = vmatprep.mubr.bf16.mxu1 %v24885_v35  ;;  %v11289_v11 = vshll.u32 %v22617_v33, 16  ;;  %v11284_v35 = vsel %vm1824_vm0, %v11279_v53, %v11283_v8  ;;  %v24892_v33 = vld [vmem:[#allocation44_spill] sm:$0xff] }
 0x479   : > { %18249 = vmatprep.mubr.bf16.mxu0 %v11260_v29  ;;  %v19998_v29 = vld [vmem:[%s20225_s13 + $0x2a8] ss:$0 sps:$4 sm:$0xff]   ;;  %v11287_v6 = vor.u32 %v11285_v40, %v11283_v8  ;;  %v24893_v40 = vld [vmem:[#allocation46_spill] sm:$0xff]  ;;  %v24896_v8 = vld [vmem:[#allocation52_spill] sm:$0xff] }
 0x47a   : > { %v11291_v20 = vrot.slane %v11289_v11, 1  ;;  %v11297_v32 = vshll.u32 %v19998_v29, 16  ;;  %v24894_v11 = vld [vmem:[#allocation48_spill] sm:$0xff]  ;;  %v24900_v29 = vld [vmem:[#allocation15_spill] sm:$0xff] }
 0x47b   : > { %v24898_v53 = vld [vmem:[#allocation12_spill] sm:$0xff] }
 0x47c   : > { %v11292_v41 = vsel %vm1824_vm0, %v11287_v6, %v11291_v20  ;;  %v11299_v18 = vrot.slane %v11297_v32, 1  ;;  %v24902_v6 = vld [vmem:[#allocation16_spill] sm:$0xff] }
 0x47d   : > { %v24909_v32 = vld [vmem:[#allocation72_spill] sm:$0xff] }
 0x47f   : > { %17466 = vmatmul.mubr.bf16.gmra.mrb[68].mxu1 %v24886_v42  ;;  %v24889_v42 = vld [vmem:[#allocation122_spill] sm:$0xff] }
 0x480   : > { %18250 = vmatmul.mubr.bf16.gmra.mrb[148].mxu0 %v11268_v63  ;;  %17469 = vmatprep.mubr.bf16.mxu1 %v24887_v21  ;;  %v11295_v63 = vor.u32 %v11293_v27, %v11291_v20  ;;  %v24895_v21 = vld [vmem:[#allocation51_spill] sm:$0xff] }
 0x481   : > { %18253 = vmatprep.mubr.bf16.mxu0 %v11276_v34  ;;  %v24891_v34 = vld [vmem:[#allocation131_spill] sm:$0xff] }
 0x482   : > { %v11300_v14 = vsel %vm1824_vm0, %v11295_v63, %v11299_v18  ;;  %v24904_v20 = vld [vmem:[#allocation35_spill] sm:$0xff]  ;;  %v24913_v63 = vld [vmem:[#allocation82_spill] sm:$0xff] }
 0x483   : > { %v24908_v27 = vld [vmem:[#allocation39_spill] sm:$0xff] }
 0x484   : > { %v24914_v18 = vld [vmem:[#allocation55_spill] sm:$0xff] }
 0x487   : > { %17470 = vmatmul.mubr.bf16.gmra.mrb[72].mxu1 %v24888_v43  ;;  %v24911_v43 = vld [vmem:[#allocation76_spill] sm:$0xff] }
 0x488   : > { %18254 = vmatmul.mubr.bf16.gmra.mrb[152].mxu0 %v11284_v35  ;;  %17473 = vmatprep.mubr.bf16.mxu1 %v24889_v42  ;;  %v24906_v35 = vld [vmem:[#allocation36_spill] sm:$0xff]  ;;  %v24912_v42 = vld [vmem:[#allocation45_spill] sm:$0xff] }
 0x489   : > { %18257 = vmatprep.mubr.bf16.mxu0 %v11292_v41  ;;  %v24910_v41 = vld [vmem:[#allocation43_spill] sm:$0xff] }
 0x48f   : > { %17474 = vmatmul.mubr.bf16.gmra.mrb[76].mxu1 %v24890_v3 }
 0x490   : > { %18258 = vmatmul.mubr.bf16.gmra.mrb[156].mxu0 %v11300_v14  ;;  %17477 = vmatprep.mubr.bf16.mxu1 %v24891_v34 }
 0x491   : > { %18277 = vmatprep.mubr.bf16.mxu0 %v22380_v30  ;;  %v24897_v30 = vld [vmem:[#allocation53_spill] sm:$0xff] }
 0x497   : > { %17478 = vmatmul.mubr.bf16.gmra.mrb[80].mxu1 %v24892_v33 }
 0x498   : > { %18278 = vmatmul.mubr.bf16.vlgmr.msra.gmra.mrb[0].mxu0 %v22383_v24  ;;  %17481 = vmatprep.mubr.bf16.mxu1 %v24893_v40  ;;  %v24899_v24 = vld [vmem:[#allocation54_spill] sm:$0xff] }
 0x499   : > { %18281 = vmatprep.mubr.bf16.mxu0 %v22392_v4  ;;  %v24901_v4 = vld [vmem:[#allocation59_spill] sm:$0xff] }
 0x49f   : > { %17482 = vmatmul.mubr.bf16.gmra.mrb[84].mxu1 %v24894_v11 }
 0x4a0   : > { %18282 = vmatmul.mubr.bf16.gmra.mrb[4].mxu0 %v22395_v38  ;;  %17485 = vmatprep.mubr.bf16.mxu1 %v24895_v21  ;;  %v24903_v38 = vld [vmem:[#allocation61_spill] sm:$0xff] }
 0x4a1   : > { %18285 = vmatprep.mubr.bf16.mxu0 %v22404_v44  ;;  %v24905_v44 = vld [vmem:[#allocation66_spill] sm:$0xff] }
 0x4a7   : > { %17486 = vmatmul.mubr.bf16.gmra.mrb[88].mxu1 %v24896_v8 }
 0x4a8   : > { %18286 = vmatmul.mubr.bf16.gmra.mrb[8].mxu0 %v22407_v54  ;;  %17489 = vmatprep.mubr.bf16.mxu1 %v24897_v30  ;;  %v24907_v54 = vld [vmem:[#allocation68_spill] sm:$0xff] }
 0x4a9   : > { %18289 = vmatprep.mubr.bf16.mxu0 %v24898_v53 }
 0x4af   : > { %17490 = vmatmul.mubr.bf16.gmra.mrb[92].mxu1 %v24899_v24 }
 0x4b0   : > { %18290 = vmatmul.mubr.bf16.gmra.mrb[12].mxu0 %v24900_v29  ;;  %17493 = vmatprep.mubr.bf16.mxu1 %v24901_v4 }
 0x4b1   : > { %18293 = vmatprep.mubr.bf16.mxu0 %v24902_v6  ;;  %v24915_v6 = vld [vmem:[#allocation86_spill] sm:$0xff] }
 0x4b7   : > { %17494 = vmatmul.mubr.bf16.gmra.mrb[96].mxu1 %v24903_v38 }
 0x4b8   : > { %18294 = vmatmul.mubr.bf16.gmra.mrb[16].mxu0 %v24904_v20  ;;  %17497 = vmatprep.mubr.bf16.mxu1 %v24905_v44  ;;  %v24916_v20 = vld [vmem:[#allocation62_spill] sm:$0xff] }
 0x4b9   : > { %18297 = vmatprep.mubr.bf16.mxu0 %v24906_v35  ;;  %v24917_v35 = vld [vmem:[#allocation92_spill] sm:$0xff] }
 0x4bf   : > { %17498 = vmatmul.mubr.bf16.gmra.mrb[100].mxu1 %v24907_v54 }
 0x4c0   : > { %18298 = vmatmul.mubr.bf16.gmra.mrb[20].mxu0 %v24908_v27  ;;  %17501 = vmatprep.mubr.bf16.mxu1 %v24909_v32  ;;  %v24918_v27 = vld [vmem:[#allocation85_spill] sm:$0xff] }
 0x4c1   : > { %18301 = vmatprep.mubr.bf16.mxu0 %v24910_v41 }
 0x4c7   : > { %17502 = vmatmul.mubr.bf16.gmra.mrb[104].mxu1 %v24911_v43 }
 0x4c8   : > { %18302 = vmatmul.mubr.bf16.gmra.mrb[24].mxu0 %v24912_v42  ;;  %17505 = vmatprep.mubr.bf16.mxu1 %v24913_v63 }
 0x4c9   : > { %18305 = vmatprep.mubr.bf16.mxu0 %v24914_v18 }
 0x4ca   : > { %v23036_v14 = vpop.f32.mrb[0].mxu1 }
 0x4cb   : > { %v23038_v3 = vpop.f32.mrb[1].mxu1 }
 0x4cc   : > { %v23040_v53 = vpop.f32.mrb[2].mxu1 }
 0x4cd   : > { %v23042_v29 = vpop.f32.mrb[3].mxu1 }
 0x4cf   : > { %17506 = vmatmul.mubr.bf16.gmra.mrb[108].mxu1 %v24915_v6 }
 0x4d0   : > { %18306 = vmatmul.mubr.bf16.gmra.mrb[28].mxu0 %v24916_v20  ;;  %17509 = vmatprep.mubr.bf16.mxu1 %v24917_v35 }
 0x4d1   : > { %18309 = vmatprep.mubr.bf16.mxu0 %v24918_v27 }
 0x4d2   : > { %v23048_v41 = vpop.f32.mrb[4].mxu1 }
 0x4d3   : > { %v5493_v42 = vpop.f32.mrb[5].mxu1 }
 0x4d4   : > { %v23050_v18 = vpop.f32.mrb[6].mxu1  ;;  %v24926_v42 = vld [vmem:[#allocation106_spill] sm:$0xff] }
 0x4d5   : > { %v23052_v5 = vpop.f32.mrb[7].mxu1 }
 0x4d7   : > { %17510 = vmatmul.mubr.bf16.gmra.mrb[112].mxu1 %v24919_v25 }
 0x4d8   : > { %18310 = vmatmul.mubr.bf16.gmra.mrb[32].mxu0 %v24920_v49  ;;  %17513 = vmatprep.mubr.bf16.mxu1 %v24921_v2 }
 0x4d9   : > { %18313 = vmatprep.mubr.bf16.mxu0 %v24922_v15 }
 0x4da   : > { %v23058_v20 = vpop.f32.mrb[8].mxu1 }
 0x4db   : > { %24923 = vst [vmem:[#allocation162_spill] sm:$0xff] %v23058_v20  ;;  %v23060_v31 = vpop.f32.mrb[9].mxu1 }
 0x4dc   : > { %24924 = vst [vmem:[#allocation163_spill] sm:$0xff] %v23060_v31  ;;  %v23062_v27 = vpop.f32.mrb[10].mxu1  ;;  %v24934_v31 = vld [vmem:[#allocation79_spill] sm:$0xff] }
 0x4dd   : > { %24925 = vst [vmem:[#allocation164_spill] sm:$0xff] %v23062_v27  ;;  %v5512_v17 = vpop.f32.mrb[11].mxu1  ;;  %v24936_v27 = vld [vmem:[#allocation88_spill] sm:$0xff] }
 0x4de   : > { %v24935_v17 = vld [vmem:[#allocation121_spill] sm:$0xff] }
 0x4df   : > { %17514 = vmatmul.mubr.bf16.gmra.mrb[116].mxu1 %v24926_v42 }
 0x4e0   : > { %18314 = vmatmul.mubr.bf16.gmra.mrb[36].mxu0 %v24927_v7  ;;  %17517 = vmatprep.mubr.bf16.mxu1 %v24928_v46 }
 0x4e1   : > { %18317 = vmatprep.mubr.bf16.mxu0 %v24929_v13 }
 0x4e2   : > { %v17411_v49 = vpop.f32.mrb[12].mxu1 }
 0x4e3   : > { %v23068_v55 = vpop.f32.mrb[13].mxu1 }
 0x4e4   : > { %24930 = vst [vmem:[#allocation165_spill] sm:$0xff] %v23068_v55  ;;  %v23070_v9 = vpop.f32.mrb[14].mxu1  ;;  %v24940_v55 = vld [vmem:[#allocation125_spill] sm:$0xff] }
 0x4e5   : > { %24931 = vst [vmem:[#allocation166_spill] sm:$0xff] %v23070_v9  ;;  %v23072_v15 = vpop.f32.mrb[15].mxu1  ;;  %v24941_v9 = vld [vmem:[#allocation89_spill] sm:$0xff] }
 0x4e6   : > { %24932 = vst [vmem:[#allocation167_spill] sm:$0xff] %v23072_v15  ;;  %v24942_v15 = vld [vmem:[#allocation129_spill] sm:$0xff] }
 0x4e7   : > { %17518 = vmatmul.mubr.bf16.gmra.mrb[120].mxu1 %v24933_v16 }
 0x4e8   : > { %18318 = vmatmul.mubr.bf16.gmra.mrb[40].mxu0 %v24934_v31  ;;  %17521 = vmatprep.mubr.bf16.mxu1 %v24935_v17 }
 0x4e9   : > { %18321 = vmatprep.mubr.bf16.mxu0 %v24936_v27 }
 0x4ea   : > { %v23078_v7 = vpop.f32.mrb[16].mxu1 }
 0x4eb   : > { %24937 = vst [vmem:[#allocation168_spill] sm:$0xff] %v23078_v7  ;;  %v23080_v20 = vpop.f32.mrb[17].mxu1 }
 0x4ec   : > { %24938 = vst [vmem:[#allocation169_spill] sm:$0xff] %v23080_v20  ;;  %v17416_v13 = vpop.f32.mrb[18].mxu1  ;;  %v24948_v20 = vld [vmem:[#allocation132_spill] sm:$0xff] }
 0x4ed   : > { %v23082_v49 = vpop.f32.mrb[19].mxu1  ;;  %v24949_v13 = vld [vmem:[#allocation99_spill] sm:$0xff] }
 0x4ee   : > { %24939 = vst [vmem:[#allocation170_spill] sm:$0xff] %v23082_v49  ;;  %v24950_v49 = vld [vmem:[#allocation135_spill] sm:$0xff] }
 0x4ef   : > { %17522 = vmatmul.mubr.bf16.gmra.mrb[124].mxu1 %v24940_v55  ;;  %v24951_v55 = vld [vmem:[#allocation108_spill] sm:$0xff] }
 0x4f0   : > { %18322 = vmatmul.mubr.bf16.gmra.mrb[44].mxu0 %v24941_v9  ;;  %17525 = vmatprep.mubr.bf16.mxu1 %v24942_v15 }
 0x4f1   : > { %18325 = vmatprep.mubr.bf16.mxu0 %v24943_v58 }
 0x4f2   : > { %v23088_v31 = vpop.f32.mrb[20].mxu1 }
 0x4f3   : > { %24944 = vst [vmem:[#allocation171_spill] sm:$0xff] %v23088_v31  ;;  %v23090_v17 = vpop.f32.mrb[21].mxu1 }
 0x4f4   : > { %24945 = vst [vmem:[#allocation173_spill] sm:$0xff] %v23090_v17  ;;  %v23092_v27 = vpop.f32.mrb[22].mxu1  ;;  %v24955_v17 = vld [vmem:[#allocation137_spill] sm:$0xff] }
 0x4f5   : > { %24946 = vst [vmem:[#allocation174_spill] sm:$0xff] %v23092_v27  ;;  %v23094_v7 = vpop.f32.mrb[23].mxu1  ;;  %v24956_v27 = vld [vmem:[#allocation111_spill] sm:$0xff] }
 0x4f6   : > { %24947 = vst [vmem:[#allocation176_spill] sm:$0xff] %v23094_v7  ;;  %v24957_v7 = vld [vmem:[#allocation140_spill] sm:$0xff] }
 0x4f7   : > { %17526 = vmatmul.mubr.bf16.gmra.mrb[128].mxu1 %v24948_v20  ;;  %v24958_v20 = vld [vmem:[#allocation109_spill] sm:$0xff] }
 0x4f8   : > { %18326 = vmatmul.mubr.bf16.gmra.mrb[48].mxu0 %v24949_v13  ;;  %17529 = vmatprep.mubr.bf16.mxu1 %v24950_v49 }
 0x4f9   : > { %18329 = vmatprep.mubr.bf16.mxu0 %v24951_v55 }
 0x4fa   : > { %v23100_v9 = vpop.f32.mrb[24].mxu1 }
 0x4fb   : > { %24952 = vst [vmem:[#allocation178_spill] sm:$0xff] %v23100_v9  ;;  %v5573_v15 = vpop.f32.mrb[25].mxu1 }
 0x4fc   : > { %v23102_v58 = vpop.f32.mrb[26].mxu1  ;;  %v24962_v15 = vld [vmem:[#allocation141_spill] sm:$0xff] }
 0x4fd   : > { %24953 = vst [vmem:[#allocation139_spill] sm:$0xff] %v23102_v58  ;;  %v23104_v31 = vpop.f32.mrb[27].mxu1  ;;  %v24963_v58 = vld [vmem:[#allocation118_spill] sm:$0xff] }
 0x4fe   : > { %24954 = vst [vmem:[#allocation180_spill] sm:$0xff] %v23104_v31  ;;  %v24964_v31 = vld [vmem:[#allocation144_spill] sm:$0xff] }
 0x4ff   : > { %17530 = vmatmul.mubr.bf16.gmra.mrb[132].mxu1 %v24955_v17  ;;  %v24965_v17 = vld [vmem:[#allocation123_spill] sm:$0xff] }
 0x500   : > { %18330 = vmatmul.mubr.bf16.gmra.mrb[52].mxu0 %v24956_v27  ;;  %17533 = vmatprep.mubr.bf16.mxu1 %v24957_v7 }
 0x501   : > { %18333 = vmatprep.mubr.bf16.mxu0 %v24958_v20 }
 0x502   : > { %v23110_v13 = vpop.f32.mrb[28].mxu1 }
 0x503   : > { %24959 = vst [vmem:[#allocation142_spill] sm:$0xff] %v23110_v13  ;;  %v23112_v49 = vpop.f32.mrb[29].mxu1  ;;  %v24969_v13 = vld [vmem:[#allocation145_spill] sm:$0xff] }
 0x504   : > { %24960 = vst [vmem:[#allocation143_spill] sm:$0xff] %v23112_v49  ;;  %v23114_v55 = vpop.f32.mrb[30].mxu1  ;;  %v24977_v49 = vld [vmem:[#allocation134_spill] sm:$0xff] }
 0x505   : > { %24961 = vst [vmem:[#allocation146_spill] sm:$0xff] %v23114_v55  ;;  %v5592_v9 = vpop.f32.mrb[31].mxu1 }
 0x506   : > { %v24970_v9 = vld [vmem:[#allocation147_spill] sm:$0xff] }
 0x507   : > { %17534 = vmatmul.mubr.bf16.gmra.mrb[136].mxu1 %v24962_v15 }
 0x508   : > { %18334 = vmatmul.mubr.bf16.gmra.mrb[56].mxu0 %v24963_v58  ;;  %17537 = vmatprep.mubr.bf16.mxu1 %v24964_v31 }
 0x509   : > { %18337 = vmatprep.mubr.bf16.mxu0 %v24965_v17 }
 0x50a   : > { %v17431_v27 = vpop.f32.mrb[32].mxu1 }
 0x50b   : > { %v23120_v28 = vpop.f32.mrb[33].mxu1 }
 0x50c   : > { %24966 = vst [vmem:[#allocation182_spill] sm:$0xff] %v23120_v28  ;;  %v23122_v7 = vpop.f32.mrb[34].mxu1  ;;  %v24974_v28 = vld [vmem:[#allocation148_spill] sm:$0xff] }
 0x50d   : > { %24967 = vst [vmem:[#allocation149_spill] sm:$0xff] %v23122_v7  ;;  %v23124_v20 = vpop.f32.mrb[35].mxu1  ;;  %v24975_v7 = vld [vmem:[#allocation133_spill] sm:$0xff] }
 0x50e   : > { %24968 = vst [vmem:[#allocation183_spill] sm:$0xff] %v23124_v20  ;;  %v24976_v20 = vld [vmem:[#allocation150_spill] sm:$0xff] }
 0x50f   : > { %17538 = vmatmul.mubr.bf16.gmra.mrb[140].mxu1 %v24969_v13 }
 0x510   : > { %18338 = vmatmul.mubr.bf16.gmra.mrb[60].mxu0 %v22582_v47  ;;  %17541 = vmatprep.mubr.bf16.mxu1 %v24970_v9 }
 0x511   : > { %18341 = vmatprep.mubr.bf16.mxu0 %v22595_v0 }
 0x512   : > { %v23130_v58 = vpop.f32.mrb[36].mxu1 }
 0x513   : > { %24971 = vst [vmem:[#allocation6_spill] sm:$0xff] %v23130_v58  ;;  %v23132_v55 = vpop.f32.mrb[37].mxu1 }
 0x514   : > { %24972 = vst [vmem:[#allocation184_spill] sm:$0xff] %v23132_v55  ;;  %v17436_v17 = vpop.f32.mrb[38].mxu1  ;;  %v24982_v55 = vld [vmem:[#allocation151_spill] sm:$0xff] }
 0x515   : > { %v23134_v27 = vpop.f32.mrb[39].mxu1  ;;  %v24983_v17 = vld [vmem:[#allocation179_spill] sm:$0xff] }
 0x516   : > { %24973 = vst [vmem:[#allocation7_spill] sm:$0xff] %v23134_v27  ;;  %v24984_v27 = vld [vmem:[#allocation152_spill] sm:$0xff] }
 0x517   : > { %17542 = vmatmul.mubr.bf16.gmra.mrb[144].mxu1 %v24974_v28  ;;  %v24994_v28 = vld [vmem:[#allocation138_spill] sm:$0xff] }
 0x518   : > { %18342 = vmatmul.mubr.bf16.gmra.mrb[64].mxu0 %v24975_v7  ;;  %17545 = vmatprep.mubr.bf16.mxu1 %v24976_v20 }
 0x519   : > { %18345 = vmatprep.mubr.bf16.mxu0 %v24977_v49 }
 0x51a   : > { %v23140_v47 = vpop.f32.mrb[40].mxu1 }
 0x51b   : > { %24978 = vst [vmem:[#allocation185_spill] sm:$0xff] %v23140_v47  ;;  %v23142_v9 = vpop.f32.mrb[41].mxu1 }
 0x51c   : > { %24979 = vst [vmem:[#allocation8_spill] sm:$0xff] %v23142_v9  ;;  %v23144_v0 = vpop.f32.mrb[42].mxu1  ;;  %v6940_v9 = vshrl.u32 %v24891_v34, 16 }
 0x51d   : > { %24980 = vst [vmem:[#allocation153_spill] sm:$0xff] %v23144_v0  ;;  %v23146_v58 = vpop.f32.mrb[43].mxu1  ;;  %v6944_v0 = vshll.u32 %v24892_v33, 16 }
 0x51e   : > { %24981 = vst [vmem:[#allocation9_spill] sm:$0xff] %v23146_v58  ;;  %v24988_v58 = vld [vmem:[#allocation175_spill] sm:$0xff] }
 0x51f   : > { %17546 = vmatmul.mubr.bf16.gmra.mrb[148].mxu1 %v24982_v55  ;;  %v6948_v55 = vshrl.u32 %v24892_v33, 16 }
 0x520   : > { %18346 = vmatmul.mubr.bf16.gmra.mrb[68].mxu0 %v24983_v17  ;;  %17549 = vmatprep.mubr.bf16.mxu1 %v24984_v27  ;;  %v24989_v17 = vld [vmem:[#allocation177_spill] sm:$0xff] }
 0x521   : > { %18349 = vmatprep.mubr.bf16.mxu0 %v22638_v45  ;;  %v24990_v45 = vld [vmem:[#allocation136_spill] sm:$0xff] }
 0x522   : > { %v23152_v7 = vpop.f32.mrb[44].mxu1  ;;  %v6942_v27 = vor.u32 %v6940_v9, %v24990_v45 }
 0x523   : > { %24985 = vst [vmem:[#allocation186_spill] sm:$0xff] %v23152_v7  ;;  %v5653_v20 = vpop.f32.mrb[45].mxu1  ;;  %v6946_v7 = vrot.slane %v6944_v0, 1 }
 0x524   : > { %v23154_v49 = vpop.f32.mrb[46].mxu1 }
 0x525   : > { %24986 = vst [vmem:[#allocation10_spill] sm:$0xff] %v23154_v49  ;;  %v23156_v47 = vpop.f32.mrb[47].mxu1  ;;  %v6950_v0 = vor.u32 %v6948_v55, %v6946_v7  ;;  %v6972_v55 = vshrl.u32 %v24895_v21, 16 }
 0x526   : > { %24987 = vst [vmem:[#allocation58_spill] sm:$0xff] %v23156_v47  ;;  %v6952_v47 = vshll.u32 %v24893_v40, 16 }
 0x527   : > { %17550 = vmatmul.mubr.bf16.gmra.mrb[152].mxu1 %v24988_v58 }
 0x528   : > { %18350 = vmatmul.mubr.bf16.gmra.mrb[72].mxu0 %v22641_v10  ;;  %17553 = vmatprep.mubr.bf16.mxu1 %v24989_v17  ;;  %v6947_v10 = vsel %vm1824_vm0, %v6942_v27, %v6946_v7  ;;  %v6956_v17 = vshrl.u32 %v24893_v40, 16  ;;  %v6954_v9 = vrot.slane %v6952_v47, 1 }
 0x529   : > { %18353 = vmatprep.mubr.bf16.mxu0 %v22657_v39  ;;  %v6960_v39 = vshll.u32 %v24894_v11, 16 }
 0x52a   : > { %v23165_v20 = vpop.f32.mrb[48].mxu1  ;;  %v6958_v45 = vor.u32 %v6956_v17, %v6954_v9  ;;  %v6955_v40 = vsel %vm1824_vm0, %v6950_v0, %v6954_v9  ;;  %v6984_v9 = vshll.u32 %v24897_v30, 16 }
 0x52b   : > { %24991 = vst [vmem:[#allocation11_spill] sm:$0xff] %v23165_v20  ;;  %v23167_v49 = vpop.f32.mrb[49].mxu1  ;;  %v6964_v20 = vshrl.u32 %v24894_v11, 16 }
 0x52c   : > { %24992 = vst [vmem:[#allocation187_spill] sm:$0xff] %v23167_v49  ;;  %v23170_v34 = vpop.f32.mrb[50].mxu1 }
 0x52d   : > { %24993 = vst [vmem:[#allocation13_spill] sm:$0xff] %v23170_v34  ;;  %v5672_v58 = vpop.f32.mrb[51].mxu1  ;;  %v6962_v34 = vrot.slane %v6960_v39, 1 }
 0x52e   : > { %v6968_v58 = vshll.u32 %v24895_v21, 16 }
 0x52f   : > { %17554 = vmatmul.mubr.bf16.gmra.mrb[156].mxu1 %v24994_v28 }
 0x530   : > { %18354 = vmatmul.mubr.bf16.gmra.mrb[76].mxu0 %v22660_v37  ;;  %17653 = vmatprep.mubr.bf16.mxu1 %v6947_v10  ;;  %v6963_v37 = vsel %vm1824_vm0, %v6958_v45, %v6962_v34  ;;  %v6970_v7 = vrot.slane %v6968_v58, 1  ;;  %v6980_v45 = vshrl.u32 %v24896_v8, 16 }
 0x531   : > { %18357 = vmatprep.mubr.bf16.mxu0 %v22672_v48  ;;  %v6976_v48 = vshll.u32 %v24896_v8, 16 }
 0x532   : > { %v17451_v49 = vpop.f32.mrb[52].mxu1  ;;  %v6974_v17 = vor.u32 %v6972_v55, %v6970_v7 }
 0x533   : > { %v23179_v33 = vpop.f32.mrb[53].mxu1  ;;  %v6966_v49 = vor.u32 %v6964_v20, %v6962_v34  ;;  %v6978_v10 = vrot.slane %v6976_v48, 1  ;;  %v6988_v20 = vshrl.u32 %v24897_v30, 16  ;;  %v6986_v34 = vrot.slane %v6984_v9, 1 }
 0x534   : > { %v23182_v27 = vpop.f32.mrb[54].mxu1 }
 0x535   : > { %v23186_v47 = vpop.f32.mrb[55].mxu1  ;;  %v6971_v21 = vsel %vm1824_vm0, %v6966_v49, %v6970_v7  ;;  %v7000_v7 = vshll.u32 %v24901_v4, 16 }
 0x537   : > { %17654 = vmatmul.mubr.bf16.vlgmr.msra.gmra.mrb[80].mxu1 %v6955_v40  ;;  %v6982_v40 = vor.u32 %v6980_v45, %v6978_v10 }
 0x538   : > { %18358 = vmatmul.mubr.bf16.gmra.mrb[80].mxu0 %v22675_v23  ;;  %17657 = vmatprep.mubr.bf16.mxu1 %v6963_v37  ;;  %v6979_v23 = vsel %vm1824_vm0, %v6974_v17, %v6978_v10  ;;  %v6990_v37 = vor.u32 %v6988_v20, %v6986_v34  ;;  %v6996_v17 = vshrl.u32 %v24899_v24, 16  ;;  %v7008_v10 = vshll.u32 %v24903_v38, 16 }
 0x539   : > { %18361 = vmatprep.mubr.bf16.mxu0 %v22684_v19  ;;  %v6992_v19 = vshll.u32 %v24899_v24, 16  ;;  %v6987_v30 = vsel %vm1824_vm0, %v6982_v40, %v6986_v34  ;;  %v7012_v40 = vshrl.u32 %v24903_v38, 16 }
 0x53a   : > { %v23193_v39 = vpop.f32.mrb[56].mxu1 }
 0x53b   : > { %v23195_v11 = vpop.f32.mrb[57].mxu1  ;;  %v6994_v55 = vrot.slane %v6992_v19, 1  ;;  %v7016_v19 = vshll.u32 %v24905_v44, 16 }
 0x53c   : > { %v17456_v0 = vpop.f32.mrb[58].mxu1 }
 0x53d   : > { %v23200_v58 = vpop.f32.mrb[59].mxu1  ;;  %v7002_v0 = vrot.slane %v7000_v7, 1  ;;  %v7018_v7 = vrot.slane %v7016_v19, 1 }
 0x53f   : > { %17658 = vmatmul.mubr.bf16.gmra.mrb[84].mxu1 %v6971_v21  ;;  %v6998_v21 = vor.u32 %v6996_v17, %v6994_v55 }
 0x540   : > { %18362 = vmatmul.mubr.bf16.gmra.mrb[84].mxu0 %v22687_v62  ;;  %17661 = vmatprep.mubr.bf16.mxu1 %v6979_v23  ;;  %v6995_v62 = vsel %vm1824_vm0, %v6990_v37, %v6994_v55  ;;  %v7010_v23 = vrot.slane %v7008_v10, 1  ;;  %v7020_v55 = vshrl.u32 %v24905_v44, 16  ;;  %v7032_v10 = vshll.u32 %v24909_v32, 16 }
 0x541   : > { %18365 = vmatprep.mubr.bf16.mxu0 %v22696_v57  ;;  %v7004_v57 = vshrl.u32 %v24901_v4, 16  ;;  %v7003_v4 = vsel %vm1824_vm0, %v6998_v21, %v7002_v0  ;;  %v7028_v21 = vshrl.u32 %v24907_v54, 16 }
 0x542   : > { %v23207_v48 = vpop.f32.mrb[60].mxu1  ;;  %v7022_v17 = vor.u32 %v7020_v55, %v7018_v7 }
 0x543   : > { %v23209_v8 = vpop.f32.mrb[61].mxu1  ;;  %v7006_v45 = vor.u32 %v7004_v57, %v7002_v0 }
 0x544   : > { %v23212_v49 = vpop.f32.mrb[62].mxu1 }
 0x545   : > { %v23216_v9 = vpop.f32.mrb[63].mxu1 }
 0x547   : > { %17662 = vmatmul.mubr.bf16.gmra.mrb[88].mxu1 %v6987_v30  ;;  %v7014_v30 = vor.u32 %v7012_v40, %v7010_v23 }
 0x548   : > { %18366 = vmatmul.mubr.bf16.gmra.mrb[88].mxu0 %v22699_v12  ;;  %17665 = vmatprep.mubr.bf16.mxu1 %v6995_v62  ;;  %v7011_v12 = vsel %vm1824_vm0, %v7006_v45, %v7010_v23  ;;  %v7036_v23 = vshrl.u32 %v24909_v32, 16 }
 0x549   : > { %18369 = vmatprep.mubr.bf16.mxu0 %v22711_v59  ;;  %v7024_v59 = vshll.u32 %v24907_v54, 16  ;;  %v7019_v44 = vsel %vm1824_vm0, %v7014_v30, %v7018_v7  ;;  %v7048_v54 = vshll.u32 %v24913_v63, 16  ;;  %v7044_v7 = vshrl.u32 %v24911_v43, 16 }
 0x54a   : > { %v23223_v20 = vpop.f32.mrb[64].mxu1 }
 0x54b   : > { %v5733_v24 = vpop.f32.mrb[65].mxu1  ;;  %v7026_v62 = vrot.slane %v7024_v59, 1 }
 0x54c   : > { %v23226_v34 = vpop.f32.mrb[66].mxu1  ;;  %v7034_v24 = vrot.slane %v7032_v10, 1 }
 0x54d   : > { %v23230_v37 = vpop.f32.mrb[67].mxu1  ;;  %v7030_v19 = vor.u32 %v7028_v21, %v7026_v62 }
 0x54f   : > { %17666 = vmatmul.mubr.bf16.gmra.mrb[92].mxu1 %v7003_v4  ;;  %v7038_v4 = vor.u32 %v7036_v23, %v7034_v24  ;;  %v7035_v32 = vsel %vm1824_vm0, %v7030_v19, %v7034_v24  ;;  %v7068_v19 = vshrl.u32 %v24917_v35, 16 }
 0x550   : > { %18370 = vmatmul.mubr.bf16.gmra.mrb[92].mxu0 %v22714_v22  ;;  %17669 = vmatprep.mubr.bf16.mxu1 %v7011_v12  ;;  %v7027_v22 = vsel %vm1824_vm0, %v7022_v17, %v7026_v62  ;;  %v7052_v17 = vshrl.u32 %v24913_v63, 16  ;;  %v7050_v62 = vrot.slane %v7048_v54, 1 }
 0x551   : > { %18373 = vmatprep.mubr.bf16.mxu0 %v22723_v36  ;;  %v7040_v36 = vshll.u32 %v24911_v43, 16 }
 0x552   : > { %v23237_v57 = vpop.f32.mrb[68].mxu1 }
 0x553   : > { %v23239_v38 = vpop.f32.mrb[69].mxu1  ;;  %v7042_v40 = vrot.slane %v7040_v36, 1  ;;  %v7060_v36 = vshrl.u32 %v24915_v6, 16 }
 0x554   : > { %v23242_v0 = vpop.f32.mrb[70].mxu1 }
 0x555   : > { %v5752_v45 = vpop.f32.mrb[71].mxu1  ;;  %v7046_v10 = vor.u32 %v7044_v7, %v7042_v40  ;;  %v23283_v7 = vld [vmem:[%s23847_s2] ss:$0 sm:$0xff] }
 0x557   : > { %17670 = vmatmul.mubr.bf16.gmra.mrb[96].mxu1 %v7019_v44  ;;  %v7054_v44 = vor.u32 %v7052_v17, %v7050_v62  ;;  %v7051_v63 = vsel %vm1824_vm0, %v7046_v10, %v7050_v62  ;;  %v23293_v62 = vld [vmem:[%s23848_s3] ss:$0 sm:$0xff] }
 0x558   : > { %18374 = vmatmul.mubr.bf16.gmra.mrb[96].mxu0 %v22726_v50  ;;  %17673 = vmatprep.mubr.bf16.mxu1 %v7027_v22  ;;  %v7043_v50 = vsel %vm1824_vm0, %v7038_v4, %v7042_v40  ;;  %v7064_v22 = vshll.u32 %v24917_v35, 16  ;;  %v7076_v35 = vshrl.u32 %v24919_v25, 16 }
 0x559   : > { %18377 = vmatprep.mubr.bf16.mxu0 %v22735_v61  ;;  %v7056_v61 = vshll.u32 %v24915_v6, 16  ;;  %v7080_v6 = vshll.u32 %v24921_v2, 16 }
 0x55a   : > { %v17471_v12 = vpop.f32.mrb[72].mxu1  ;;  %v7066_v4 = vrot.slane %v7064_v22, 1 }
 0x55b   : > { %v23251_v55 = vpop.f32.mrb[73].mxu1  ;;  %v7058_v21 = vrot.slane %v7056_v61, 1  ;;  %v7088_v61 = vshll.u32 %v24926_v42, 16 }
 0x55c   : > { %v23254_v59 = vpop.f32.mrb[74].mxu1  ;;  %v7070_v12 = vor.u32 %v7068_v19, %v7066_v4 }
 0x55d   : > { %v23258_v30 = vpop.f32.mrb[75].mxu1  ;;  %v7062_v40 = vor.u32 %v7060_v36, %v7058_v21 }
 0x55f   : > { %17674 = vmatmul.mubr.bf16.gmra.mrb[100].mxu1 %v7035_v32  ;;  %v7067_v17 = vsel %vm1824_vm0, %v7062_v40, %v7066_v4 }
 0x560   : > { %18378 = vmatmul.mubr.bf16.gmra.mrb[100].mxu0 %v22738_v56  ;;  %17677 = vmatprep.mubr.bf16.mxu1 %v7043_v50  ;;  %v7059_v56 = vsel %vm1824_vm0, %v7054_v44, %v7058_v21 }
 0x561   : > { %18381 = vmatprep.mubr.bf16.mxu0 %v22747_v52  ;;  %v7072_v52 = vshll.u32 %v24919_v25, 16 }
 0x562   : > { %v23265_v45 = vpop.f32.mrb[76].mxu1 }
 0x563   : > { %v23267_v43 = vpop.f32.mrb[77].mxu1  ;;  %v7074_v54 = vrot.slane %v7072_v52, 1  ;;  %v7090_v52 = vrot.slane %v7088_v61, 1 }
 0x564   : > { %v17476_v23 = vpop.f32.mrb[78].mxu1 }
 0x565   : > { %v23272_v24 = vpop.f32.mrb[79].mxu1  ;;  %v7075_v21 = vsel %vm1824_vm0, %v7070_v12, %v7074_v54  ;;  %v7082_v23 = vrot.slane %v7080_v6, 1  ;;  %v7078_v36 = vor.u32 %v7076_v35, %v7074_v54  ;;  %v7096_v6 = vshll.u32 %v24928_v46, 16 }
 0x567   : > { %17678 = vmatmul.mubr.bf16.gmra.mrb[104].mxu1 %v7051_v63  ;;  %v7083_v54 = vsel %vm1824_vm0, %v7078_v36, %v7082_v23  ;;  %v24996_v36 = vld [vmem:[#allocation20_spill] sm:$0xff] }
 0x568   : > { %18382 = vmatmul.mubr.bf16.gmra.mrb[104].mxu0 %v22750_v51  ;;  %17681 = vmatprep.mubr.bf16.mxu1 %v7059_v56 }
 0x569   : > { %18385 = vmatprep.mubr.bf16.mxu0 %v22759_v1  ;;  %v7084_v1 = vshrl.u32 %v24921_v2, 16 }
 0x56b   : > { %v18279_v32 = vpop.f32.mrb[0].mxu0  ;;  %v7086_v19 = vor.u32 %v7084_v1, %v7082_v23 }
 0x56c   : > { %v18453_v50 = vadd.f32 %v18279_v32, %v23036_v14  ;;  %v12625_v51 = vpop.f32.mrb[1].mxu0 }
 0x56d   : > { %v18454_v10 = vadd.f32 %v12625_v51, %v23038_v3  ;;  %v18280_v44 = vpop.f32.mrb[2].mxu0 }
 0x56e   : > { %v13881_v25 = vmul.f32 %v18453_v50, %v23283_v7  ;;  %v18455_v14 = vadd.f32 %v18280_v44, %v23040_v53  ;;  %v12628_v22 = vpop.f32.mrb[3].mxu0  ;;  %v7104_v44 = vshll.u32 %v24933_v16, 16 }
 0x56f   : > { %v13879_v2 = vmul.f32 %v18454_v10, %v23283_v7  ;;  %v18456_v63 = vadd.f32 %v12628_v22, %v23042_v29  ;;  %17682 = vmatmul.mubr.bf16.gmra.mrb[108].mxu1 %v7067_v17  ;;  %v7100_v10 = vshrl.u32 %v24928_v46, 16 }
 0x570   : > { %v14016_v56 = vadd.f32 %v23293_v62, %v13881_v25  ;;  %v13882_v3 = vmul.f32 %v18455_v14, %v23283_v7  ;;  %18386 = vmatmul.mubr.bf16.gmra.mrb[108].mxu0 %v22762_v26  ;;  %17685 = vmatprep.mubr.bf16.mxu1 %v7075_v21  ;;  %v7092_v26 = vshrl.u32 %v24926_v42, 16 }
 0x571   : > { %v14014_v53 = vadd.f32 %v23293_v62, %v13879_v2  ;;  %v13880_v4 = vmul.f32 %v18456_v63, %v23283_v7  ;;  %18389 = vmatprep.mubr.bf16.mxu0 %v22774_v60  ;;  %v7091_v60 = vsel %vm1824_vm0, %v7086_v19, %v7090_v52  ;;  %v24995_v2 = vld [vmem:[#allocation19_spill] sm:$0xff] }
 0x572   : > { %v14017_v29 = vadd.f32 %v23293_v62, %v13882_v3  ;;  %v14144_v32 = vmax.f32 %v14016_v56, 0.0  ;;  %v7094_v46 = vor.u32 %v7092_v26, %v7090_v52  ;;  %v24997_v3 = vld [vmem:[#allocation121_spill] sm:$0xff] }
 0x573   : > { %v14015_v40 = vadd.f32 %v23293_v62, %v13880_v4  ;;  %v18283_v12 = vpop.f32.mrb[4].mxu0  ;;  %v14142_v17 = vmax.f32 %v14014_v53, 0.0  ;;  %v7112_v19 = vshll.u32 %v24997_v3, 16 }
 0x574   : > { %v14145_v35 = vmax.f32 %v14017_v29, 0.0  ;;  %v18457_v50 = vadd.f32 %v18283_v12, %v23048_v41  ;;  %v12641_v51 = vpop.f32.mrb[5].mxu0  ;;  %v7098_v41 = vrot.slane %v7096_v6, 1  ;;  %v24998_v12 = vld [vmem:[#allocation162_spill] sm:$0xff]  ;;  %v7116_v6 = vshrl.u32 %v24997_v3, 16 }
 0x575   : > { %v14143_v1 = vmax.f32 %v14015_v40, 0.0  ;;  %v18284_v61 = vpop.f32.mrb[6].mxu0  ;;  %v7108_v40 = vshrl.u32 %v24933_v16, 16  ;;  %v25001_v16 = vld [vmem:[#allocation164_spill] sm:$0xff] }
 0x576   : > { %v15686_v21 = vpack.c.bf16 %v14145_v35, %v14144_v32  ;;  %v13884_v25 = vmul.f32 %v18457_v50, %v23283_v7  ;;  %v18458_v42 = vadd.f32 %v18284_v61, %v23050_v18  ;;  %v12644_v14 = vpop.f32.mrb[7].mxu0  ;;  %v7102_v56 = vor.u32 %v7100_v10, %v7098_v41  ;;  %v24999_v32 = vld [vmem:[#allocation125_spill] sm:$0xff] }
 0x577   : > { %v15681_v22 = vpack.c.bf16 %v14143_v1, %v14142_v17  ;;  %v18459_v23 = vadd.f32 %v12644_v14, %v23052_v5  ;;  %17686 = vmatmul.mubr.bf16.gmra.mrb[112].mxu1 %v7083_v54  ;;  %v7106_v5 = vrot.slane %v7104_v44, 1  ;;  %v7099_v26 = vsel %vm1824_vm0, %v7094_v46, %v7098_v41  ;;  %v25002_v46 = vld [vmem:[#allocation23_spill] sm:$0xff] }
 0x578   : > { %15998 = vst [vmem:[%s23322_s9 + $0x8] sm:$0xff] %v15686_v21   ;;  %18390 = vmatmul.mubr.bf16.gmra.mrb[112].mxu0 %v24995_v2  ;;  %17689 = vmatprep.mubr.bf16.mxu1 %v7091_v60  ;;  %v14019_v63 = vadd.f32 %v23293_v62, %v13884_v25  ;;  %v13885_v53 = vmul.f32 %v18458_v42, %v23283_v7  ;;  %v7120_v35 = vshll.u32 %v24999_v32, 16  ;;  %v25000_v60 = vld [vmem:[#allocation163_spill] sm:$0xff]  ;;  %v7114_v25 = vrot.slane %v7112_v19, 1 }
 0x579   : > { %15682 = vst [vmem:[%s23322_s9] sm:$0xff] %v15681_v22   ;;  %v13883_v18 = vmul.f32 %v18459_v23, %v23283_v7  ;;  %18393 = vmatprep.mubr.bf16.mxu0 %v24996_v36  ;;  %v7107_v61 = vsel %vm1824_vm0, %v7102_v56, %v7106_v5  ;;  %v7110_v23 = vor.u32 %v7108_v40, %v7106_v5  ;;  %v25003_v56 = vld [vmem:[#allocation24_spill] sm:$0xff] }
 0x57a   : > { %v14147_v50 = vmax.f32 %v14019_v63, 0.0  ;;  %v14020_v42 = vadd.f32 %v23293_v62, %v13885_v53  ;;  %v7118_v63 = vor.u32 %v7116_v6, %v7114_v25  ;;  %v7124_v6 = vshrl.u32 %v24999_v32, 16  ;;  %v25009_v32 = vld [vmem:[#allocation27_spill] sm:$0xff] }
 0x57b   : > { %v14018_v4 = vadd.f32 %v23293_v62, %v13883_v18  ;;  %v18287_v29 = vpop.f32.mrb[8].mxu0  ;;  %v7122_v18 = vrot.slane %v7120_v35, 1  ;;  %v7115_v5 = vsel %vm1824_vm0, %v7110_v23, %v7114_v25 }
 0x57c   : > { %v18460_v52 = vadd.f32 %v18287_v29, %v24998_v12  ;;  %v12657_v54 = vpop.f32.mrb[9].mxu0  ;;  %v14148_v19 = vmax.f32 %v14020_v42, 0.0  ;;  %v25004_v29 = vld [vmem:[#allocation129_spill] sm:$0xff]  ;;  %v25008_v42 = vld [vmem:[#allocation167_spill] sm:$0xff] }
 0x57d   : > { %v14146_v51 = vmax.f32 %v14018_v4, 0.0  ;;  %v18461_v17 = vadd.f32 %v12657_v54, %v25000_v60  ;;  %v18288_v1 = vpop.f32.mrb[10].mxu0  ;;  %v7128_v40 = vshll.u32 %v25004_v29, 16  ;;  %v7126_v23 = vor.u32 %v7124_v6, %v7122_v18 }
 0x57e   : > { %v13887_v10 = vmul.f32 %v18460_v52, %v23283_v7  ;;  %v18462_v44 = vadd.f32 %v18288_v1, %v25001_v16  ;;  %v12660_v21 = vpop.f32.mrb[11].mxu0  ;;  %v25006_v1 = vld [vmem:[#allocation132_spill] sm:$0xff]  ;;  %v25007_v16 = vld [vmem:[#allocation166_spill] sm:$0xff] }
 0x57f   : > { %v15691_v14 = vpack.c.bf16 %v14147_v50, %v14146_v51  ;;  %v13886_v22 = vmul.f32 %v18461_v17, %v23283_v7  ;;  %17690 = vmatmul.mubr.bf16.gmra.mrb[116].mxu1 %v7099_v26  ;;  %v7123_v26 = vsel %vm1824_vm0, %v7118_v63, %v7122_v18  ;;  %v25005_v50 = vld [vmem:[#allocation165_spill] sm:$0xff]  ;;  %v7132_v17 = vshrl.u32 %v25004_v29, 16  ;;  %v25012_v29 = vld [vmem:[#allocation168_spill] sm:$0xff] }
 0x580   : > { %v14022_v41 = vadd.f32 %v23293_v62, %v13887_v10  ;;  %v13888_v2 = vmul.f32 %v18462_v44, %v23283_v7  ;;  %18394 = vmatmul.mubr.bf16.gmra.mrb[116].mxu0 %v25002_v46  ;;  %17693 = vmatprep.mubr.bf16.mxu1 %v7107_v61  ;;  %v7136_v61 = vshll.u32 %v25006_v1, 16  ;;  %v25010_v46 = vld [vmem:[#allocation28_spill] sm:$0xff] }
 0x581   : > { %15999 = vst [vmem:[%s23322_s9 + $0x10] sm:$0xff] %v15691_v14   ;;  %v14021_v36 = vadd.f32 %v23293_v62, %v13886_v22  ;;  %18397 = vmatprep.mubr.bf16.mxu0 %v25003_v56  ;;  %v7130_v22 = vrot.slane %v7128_v40, 1  ;;  %v7140_v56 = vshrl.u32 %v25006_v1, 16 }
 0x582   : > { %v14023_v3 = vadd.f32 %v23293_v62, %v13888_v2  ;;  %v14150_v12 = vmax.f32 %v14022_v41, 0.0 }
 0x583   : > { %v14149_v53 = vmax.f32 %v14021_v36, 0.0  ;;  %v18291_v4 = vpop.f32.mrb[12].mxu0  ;;  %v7134_v63 = vor.u32 %v7132_v17, %v7130_v22  ;;  %v7138_v36 = vrot.slane %v7136_v61, 1 }
 0x584   : > { %v14151_v52 = vmax.f32 %v14023_v3, 0.0  ;;  %v12673_v54 = vpop.f32.mrb[13].mxu0  ;;  %v25011_v3 = vld [vmem:[#allocation135_spill] sm:$0xff] }
 0x585   : > { %v15696_v35 = vpack.c.bf16 %v14149_v53, %v14148_v19  ;;  %v18463_v51 = vadd.f32 %v12673_v54, %v25005_v50  ;;  %v18292_v60 = vpop.f32.mrb[14].mxu0  ;;  %v7144_v19 = vshll.u32 %v25011_v3, 16  ;;  %v25013_v54 = vld [vmem:[#allocation137_spill] sm:$0xff]  ;;  %v7139_v17 = vsel %vm1824_vm0, %v7134_v63, %v7138_v36  ;;  %v25017_v63 = vld [vmem:[#allocation32_spill] sm:$0xff] }
 0x586   : > { %v15701_v10 = vpack.c.bf16 %v14151_v52, %v14150_v12  ;;  %v18464_v44 = vadd.f32 %v18292_v60, %v25007_v16  ;;  %v12676_v21 = vpop.f32.mrb[15].mxu0  ;;  %v7131_v12 = vsel %vm1824_vm0, %v7126_v23, %v7130_v22  ;;  %v7148_v52 = vshrl.u32 %v25011_v3, 16  ;;  %v25014_v50 = vld [vmem:[#allocation169_spill] sm:$0xff]  ;;  %v25016_v22 = vld [vmem:[#allocation31_spill] sm:$0xff] }
 0x587   : > { %16000 = vst [vmem:[%s23322_s9 + $0x18] sm:$0xff] %v15696_v35   ;;  %v13889_v25 = vmul.f32 %v18463_v51, %v23283_v7  ;;  %v18465_v14 = vadd.f32 %v12676_v21, %v25008_v42  ;;  %17694 = vmatmul.mubr.bf16.gmra.mrb[120].mxu1 %v7115_v5  ;;  %v7146_v16 = vrot.slane %v7144_v19, 1  ;;  %v25015_v42 = vld [vmem:[#allocation170_spill] sm:$0xff] }
 0x588   : > { %16001 = vst [vmem:[%s23322_s9 + $0x20] sm:$0xff] %v15701_v10   ;;  %18398 = vmatmul.mubr.bf16.gmra.mrb[120].mxu0 %v25009_v32  ;;  %17697 = vmatprep.mubr.bf16.mxu1 %v7123_v26  ;;  %v13891_v53 = vmul.f32 %v18464_v44, %v23283_v7  ;;  %v7152_v26 = vshll.u32 %v25013_v54, 16  ;;  %v7142_v10 = vor.u32 %v7140_v56, %v7138_v36  ;;  %v7156_v56 = vshrl.u32 %v25013_v54, 16 }
 0x589   : > { %v14024_v41 = vadd.f32 %v23293_v62, %v13889_v25  ;;  %v13890_v2 = vmul.f32 %v18465_v14, %v23283_v7  ;;  %18401 = vmatprep.mubr.bf16.mxu0 %v25010_v46  ;;  %v7150_v32 = vor.u32 %v7148_v52, %v7146_v16 }
 0x58a   : > { %v14026_v44 = vadd.f32 %v23293_v62, %v13891_v53  ;;  %v7154_v23 = vrot.slane %v7152_v26, 1  ;;  %v7147_v36 = vsel %vm1824_vm0, %v7142_v10, %v7146_v16 }
 0x58b   : > { %v14025_v4 = vadd.f32 %v23293_v62, %v13890_v2  ;;  %v18295_v5 = vpop.f32.mrb[16].mxu0  ;;  %v14152_v6 = vmax.f32 %v14024_v41, 0.0 }
 0x58c   : > { %v18466_v40 = vadd.f32 %v18295_v5, %v25012_v29  ;;  %v12689_v18 = vpop.f32.mrb[17].mxu0  ;;  %v14154_v3 = vmax.f32 %v14026_v44, 0.0  ;;  %v25018_v5 = vld [vmem:[#allocation140_spill] sm:$0xff]  ;;  %v7155_v52 = vsel %vm1824_vm0, %v7150_v32, %v7154_v23  ;;  %v7158_v44 = vor.u32 %v7156_v56, %v7154_v23 }
 0x58d   : > { %v14153_v35 = vmax.f32 %v14025_v4, 0.0  ;;  %v18467_v51 = vadd.f32 %v12689_v18, %v25014_v50  ;;  %v18296_v60 = vpop.f32.mrb[18].mxu0  ;;  %v7160_v29 = vshll.u32 %v25018_v5, 16  ;;  %v7164_v26 = vshrl.u32 %v25018_v5, 16 }
 0x58e   : > { %v13894_v1 = vmul.f32 %v18466_v40, %v23283_v7  ;;  %v12692_v61 = vpop.f32.mrb[19].mxu0  ;;  %v25019_v40 = vld [vmem:[#allocation171_spill] sm:$0xff] }
 0x58f   : > { %v15706_v21 = vpack.c.bf16 %v14153_v35, %v14152_v6  ;;  %v13892_v25 = vmul.f32 %v18467_v51, %v23283_v7  ;;  %v18468_v14 = vadd.f32 %v12692_v61, %v25015_v42  ;;  %17698 = vmatmul.mubr.bf16.gmra.mrb[124].mxu1 %v7131_v12  ;;  %v7168_v6 = vshll.u32 %v24962_v15, 16  ;;  %v25020_v51 = vld [vmem:[#allocation173_spill] sm:$0xff]  ;;  %v25021_v61 = vld [vmem:[#allocation174_spill] sm:$0xff]  ;;  %v25022_v42 = vld [vmem:[#allocation176_spill] sm:$0xff] }
 0x590   : > { %18402 = vmatmul.mubr.bf16.gmra.mrb[124].mxu0 %v25016_v22  ;;  %17701 = vmatprep.mubr.bf16.mxu1 %v7139_v17  ;;  %v14029_v41 = vadd.f32 %v23293_v62, %v13894_v1  ;;  %v7162_v22 = vrot.slane %v7160_v29, 1  ;;  %v7172_v29 = vshrl.u32 %v24962_v15, 16  ;;  %v25026_v15 = vld [vmem:[#allocation139_spill] sm:$0xff] }
 0x591   : > { %16002 = vst [vmem:[%s23322_s9 + $0x28] sm:$0xff] %v15706_v21   ;;  %v14027_v2 = vadd.f32 %v23293_v62, %v13892_v25  ;;  %v13893_v46 = vmul.f32 %v18468_v14, %v23283_v7  ;;  %18405 = vmatprep.mubr.bf16.mxu0 %v25017_v63  ;;  %v25024_v63 = vld [vmem:[#allocation154_spill] sm:$0xff] }
 0x592   : > { %v14157_v35 = vmax.f32 %v14029_v41, 0.0  ;;  %v7166_v56 = vor.u32 %v7164_v26, %v7162_v22  ;;  %v7163_v5 = vsel %vm1824_vm0, %v7158_v44, %v7162_v22 }
 0x593   : > { %v14155_v19 = vmax.f32 %v14027_v2, 0.0  ;;  %v14028_v53 = vadd.f32 %v23293_v62, %v13893_v46  ;;  %v18299_v4 = vpop.f32.mrb[20].mxu0  ;;  %v25023_v2 = vld [vmem:[#allocation40_spill] sm:$0xff] }
 0x594   : > { %v18469_v18 = vadd.f32 %v18299_v4, %v25019_v40  ;;  %v12705_v12 = vpop.f32.mrb[21].mxu0  ;;  %v7184_v40 = vshll.u32 %v24969_v13, 16 }
 0x595   : > { %v15711_v50 = vpack.c.bf16 %v14155_v19, %v14154_v3  ;;  %v14156_v54 = vmax.f32 %v14028_v53, 0.0  ;;  %v18470_v60 = vadd.f32 %v12705_v12, %v25020_v51  ;;  %v18300_v17 = vpop.f32.mrb[22].mxu0  ;;  %v7170_v3 = vrot.slane %v7168_v6, 1 }
 0x596   : > { %v13897_v1 = vmul.f32 %v18469_v18, %v23283_v7  ;;  %v18471_v10 = vadd.f32 %v18300_v17, %v25021_v61  ;;  %v12708_v16 = vpop.f32.mrb[23].mxu0  ;;  %v7180_v6 = vshrl.u32 %v24964_v31, 16  ;;  %v7186_v22 = vrot.slane %v7184_v40, 1  ;;  %v25032_v40 = vld [vmem:[#allocation148_spill] sm:$0xff] }
 0x597   : > { %16003 = vst [vmem:[%s23322_s9 + $0x30] sm:$0xff] %v15711_v50   ;;  %v15716_v21 = vpack.c.bf16 %v14157_v35, %v14156_v54  ;;  %v13895_v25 = vmul.f32 %v18470_v60, %v23283_v7  ;;  %v18472_v14 = vadd.f32 %v12708_v16, %v25022_v42  ;;  %17702 = vmatmul.mubr.bf16.gmra.mrb[128].mxu1 %v7147_v36  ;;  %v7176_v36 = vshll.u32 %v24964_v31, 16  ;;  %v25028_v31 = vld [vmem:[#allocation155_spill] sm:$0xff] }
 0x598   : > { %v14032_v32 = vadd.f32 %v23293_v62, %v13897_v1  ;;  %v13898_v41 = vmul.f32 %v18471_v10, %v23283_v7  ;;  %18406 = vmatmul.mubr.bf16.gmra.mrb[128].mxu0 %v25023_v2  ;;  %17705 = vmatprep.mubr.bf16.mxu1 %v7155_v52  ;;  %v25025_v52 = vld [vmem:[#allocation178_spill] sm:$0xff]  ;;  %v7171_v60 = vsel %vm1824_vm0, %v7166_v56, %v7170_v3  ;;  %v25029_v2 = vld [vmem:[#allocation156_spill] sm:$0xff] }
 0x599   : > { %16004 = vst [vmem:[%s23322_s9 + $0x38] sm:$0xff] %v15716_v21   ;;  %v14030_v46 = vadd.f32 %v23293_v62, %v13895_v25  ;;  %v13896_v23 = vmul.f32 %v18472_v14, %v23283_v7  ;;  %18409 = vmatprep.mubr.bf16.mxu0 %v25024_v63  ;;  %v7178_v16 = vrot.slane %v7176_v36, 1  ;;  %v25027_v21 = vld [vmem:[#allocation180_spill] sm:$0xff]  ;;  %v7174_v42 = vor.u32 %v7172_v29, %v7170_v3  ;;  %v25030_v3 = vld [vmem:[#allocation147_spill] sm:$0xff]  ;;  %v25031_v36 = vld [vmem:[#allocation142_spill] sm:$0xff] }
 0x59a   : > { %v14033_v19 = vadd.f32 %v23293_v62, %v13898_v41  ;;  %v14160_v18 = vmax.f32 %v14032_v32, 0.0  ;;  %v7188_v29 = vshrl.u32 %v24969_v13, 16 }
 0x59b   : > { %v14031_v53 = vadd.f32 %v23293_v62, %v13896_v23  ;;  %v18303_v4 = vpop.f32.mrb[24].mxu0  ;;  %v14158_v50 = vmax.f32 %v14030_v46, 0.0  ;;  %v7182_v14 = vor.u32 %v7180_v6, %v7178_v16  ;;  %v7179_v56 = vsel %vm1824_vm0, %v7174_v42, %v7178_v16  ;;  %v25036_v42 = vld [vmem:[#allocation157_spill] sm:$0xff] }
 0x59c   : > { %v14161_v12 = vmax.f32 %v14033_v19, 0.0  ;;  %v18473_v35 = vadd.f32 %v18303_v4, %v25025_v52  ;;  %v12721_v26 = vpop.f32.mrb[25].mxu0  ;;  %v7192_v19 = vshll.u32 %v25030_v3, 16 }
 0x59d   : > { %v14159_v54 = vmax.f32 %v14031_v53, 0.0  ;;  %v18304_v51 = vpop.f32.mrb[26].mxu0 }
 0x59e   : > { %v15726_v17 = vpack.c.bf16 %v14161_v12, %v14160_v18  ;;  %v13900_v1 = vmul.f32 %v18473_v35, %v23283_v7  ;;  %v18474_v61 = vadd.f32 %v18304_v51, %v25026_v15  ;;  %v12724_v10 = vpop.f32.mrb[27].mxu0  ;;  %v7200_v18 = vshll.u32 %v25032_v40, 16  ;;  %v25033_v35 = vld [vmem:[#allocation143_spill] sm:$0xff]  ;;  %v25034_v51 = vld [vmem:[#allocation146_spill] sm:$0xff] }
 0x59f   : > { %v15721_v44 = vpack.c.bf16 %v14159_v54, %v14158_v50  ;;  %v18475_v25 = vadd.f32 %v12724_v10, %v25027_v21  ;;  %17706 = vmatmul.mubr.bf16.gmra.mrb[132].mxu1 %v7163_v5  ;;  %v7187_v5 = vsel %vm1824_vm0, %v7182_v14, %v7186_v22  ;;  %v7196_v50 = vshrl.u32 %v25030_v3, 16 }
 0x5a0   : > { %16006 = vst [vmem:[%s23322_s9 + $0x48] sm:$0xff] %v15726_v17   ;;  %18410 = vmatmul.mubr.bf16.gmra.mrb[132].mxu0 %v25028_v31  ;;  %17709 = vmatprep.mubr.bf16.mxu1 %v7171_v60  ;;  %v14035_v32 = vadd.f32 %v23293_v62, %v13900_v1  ;;  %v13901_v46 = vmul.f32 %v18474_v61, %v23283_v7  ;;  %v7194_v61 = vrot.slane %v7192_v19, 1  ;;  %v7202_v14 = vrot.slane %v7200_v18, 1 }
 0x5a1   : > { %16005 = vst [vmem:[%s23322_s9 + $0x40] sm:$0xff] %v15721_v44   ;;  %v13899_v41 = vmul.f32 %v18475_v25, %v23283_v7  ;;  %18413 = vmatprep.mubr.bf16.mxu0 %v25029_v2  ;;  %v25035_v44 = vld [vmem:[#allocation56_spill] sm:$0xff]  ;;  %v7190_v21 = vor.u32 %v7188_v29, %v7186_v22  ;;  %v25039_v29 = vld [vmem:[#allocation182_spill] sm:$0xff] }
 0x5a2   : > { %v14163_v12 = vmax.f32 %v14035_v32, 0.0  ;;  %v14036_v1 = vadd.f32 %v23293_v62, %v13901_v46  ;;  %v7198_v31 = vor.u32 %v7196_v50, %v7194_v61 }
 0x5a3   : > { %v14034_v23 = vadd.f32 %v23293_v62, %v13899_v41  ;;  %v18307_v63 = vpop.f32.mrb[28].mxu0 }
 0x5a4   : > { %v18476_v53 = vadd.f32 %v18307_v63, %v25031_v36  ;;  %v12737_v4 = vpop.f32.mrb[29].mxu0  ;;  %v14164_v41 = vmax.f32 %v14036_v1, 0.0  ;;  %v25037_v63 = vld [vmem:[#allocation150_spill] sm:$0xff]  ;;  %v7195_v36 = vsel %vm1824_vm0, %v7190_v21, %v7194_v61 }
 0x5a5   : > { %v14162_v52 = vmax.f32 %v14034_v23, 0.0  ;;  %v18477_v26 = vadd.f32 %v12737_v4, %v25033_v35  ;;  %v18308_v6 = vpop.f32.mrb[30].mxu0  ;;  %v7204_v23 = vshrl.u32 %v25032_v40, 16  ;;  %v7212_v35 = vshrl.u32 %v25037_v63, 16  ;;  %v25040_v40 = vld [vmem:[#allocation149_spill] sm:$0xff] }
 0x5a6   : > { %v13903_v54 = vmul.f32 %v18476_v53, %v23283_v7  ;;  %v18478_v60 = vadd.f32 %v18308_v6, %v25034_v51  ;;  %v12740_v17 = vpop.f32.mrb[31].mxu0  ;;  %v25038_v53 = vld [vmem:[#allocation151_spill] sm:$0xff] }
 0x5a7   : > { %v15731_v15 = vpack.c.bf16 %v14163_v12, %v14162_v52  ;;  %v13902_v13 = vmul.f32 %v18477_v26, %v23283_v7  ;;  %17710 = vmatmul.mubr.bf16.gmra.mrb[136].mxu1 %v7179_v56  ;;  %v7208_v56 = vshll.u32 %v25037_v63, 16  ;;  %v7216_v4 = vshll.u32 %v25038_v53, 16  ;;  %v25041_v51 = vld [vmem:[#allocation183_spill] sm:$0xff] }
 0x5a8   : > { %v14038_v10 = vadd.f32 %v23293_v62, %v13903_v54  ;;  %v13904_v16 = vmul.f32 %v18478_v60, %v23283_v7  ;;  %18414 = vmatmul.mubr.bf16.gmra.mrb[136].mxu0 %v25035_v44  ;;  %17713 = vmatprep.mubr.bf16.mxu1 %v7187_v5  ;;  %v7203_v52 = vsel %vm1824_vm0, %v7198_v31, %v7202_v14  ;;  %v7220_v61 = vshrl.u32 %v25038_v53, 16  ;;  %v25043_v44 = vld [vmem:[#allocation160_spill] sm:$0xff] }
 0x5a9   : > { %16007 = vst [vmem:[%s23322_s9 + $0x50] sm:$0xff] %v15731_v15   ;;  %v14037_v25 = vadd.f32 %v23293_v62, %v13902_v13  ;;  %18417 = vmatprep.mubr.bf16.mxu0 %v25036_v42  ;;  %v7206_v17 = vor.u32 %v7204_v23, %v7202_v14  ;;  %v7210_v1 = vrot.slane %v7208_v56, 1  ;;  %v25042_v15 = vld [vmem:[#allocation158_spill] sm:$0xff]  ;;  %v7218_v13 = vrot.slane %v7216_v4, 1  ;;  %v25045_v31 = vld [vmem:[#allocation152_spill] sm:$0xff] }
 0x5aa   : > { %v14039_v32 = vadd.f32 %v23293_v62, %v13904_v16  ;;  %v14166_v3 = vmax.f32 %v14038_v10, 0.0  ;;  %v25046_v23 = vld [vmem:[#allocation6_spill] sm:$0xff] }
 0x5ab   : > { %v14165_v2 = vmax.f32 %v14037_v25, 0.0  ;;  %v18311_v46 = vpop.f32.mrb[32].mxu0  ;;  %v7214_v21 = vor.u32 %v7212_v35, %v7210_v1  ;;  %v25044_v25 = vld [vmem:[#allocation119_spill] sm:$0xff] }
 0x5ac   : > { %v14167_v19 = vmax.f32 %v14039_v32, 0.0  ;;  %v12753_v22 = vpop.f32.mrb[33].mxu0  ;;  %v12525_v42 = vrot.slane %v25044_v25, 1  ;;  %v7224_v32 = vshll.u32 %v25045_v31, 16  ;;  %v7211_v46 = vsel %vm1824_vm0, %v7206_v17, %v7210_v1  ;;  %v25051_v1 = vld [vmem:[#allocation7_spill] sm:$0xff] }
 0x5ad   : > { %v15736_v5 = vpack.c.bf16 %v14165_v2, %v14164_v41  ;;  %v18479_v18 = vadd.f32 %v12753_v22, %v25039_v29  ;;  %v18312_v12 = vpop.f32.mrb[34].mxu0  ;;  %v25047_v22 = vld [vmem:[#allocation175_spill] sm:$0xff] }
 0x5ae   : > { %v15741_v26 = vpack.c.bf16 %v14167_v19, %v14166_v3  ;;  %v18480_v6 = vadd.f32 %v18312_v12, %v25040_v40  ;;  %v12756_v50 = vpop.f32.mrb[35].mxu0  ;;  %v7222_v3 = vor.u32 %v7220_v61, %v7218_v13  ;;  %v7228_v19 = vshrl.u32 %v25045_v31, 16  ;;  %v25052_v61 = vld [vmem:[#allocation161_spill] sm:$0xff] }
 0x5af   : > { %16008 = vst [vmem:[%s23322_s9 + $0x58] sm:$0xff] %v15736_v5   ;;  %v13905_v54 = vmul.f32 %v18479_v18, %v23283_v7  ;;  %v18481_v60 = vadd.f32 %v12756_v50, %v25041_v51  ;;  %17714 = vmatmul.mubr.bf16.gmra.mrb[140].mxu1 %v7195_v36  ;;  %v7232_v36 = vshll.u32 %v25047_v22, 16  ;;  %v25048_v5 = vld [vmem:[#allocation184_spill] sm:$0xff]  ;;  %v7219_v12 = vsel %vm1824_vm0, %v7214_v21, %v7218_v13  ;;  %v25050_v50 = vld [vmem:[#allocation127_spill] sm:$0xff] }
 0x5b0   : > { %16009 = vst [vmem:[%s23322_s9 + $0x60] sm:$0xff] %v15741_v26   ;;  %18418 = vmatmul.mubr.bf16.gmra.mrb[140].mxu0 %v25042_v15  ;;  %17717 = vmatprep.mubr.bf16.mxu1 %v7203_v52  ;;  %v13907_v14 = vmul.f32 %v18480_v6, %v23283_v7  ;;  %v25049_v26 = vld [vmem:[#allocation159_spill] sm:$0xff]  ;;  %v7226_v6 = vrot.slane %v7224_v32, 1  ;;  %v25053_v32 = vld [vmem:[#allocation128_spill] sm:$0xff] }
 0x5b1   : > { %v14040_v10 = vadd.f32 %v23293_v62, %v13905_v54  ;;  %v13906_v16 = vmul.f32 %v18481_v60, %v23283_v7  ;;  %18421 = vmatprep.mubr.bf16.mxu0 %v25043_v44  ;;  %v12526_v40 = vsel %vm3767_vm1, %v25049_v26, %v12525_v42  ;;  %v12527_v54 = vrot.slane %v25050_v50, 1 }
 0x5b2   : > { %v14042_v51 = vadd.f32 %v23293_v62, %v13907_v14  ;;  %v7230_v13 = vor.u32 %v7228_v19, %v7226_v6  ;;  %v7227_v25 = vsel %vm1824_vm0, %v7222_v3, %v7226_v6  ;;  %v12529_v14 = vrot.slane %v25053_v32, 1 }
 0x5b3   : > { %v14041_v41 = vadd.f32 %v23293_v62, %v13906_v16  ;;  %v18315_v2 = vpop.f32.mrb[36].mxu0  ;;  %v14168_v53 = vmax.f32 %v14040_v10, 0.0  ;;  %v7234_v10 = vrot.slane %v7232_v36, 1  ;;  %v12528_v31 = vsel %vm3767_vm1, %v12525_v42, %v12527_v54  ;;  %v25055_v36 = vld [vmem:[#allocation185_spill] sm:$0xff] }
 0x5b4   : > { %v18482_v63 = vadd.f32 %v18315_v2, %v25046_v23  ;;  %v12769_v56 = vpop.f32.mrb[37].mxu0  ;;  %v14170_v2 = vmax.f32 %v14042_v51, 0.0  ;;  %v7248_v42 = vshll.u32 %v24994_v28, 16  ;;  %v12530_v51 = vsel %vm3767_vm1, %v12527_v54, %v12529_v14 }
 0x5b5   : > { %v14169_v4 = vmax.f32 %v14041_v41, 0.0  ;;  %v18483_v29 = vadd.f32 %v12769_v56, %v25048_v5  ;;  %v18316_v18 = vpop.f32.mrb[38].mxu0  ;;  %v7236_v41 = vshrl.u32 %v25047_v22, 16  ;;  %v25054_v56 = vld [vmem:[#allocation177_spill] sm:$0xff]  ;;  %v7235_v5 = vsel %vm1824_vm0, %v7230_v13, %v7234_v10 }
 0x5b6   : > { %v13910_v52 = vmul.f32 %v18482_v63, %v23283_v7  ;;  %v12772_v35 = vpop.f32.mrb[39].mxu0  ;;  %v7240_v19 = vshll.u32 %v25054_v56, 16  ;;  %v7244_v3 = vshrl.u32 %v25054_v56, 16 }
 0x5b7   : > { %v15746_v60 = vpack.c.bf16 %v14169_v4, %v14168_v53  ;;  %v13908_v17 = vmul.f32 %v18483_v29, %v23283_v7  ;;  %v18484_v15 = vadd.f32 %v12772_v35, %v25051_v1  ;;  %17718 = vmatmul.mubr.bf16.gmra.mrb[144].mxu1 %v7211_v46 }
 0x5b8   : > { %18422 = vmatmul.mubr.bf16.gmra.mrb[144].mxu0 %v25052_v61  ;;  %17721 = vmatprep.mubr.bf16.mxu1 %v7219_v12  ;;  %v14045_v16 = vadd.f32 %v23293_v62, %v13910_v52  ;;  %v25056_v12 = vld [vmem:[#allocation8_spill] sm:$0xff]  ;;  %v7242_v13 = vrot.slane %v7240_v19, 1  ;;  %v7252_v19 = vshrl.u32 %v24994_v28, 16  ;;  %v25061_v28 = vld [vmem:[#allocation10_spill] sm:$0xff] }
 0x5b9   : > { %16010 = vst [vmem:[%s23322_s9 + $0x68] sm:$0xff] %v15746_v60   ;;  %v14043_v44 = vadd.f32 %v23293_v62, %v13908_v17  ;;  %v13909_v21 = vmul.f32 %v18484_v15, %v23283_v7  ;;  %18425 = vmatprep.mubr.bf16.mxu0 %v12526_v40  ;;  %v25057_v40 = vld [vmem:[#allocation153_spill] sm:$0xff]  ;;  %v7238_v60 = vor.u32 %v7236_v41, %v7234_v10 }
 0x5ba   : > { %v14173_v29 = vmax.f32 %v14045_v16, 0.0  ;;  %v25058_v15 = vld [vmem:[#allocation9_spill] sm:$0xff]  ;;  %v7246_v41 = vor.u32 %v7244_v3, %v7242_v13 }
 0x5bb   : > { %v14171_v46 = vmax.f32 %v14043_v44, 0.0  ;;  %v14044_v23 = vadd.f32 %v23293_v62, %v13909_v21  ;;  %v18319_v63 = vpop.f32.mrb[40].mxu0  ;;  %v20017_v21 = vld [vmem:[%s20225_s13 + $0x298] sm:$0xff]  }
 0x5bc   : > { %v18485_v53 = vadd.f32 %v18319_v63, %v25055_v36  ;;  %v12785_v4 = vpop.f32.mrb[41].mxu0  ;;  %v12531_v32 = vrot.slane %v20017_v21, 1 }
 0x5bd   : > { %v15751_v18 = vpack.c.bf16 %v14171_v46, %v14170_v2  ;;  %v14172_v22 = vmax.f32 %v14044_v23, 0.0  ;;  %v18486_v52 = vadd.f32 %v12785_v4, %v25056_v12  ;;  %v18320_v35 = vpop.f32.mrb[42].mxu0  ;;  %v7250_v2 = vrot.slane %v7248_v42, 1  ;;  %v25059_v4 = vld [vmem:[#allocation186_spill] sm:$0xff] }
 0x5be   : > { %v13913_v26 = vmul.f32 %v18485_v53, %v23283_v7  ;;  %v18487_v6 = vadd.f32 %v18320_v35, %v25057_v40  ;;  %v12788_v50 = vpop.f32.mrb[43].mxu0 }
 0x5bf   : > { %16011 = vst [vmem:[%s23322_s9 + $0x70] sm:$0xff] %v15751_v18   ;;  %v15756_v17 = vpack.c.bf16 %v14173_v29, %v14172_v22  ;;  %v13911_v1 = vmul.f32 %v18486_v52, %v23283_v7  ;;  %v18488_v61 = vadd.f32 %v12788_v50, %v25058_v15  ;;  %17722 = vmatmul.mubr.bf16.gmra.mrb[148].mxu1 %v7227_v25  ;;  %v20018_v25 = vld [vmem:[%s20225_s13 + $0x2a0] sm:$0xff]   ;;  %v25060_v18 = vld [vmem:[#allocation181_spill] sm:$0xff] }
 0x5c0   : > { %v14048_v16 = vadd.f32 %v23293_v62, %v13913_v26  ;;  %v13914_v44 = vmul.f32 %v18487_v6, %v23283_v7  ;;  %18426 = vmatmul.mubr.bf16.gmra.mrb[148].mxu0 %v12528_v31  ;;  %17725 = vmatprep.mubr.bf16.mxu1 %v7235_v5  ;;  %v12533_v23 = vrot.slane %v20018_v25, 1  ;;  %v7243_v31 = vsel %vm1824_vm0, %v7238_v60, %v7242_v13 }
 0x5c1   : > { %16012 = vst [vmem:[%s23322_s9 + $0x78] sm:$0xff] %v15756_v17   ;;  %v14046_v54 = vadd.f32 %v23293_v62, %v13911_v1  ;;  %v13912_v10 = vmul.f32 %v18488_v61, %v23283_v7  ;;  %18429 = vmatprep.mubr.bf16.mxu0 %v12530_v51  ;;  %v7256_v3 = vshll.u32 %v25060_v18, 16  ;;  %v12532_v52 = vsel %vm3767_vm1, %v12529_v14, %v12531_v32  ;;  %v25062_v17 = vld [vmem:[#allocation58_spill] sm:$0xff] }
 0x5c2   : > { %v14049_v46 = vadd.f32 %v23293_v62, %v13914_v44  ;;  %v14176_v36 = vmax.f32 %v14048_v16, 0.0  ;;  %v7251_v35 = vsel %vm1824_vm0, %v7246_v41, %v7250_v2  ;;  %v12534_v51 = vsel %vm3767_vm1, %v12531_v32, %v12533_v23  ;;  %v20019_v16 = vld [vmem:[%s20225_s13 + $0x2a8] ss:$0 sps:$4 sm:$0xff]   ;;  %s20104_s13 = smov [#allocation3]  }
 0x5c3   : > { %v14047_v63 = vadd.f32 %v23293_v62, %v13912_v10  ;;  %v18323_v56 = vpop.f32.mrb[44].mxu0  ;;  %v14174_v42 = vmax.f32 %v14046_v54, 0.0  ;;  %v7254_v15 = vor.u32 %v7252_v19, %v7250_v2  ;;  %v7258_v14 = vrot.slane %v7256_v3, 1  ;;  %v25063_v10 = vld [vmem:[#allocation11_spill] sm:$0xff]  ;;  %s20028_s10 = sshll.u32 %s20104_s13, 4  ;;  %s20029_s10 = int_to_ptr.vmem [resolvable:$false] %s20028_s10 }
 0x5c4   : > { %v14177_v53 = vmax.f32 %v14049_v46, 0.0  ;;  %v18489_v5 = vadd.f32 %v18323_v56, %v25059_v4  ;;  %v12801_v29 = vpop.f32.mrb[45].mxu0  ;;  %v12535_v44 = vrot.slane %v20019_v16, 1  ;;  %v25064_v56 = vld [vmem:[#allocation187_spill] sm:$0xff]  ;;  %v25065_v4 = vld [vmem:[#allocation13_spill] sm:$0xff]  ;;  %s20030_s11 = scalar_lea.vmem %s20029_s10, 16384  ;;  %p20031_p1 = scmp.lt.s32.totalorder %s23793_s29, %s20029_s10 }
 0x5c5   : > { %v14175_v22 = vmax.f32 %v14047_v63, 0.0  ;;  %v18324_v12 = vpop.f32.mrb[46].mxu0  ;;  %v7259_v25 = vsel %vm1824_vm0, %v7254_v15, %v7258_v14  ;;  %p20032_p2 = scmp.lt.s32.totalorder %s20030_s11, %s20024_s18 }
 0x5c6   : > { %v15766_v26 = vpack.c.bf16 %v14177_v53, %v14176_v36  ;;  %v13916_v40 = vmul.f32 %v18489_v5, %v23283_v7  ;;  %v18490_v6 = vadd.f32 %v18324_v12, %v25061_v28  ;;  %v12804_v50 = vpop.f32.mrb[47].mxu0  ;;  %v12536_v36 = vsel %vm3767_vm1, %v12533_v23, %v12535_v44 }
 0x5c7   : > { %v15761_v60 = vpack.c.bf16 %v14175_v22, %v14174_v42  ;;  %v18491_v1 = vadd.f32 %v12804_v50, %v25062_v17  ;;  %17726 = vmatmul.mubr.bf16.gmra.mrb[152].mxu1 %v7243_v31  ;;  %p20033_p3 = por %p20032_p2, %p20031_p1 }
 0x5c8   : > { %16014 = vst [vmem:[%s23322_s9 + $0x88] sm:$0xff] %v15766_v26   ;;  %18430 = vmatmul.mubr.bf16.gmra.mrb[152].mxu0 %v12532_v52  ;;  %17729 = vmatprep.mubr.bf16.mxu1 %v7251_v35  ;;  %v14051_v61 = vadd.f32 %v23293_v62, %v13916_v40  ;;  %v13917_v21 = vmul.f32 %v18490_v6, %v23283_v7 }
 0x5c9   : > { %16013 = vst [vmem:[%s23322_s9 + $0x80] sm:$0xff] %v15761_v60   ;;  %v13915_v13 = vmul.f32 %v18491_v1, %v23283_v7  ;;  %18433 = vmatprep.mubr.bf16.mxu0 %v12534_v51  ;;  %p20034_p5 = pnand %p20033_p3, %p20027_p0 }
 0x5ca   : > { %v14179_v2 = vmax.f32 %v14051_v61, 0.0  ;;  %v14052_v18 = vadd.f32 %v23293_v62, %v13917_v21 }
 0x5cb   : > { %v14050_v32 = vadd.f32 %v23293_v62, %v13915_v13  ;;  %v18327_v54 = vpop.f32.mrb[48].mxu0 }
 0x5cc   : > { %v18492_v41 = vadd.f32 %v18327_v54, %v25063_v10  ;;  %v12817_v46 = vpop.f32.mrb[49].mxu0  ;;  %v14180_v35 = vmax.f32 %v14052_v18, 0.0 }
 0x5cd   : > { %v14178_v63 = vmax.f32 %v14050_v32, 0.0  ;;  %v18493_v31 = vadd.f32 %v12817_v46, %v25064_v56  ;;  %v18328_v19 = vpop.f32.mrb[50].mxu0 }
 0x5ce   : > { %v13919_v53 = vmul.f32 %v18492_v41, %v23283_v7  ;;  %v18494_v5 = vadd.f32 %v18328_v19, %v25065_v4  ;;  %v12820_v29 = vpop.f32.mrb[51].mxu0 }
 0x5cf   : > { %v15771_v3 = vpack.c.bf16 %v14179_v2, %v14178_v63  ;;  %v13918_v42 = vmul.f32 %v18493_v31, %v23283_v7  ;;  %17730 = vmatmul.mubr.bf16.gmra.mrb[156].mxu1 %v7259_v25 }
 0x5d0   : > { %v14054_v22 = vadd.f32 %v23293_v62, %v13919_v53  ;;  %v13920_v12 = vmul.f32 %v18494_v5, %v23283_v7  ;;  %18434 = vmatmul.mubr.bf16.gmra.mrb[156].mxu0 %v12536_v36 }
 0x5d1   : > { %16015 = vst [vmem:[%s23322_s9 + $0x90] sm:$0xff] %v15771_v3   ;;  %v14053_v23 = vadd.f32 %v23293_v62, %v13918_v42 }
 0x5d2   : > { %v14055_v52 = vadd.f32 %v23293_v62, %v13920_v12  ;;  %v14182_v28 = vmax.f32 %v14054_v22, 0.0 }
 0x5d3   : > { %v14181_v26 = vmax.f32 %v14053_v23, 0.0  ;;  %v18331_v40 = vpop.f32.mrb[52].mxu0 }
 0x5d4   : > { %v14183_v6 = vmax.f32 %v14055_v52, 0.0  ;;  %v12833_v50 = vpop.f32.mrb[53].mxu0 }
 0x5d5   : > { %v15776_v51 = vpack.c.bf16 %v14181_v26, %v14180_v35  ;;  %v18495_v60 = vadd.f32 %v12833_v50, %v23179_v33  ;;  %v18332_v17 = vpop.f32.mrb[54].mxu0 }
 0x5d6   : > { %v15781_v1 = vpack.c.bf16 %v14183_v6, %v14182_v28  ;;  %v18496_v15 = vadd.f32 %v18332_v17, %v23182_v27  ;;  %v12836_v14 = vpop.f32.mrb[55].mxu0 }
 0x5d7   : > { %16016 = vst [vmem:[%s23322_s9 + $0x98] sm:$0xff] %v15776_v51   ;;  %v13921_v61 = vmul.f32 %v18495_v60, %v23283_v7  ;;  %v18497_v13 = vadd.f32 %v12836_v14, %v23186_v47 }
 0x5d8   : > { %16017 = vst [vmem:[%s23322_s9 + $0xa0] sm:$0xff] %v15781_v1   ;;  %v13923_v21 = vmul.f32 %v18496_v15, %v23283_v7 }
 0x5d9   : > { %v14056_v16 = vadd.f32 %v23293_v62, %v13921_v61  ;;  %v13922_v44 = vmul.f32 %v18497_v13, %v23283_v7 }
 0x5da   : > { %v14058_v63 = vadd.f32 %v23293_v62, %v13923_v21 }
 0x5db   : > { %v14057_v33 = vadd.f32 %v23293_v62, %v13922_v44  ;;  %v18335_v32 = vpop.f32.mrb[56].mxu0  ;;  %v14184_v10 = vmax.f32 %v14056_v16, 0.0 }
 0x5dc   : > { %v18498_v54 = vadd.f32 %v18335_v32, %v23193_v39  ;;  %v12849_v27 = vpop.f32.mrb[57].mxu0 }
 0x5dd   : > { %v14185_v41 = vmax.f32 %v14057_v33, 0.0  ;;  %v18499_v46 = vadd.f32 %v12849_v27, %v23195_v11  ;;  %v18336_v25 = vpop.f32.mrb[58].mxu0  ;;  %v14186_v11 = vmax.f32 %v14058_v63, 0.0 }
 0x5de   : > { %v13926_v47 = vmul.f32 %v18498_v54, %v23283_v7  ;;  %v12852_v2 = vpop.f32.mrb[59].mxu0 }
 0x5df   : > { %v15786_v56 = vpack.c.bf16 %v14185_v41, %v14184_v10  ;;  %v13924_v31 = vmul.f32 %v18499_v46, %v23283_v7  ;;  %v18500_v19 = vadd.f32 %v12852_v2, %v23200_v58 }
 0x5e0   : > { %v14061_v36 = vadd.f32 %v23293_v62, %v13926_v47 }
 0x5e1   : > { %16018 = vst [vmem:[%s23322_s9 + $0xa8] sm:$0xff] %v15786_v56   ;;  %v14059_v39 = vadd.f32 %v23293_v62, %v13924_v31  ;;  %v13925_v53 = vmul.f32 %v18500_v19, %v23283_v7 }
 0x5e2   : > { %v14189_v42 = vmax.f32 %v14061_v36, 0.0 }
 0x5e3   : > { %v14187_v4 = vmax.f32 %v14059_v39, 0.0  ;;  %v14060_v5 = vadd.f32 %v23293_v62, %v13925_v53  ;;  %v18339_v29 = vpop.f32.mrb[60].mxu0  ;;  %v23599_v39 = vld [vmem:[%s23848_s3] ss:$0 sm:$0xff] }
 0x5e4   : > { %v18501_v18 = vadd.f32 %v18339_v29, %v23207_v48  ;;  %v12865_v3 = vpop.f32.mrb[61].mxu0 }
 0x5e5   : > { %v15791_v22 = vpack.c.bf16 %v14187_v4, %v14186_v11  ;;  %v14188_v58 = vmax.f32 %v14060_v5, 0.0  ;;  %v18502_v12 = vadd.f32 %v12865_v3, %v23209_v8  ;;  %v18340_v23 = vpop.f32.mrb[62].mxu0 }
 0x5e6   : > { %v13929_v52 = vmul.f32 %v18501_v18, %v23283_v7  ;;  %v18503_v35 = vadd.f32 %v18340_v23, %v23212_v49  ;;  %v12868_v26 = vpop.f32.mrb[63].mxu0 }
 0x5e7   : > { %16019 = vst [vmem:[%s23322_s9 + $0xb0] sm:$0xff] %v15791_v22   ;;  %v15796_v40 = vpack.c.bf16 %v14189_v42, %v14188_v58  ;;  %v13927_v28 = vmul.f32 %v18502_v12, %v23283_v7  ;;  %v18504_v6 = vadd.f32 %v12868_v26, %v23216_v9 }
 0x5e8   : > { %v14064_v48 = vadd.f32 %v23293_v62, %v13929_v52  ;;  %v13930_v50 = vmul.f32 %v18503_v35, %v23283_v7 }
 0x5e9   : > { %16020 = vst [vmem:[%s23322_s9 + $0xb8] sm:$0xff] %v15796_v40   ;;  %v14062_v51 = vadd.f32 %v23293_v62, %v13927_v28  ;;  %v13928_v8 = vmul.f32 %v18504_v6, %v23283_v7 }
 0x5ea   : > { %v14065_v60 = vadd.f32 %v23293_v62, %v13930_v50  ;;  %v14192_v1 = vmax.f32 %v14064_v48, 0.0 }
 0x5eb   : > { %v14063_v49 = vadd.f32 %v23293_v62, %v13928_v8  ;;  %v18343_v17 = vpop.f32.mrb[64].mxu0  ;;  %v14190_v61 = vmax.f32 %v14062_v51, 0.0 }
 0x5ec   : > { %v14193_v15 = vmax.f32 %v14065_v60, 0.0  ;;  %v18505_v9 = vadd.f32 %v18343_v17, %v23223_v20  ;;  %v12881_v14 = vpop.f32.mrb[65].mxu0  ;;  %v23587_v20 = vld [vmem:[%s23847_s2] ss:$0 sm:$0xff] }
 0x5ed   : > { %v14191_v13 = vmax.f32 %v14063_v49, 0.0  ;;  %v18344_v16 = vpop.f32.mrb[66].mxu0 }
 0x5ee   : > { %v15806_v44 = vpack.c.bf16 %v14193_v15, %v14192_v1  ;;  %v13932_v21 = vmul.f32 %v18505_v9, %v23283_v7  ;;  %v18506_v33 = vadd.f32 %v18344_v16, %v23226_v34  ;;  %v12884_v32 = vpop.f32.mrb[67].mxu0 }
 0x5ef   : > { %v15801_v54 = vpack.c.bf16 %v14191_v13, %v14190_v61  ;;  %v18507_v27 = vadd.f32 %v12884_v32, %v23230_v37 }
 0x5f0   : > { %16022 = vst [vmem:[%s23322_s9 + $0xc8] sm:$0xff] %v15806_v44   ;;  %v14067_v10 = vadd.f32 %v23293_v62, %v13932_v21  ;;  %v13933_v46 = vmul.f32 %v23587_v20, %v18506_v33 }
 0x5f1   : > { %16021 = vst [vmem:[%s23322_s9 + $0xc0] sm:$0xff] %v15801_v54   ;;  %v13931_v41 = vmul.f32 %v23587_v20, %v18507_v27 }
 0x5f2   : > { %v14195_v47 = vmax.f32 %v14067_v10, 0.0 }
 0x5f3   : > { %v14066_v7 = vadd.f32 %v23293_v62, %v13931_v41  ;;  %v18347_v34 = vpop.f32.mrb[68].mxu0  ;;  %v14068_v62 = vadd.f32 %v23599_v39, %v13933_v46 }
 0x5f4   : > { %v18508_v25 = vadd.f32 %v18347_v34, %v23237_v57  ;;  %v12897_v37 = vpop.f32.mrb[69].mxu0 }
 0x5f5   : > { %v14194_v2 = vmax.f32 %v14066_v7, 0.0  ;;  %v18509_v63 = vadd.f32 %v12897_v37, %v23239_v38  ;;  %v18348_v56 = vpop.f32.mrb[70].mxu0  ;;  %v14196_v5 = vmax.f32 %v14068_v62, 0.0 }
 0x5f6   : > { %v13935_v31 = vmul.f32 %v23587_v20, %v18508_v25  ;;  %v18510_v19 = vadd.f32 %v18348_v56, %v23242_v0  ;;  %v12900_v36 = vpop.f32.mrb[71].mxu0 }
 0x5f7   : > { %v15811_v53 = vpack.c.bf16 %v14195_v47, %v14194_v2  ;;  %v13934_v57 = vmul.f32 %v23587_v20, %v18509_v63 }
 0x5f8   : > { %v14070_v11 = vadd.f32 %v23599_v39, %v13935_v31  ;;  %v13936_v38 = vmul.f32 %v23587_v20, %v18510_v19 }
 0x5f9   : > { %16023 = vst [vmem:[%s23322_s9 + $0xd0] sm:$0xff] %v15811_v53   ;;  %v14069_v4 = vadd.f32 %v23599_v39, %v13934_v57 }
 0x5fa   : > { %v14071_v0 = vadd.f32 %v23599_v39, %v13936_v38  ;;  %v14198_v3 = vmax.f32 %v14070_v11, 0.0 }
 0x5fb   : > { %v14197_v29 = vmax.f32 %v14069_v4, 0.0  ;;  %v18351_v18 = vpop.f32.mrb[72].mxu0 }
 0x5fc   : > { %v14199_v42 = vmax.f32 %v14071_v0, 0.0  ;;  %v12913_v22 = vpop.f32.mrb[73].mxu0 }
 0x5fd   : > { %v15816_v58 = vpack.c.bf16 %v14197_v29, %v14196_v5  ;;  %v18511_v12 = vadd.f32 %v12913_v22, %v23251_v55  ;;  %v18352_v23 = vpop.f32.mrb[74].mxu0 }
 0x5fe   : > { %v15821_v52 = vpack.c.bf16 %v14199_v42, %v14198_v3  ;;  %v18512_v35 = vadd.f32 %v18352_v23, %v23254_v59  ;;  %v12916_v26 = vpop.f32.mrb[75].mxu0 }
 0x5ff   : > { %16024 = vst [vmem:[%s23322_s9 + $0xd8] sm:$0xff] %v15816_v58   ;;  %v13937_v40 = vmul.f32 %v23587_v20, %v18511_v12  ;;  %v18513_v28 = vadd.f32 %v12916_v26, %v23258_v30 }
 0x600   : > { %16025 = vst [vmem:[%s23322_s9 + $0xe0] sm:$0xff] %v15821_v52   ;;  %v13939_v50 = vmul.f32 %v23587_v20, %v18512_v35 }
 0x601   : > { %v14072_v6 = vadd.f32 %v23599_v39, %v13937_v40  ;;  %v13938_v48 = vmul.f32 %v23587_v20, %v18513_v28 }
 0x602   : > { %v14074_v9 = vadd.f32 %v23599_v39, %v13939_v50 }
 0x603   : > { %v14073_v55 = vadd.f32 %v23599_v39, %v13938_v48  ;;  %v18355_v51 = vpop.f32.mrb[76].mxu0  ;;  %v14200_v60 = vmax.f32 %v14072_v6, 0.0 }
 0x604   : > { %v18514_v8 = vadd.f32 %v18355_v51, %v23265_v45  ;;  %v12929_v59 = vpop.f32.mrb[77].mxu0 }
 0x605   : > { %v14201_v49 = vmax.f32 %v14073_v55, 0.0  ;;  %v18515_v17 = vadd.f32 %v12929_v59, %v23267_v43  ;;  %v18356_v1 = vpop.f32.mrb[78].mxu0  ;;  %v14202_v43 = vmax.f32 %v14074_v9, 0.0 }
 0x606   : > { %v13942_v30 = vmul.f32 %v23587_v20, %v18514_v8  ;;  %v12932_v15 = vpop.f32.mrb[79].mxu0 }
 0x607   : > { %v15826_v14 = vpack.c.bf16 %v14201_v49, %v14200_v60  ;;  %v13940_v61 = vmul.f32 %v23587_v20, %v18515_v17  ;;  %v18516_v13 = vadd.f32 %v12932_v15, %v23272_v24 }
 0x608   : > { %v14077_v16 = vadd.f32 %v23599_v39, %v13942_v30 }
 0x609   : > { %16026 = vst [vmem:[%s23322_s9 + $0xe8] sm:$0xff] %v15826_v14   ;;  %v14075_v45 = vadd.f32 %v23599_v39, %v13940_v61  ;;  %v13941_v44 = vmul.f32 %v23587_v20, %v18516_v13 }
 0x60a   : > { %v17655_v21 = vpop.f32.mrb[80].mxu1  ;;  %v14205_v24 = vmax.f32 %v14077_v16, 0.0 }
 0x60b   : > { %v14203_v33 = vmax.f32 %v14075_v45, 0.0  ;;  %v14076_v32 = vadd.f32 %v23599_v39, %v13941_v44  ;;  %v18359_v54 = vpop.f32.mrb[80].mxu0  ;;  %v7742_v27 = vpop.f32.mrb[81].mxu1 }
 0x60c   : > { %v18517_v10 = vadd.f32 %v18359_v54, %v17655_v21  ;;  %v12945_v41 = vpop.f32.mrb[81].mxu0  ;;  %v17656_v46 = vpop.f32.mrb[82].mxu1 }
 0x60d   : > { %v15831_v7 = vpack.c.bf16 %v14203_v33, %v14202_v43  ;;  %v14204_v34 = vmax.f32 %v14076_v32, 0.0  ;;  %v18518_v25 = vadd.f32 %v12945_v41, %v7742_v27  ;;  %v18360_v37 = vpop.f32.mrb[82].mxu0  ;;  %v7745_v47 = vpop.f32.mrb[83].mxu1 }
 0x60e   : > { %v13945_v2 = vmul.f32 %v23587_v20, %v18517_v10  ;;  %v18519_v63 = vadd.f32 %v18360_v37, %v17656_v46  ;;  %v12948_v56 = vpop.f32.mrb[83].mxu0 }
 0x60f   : > { %16027 = vst [vmem:[%s23322_s9 + $0xf0] sm:$0xff] %v15831_v7   ;;  %v15836_v31 = vpack.c.bf16 %v14205_v24, %v14204_v34  ;;  %v13943_v19 = vmul.f32 %v23587_v20, %v18518_v25  ;;  %v18520_v36 = vadd.f32 %v12948_v56, %v7745_v47 }
 0x610   : > { %v14080_v62 = vadd.f32 %v23599_v39, %v13945_v2  ;;  %v13946_v53 = vmul.f32 %v23587_v20, %v18519_v63 }
 0x611   : > { %16028 = vst [vmem:[%s23322_s9 + $0xf8] sm:$0xff] %v15836_v31   ;;  %v14078_v57 = vadd.f32 %v23599_v39, %v13943_v19  ;;  %v13944_v11 = vmul.f32 %v23587_v20, %v18520_v36 }
 0x612   : > { %v14081_v38 = vadd.f32 %v23599_v39, %v13946_v53  ;;  %v17659_v4 = vpop.f32.mrb[84].mxu1  ;;  %v14208_v18 = vmax.f32 %v14080_v62, 0.0 }
 0x613   : > { %v14079_v0 = vadd.f32 %v23599_v39, %v13944_v11  ;;  %v18363_v5 = vpop.f32.mrb[84].mxu0  ;;  %v7758_v29 = vpop.f32.mrb[85].mxu1  ;;  %v14206_v12 = vmax.f32 %v14078_v57, 0.0 }
 0x614   : > { %v14209_v3 = vmax.f32 %v14081_v38, 0.0  ;;  %v18521_v42 = vadd.f32 %v18363_v5, %v17659_v4  ;;  %v12961_v22 = vpop.f32.mrb[85].mxu0  ;;  %v17660_v58 = vpop.f32.mrb[86].mxu1 }
 0x615   : > { %v14207_v23 = vmax.f32 %v14079_v0, 0.0  ;;  %v18364_v52 = vpop.f32.mrb[86].mxu0  ;;  %v7761_v35 = vpop.f32.mrb[87].mxu1 }
 0x616   : > { %v15846_v26 = vpack.c.bf16 %v14209_v3, %v14208_v18  ;;  %v13948_v40 = vmul.f32 %v23587_v20, %v18521_v42  ;;  %v18522_v28 = vadd.f32 %v18364_v52, %v17660_v58  ;;  %v12964_v6 = vpop.f32.mrb[87].mxu0 }
 0x617   : > { %v15841_v48 = vpack.c.bf16 %v14207_v23, %v14206_v12  ;;  %v18523_v50 = vadd.f32 %v12964_v6, %v7761_v35 }
 0x618   : > { %16030 = vst [vmem:[%s23322_s9 + $0x108] sm:$0xff] %v15846_v26   ;;  %v14083_v55 = vadd.f32 %v23599_v39, %v13948_v40  ;;  %v13949_v59 = vmul.f32 %v23587_v20, %v18522_v28 }
 0x619   : > { %16029 = vst [vmem:[%s23322_s9 + $0x100] sm:$0xff] %v15841_v48   ;;  %v13947_v51 = vmul.f32 %v23587_v20, %v18523_v50 }
 0x61a   : > { %v17663_v8 = vpop.f32.mrb[88].mxu1  ;;  %v14211_v9 = vmax.f32 %v14083_v55, 0.0  ;;  %v14084_v43 = vadd.f32 %v23599_v39, %v13949_v59 }
 0x61b   : > { %v14082_v60 = vadd.f32 %v23599_v39, %v13947_v51  ;;  %v18367_v49 = vpop.f32.mrb[88].mxu0  ;;  %v7774_v17 = vpop.f32.mrb[89].mxu1 }
 0x61c   : > { %v18524_v1 = vadd.f32 %v18367_v49, %v17663_v8  ;;  %v12977_v30 = vpop.f32.mrb[89].mxu0  ;;  %v17664_v15 = vpop.f32.mrb[90].mxu1  ;;  %v14212_v24 = vmax.f32 %v14084_v43, 0.0 }
 0x61d   : > { %v14210_v14 = vmax.f32 %v14082_v60, 0.0  ;;  %v18525_v61 = vadd.f32 %v12977_v30, %v7774_v17  ;;  %v18368_v13 = vpop.f32.mrb[90].mxu0  ;;  %v7777_v16 = vpop.f32.mrb[91].mxu1 }
 0x61e   : > { %v13951_v45 = vmul.f32 %v23587_v20, %v18524_v1  ;;  %v18526_v44 = vadd.f32 %v18368_v13, %v17664_v15  ;;  %v12980_v21 = vpop.f32.mrb[91].mxu0 }
 0x61f   : > { %v15851_v33 = vpack.c.bf16 %v14211_v9, %v14210_v14  ;;  %v13950_v32 = vmul.f32 %v23587_v20, %v18525_v61 }
 0x620   : > { %v14086_v54 = vadd.f32 %v23599_v39, %v13951_v45  ;;  %v13952_v27 = vmul.f32 %v23587_v20, %v18526_v44 }
 0x621   : > { %16031 = vst [vmem:[%s23322_s9 + $0x110] sm:$0xff] %v15851_v33   ;;  %v14085_v10 = vadd.f32 %v23599_v39, %v13950_v32 }
 0x622   : > { %v14087_v41 = vadd.f32 %v23599_v39, %v13952_v27  ;;  %v17667_v46 = vpop.f32.mrb[92].mxu1  ;;  %v14214_v37 = vmax.f32 %v14086_v54, 0.0 }
 0x623   : > { %v14213_v7 = vmax.f32 %v14085_v10, 0.0  ;;  %v18371_v34 = vpop.f32.mrb[92].mxu0  ;;  %v7790_v25 = vpop.f32.mrb[93].mxu1 }
 0x624   : > { %v14215_v47 = vmax.f32 %v14087_v41, 0.0  ;;  %v12993_v2 = vpop.f32.mrb[93].mxu0  ;;  %v17668_v63 = vpop.f32.mrb[94].mxu1 }
 0x625   : > { %v15856_v56 = vpack.c.bf16 %v14213_v7, %v14212_v24  ;;  %v18527_v31 = vadd.f32 %v12993_v2, %v7790_v25  ;;  %v18372_v19 = vpop.f32.mrb[94].mxu0  ;;  %v7793_v36 = vpop.f32.mrb[95].mxu1 }
 0x626   : > { %v15861_v62 = vpack.c.bf16 %v14215_v47, %v14214_v37  ;;  %v18528_v53 = vadd.f32 %v18372_v19, %v17668_v63  ;;  %v12996_v57 = vpop.f32.mrb[95].mxu0 }
 0x627   : > { %16032 = vst [vmem:[%s23322_s9 + $0x118] sm:$0xff] %v15856_v56   ;;  %v13953_v11 = vmul.f32 %v23587_v20, %v18527_v31  ;;  %v18529_v38 = vadd.f32 %v12996_v57, %v7793_v36 }
 0x628   : > { %16033 = vst [vmem:[%s23322_s9 + $0x120] sm:$0xff] %v15861_v62   ;;  %v13955_v29 = vmul.f32 %v23587_v20, %v18528_v53 }
 0x629   : > { %v14088_v4 = vadd.f32 %v23599_v39, %v13953_v11  ;;  %v13954_v0 = vmul.f32 %v23587_v20, %v18529_v38 }
 0x62a   : > { %v17671_v5 = vpop.f32.mrb[96].mxu1  ;;  %v14090_v48 = vadd.f32 %v23599_v39, %v13955_v29 }
 0x62b   : > { %v14089_v18 = vadd.f32 %v23599_v39, %v13954_v0  ;;  %v18375_v3 = vpop.f32.mrb[96].mxu0  ;;  %v7806_v42 = vpop.f32.mrb[97].mxu1  ;;  %v14216_v23 = vmax.f32 %v14088_v4, 0.0 }
 0x62c   : > { %v18530_v22 = vadd.f32 %v18375_v3, %v17671_v5  ;;  %v13009_v58 = vpop.f32.mrb[97].mxu0  ;;  %v17672_v12 = vpop.f32.mrb[98].mxu1  ;;  %v14218_v17 = vmax.f32 %v14090_v48, 0.0 }
 0x62d   : > { %v14217_v52 = vmax.f32 %v14089_v18, 0.0  ;;  %v18531_v35 = vadd.f32 %v13009_v58, %v7806_v42  ;;  %v18376_v26 = vpop.f32.mrb[98].mxu0  ;;  %v7809_v40 = vpop.f32.mrb[99].mxu1 }
 0x62e   : > { %v13958_v28 = vmul.f32 %v23587_v20, %v18530_v22  ;;  %v13012_v6 = vpop.f32.mrb[99].mxu0 }
 0x62f   : > { %v15866_v50 = vpack.c.bf16 %v14217_v52, %v14216_v23  ;;  %v13956_v55 = vmul.f32 %v23587_v20, %v18531_v35  ;;  %v18532_v51 = vadd.f32 %v13012_v6, %v7809_v40 }
 0x630   : > { %v14093_v8 = vadd.f32 %v23599_v39, %v13958_v28 }
 0x631   : > { %16034 = vst [vmem:[%s23322_s9 + $0x128] sm:$0xff] %v15866_v50   ;;  %v14091_v59 = vadd.f32 %v23599_v39, %v13956_v55  ;;  %v13957_v60 = vmul.f32 %v23587_v20, %v18532_v51 }
 0x632   : > { %v17675_v49 = vpop.f32.mrb[100].mxu1  ;;  %v14221_v16 = vmax.f32 %v14093_v8, 0.0 }
 0x633   : > { %v14219_v1 = vmax.f32 %v14091_v59, 0.0  ;;  %v14092_v30 = vadd.f32 %v23599_v39, %v13957_v60  ;;  %v18379_v15 = vpop.f32.mrb[100].mxu0  ;;  %v7822_v9 = vpop.f32.mrb[101].mxu1 }
 0x634   : > { %v18533_v14 = vadd.f32 %v18379_v15, %v17675_v49  ;;  %v13025_v61 = vpop.f32.mrb[101].mxu0  ;;  %v17676_v13 = vpop.f32.mrb[102].mxu1 }
 0x635   : > { %v15871_v45 = vpack.c.bf16 %v14219_v1, %v14218_v17  ;;  %v14220_v44 = vmax.f32 %v14092_v30, 0.0  ;;  %v18534_v21 = vadd.f32 %v13025_v61, %v7822_v9  ;;  %v18380_v43 = vpop.f32.mrb[102].mxu0  ;;  %v7825_v33 = vpop.f32.mrb[103].mxu1 }
 0x636   : > { %v13961_v32 = vmul.f32 %v23587_v20, %v18533_v14  ;;  %v18535_v54 = vadd.f32 %v18380_v43, %v17676_v13  ;;  %v13028_v27 = vpop.f32.mrb[103].mxu0 }
 0x637   : > { %16035 = vst [vmem:[%s23322_s9 + $0x130] sm:$0xff] %v15871_v45   ;;  %v15876_v10 = vpack.c.bf16 %v14221_v16, %v14220_v44  ;;  %v13959_v41 = vmul.f32 %v23587_v20, %v18534_v21  ;;  %v18536_v46 = vadd.f32 %v13028_v27, %v7825_v33 }
 0x638   : > { %v14096_v24 = vadd.f32 %v23599_v39, %v13961_v32  ;;  %v13962_v7 = vmul.f32 %v23587_v20, %v18535_v54 }
 0x639   : > { %16036 = vst [vmem:[%s23322_s9 + $0x138] sm:$0xff] %v15876_v10   ;;  %v14094_v34 = vadd.f32 %v23599_v39, %v13959_v41  ;;  %v13960_v25 = vmul.f32 %v23587_v20, %v18536_v46 }
 0x63a   : > { %v14097_v37 = vadd.f32 %v23599_v39, %v13962_v7  ;;  %v17679_v47 = vpop.f32.mrb[104].mxu1  ;;  %v14224_v31 = vmax.f32 %v14096_v24, 0.0 }
 0x63b   : > { %v14095_v2 = vadd.f32 %v23599_v39, %v13960_v25  ;;  %v18383_v63 = vpop.f32.mrb[104].mxu0  ;;  %v7838_v56 = vpop.f32.mrb[105].mxu1  ;;  %v14222_v57 = vmax.f32 %v14094_v34, 0.0 }
 0x63c   : > { %v14225_v19 = vmax.f32 %v14097_v37, 0.0  ;;  %v18537_v36 = vadd.f32 %v18383_v63, %v17679_v47  ;;  %v13041_v62 = vpop.f32.mrb[105].mxu0  ;;  %v17680_v53 = vpop.f32.mrb[106].mxu1 }
 0x63d   : > { %v14223_v11 = vmax.f32 %v14095_v2, 0.0  ;;  %v18384_v38 = vpop.f32.mrb[106].mxu0  ;;  %v7841_v4 = vpop.f32.mrb[107].mxu1 }
 0x63e   : > { %v15886_v0 = vpack.c.bf16 %v14225_v19, %v14224_v31  ;;  %v13964_v5 = vmul.f32 %v23587_v20, %v18537_v36  ;;  %v18538_v29 = vadd.f32 %v18384_v38, %v17680_v53  ;;  %v13044_v18 = vpop.f32.mrb[107].mxu0 }
 0x63f   : > { %v15881_v3 = vpack.c.bf16 %v14223_v11, %v14222_v57  ;;  %v18539_v42 = vadd.f32 %v13044_v18, %v7841_v4 }
 0x640   : > { %16038 = vst [vmem:[%s23322_s9 + $0x148] sm:$0xff] %v15886_v0   ;;  %v14099_v22 = vadd.f32 %v23599_v39, %v13964_v5  ;;  %v13965_v23 = vmul.f32 %v23587_v20, %v18538_v29 }
 0x641   : > { %16037 = vst [vmem:[%s23322_s9 + $0x140] sm:$0xff] %v15881_v3   ;;  %v13963_v58 = vmul.f32 %v23587_v20, %v18539_v42 }
 0x642   : > { %v17683_v12 = vpop.f32.mrb[108].mxu1  ;;  %v14227_v48 = vmax.f32 %v14099_v22, 0.0  ;;  %v14100_v17 = vadd.f32 %v23599_v39, %v13965_v23 }
 0x643   : > { %v14098_v52 = vadd.f32 %v23599_v39, %v13963_v58  ;;  %v18387_v35 = vpop.f32.mrb[108].mxu0  ;;  %v7854_v26 = vpop.f32.mrb[109].mxu1 }
 0x644   : > { %v18540_v40 = vadd.f32 %v18387_v35, %v17683_v12  ;;  %v13057_v28 = vpop.f32.mrb[109].mxu0  ;;  %v17684_v6 = vpop.f32.mrb[110].mxu1  ;;  %v14228_v16 = vmax.f32 %v14100_v17, 0.0 }
 0x645   : > { %v14226_v50 = vmax.f32 %v14098_v52, 0.0  ;;  %v18541_v55 = vadd.f32 %v13057_v28, %v7854_v26  ;;  %v18388_v51 = vpop.f32.mrb[110].mxu0  ;;  %v7857_v8 = vpop.f32.mrb[111].mxu1 }
 0x646   : > { %v13967_v59 = vmul.f32 %v23587_v20, %v18540_v40  ;;  %v18542_v60 = vadd.f32 %v18388_v51, %v17684_v6  ;;  %v13060_v49 = vpop.f32.mrb[111].mxu0 }
 0x647   : > { %v15891_v1 = vpack.c.bf16 %v14227_v48, %v14226_v50  ;;  %v13966_v30 = vmul.f32 %v23587_v20, %v18541_v55 }
 0x648   : > { %v14102_v15 = vadd.f32 %v23599_v39, %v13967_v59  ;;  %v13968_v9 = vmul.f32 %v23587_v20, %v18542_v60 }
 0x649   : > { %16039 = vst [vmem:[%s23322_s9 + $0x150] sm:$0xff] %v15891_v1   ;;  %v14101_v14 = vadd.f32 %v23599_v39, %v13966_v30 }
 0x64a   : > { %v14103_v61 = vadd.f32 %v23599_v39, %v13968_v9  ;;  %v17687_v13 = vpop.f32.mrb[112].mxu1  ;;  %v14230_v43 = vmax.f32 %v14102_v15, 0.0 }
 0x64b   : > { %v14229_v45 = vmax.f32 %v14101_v14, 0.0  ;;  %v18391_v44 = vpop.f32.mrb[112].mxu0  ;;  %v7870_v21 = vpop.f32.mrb[113].mxu1 }
 0x64c   : > { %v14231_v33 = vmax.f32 %v14103_v61, 0.0  ;;  %v13073_v32 = vpop.f32.mrb[113].mxu0  ;;  %v17688_v54 = vpop.f32.mrb[114].mxu1 }
 0x64d   : > { %v15896_v27 = vpack.c.bf16 %v14229_v45, %v14228_v16  ;;  %v18543_v10 = vadd.f32 %v13073_v32, %v7870_v21  ;;  %v18392_v41 = vpop.f32.mrb[114].mxu0  ;;  %v7873_v46 = vpop.f32.mrb[115].mxu1 }
 0x64e   : > { %v15901_v24 = vpack.c.bf16 %v14231_v33, %v14230_v43  ;;  %v18544_v7 = vadd.f32 %v18392_v41, %v17688_v54  ;;  %v13076_v34 = vpop.f32.mrb[115].mxu0 }
 0x64f   : > { %16040 = vst [vmem:[%s23322_s9 + $0x158] sm:$0xff] %v15896_v27   ;;  %v13969_v25 = vmul.f32 %v23587_v20, %v18543_v10  ;;  %v18545_v37 = vadd.f32 %v13076_v34, %v7873_v46 }
 0x650   : > { %16041 = vst [vmem:[%s23322_s9 + $0x160] sm:$0xff] %v15901_v24   ;;  %v13971_v56 = vmul.f32 %v23587_v20, %v18544_v7 }
 0x651   : > { %v14104_v47 = vadd.f32 %v23599_v39, %v13969_v25  ;;  %v13970_v2 = vmul.f32 %v23587_v20, %v18545_v37 }
 0x652   : > { %v17691_v63 = vpop.f32.mrb[116].mxu1  ;;  %v14106_v3 = vadd.f32 %v23599_v39, %v13971_v56 }
 0x653   : > { %v14105_v31 = vadd.f32 %v23599_v39, %v13970_v2  ;;  %v18395_v19 = vpop.f32.mrb[116].mxu0  ;;  %v7886_v36 = vpop.f32.mrb[117].mxu1  ;;  %v14232_v11 = vmax.f32 %v14104_v47, 0.0 }
 0x654   : > { %v18546_v62 = vadd.f32 %v18395_v19, %v17691_v63  ;;  %v13089_v53 = vpop.f32.mrb[117].mxu0  ;;  %v17692_v57 = vpop.f32.mrb[118].mxu1  ;;  %v14234_v26 = vmax.f32 %v14106_v3, 0.0 }
 0x655   : > { %v14233_v38 = vmax.f32 %v14105_v31, 0.0  ;;  %v18547_v4 = vadd.f32 %v13089_v53, %v7886_v36  ;;  %v18396_v0 = vpop.f32.mrb[118].mxu0  ;;  %v7889_v5 = vpop.f32.mrb[119].mxu1 }
 0x656   : > { %v13974_v29 = vmul.f32 %v23587_v20, %v18546_v62  ;;  %v13092_v18 = vpop.f32.mrb[119].mxu0 }
 0x657   : > { %v15906_v42 = vpack.c.bf16 %v14233_v38, %v14232_v11  ;;  %v13972_v22 = vmul.f32 %v23587_v20, %v18547_v4  ;;  %v18548_v58 = vadd.f32 %v13092_v18, %v7889_v5 }
 0x658   : > { %v14109_v12 = vadd.f32 %v23599_v39, %v13974_v29 }
 0x659   : > { %16042 = vst [vmem:[%s23322_s9 + $0x168] sm:$0xff] %v15906_v42   ;;  %v14107_v23 = vadd.f32 %v23599_v39, %v13972_v22  ;;  %v13973_v52 = vmul.f32 %v23587_v20, %v18548_v58 }
 0x65a   : > { %v17695_v35 = vpop.f32.mrb[120].mxu1  ;;  %v14237_v8 = vmax.f32 %v14109_v12, 0.0 }
 0x65b   : > { %v14235_v40 = vmax.f32 %v14107_v23, 0.0  ;;  %v14108_v28 = vadd.f32 %v23599_v39, %v13973_v52  ;;  %v18399_v6 = vpop.f32.mrb[120].mxu0  ;;  %v7902_v48 = vpop.f32.mrb[121].mxu1 }
 0x65c   : > { %v18549_v50 = vadd.f32 %v18399_v6, %v17695_v35  ;;  %v13105_v55 = vpop.f32.mrb[121].mxu0  ;;  %v17696_v51 = vpop.f32.mrb[122].mxu1 }
 0x65d   : > { %v15911_v59 = vpack.c.bf16 %v14235_v40, %v14234_v26  ;;  %v14236_v60 = vmax.f32 %v14108_v28, 0.0  ;;  %v18550_v49 = vadd.f32 %v13105_v55, %v7902_v48  ;;  %v18400_v17 = vpop.f32.mrb[122].mxu0  ;;  %v7905_v1 = vpop.f32.mrb[123].mxu1 }
 0x65e   : > { %v13977_v30 = vmul.f32 %v23587_v20, %v18549_v50  ;;  %v18551_v15 = vadd.f32 %v18400_v17, %v17696_v51  ;;  %v13108_v9 = vpop.f32.mrb[123].mxu0 }
 0x65f   : > { %16043 = vst [vmem:[%s23322_s9 + $0x170] sm:$0xff] %v15911_v59   ;;  %v15916_v14 = vpack.c.bf16 %v14237_v8, %v14236_v60  ;;  %v13975_v61 = vmul.f32 %v23587_v20, %v18550_v49  ;;  %v18552_v13 = vadd.f32 %v13108_v9, %v7905_v1 }
 0x660   : > { %v14112_v16 = vadd.f32 %v23599_v39, %v13977_v30  ;;  %v13978_v45 = vmul.f32 %v23587_v20, %v18551_v15 }
 0x661   : > { %16044 = vst [vmem:[%s23322_s9 + $0x178] sm:$0xff] %v15916_v14   ;;  %v14110_v44 = vadd.f32 %v23599_v39, %v13975_v61  ;;  %v13976_v21 = vmul.f32 %v23587_v20, %v18552_v13 }
 0x662   : > { %v14113_v43 = vadd.f32 %v23599_v39, %v13978_v45  ;;  %v17699_v33 = vpop.f32.mrb[124].mxu1  ;;  %v14240_v10 = vmax.f32 %v14112_v16, 0.0 }
 0x663   : > { %v14111_v32 = vadd.f32 %v23599_v39, %v13976_v21  ;;  %v18403_v54 = vpop.f32.mrb[124].mxu0  ;;  %v7918_v27 = vpop.f32.mrb[125].mxu1  ;;  %v14238_v34 = vmax.f32 %v14110_v44, 0.0 }
 0x664   : > { %v14241_v41 = vmax.f32 %v14113_v43, 0.0  ;;  %v18553_v46 = vadd.f32 %v18403_v54, %v17699_v33  ;;  %v13121_v24 = vpop.f32.mrb[125].mxu0  ;;  %v17700_v7 = vpop.f32.mrb[126].mxu1 }
 0x665   : > { %v14239_v25 = vmax.f32 %v14111_v32, 0.0  ;;  %v18404_v37 = vpop.f32.mrb[126].mxu0  ;;  %v7921_v47 = vpop.f32.mrb[127].mxu1 }
 0x666   : > { %v15926_v2 = vpack.c.bf16 %v14241_v41, %v14240_v10  ;;  %v13980_v63 = vmul.f32 %v23587_v20, %v18553_v46  ;;  %v18554_v56 = vadd.f32 %v18404_v37, %v17700_v7  ;;  %v13124_v31 = vpop.f32.mrb[127].mxu0 }
 0x667   : > { %v15921_v19 = vpack.c.bf16 %v14239_v25, %v14238_v34  ;;  %v18555_v36 = vadd.f32 %v13124_v31, %v7921_v47 }
 0x668   : > { %16046 = vst [vmem:[%s23322_s9 + $0x188] sm:$0xff] %v15926_v2   ;;  %v14115_v62 = vadd.f32 %v23599_v39, %v13980_v63  ;;  %v13981_v11 = vmul.f32 %v23587_v20, %v18554_v56 }
 0x669   : > { %16045 = vst [vmem:[%s23322_s9 + $0x180] sm:$0xff] %v15921_v19   ;;  %v13979_v53 = vmul.f32 %v23587_v20, %v18555_v36 }
 0x66a   : > { %v17703_v57 = vpop.f32.mrb[128].mxu1  ;;  %v14243_v3 = vmax.f32 %v14115_v62, 0.0  ;;  %v14116_v26 = vadd.f32 %v23599_v39, %v13981_v11 }
 0x66b   : > { %v14114_v38 = vadd.f32 %v23599_v39, %v13979_v53  ;;  %v18407_v4 = vpop.f32.mrb[128].mxu0  ;;  %v7934_v0 = vpop.f32.mrb[129].mxu1 }
 0x66c   : > { %v18556_v5 = vadd.f32 %v18407_v4, %v17703_v57  ;;  %v13137_v29 = vpop.f32.mrb[129].mxu0  ;;  %v17704_v18 = vpop.f32.mrb[130].mxu1  ;;  %v14244_v8 = vmax.f32 %v14116_v26, 0.0 }
 0x66d   : > { %v14242_v42 = vmax.f32 %v14114_v38, 0.0  ;;  %v18557_v22 = vadd.f32 %v13137_v29, %v7934_v0  ;;  %v18408_v58 = vpop.f32.mrb[130].mxu0  ;;  %v7937_v12 = vpop.f32.mrb[131].mxu1 }
 0x66e   : > { %v13983_v23 = vmul.f32 %v23587_v20, %v18556_v5  ;;  %v18558_v52 = vadd.f32 %v18408_v58, %v17704_v18  ;;  %v13140_v35 = vpop.f32.mrb[131].mxu0 }
 0x66f   : > { %v15931_v40 = vpack.c.bf16 %v14243_v3, %v14242_v42  ;;  %v13982_v28 = vmul.f32 %v23587_v20, %v18557_v22 }
 0x670   : > { %v14118_v6 = vadd.f32 %v23599_v39, %v13983_v23  ;;  %v13984_v48 = vmul.f32 %v23587_v20, %v18558_v52 }
 0x671   : > { %16047 = vst [vmem:[%s23322_s9 + $0x190] sm:$0xff] %v15931_v40   ;;  %v14117_v50 = vadd.f32 %v23599_v39, %v13982_v28 }
 0x672   : > { %v14119_v55 = vadd.f32 %v23599_v39, %v13984_v48  ;;  %v17707_v51 = vpop.f32.mrb[132].mxu1  ;;  %v14246_v17 = vmax.f32 %v14118_v6, 0.0 }
 0x673   : > { %v14245_v59 = vmax.f32 %v14117_v50, 0.0  ;;  %v18411_v60 = vpop.f32.mrb[132].mxu0  ;;  %v7950_v49 = vpop.f32.mrb[133].mxu1 }
 0x674   : > { %v14247_v1 = vmax.f32 %v14119_v55, 0.0  ;;  %v13153_v30 = vpop.f32.mrb[133].mxu0  ;;  %v17708_v15 = vpop.f32.mrb[134].mxu1 }
 0x675   : > { %v15936_v9 = vpack.c.bf16 %v14245_v59, %v14244_v8  ;;  %v18559_v14 = vadd.f32 %v13153_v30, %v7950_v49  ;;  %v18412_v61 = vpop.f32.mrb[134].mxu0  ;;  %v7953_v13 = vpop.f32.mrb[135].mxu1 }
 0x676   : > { %v15941_v16 = vpack.c.bf16 %v14247_v1, %v14246_v17  ;;  %v18560_v45 = vadd.f32 %v18412_v61, %v17708_v15  ;;  %v13156_v44 = vpop.f32.mrb[135].mxu0 }
 0x677   : > { %16048 = vst [vmem:[%s23322_s9 + $0x198] sm:$0xff] %v15936_v9   ;;  %v13985_v21 = vmul.f32 %v23587_v20, %v18559_v14  ;;  %v18561_v43 = vadd.f32 %v13156_v44, %v7953_v13 }
 0x678   : > { %16049 = vst [vmem:[%s23322_s9 + $0x1a0] sm:$0xff] %v15941_v16   ;;  %v13987_v27 = vmul.f32 %v23587_v20, %v18560_v45 }
 0x679   : > { %v14120_v33 = vadd.f32 %v23599_v39, %v13985_v21  ;;  %v13986_v32 = vmul.f32 %v23587_v20, %v18561_v43 }
 0x67a   : > { %v17711_v54 = vpop.f32.mrb[136].mxu1  ;;  %v14122_v19 = vadd.f32 %v23599_v39, %v13987_v27 }
 0x67b   : > { %v14121_v10 = vadd.f32 %v23599_v39, %v13986_v32  ;;  %v18415_v41 = vpop.f32.mrb[136].mxu0  ;;  %v7966_v46 = vpop.f32.mrb[137].mxu1  ;;  %v14248_v25 = vmax.f32 %v14120_v33, 0.0 }
 0x67c   : > { %v18562_v24 = vadd.f32 %v18415_v41, %v17711_v54  ;;  %v13169_v7 = vpop.f32.mrb[137].mxu0  ;;  %v17712_v34 = vpop.f32.mrb[138].mxu1  ;;  %v14250_v0 = vmax.f32 %v14122_v19, 0.0 }
 0x67d   : > { %v14249_v37 = vmax.f32 %v14121_v10, 0.0  ;;  %v18563_v47 = vadd.f32 %v13169_v7, %v7966_v46  ;;  %v18416_v2 = vpop.f32.mrb[138].mxu0  ;;  %v7969_v63 = vpop.f32.mrb[139].mxu1 }
 0x67e   : > { %v13990_v56 = vmul.f32 %v23587_v20, %v18562_v24  ;;  %v13172_v31 = vpop.f32.mrb[139].mxu0 }
 0x67f   : > { %v15946_v36 = vpack.c.bf16 %v14249_v37, %v14248_v25  ;;  %v13988_v62 = vmul.f32 %v23587_v20, %v18563_v47  ;;  %v18564_v53 = vadd.f32 %v13172_v31, %v7969_v63 }
 0x680   : > { %v14125_v57 = vadd.f32 %v23599_v39, %v13990_v56 }
 0x681   : > { %16050 = vst [vmem:[%s23322_s9 + $0x1a8] sm:$0xff] %v15946_v36   ;;  %v14123_v11 = vadd.f32 %v23599_v39, %v13988_v62  ;;  %v13989_v38 = vmul.f32 %v23587_v20, %v18564_v53 }
 0x682   : > { %v17715_v4 = vpop.f32.mrb[140].mxu1  ;;  %v14253_v12 = vmax.f32 %v14125_v57, 0.0 }
 0x683   : > { %v14251_v5 = vmax.f32 %v14123_v11, 0.0  ;;  %v14124_v29 = vadd.f32 %v23599_v39, %v13989_v38  ;;  %v18419_v18 = vpop.f32.mrb[140].mxu0  ;;  %v7982_v3 = vpop.f32.mrb[141].mxu1 }
 0x684   : > { %v18565_v42 = vadd.f32 %v18419_v18, %v17715_v4  ;;  %v13185_v22 = vpop.f32.mrb[141].mxu0  ;;  %v17716_v58 = vpop.f32.mrb[142].mxu1 }
 0x685   : > { %v15951_v23 = vpack.c.bf16 %v14251_v5, %v14250_v0  ;;  %v14252_v52 = vmax.f32 %v14124_v29, 0.0  ;;  %v18566_v35 = vadd.f32 %v13185_v22, %v7982_v3  ;;  %v18420_v26 = vpop.f32.mrb[142].mxu0  ;;  %v7985_v40 = vpop.f32.mrb[143].mxu1 }
 0x686   : > { %v13993_v28 = vmul.f32 %v23587_v20, %v18565_v42  ;;  %v18567_v6 = vadd.f32 %v18420_v26, %v17716_v58  ;;  %v13188_v48 = vpop.f32.mrb[143].mxu0 }
 0x687   : > { %16051 = vst [vmem:[%s23322_s9 + $0x1b0] sm:$0xff] %v15951_v23   ;;  %v15956_v50 = vpack.c.bf16 %v14253_v12, %v14252_v52  ;;  %v13991_v55 = vmul.f32 %v23587_v20, %v18566_v35  ;;  %v18568_v51 = vadd.f32 %v13188_v48, %v7985_v40 }
 0x688   : > { %v14128_v8 = vadd.f32 %v23599_v39, %v13993_v28  ;;  %v13994_v59 = vmul.f32 %v23587_v20, %v18567_v6 }
 0x689   : > { %16052 = vst [vmem:[%s23322_s9 + $0x1b8] sm:$0xff] %v15956_v50   ;;  %v14126_v60 = vadd.f32 %v23599_v39, %v13991_v55  ;;  %v13992_v49 = vmul.f32 %v23587_v20, %v18568_v51 }
 0x68a   : > { %v14129_v17 = vadd.f32 %v23599_v39, %v13994_v59  ;;  %v17719_v1 = vpop.f32.mrb[144].mxu1  ;;  %v14256_v14 = vmax.f32 %v14128_v8, 0.0 }
 0x68b   : > { %v14127_v30 = vadd.f32 %v23599_v39, %v13992_v49  ;;  %v18423_v15 = vpop.f32.mrb[144].mxu0  ;;  %v7998_v9 = vpop.f32.mrb[145].mxu1  ;;  %v14254_v44 = vmax.f32 %v14126_v60, 0.0 }
 0x68c   : > { %v14257_v61 = vmax.f32 %v14129_v17, 0.0  ;;  %v18569_v13 = vadd.f32 %v18423_v15, %v17719_v1  ;;  %v13201_v16 = vpop.f32.mrb[145].mxu0  ;;  %v17720_v45 = vpop.f32.mrb[146].mxu1 }
 0x68d   : > { %v14255_v21 = vmax.f32 %v14127_v30, 0.0  ;;  %v18424_v43 = vpop.f32.mrb[146].mxu0  ;;  %v8001_v33 = vpop.f32.mrb[147].mxu1  ;;  %v20022_v30 = vld [vmem:[%s23847_s2] ss:$0 sm:$0xff] }
 0x68e   : > { %v15966_v32 = vpack.c.bf16 %v14257_v61, %v14256_v14  ;;  %v13996_v54 = vmul.f32 %v23587_v20, %v18569_v13  ;;  %v18570_v27 = vadd.f32 %v18424_v43, %v17720_v45  ;;  %v13204_v10 = vpop.f32.mrb[147].mxu0 }
 0x68f   : > { %v15961_v41 = vpack.c.bf16 %v14255_v21, %v14254_v44  ;;  %v18571_v46 = vadd.f32 %v13204_v10, %v8001_v33 }
 0x690   : > { %16054 = vst [vmem:[%s23322_s9 + $0x1c8] sm:$0xff] %v15966_v32   ;;  %v14131_v24 = vadd.f32 %v23599_v39, %v13996_v54  ;;  %v13997_v25 = vmul.f32 %v23587_v20, %v18570_v27 }
 0x691   : > { %16053 = vst [vmem:[%s23322_s9 + $0x1c0] sm:$0xff] %v15961_v41   ;;  %v13995_v7 = vmul.f32 %v23587_v20, %v18571_v46  ;;  %v20023_v41 = vld [vmem:[%s23848_s3] ss:$0 sm:$0xff] }
 0x692   : > { %v17723_v34 = vpop.f32.mrb[148].mxu1  ;;  %v14259_v19 = vmax.f32 %v14131_v24, 0.0  ;;  %v14132_v0 = vadd.f32 %v23599_v39, %v13997_v25 }
 0x693   : > { %v14130_v37 = vadd.f32 %v23599_v39, %v13995_v7  ;;  %v18427_v47 = vpop.f32.mrb[148].mxu0  ;;  %v8014_v2 = vpop.f32.mrb[149].mxu1 }
 0x694   : > { %v18572_v63 = vadd.f32 %v18427_v47, %v17723_v34  ;;  %v13217_v56 = vpop.f32.mrb[149].mxu0  ;;  %v17724_v31 = vpop.f32.mrb[150].mxu1  ;;  %v14260_v12 = vmax.f32 %v14132_v0, 0.0 }
 0x695   : > { %v14258_v36 = vmax.f32 %v14130_v37, 0.0  ;;  %v18573_v62 = vadd.f32 %v13217_v56, %v8014_v2  ;;  %v18428_v53 = vpop.f32.mrb[150].mxu0  ;;  %v8017_v57 = vpop.f32.mrb[151].mxu1 }
 0x696   : > { %v13999_v11 = vmul.f32 %v23587_v20, %v18572_v63  ;;  %v18574_v38 = vadd.f32 %v18428_v53, %v17724_v31  ;;  %v13220_v4 = vpop.f32.mrb[151].mxu0 }
 0x697   : > { %v15971_v5 = vpack.c.bf16 %v14259_v19, %v14258_v36  ;;  %v13998_v29 = vmul.f32 %v23587_v20, %v18573_v62 }
 0x698   : > { %v14134_v18 = vadd.f32 %v23599_v39, %v13999_v11  ;;  %v14000_v3 = vmul.f32 %v23587_v20, %v18574_v38 }
 0x699   : > { %16055 = vst [vmem:[%s23322_s9 + $0x1d0] sm:$0xff] %v15971_v5   ;;  %v14133_v42 = vadd.f32 %v23599_v39, %v13998_v29 }
 0x69a   : > { %v14135_v22 = vadd.f32 %v23599_v39, %v14000_v3  ;;  %v17727_v58 = vpop.f32.mrb[152].mxu1  ;;  %v14262_v26 = vmax.f32 %v14134_v18, 0.0 }
 0x69b   : > { %v14261_v23 = vmax.f32 %v14133_v42, 0.0  ;;  %v18431_v52 = vpop.f32.mrb[152].mxu0  ;;  %v8030_v35 = vpop.f32.mrb[153].mxu1 }
 0x69c   : > { %v14263_v40 = vmax.f32 %v14135_v22, 0.0  ;;  %v13233_v28 = vpop.f32.mrb[153].mxu0  ;;  %v17728_v6 = vpop.f32.mrb[154].mxu1 }
 0x69d   : > { %v15976_v48 = vpack.c.bf16 %v14261_v23, %v14260_v12  ;;  %v18575_v50 = vadd.f32 %v13233_v28, %v8030_v35  ;;  %v18432_v55 = vpop.f32.mrb[154].mxu0  ;;  %v8033_v51 = vpop.f32.mrb[155].mxu1 }
 0x69e   : > { %v15981_v8 = vpack.c.bf16 %v14263_v40, %v14262_v26  ;;  %v18576_v59 = vadd.f32 %v18432_v55, %v17728_v6  ;;  %v13236_v60 = vpop.f32.mrb[155].mxu0 }
 0x69f   : > { %16056 = vst [vmem:[%s23322_s9 + $0x1d8] sm:$0xff] %v15976_v48   ;;  %v14001_v49 = vmul.f32 %v23587_v20, %v18575_v50  ;;  %v18577_v17 = vadd.f32 %v13236_v60, %v8033_v51 }
 0x6a0   : > { %16057 = vst [vmem:[%s23322_s9 + $0x1e0] sm:$0xff] %v15981_v8   ;;  %v14003_v14 = vmul.f32 %v20022_v30, %v18576_v59 }
 0x6a1   : > { %v14136_v1 = vadd.f32 %v23599_v39, %v14001_v49  ;;  %v14002_v15 = vmul.f32 %v20022_v30, %v18577_v17 }
 0x6a2   : > { %v17731_v9 = vpop.f32.mrb[156].mxu1 }
 0x6a3   : > { %v14137_v61 = vadd.f32 %v23599_v39, %v14002_v15  ;;  %v18435_v13 = vpop.f32.mrb[156].mxu0  ;;  %v8046_v16 = vpop.f32.mrb[157].mxu1  ;;  %v14264_v20 = vmax.f32 %v14136_v1, 0.0  ;;  %v14138_v39 = vadd.f32 %v20023_v41, %v14003_v14 }
 0x6a4   : > { %v18578_v45 = vadd.f32 %v18435_v13, %v17731_v9  ;;  %v13249_v44 = vpop.f32.mrb[157].mxu0  ;;  %v17732_v21 = vpop.f32.mrb[158].mxu1 }
 0x6a5   : > { %v14265_v43 = vmax.f32 %v14137_v61, 0.0  ;;  %v18579_v33 = vadd.f32 %v13249_v44, %v8046_v16  ;;  %v18436_v32 = vpop.f32.mrb[158].mxu0  ;;  %v8049_v54 = vpop.f32.mrb[159].mxu1  ;;  %v14266_v47 = vmax.f32 %v14138_v39, 0.0 }
 0x6a6   : > { %v14006_v27 = vmul.f32 %v20022_v30, %v18578_v45  ;;  %v13252_v10 = vpop.f32.mrb[159].mxu0 }
 0x6a7   : > { %v15986_v46 = vpack.c.bf16 %v14265_v43, %v14264_v20  ;;  %v14004_v24 = vmul.f32 %v20022_v30, %v18579_v33  ;;  %v18580_v7 = vadd.f32 %v13252_v10, %v8049_v54 }
 0x6a8   : > { %v14141_v34 = vadd.f32 %v20023_v41, %v14006_v27 }
 0x6a9   : > { %16058 = vst [vmem:[%s23322_s9 + $0x1e8] sm:$0xff] %v15986_v46   ;;  %v14139_v25 = vadd.f32 %v20023_v41, %v14004_v24  ;;  %v14005_v37 = vmul.f32 %v20022_v30, %v18580_v7 }
 0x6aa   : > { %v14269_v56 = vmax.f32 %v14141_v34, 0.0 }
 0x6ab   : > { %v14267_v2 = vmax.f32 %v14139_v25, 0.0  ;;  %v14140_v63 = vadd.f32 %v20023_v41, %v14005_v37 }
 0x6ad   : > { %v15991_v31 = vpack.c.bf16 %v14267_v2, %v14266_v47  ;;  %v14268_v19 = vmax.f32 %v14140_v63, 0.0 }
 0x6af   : > { %16059 = vst [vmem:[%s23322_s9 + $0x1f0] sm:$0xff] %v15991_v31   ;;  %v15996_v36 = vpack.c.bf16 %v14269_v56, %v14268_v19 }
 0x6b1   : > { %16060 = vst [vmem:[%s23322_s9 + $0x1f8] sm:$0xff] %v15996_v36  }
 0x6b2   : > { %20037 = shalt.err (!%p20034_p5)
}
 0x6b3   : > { %s20038_s7 = scalar_lea.hbm %s23791_s6, 8192  ;;  %s20042_s14 = scalar_lea.hbm %s23849_s4, 16384 }
 0x6b4   : > { %p20039_p6 = scmp.ne.s32.totalorder %s23791_s6, %s20038_s7  ;;  %p20043_p10 = scmp.lt.u32.totalorder %s23791_s6, %s23849_s4 }
 0x6b5   : > { %p20044_p11 = scmp.lt.u32.totalorder %s20042_s14, %s20038_s7  ;;  %p20046_p13 = scmp.lt.u32.totalorder %s20038_s7, %s23791_s6 }
 0x6b6   : > { %p20040_p7 = pnand %p20039_p6, %p20172_p4 }
 0x6b7   : > { %p20045_p12 = por %p20044_p11, %p20043_p10 }
 0x6b8   : > { %p20041_p9 = pneg %p20040_p7 }
 0x6b9   : > { %p20047_p0 = por %p20046_p13, %p20045_p12 }
 0x6bb   : > { %p20048_p1 = pnand %p20047_p0, %p20041_p9 }
 0x6bd   : > { %20051 = shalt.err (!%p20048_p1)
}
 0x6be   : > { %s20105_s24 = smov 64   ;;  %s20106_s26 = smov 4  }
 0x6bf   : > { %19702 = dma.vmem_to_hbm [thread:$0]  (%p20172_p4), %s23793_s29, 8192, %s23791_s6, %s23799_s8, %s20105_s24, %s20105_s24, %s20106_s26  }
 0x6c0 PF: > { %p19708_p2 = scmp.ge.s32.totalorder %s20102_s20, 2  ;;  %s14940_s30 = sand.u32 1, %s20082_s15  }
 0x6c1   : > { %s14941_s5 = scalar_lea.sflag [#allocation4], %s14940_s30 }
 0x6c2   : > { %p19705_p3 = pnand %p19708_p2, %p20179_p8 }
 0x6c4   : > { %20077 = dma.done.wait (!%p19705_p3), %s14941_s5, 8192  }
 0x6c5   : > { %20079 = vsyncadd (!%p19705_p3), %s14941_s5, 4294959104  ;;  %s17_s20 = sadd.s32 1, %s20102_s20   ;;  %s25066_s15 = smov %s20086_s16 }
 0x6c6   : > { %p14_p5 = scmp.ge.s32.totalorder %s17_s20, 4   ;;  %s25067_s16 = smov %s20090_s17 }
 0x6c7   : > { %s25068_s17 = smov %s20185_s28  ;;  %s25069_s18 = smov %s20098_s19 }
 0x6c8   : > { %s25070_s19 = smov %s25072_s23  ;;  %16 = sbr.rel (!%p14_p5) target bundleno = 4 (0x4), region = 88 }
 0x6cf   :  { %14946 = vsyncpa [#allocation4], 1 }
 0x6d0   :  { %14948 = vsyncpa [#allocation4 + $0x1], 1 }

</bundles_post_ra>
